<compile_context>
chip_gen: v7x
topology: tpu7x:2x2x1
jax: 0.10.0
libtpu: 0.0.40
codegen_flags: <defaults>
</compile_context>

<pallas_src>
import functools

import jax
import jax.numpy as jnp
from jax import lax
from jax.experimental import pallas as pl
from jax.experimental.pallas import tpu as pltpu


TN = 128
# fc1 K-tile cap.  Per perf review: 16384 keeps the double-buffered bf16
# weight block (2 x 4 MiB) comfortably inside v7x's 64 MiB VMEM; on
# v5e/v6e (128 MiB VMEM) 32768 would cut grid-step overhead further.
FC1_TK_MAX = 16384


# ----------------------------------------------------------------------------
# Fused Conv2d(k=5, VALID) + ReLU + MaxPool2d(2, 2) kernel
# ----------------------------------------------------------------------------
def conv_relu_pool_kernel(x00_ref, x01_ref, x10_ref, x11_ref, w_ref, b_ref,
                          o_ref, *, cin):
    # grid = (N, C_out).  The input block (all C_in channels, one pooling
    # phase each) is indexed only by N, so it stays resident across the whole
    # C_out sweep.  The C_in loop is fully unrolled (cin is 3 or 6) and the
    # four pooling-phase partials are carried in values, so o_ref is written
    # exactly once (no accumulator RMW traffic, full LLO scheduling visibility).
    co = pl.program_id(1)
    hp = o_ref.shape[2]
    wp = o_ref.shape[3]
    xs = ((x00_ref, x01_ref), (x10_ref, x11_ref))

    ph = [None, None, None, None]             # partial sums per pooling phase
    for ci in range(cin):
        wbase = (co * cin + ci) * 25          # flat offset into (Cout*Cin*25,)
        # Iterate over the 36 UNIQUE (row-phase, row-offset, col-phase,
        # col-offset) shifted input slices; each feeds 1-4 pooling phases.
        for sr in range(6):                   # sr = di + kh
            pr, r0 = sr & 1, sr >> 1
            for sc in range(6):               # sc = dj + kw
                pc, c0 = sc & 1, sc >> 1
                xsl = xs[pr][pc][0, ci, r0:r0 + hp, c0:c0 + wp]
                for di in range(2):
                    kh = sr - di
                    if kh < 0 or kh > 4:
                        continue
                    for dj in range(2):
                        kw = sc - dj
                        if kw < 0 or kw > 4:
                            continue
                        wv = w_ref[wbase + kh * 5 + kw]   # scalar from SMEM
                        p = 2 * di + dj
                        t = xsl * wv
                        ph[p] = t if ph[p] is None else ph[p] + t

    # pool(relu(conv + b)) == relu(max_window(conv) + b)
    # (ReLU monotone; per-channel bias constant over the 2x2 window)
    m = jnp.maximum(jnp.maximum(ph[0], ph[1]), jnp.maximum(ph[2], ph[3]))
    o_ref[0, 0] = jnp.maximum(m + b_ref[co], 0.0)


def conv2d_relu_pool(x, w, b):
    """x: (N, Cin, H, W) f32; w: (Cout, Cin, 5, 5); b: (Cout,).
    Returns relu/pooled output (N, Cout, (H-4)//2, (W-4)//2)."""
    n, cin, h, wdim = x.shape
    assert h % 2 == 0 and wdim % 2 == 0
    cout = w.shape[0]
    hp, wp = (h - 4) // 2, (wdim - 4) // 2
    hc, wc = h // 2, wdim // 2

    # Glue: deinterleave into the 4 (even/odd row, even/odd col) phases once so
    # every in-kernel access is a contiguous unit-stride slice.
    # TODO(synk): emit the conv output directly in this 4-phase / lane-dense
    # layout from the kernel epilogue (skips the strided XLA reshuffle before
    # the next layer) and evaluate an MXU im2col formulation of the conv.
    xdei = [x[:, :, pr::2, pc::2] for pr in range(2) for pc in range(2)]
    w_flat = w.reshape(-1)

    # NOTE(perf/v7x): the input block index depends only on the batch axis, so
    # its default double buffer is dead weight; pipeline_mode=pl.Buffered(1)
    # on x_spec would reclaim ~12 MiB on the full-size net.  Left at the
    # default here for compile portability.
    x_spec = pl.BlockSpec((1, cin, hc, wc), lambda nb, co: (nb, 0, 0, 0))
    smem_spec = pl.BlockSpec(memory_space=pltpu.MemorySpace.SMEM)

    return pl.pallas_call(
        functools.partial(conv_relu_pool_kernel, cin=cin),
        out_shape=jax.ShapeDtypeStruct((n, cout, hp, wp), jnp.float32),
        grid=(n, cout),
        in_specs=[x_spec, x_spec, x_spec, x_spec, smem_spec, smem_spec],
        out_specs=pl.BlockSpec((1, 1, hp, wp), lambda nb, co: (nb, co, 0, 0)),
        compiler_params=pltpu.CompilerParams(
            dimension_semantics=("parallel", "parallel"),
        ),
    )(*xdei, w_flat, b)


# ----------------------------------------------------------------------------
# fc1: K-tiled MXU matmul (bf16 weight stream, f32 accumulation),
# bias + ReLU fused into the final K step.
# ----------------------------------------------------------------------------
def linear_kernel(x_ref, w_ref, b_ref, o_ref, *, nsteps, apply_relu):
    kk = pl.program_id(1)
    prod = jnp.dot(x_ref[...].astype(w_ref.dtype), w_ref[...],
                   preferred_element_type=jnp.float32)

    @pl.when(kk == 0)
    def _init():
        o_ref[...] = prod

    @pl.when(kk > 0)
    def _accum():
        o_ref[...] = o_ref[...] + prod

    @pl.when(kk == nsteps - 1)
    def _epilogue():
        y = o_ref[...] + b_ref[...]
        if apply_relu:
            y = jnp.maximum(y, 0.0)
        o_ref[...] = y


def fc1_tile_k(k_features):
    """K-tile for fc1, multiple of 128, capped for v7x VMEM."""
    return min(FC1_TK_MAX, pl.cdiv(k_features, TN) * TN)


def prepare_linear(wt, b, *, tk, tn=TN, dtype=jnp.float32):
    """Zero-pad W^T (K, Nout) and bias ONCE at parameter-setup time to tile
    multiples; optionally down-cast the weight (bf16 for the HBM-bound fc1 --
    a deliberate precision trade, accumulation stays f32)."""
    k, nout = wt.shape
    kp = pl.cdiv(k, tk) * tk
    npad = pl.cdiv(nout, tn) * tn
    wp = jnp.pad(wt, ((0, kp - k), (0, npad - nout))).astype(dtype)
    bp = jnp.pad(b, (0, npad - nout)).reshape(1, npad).astype(jnp.float32)
    return wp, bp


def linear(x, w_padded, b_padded, *, apply_relu, tk, tn=TN):
    """x: (B, K); w_padded: (Kp, Np) pre-padded W^T; b_padded: (1, Np).
    Returns the padded (B, Np) result (padded columns are exactly 0)."""
    bsz, k = x.shape
    kp, npad = w_padded.shape
    assert kp % tk == 0 and npad % tn == 0
    ksteps = kp // tk

    # TODO(synk): mask the final K step in-kernel instead of padding the
    # activation (cleanup-tier; the pad is tiny relative to the weight stream).
    xp = x if kp == k else jnp.pad(x, ((0, 0), (0, kp - k)))

    return pl.pallas_call(
        functools.partial(linear_kernel, nsteps=ksteps, apply_relu=apply_relu),
        out_shape=jax.ShapeDtypeStruct((bsz, npad), jnp.float32),
        grid=(npad // tn, ksteps),
        in_specs=[
            pl.BlockSpec((bsz, tk), lambda j, kk: (0, kk)),
            pl.BlockSpec((tk, tn), lambda j, kk: (kk, j)),
            pl.BlockSpec((1, tn), lambda j, kk: (0, j)),
        ],
        out_specs=pl.BlockSpec((bsz, tn), lambda j, kk: (0, j)),
        compiler_params=pltpu.CompilerParams(
            dimension_semantics=("parallel", "arbitrary"),
            # tk<=16384 bf16 weight block x2 buffers = 8 MiB + activations.
            vmem_limit_bytes=24 * 1024 * 1024,
        ),
    )(xp, w_padded, b_padded)


# ----------------------------------------------------------------------------
# fc2 + ReLU + fc3 fused into one tiny MXU kernel (single grid step)
# ----------------------------------------------------------------------------
def mlp_head_kernel(x_ref, w2_ref, b2_ref, w3_ref, b3_ref, o_ref):
    h = jnp.dot(x_ref[...], w2_ref[...], preferred_element_type=jnp.float32)
    h = jnp.maximum(h + b2_ref[...], 0.0)
    o_ref[...] = jnp.dot(h, w3_ref[...],
                         preferred_element_type=jnp.float32) + b3_ref[...]


def prepare_head(w2t, b2, w3t, b3, tn=TN):
    d = pl.cdiv(w2t.shape[0], tn) * tn
    n2 = pl.cdiv(w2t.shape[1], tn) * tn
    n3 = pl.cdiv(w3t.shape[1], tn) * tn
    w2p = jnp.pad(w2t, ((0, d - w2t.shape[0]), (0, n2 - w2t.shape[1])))
    b2p = jnp.pad(b2, (0, n2 - b2.shape[0])).reshape(1, n2)
    w3p = jnp.pad(w3t, ((0, n2 - w3t.shape[0]), (0, n3 - w3t.shape[1])))
    b3p = jnp.pad(b3, (0, n3 - b3.shape[0])).reshape(1, n3)
    return w2p, b2p, w3p, b3p


def mlp_head(x, w2, b2, w3, b3):
    bsz, d = x.shape
    n2 = w2.shape[1]
    n3 = w3.shape[1]
    return pl.pallas_call(
        mlp_head_kernel,
        out_shape=jax.ShapeDtypeStruct((bsz, n3), jnp.float32),
        in_specs=[pl.BlockSpec((bsz, d), lambda: (0, 0)),
                  pl.BlockSpec((d, n2), lambda: (0, 0)),
                  pl.BlockSpec((1, n2), lambda: (0, 0)),
                  pl.BlockSpec((n2, n3), lambda: (0, 0)),
                  pl.BlockSpec((1, n3), lambda: (0, 0))],
        out_specs=pl.BlockSpec((bsz, n3), lambda: (0, 0)),
    )(x, w2, b2, w3, b3)


# ----------------------------------------------------------------------------
# Full forward pass (matches Net.forward)
# ----------------------------------------------------------------------------
def net_forward(x, params):
    (c1w, c1b, c2w, c2b, f1wp, f1bp, f2wp, f2bp, f3wp, f3bp) = params
    h = conv2d_relu_pool(x, c1w, c1b)
    h = conv2d_relu_pool(h, c2w, c2b)
    n = h.shape[0]
    h = h.reshape(n, -1)                         # == x.view(-1, flat_features)
    tk = fc1_tile_k(h.shape[1])
    # fc1 (+bias+ReLU fused); bf16 weight stream, f32 accumulation.  Output is
    # kept in its padded (N, 128) layout (padded columns are 0) and consumed
    # directly by the fused fc2/fc3 head.
    h = linear(h, f1wp, f1bp, apply_relu=True, tk=tk)
    y = mlp_head(h, f2wp, f2bp, f3wp, f3bp)
    return y[:, :3]


# ----------------------------------------------------------------------------
# Pure-JAX references for correctness checks
# ----------------------------------------------------------------------------
def _ref_conv_relu_pool(x, w, b):
    y = lax.conv_general_dilated(
        x, w, window_strides=(1, 1), padding="VALID",
        dimension_numbers=("NCHW", "OIHW", "NCHW"),
        precision=lax.Precision.HIGHEST)
    y = jnp.maximum(y + b[None, :, None, None], 0.0)
    return lax.reduce_window(y, -jnp.inf, lax.max,
                             (1, 1, 2, 2), (1, 1, 2, 2), "VALID")


def _ref_net(x, raw):
    (c1w, c1b, c2w, c2b, f1w, f1b, f2w, f2b, f3w, f3b) = raw
    h = _ref_conv_relu_pool(x, c1w, c1b)
    h = _ref_conv_relu_pool(h, c2w, c2b)
    h = h.reshape(h.shape[0], -1)
    # Mirror the kernel's fc1 precision: bf16 weight + bf16 activation, f32 acc.
    h = jnp.maximum(
        jnp.dot(h.astype(jnp.bfloat16), f1w.astype(jnp.bfloat16),
                preferred_element_type=jnp.float32) + f1b, 0.0)
    h = jnp.maximum(
        jnp.dot(h, f2w, precision=lax.Precision.HIGHEST) + f2b, 0.0)
    return jnp.dot(h, f3w, precision=lax.Precision.HIGHEST) + f3b


if __name__ == "__main__":
    key = jax.random.PRNGKey(0)
    ks = jax.random.split(key, 11)

    # Small shapes.  The original module hard-codes fc1 in-features = 1024144
    # = 16*253*253 (i.e. (N,3,1024,1024) inputs); here the exact op sequence
    # is kept but spatial is scaled to 32x32, giving 16*5*5 = 400 features.
    N, H, W = 2, 32, 32

    conv1_w = jax.random.normal(ks[0], (6, 3, 5, 5), jnp.float32) * 0.1
    conv1_b = jax.random.normal(ks[1], (6,), jnp.float32) * 0.1
    conv2_w = jax.random.normal(ks[2], (16, 6, 5, 5), jnp.float32) * 0.05
    conv2_b = jax.random.normal(ks[3], (16,), jnp.float32) * 0.1

    hp1 = (H - 4) // 2                     # 14
    hp2 = (hp1 - 4) // 2                   # 5
    K1 = 16 * hp2 * hp2                    # 400 here; 1024144 in the original
    fc1_wT = jax.random.normal(ks[4], (K1, 120), jnp.float32) * 0.02
    fc1_b = jax.random.normal(ks[5], (120,), jnp.float32) * 0.1
    fc2_wT = jax.random.normal(ks[6], (120, 84), jnp.float32) * 0.1
    fc2_b = jax.random.normal(ks[7], (84,), jnp.float32) * 0.1
    fc3_wT = jax.random.normal(ks[8], (84, 3), jnp.float32) * 0.1
    fc3_b = jax.random.normal(ks[9], (3,), jnp.float32) * 0.1

    # Parameter setup done ONCE, outside the jitted forward: pad to tile
    # multiples and store the fc1 weight in bf16 (HBM-bandwidth bound layer).
    tk1 = fc1_tile_k(K1)
    fc1_wp, fc1_bp = prepare_linear(fc1_wT, fc1_b, tk=tk1, dtype=jnp.bfloat16)
    fc2_wp, fc2_bp, fc3_wp, fc3_bp = prepare_head(fc2_wT, fc2_b, fc3_wT, fc3_b)

    params = (conv1_w, conv1_b, conv2_w, conv2_b,
              fc1_wp, fc1_bp, fc2_wp, fc2_bp, fc3_wp, fc3_bp)

    x = jax.random.normal(ks[10], (N, 3, H, W), jnp.float32)

    # --- correctness: fused conv kernel vs pure-JAX reference ---------------
    got = conv2d_relu_pool(x, conv1_w, conv1_b)
    want = _ref_conv_relu_pool(x, conv1_w, conv1_b)
    assert jnp.allclose(got, want, rtol=1e-3, atol=1e-3), "conv check failed"

    # --- full forward pass ---------------------------------------------------
    out = jax.jit(net_forward)(x, params)
    out = jax.block_until_ready(out)
    assert out.shape == (N, 3), out.shape

    ref = _ref_net(x, (conv1_w, conv1_b, conv2_w, conv2_b,
                       fc1_wT, fc1_b, fc2_wT, fc2_b, fc3_wT, fc3_b))
    assert jnp.allclose(out, ref, rtol=5e-2, atol=5e-3), "full-net check failed"
    assert bool(jnp.all(jnp.isfinite(out)))
    print("KERNEL_OK")
</pallas_src>

<mosaic_0001>
module attributes {stable_mosaic.version = 11 : i64} {
  func.func @conv_relu_pool_kernel(%arg0: i32, %arg1: i32, %arg2: memref<1x3x16x16xf32, #tpu.memory_space<vmem>>, %arg3: memref<1x3x16x16xf32, #tpu.memory_space<vmem>>, %arg4: memref<1x3x16x16xf32, #tpu.memory_space<vmem>>, %arg5: memref<1x3x16x16xf32, #tpu.memory_space<vmem>>, %arg6: memref<450xf32, #tpu.memory_space<smem>>, %arg7: memref<6xf32, #tpu.memory_space<smem>>, %arg8: memref<1x1x14x14xf32, #tpu.memory_space<vmem>>) attributes {dimension_semantics = [#tpu.dimension_semantics<parallel>, #tpu.dimension_semantics<parallel>], iteration_bounds = array<i64: 2, 6>, scalar_prefetch = 0 : i64, scratch_operands = 0 : i64, tpu.core_type = #tpu.core_type<tc>, window_params = [{transform_indices = @transform_0, window_bounds = array<i64: 1, 3, 16, 16>}, {transform_indices = @transform_1, window_bounds = array<i64: 1, 3, 16, 16>}, {transform_indices = @transform_2, window_bounds = array<i64: 1, 3, 16, 16>}, {transform_indices = @transform_3, window_bounds = array<i64: 1, 3, 16, 16>}, {transform_indices = @transform_4, window_bounds = array<i64: 450>}, {transform_indices = @transform_5, window_bounds = array<i64: 6>}, {transform_indices = @transform_6, window_bounds = array<i64: 1, 1, 14, 14>}]} {
    %c3_i32 = arith.constant 3 : i32
    %0 = arith.muli %arg1, %c3_i32 : i32
    %c0_i32 = arith.constant 0 : i32
    %1 = arith.addi %0, %c0_i32 : i32
    %c25_i32 = arith.constant 25 : i32
    %2 = arith.muli %1, %c25_i32 : i32
    %c0 = arith.constant 0 : index
    %c0_0 = arith.constant 0 : index
    %c0_1 = arith.constant 0 : index
    %c0_2 = arith.constant 0 : index
    %3 = vector.load %arg2[%c0, %c0_0, %c0_1, %c0_2] : memref<1x3x16x16xf32, #tpu.memory_space<vmem>>, vector<1x1x14x14xf32>
    %4 = vector.shape_cast %3 : vector<1x1x14x14xf32> to vector<14x14xf32>
    %c0_i32_3 = arith.constant 0 : i32
    %5 = arith.addi %2, %c0_i32_3 : i32
    %c0_i32_4 = arith.constant 0 : i32
    %6 = arith.addi %5, %c0_i32_4 : i32
    %7 = arith.index_cast %6 : i32 to index
    %8 = memref.load %arg6[%7] : memref<450xf32, #tpu.memory_space<smem>>
    %9 = vector.broadcast %8 : f32 to vector<14x14xf32>
    %10 = arith.mulf %4, %9 : vector<14x14xf32>
    %c0_5 = arith.constant 0 : index
    %c0_6 = arith.constant 0 : index
    %c0_7 = arith.constant 0 : index
    %c0_8 = arith.constant 0 : index
    %11 = vector.load %arg3[%c0_5, %c0_6, %c0_7, %c0_8] : memref<1x3x16x16xf32, #tpu.memory_space<vmem>>, vector<1x1x14x14xf32>
    %12 = vector.shape_cast %11 : vector<1x1x14x14xf32> to vector<14x14xf32>
    %c0_i32_9 = arith.constant 0 : i32
    %13 = arith.addi %2, %c0_i32_9 : i32
    %c1_i32 = arith.constant 1 : i32
    %14 = arith.addi %13, %c1_i32 : i32
    %15 = arith.index_cast %14 : i32 to index
    %16 = memref.load %arg6[%15] : memref<450xf32, #tpu.memory_space<smem>>
    %17 = vector.broadcast %16 : f32 to vector<14x14xf32>
    %18 = arith.mulf %12, %17 : vector<14x14xf32>
    %19 = arith.addf %10, %18 : vector<14x14xf32>
    %c0_i32_10 = arith.constant 0 : i32
    %20 = arith.addi %2, %c0_i32_10 : i32
    %c0_i32_11 = arith.constant 0 : i32
    %21 = arith.addi %20, %c0_i32_11 : i32
    %22 = arith.index_cast %21 : i32 to index
    %23 = memref.load %arg6[%22] : memref<450xf32, #tpu.memory_space<smem>>
    %24 = vector.broadcast %23 : f32 to vector<14x14xf32>
    %25 = arith.mulf %12, %24 : vector<14x14xf32>
    %c0_12 = arith.constant 0 : index
    %c0_13 = arith.constant 0 : index
    %c0_14 = arith.constant 0 : index
    %c1 = arith.constant 1 : index
    %26 = vector.load %arg2[%c0_12, %c0_13, %c0_14, %c1] : memref<1x3x16x16xf32, #tpu.memory_space<vmem>>, vector<1x1x14x14xf32>
    %27 = vector.shape_cast %26 : vector<1x1x14x14xf32> to vector<14x14xf32>
    %c0_i32_15 = arith.constant 0 : i32
    %28 = arith.addi %2, %c0_i32_15 : i32
    %c2_i32 = arith.constant 2 : i32
    %29 = arith.addi %28, %c2_i32 : i32
    %30 = arith.index_cast %29 : i32 to index
    %31 = memref.load %arg6[%30] : memref<450xf32, #tpu.memory_space<smem>>
    %32 = vector.broadcast %31 : f32 to vector<14x14xf32>
    %33 = arith.mulf %27, %32 : vector<14x14xf32>
    %34 = arith.addf %19, %33 : vector<14x14xf32>
    %c0_i32_16 = arith.constant 0 : i32
    %35 = arith.addi %2, %c0_i32_16 : i32
    %c1_i32_17 = arith.constant 1 : i32
    %36 = arith.addi %35, %c1_i32_17 : i32
    %37 = arith.index_cast %36 : i32 to index
    %38 = memref.load %arg6[%37] : memref<450xf32, #tpu.memory_space<smem>>
    %39 = vector.broadcast %38 : f32 to vector<14x14xf32>
    %40 = arith.mulf %27, %39 : vector<14x14xf32>
    %41 = arith.addf %25, %40 : vector<14x14xf32>
    %c0_18 = arith.constant 0 : index
    %c0_19 = arith.constant 0 : index
    %c0_20 = arith.constant 0 : index
    %c1_21 = arith.constant 1 : index
    %42 = vector.load %arg3[%c0_18, %c0_19, %c0_20, %c1_21] : memref<1x3x16x16xf32, #tpu.memory_space<vmem>>, vector<1x1x14x14xf32>
    %43 = vector.shape_cast %42 : vector<1x1x14x14xf32> to vector<14x14xf32>
    %c0_i32_22 = arith.constant 0 : i32
    %44 = arith.addi %2, %c0_i32_22 : i32
    %c3_i32_23 = arith.constant 3 : i32
    %45 = arith.addi %44, %c3_i32_23 : i32
    %46 = arith.index_cast %45 : i32 to index
    %47 = memref.load %arg6[%46] : memref<450xf32, #tpu.memory_space<smem>>
    %48 = vector.broadcast %47 : f32 to vector<14x14xf32>
    %49 = arith.mulf %43, %48 : vector<14x14xf32>
    %50 = arith.addf %34, %49 : vector<14x14xf32>
    %c0_i32_24 = arith.constant 0 : i32
    %51 = arith.addi %2, %c0_i32_24 : i32
    %c2_i32_25 = arith.constant 2 : i32
    %52 = arith.addi %51, %c2_i32_25 : i32
    %53 = arith.index_cast %52 : i32 to index
    %54 = memref.load %arg6[%53] : memref<450xf32, #tpu.memory_space<smem>>
    %55 = vector.broadcast %54 : f32 to vector<14x14xf32>
    %56 = arith.mulf %43, %55 : vector<14x14xf32>
    %57 = arith.addf %41, %56 : vector<14x14xf32>
    %c0_26 = arith.constant 0 : index
    %c0_27 = arith.constant 0 : index
    %c0_28 = arith.constant 0 : index
    %c2 = arith.constant 2 : index
    %58 = vector.load %arg2[%c0_26, %c0_27, %c0_28, %c2] : memref<1x3x16x16xf32, #tpu.memory_space<vmem>>, vector<1x1x14x14xf32>
    %59 = vector.shape_cast %58 : vector<1x1x14x14xf32> to vector<14x14xf32>
    %c0_i32_29 = arith.constant 0 : i32
    %60 = arith.addi %2, %c0_i32_29 : i32
    %c4_i32 = arith.constant 4 : i32
    %61 = arith.addi %60, %c4_i32 : i32
    %62 = arith.index_cast %61 : i32 to index
    %63 = memref.load %arg6[%62] : memref<450xf32, #tpu.memory_space<smem>>
    %64 = vector.broadcast %63 : f32 to vector<14x14xf32>
    %65 = arith.mulf %59, %64 : vector<14x14xf32>
    %66 = arith.addf %50, %65 : vector<14x14xf32>
    %c0_i32_30 = arith.constant 0 : i32
    %67 = arith.addi %2, %c0_i32_30 : i32
    %c3_i32_31 = arith.constant 3 : i32
    %68 = arith.addi %67, %c3_i32_31 : i32
    %69 = arith.index_cast %68 : i32 to index
    %70 = memref.load %arg6[%69] : memref<450xf32, #tpu.memory_space<smem>>
    %71 = vector.broadcast %70 : f32 to vector<14x14xf32>
    %72 = arith.mulf %59, %71 : vector<14x14xf32>
    %73 = arith.addf %57, %72 : vector<14x14xf32>
    %c0_32 = arith.constant 0 : index
    %c0_33 = arith.constant 0 : index
    %c0_34 = arith.constant 0 : index
    %c2_35 = arith.constant 2 : index
    %74 = vector.load %arg3[%c0_32, %c0_33, %c0_34, %c2_35] : memref<1x3x16x16xf32, #tpu.memory_space<vmem>>, vector<1x1x14x14xf32>
    %75 = vector.shape_cast %74 : vector<1x1x14x14xf32> to vector<14x14xf32>
    %c0_i32_36 = arith.constant 0 : i32
    %76 = arith.addi %2, %c0_i32_36 : i32
    %c4_i32_37 = arith.constant 4 : i32
    %77 = arith.addi %76, %c4_i32_37 : i32
    %78 = arith.index_cast %77 : i32 to index
    %79 = memref.load %arg6[%78] : memref<450xf32, #tpu.memory_space<smem>>
    %80 = vector.broadcast %79 : f32 to vector<14x14xf32>
    %81 = arith.mulf %75, %80 : vector<14x14xf32>
    %82 = arith.addf %73, %81 : vector<14x14xf32>
    %c0_38 = arith.constant 0 : index
    %c0_39 = arith.constant 0 : index
    %c0_40 = arith.constant 0 : index
    %c0_41 = arith.constant 0 : index
    %83 = vector.load %arg4[%c0_38, %c0_39, %c0_40, %c0_41] : memref<1x3x16x16xf32, #tpu.memory_space<vmem>>, vector<1x1x14x14xf32>
    %84 = vector.shape_cast %83 : vector<1x1x14x14xf32> to vector<14x14xf32>
    %c5_i32 = arith.constant 5 : i32
    %85 = arith.addi %2, %c5_i32 : i32
    %c0_i32_42 = arith.constant 0 : i32
    %86 = arith.addi %85, %c0_i32_42 : i32
    %87 = arith.index_cast %86 : i32 to index
    %88 = memref.load %arg6[%87] : memref<450xf32, #tpu.memory_space<smem>>
    %89 = vector.broadcast %88 : f32 to vector<14x14xf32>
    %90 = arith.mulf %84, %89 : vector<14x14xf32>
    %91 = arith.addf %66, %90 : vector<14x14xf32>
    %c0_i32_43 = arith.constant 0 : i32
    %92 = arith.addi %2, %c0_i32_43 : i32
    %c0_i32_44 = arith.constant 0 : i32
    %93 = arith.addi %92, %c0_i32_44 : i32
    %94 = arith.index_cast %93 : i32 to index
    %95 = memref.load %arg6[%94] : memref<450xf32, #tpu.memory_space<smem>>
    %96 = vector.broadcast %95 : f32 to vector<14x14xf32>
    %97 = arith.mulf %84, %96 : vector<14x14xf32>
    %c0_45 = arith.constant 0 : index
    %c0_46 = arith.constant 0 : index
    %c0_47 = arith.constant 0 : index
    %c0_48 = arith.constant 0 : index
    %98 = vector.load %arg5[%c0_45, %c0_46, %c0_47, %c0_48] : memref<1x3x16x16xf32, #tpu.memory_space<vmem>>, vector<1x1x14x14xf32>
    %99 = vector.shape_cast %98 : vector<1x1x14x14xf32> to vector<14x14xf32>
    %c5_i32_49 = arith.constant 5 : i32
    %100 = arith.addi %2, %c5_i32_49 : i32
    %c1_i32_50 = arith.constant 1 : i32
    %101 = arith.addi %100, %c1_i32_50 : i32
    %102 = arith.index_cast %101 : i32 to index
    %103 = memref.load %arg6[%102] : memref<450xf32, #tpu.memory_space<smem>>
    %104 = vector.broadcast %103 : f32 to vector<14x14xf32>
    %105 = arith.mulf %99, %104 : vector<14x14xf32>
    %106 = arith.addf %91, %105 : vector<14x14xf32>
    %c5_i32_51 = arith.constant 5 : i32
    %107 = arith.addi %2, %c5_i32_51 : i32
    %c0_i32_52 = arith.constant 0 : i32
    %108 = arith.addi %107, %c0_i32_52 : i32
    %109 = arith.index_cast %108 : i32 to index
    %110 = memref.load %arg6[%109] : memref<450xf32, #tpu.memory_space<smem>>
    %111 = vector.broadcast %110 : f32 to vector<14x14xf32>
    %112 = arith.mulf %99, %111 : vector<14x14xf32>
    %113 = arith.addf %82, %112 : vector<14x14xf32>
    %c0_i32_53 = arith.constant 0 : i32
    %114 = arith.addi %2, %c0_i32_53 : i32
    %c1_i32_54 = arith.constant 1 : i32
    %115 = arith.addi %114, %c1_i32_54 : i32
    %116 = arith.index_cast %115 : i32 to index
    %117 = memref.load %arg6[%116] : memref<450xf32, #tpu.memory_space<smem>>
    %118 = vector.broadcast %117 : f32 to vector<14x14xf32>
    %119 = arith.mulf %99, %118 : vector<14x14xf32>
    %120 = arith.addf %97, %119 : vector<14x14xf32>
    %c0_i32_55 = arith.constant 0 : i32
    %121 = arith.addi %2, %c0_i32_55 : i32
    %c0_i32_56 = arith.constant 0 : i32
    %122 = arith.addi %121, %c0_i32_56 : i32
    %123 = arith.index_cast %122 : i32 to index
    %124 = memref.load %arg6[%123] : memref<450xf32, #tpu.memory_space<smem>>
    %125 = vector.broadcast %124 : f32 to vector<14x14xf32>
    %126 = arith.mulf %99, %125 : vector<14x14xf32>
    %c0_57 = arith.constant 0 : index
    %c0_58 = arith.constant 0 : index
    %c0_59 = arith.constant 0 : index
    %c1_60 = arith.constant 1 : index
    %127 = vector.load %arg4[%c0_57, %c0_58, %c0_59, %c1_60] : memref<1x3x16x16xf32, #tpu.memory_space<vmem>>, vector<1x1x14x14xf32>
    %128 = vector.shape_cast %127 : vector<1x1x14x14xf32> to vector<14x14xf32>
    %c5_i32_61 = arith.constant 5 : i32
    %129 = arith.addi %2, %c5_i32_61 : i32
    %c2_i32_62 = arith.constant 2 : i32
    %130 = arith.addi %129, %c2_i32_62 : i32
    %131 = arith.index_cast %130 : i32 to index
    %132 = memref.load %arg6[%131] : memref<450xf32, #tpu.memory_space<smem>>
    %133 = vector.broadcast %132 : f32 to vector<14x14xf32>
    %134 = arith.mulf %128, %133 : vector<14x14xf32>
    %135 = arith.addf %106, %134 : vector<14x14xf32>
    %c5_i32_63 = arith.constant 5 : i32
    %136 = arith.addi %2, %c5_i32_63 : i32
    %c1_i32_64 = arith.constant 1 : i32
    %137 = arith.addi %136, %c1_i32_64 : i32
    %138 = arith.index_cast %137 : i32 to index
    %139 = memref.load %arg6[%138] : memref<450xf32, #tpu.memory_space<smem>>
    %140 = vector.broadcast %139 : f32 to vector<14x14xf32>
    %141 = arith.mulf %128, %140 : vector<14x14xf32>
    %142 = arith.addf %113, %141 : vector<14x14xf32>
    %c0_i32_65 = arith.constant 0 : i32
    %143 = arith.addi %2, %c0_i32_65 : i32
    %c2_i32_66 = arith.constant 2 : i32
    %144 = arith.addi %143, %c2_i32_66 : i32
    %145 = arith.index_cast %144 : i32 to index
    %146 = memref.load %arg6[%145] : memref<450xf32, #tpu.memory_space<smem>>
    %147 = vector.broadcast %146 : f32 to vector<14x14xf32>
    %148 = arith.mulf %128, %147 : vector<14x14xf32>
    %149 = arith.addf %120, %148 : vector<14x14xf32>
    %c0_i32_67 = arith.constant 0 : i32
    %150 = arith.addi %2, %c0_i32_67 : i32
    %c1_i32_68 = arith.constant 1 : i32
    %151 = arith.addi %150, %c1_i32_68 : i32
    %152 = arith.index_cast %151 : i32 to index
    %153 = memref.load %arg6[%152] : memref<450xf32, #tpu.memory_space<smem>>
    %154 = vector.broadcast %153 : f32 to vector<14x14xf32>
    %155 = arith.mulf %128, %154 : vector<14x14xf32>
    %156 = arith.addf %126, %155 : vector<14x14xf32>
    %c0_69 = arith.constant 0 : index
    %c0_70 = arith.constant 0 : index
    %c0_71 = arith.constant 0 : index
    %c1_72 = arith.constant 1 : index
    %157 = vector.load %arg5[%c0_69, %c0_70, %c0_71, %c1_72] : memref<1x3x16x16xf32, #tpu.memory_space<vmem>>, vector<1x1x14x14xf32>
    %158 = vector.shape_cast %157 : vector<1x1x14x14xf32> to vector<14x14xf32>
    %c5_i32_73 = arith.constant 5 : i32
    %159 = arith.addi %2, %c5_i32_73 : i32
    %c3_i32_74 = arith.constant 3 : i32
    %160 = arith.addi %159, %c3_i32_74 : i32
    %161 = arith.index_cast %160 : i32 to index
    %162 = memref.load %arg6[%161] : memref<450xf32, #tpu.memory_space<smem>>
    %163 = vector.broadcast %162 : f32 to vector<14x14xf32>
    %164 = arith.mulf %158, %163 : vector<14x14xf32>
    %165 = arith.addf %135, %164 : vector<14x14xf32>
    %c5_i32_75 = arith.constant 5 : i32
    %166 = arith.addi %2, %c5_i32_75 : i32
    %c2_i32_76 = arith.constant 2 : i32
    %167 = arith.addi %166, %c2_i32_76 : i32
    %168 = arith.index_cast %167 : i32 to index
    %169 = memref.load %arg6[%168] : memref<450xf32, #tpu.memory_space<smem>>
    %170 = vector.broadcast %169 : f32 to vector<14x14xf32>
    %171 = arith.mulf %158, %170 : vector<14x14xf32>
    %172 = arith.addf %142, %171 : vector<14x14xf32>
    %c0_i32_77 = arith.constant 0 : i32
    %173 = arith.addi %2, %c0_i32_77 : i32
    %c3_i32_78 = arith.constant 3 : i32
    %174 = arith.addi %173, %c3_i32_78 : i32
    %175 = arith.index_cast %174 : i32 to index
    %176 = memref.load %arg6[%175] : memref<450xf32, #tpu.memory_space<smem>>
    %177 = vector.broadcast %176 : f32 to vector<14x14xf32>
    %178 = arith.mulf %158, %177 : vector<14x14xf32>
    %179 = arith.addf %149, %178 : vector<14x14xf32>
    %c0_i32_79 = arith.constant 0 : i32
    %180 = arith.addi %2, %c0_i32_79 : i32
    %c2_i32_80 = arith.constant 2 : i32
    %181 = arith.addi %180, %c2_i32_80 : i32
    %182 = arith.index_cast %181 : i32 to index
    %183 = memref.load %arg6[%182] : memref<450xf32, #tpu.memory_space<smem>>
    %184 = vector.broadcast %183 : f32 to vector<14x14xf32>
    %185 = arith.mulf %158, %184 : vector<14x14xf32>
    %186 = arith.addf %156, %185 : vector<14x14xf32>
    %c0_81 = arith.constant 0 : index
    %c0_82 = arith.constant 0 : index
    %c0_83 = arith.constant 0 : index
    %c2_84 = arith.constant 2 : index
    %187 = vector.load %arg4[%c0_81, %c0_82, %c0_83, %c2_84] : memref<1x3x16x16xf32, #tpu.memory_space<vmem>>, vector<1x1x14x14xf32>
    %188 = vector.shape_cast %187 : vector<1x1x14x14xf32> to vector<14x14xf32>
    %c5_i32_85 = arith.constant 5 : i32
    %189 = arith.addi %2, %c5_i32_85 : i32
    %c4_i32_86 = arith.constant 4 : i32
    %190 = arith.addi %189, %c4_i32_86 : i32
    %191 = arith.index_cast %190 : i32 to index
    %192 = memref.load %arg6[%191] : memref<450xf32, #tpu.memory_space<smem>>
    %193 = vector.broadcast %192 : f32 to vector<14x14xf32>
    %194 = arith.mulf %188, %193 : vector<14x14xf32>
    %195 = arith.addf %165, %194 : vector<14x14xf32>
    %c5_i32_87 = arith.constant 5 : i32
    %196 = arith.addi %2, %c5_i32_87 : i32
    %c3_i32_88 = arith.constant 3 : i32
    %197 = arith.addi %196, %c3_i32_88 : i32
    %198 = arith.index_cast %197 : i32 to index
    %199 = memref.load %arg6[%198] : memref<450xf32, #tpu.memory_space<smem>>
    %200 = vector.broadcast %199 : f32 to vector<14x14xf32>
    %201 = arith.mulf %188, %200 : vector<14x14xf32>
    %202 = arith.addf %172, %201 : vector<14x14xf32>
    %c0_i32_89 = arith.constant 0 : i32
    %203 = arith.addi %2, %c0_i32_89 : i32
    %c4_i32_90 = arith.constant 4 : i32
    %204 = arith.addi %203, %c4_i32_90 : i32
    %205 = arith.index_cast %204 : i32 to index
    %206 = memref.load %arg6[%205] : memref<450xf32, #tpu.memory_space<smem>>
    %207 = vector.broadcast %206 : f32 to vector<14x14xf32>
    %208 = arith.mulf %188, %207 : vector<14x14xf32>
    %209 = arith.addf %179, %208 : vector<14x14xf32>
    %c0_i32_91 = arith.constant 0 : i32
    %210 = arith.addi %2, %c0_i32_91 : i32
    %c3_i32_92 = arith.constant 3 : i32
    %211 = arith.addi %210, %c3_i32_92 : i32
    %212 = arith.index_cast %211 : i32 to index
    %213 = memref.load %arg6[%212] : memref<450xf32, #tpu.memory_space<smem>>
    %214 = vector.broadcast %213 : f32 to vector<14x14xf32>
    %215 = arith.mulf %188, %214 : vector<14x14xf32>
    %216 = arith.addf %186, %215 : vector<14x14xf32>
    %c0_93 = arith.constant 0 : index
    %c0_94 = arith.constant 0 : index
    %c0_95 = arith.constant 0 : index
    %c2_96 = arith.constant 2 : index
    %217 = vector.load %arg5[%c0_93, %c0_94, %c0_95, %c2_96] : memref<1x3x16x16xf32, #tpu.memory_space<vmem>>, vector<1x1x14x14xf32>
    %218 = vector.shape_cast %217 : vector<1x1x14x14xf32> to vector<14x14xf32>
    %c5_i32_97 = arith.constant 5 : i32
    %219 = arith.addi %2, %c5_i32_97 : i32
    %c4_i32_98 = arith.constant 4 : i32
    %220 = arith.addi %219, %c4_i32_98 : i32
    %221 = arith.index_cast %220 : i32 to index
    %222 = memref.load %arg6[%221] : memref<450xf32, #tpu.memory_space<smem>>
    %223 = vector.broadcast %222 : f32 to vector<14x14xf32>
    %224 = arith.mulf %218, %223 : vector<14x14xf32>
    %225 = arith.addf %202, %224 : vector<14x14xf32>
    %c0_i32_99 = arith.constant 0 : i32
    %226 = arith.addi %2, %c0_i32_99 : i32
    %c4_i32_100 = arith.constant 4 : i32
    %227 = arith.addi %226, %c4_i32_100 : i32
    %228 = arith.index_cast %227 : i32 to index
    %229 = memref.load %arg6[%228] : memref<450xf32, #tpu.memory_space<smem>>
    %230 = vector.broadcast %229 : f32 to vector<14x14xf32>
    %231 = arith.mulf %218, %230 : vector<14x14xf32>
    %232 = arith.addf %216, %231 : vector<14x14xf32>
    %c0_101 = arith.constant 0 : index
    %c0_102 = arith.constant 0 : index
    %c1_103 = arith.constant 1 : index
    %c0_104 = arith.constant 0 : index
    %233 = vector.load %arg2[%c0_101, %c0_102, %c1_103, %c0_104] : memref<1x3x16x16xf32, #tpu.memory_space<vmem>>, vector<1x1x14x14xf32>
    %234 = vector.shape_cast %233 : vector<1x1x14x14xf32> to vector<14x14xf32>
    %c10_i32 = arith.constant 10 : i32
    %235 = arith.addi %2, %c10_i32 : i32
    %c0_i32_105 = arith.constant 0 : i32
    %236 = arith.addi %235, %c0_i32_105 : i32
    %237 = arith.index_cast %236 : i32 to index
    %238 = memref.load %arg6[%237] : memref<450xf32, #tpu.memory_space<smem>>
    %239 = vector.broadcast %238 : f32 to vector<14x14xf32>
    %240 = arith.mulf %234, %239 : vector<14x14xf32>
    %241 = arith.addf %195, %240 : vector<14x14xf32>
    %c5_i32_106 = arith.constant 5 : i32
    %242 = arith.addi %2, %c5_i32_106 : i32
    %c0_i32_107 = arith.constant 0 : i32
    %243 = arith.addi %242, %c0_i32_107 : i32
    %244 = arith.index_cast %243 : i32 to index
    %245 = memref.load %arg6[%244] : memref<450xf32, #tpu.memory_space<smem>>
    %246 = vector.broadcast %245 : f32 to vector<14x14xf32>
    %247 = arith.mulf %234, %246 : vector<14x14xf32>
    %248 = arith.addf %209, %247 : vector<14x14xf32>
    %c0_108 = arith.constant 0 : index
    %c0_109 = arith.constant 0 : index
    %c1_110 = arith.constant 1 : index
    %c0_111 = arith.constant 0 : index
    %249 = vector.load %arg3[%c0_108, %c0_109, %c1_110, %c0_111] : memref<1x3x16x16xf32, #tpu.memory_space<vmem>>, vector<1x1x14x14xf32>
    %250 = vector.shape_cast %249 : vector<1x1x14x14xf32> to vector<14x14xf32>
    %c10_i32_112 = arith.constant 10 : i32
    %251 = arith.addi %2, %c10_i32_112 : i32
    %c1_i32_113 = arith.constant 1 : i32
    %252 = arith.addi %251, %c1_i32_113 : i32
    %253 = arith.index_cast %252 : i32 to index
    %254 = memref.load %arg6[%253] : memref<450xf32, #tpu.memory_space<smem>>
    %255 = vector.broadcast %254 : f32 to vector<14x14xf32>
    %256 = arith.mulf %250, %255 : vector<14x14xf32>
    %257 = arith.addf %241, %256 : vector<14x14xf32>
    %c10_i32_114 = arith.constant 10 : i32
    %258 = arith.addi %2, %c10_i32_114 : i32
    %c0_i32_115 = arith.constant 0 : i32
    %259 = arith.addi %258, %c0_i32_115 : i32
    %260 = arith.index_cast %259 : i32 to index
    %261 = memref.load %arg6[%260] : memref<450xf32, #tpu.memory_space<smem>>
    %262 = vector.broadcast %261 : f32 to vector<14x14xf32>
    %263 = arith.mulf %250, %262 : vector<14x14xf32>
    %264 = arith.addf %225, %263 : vector<14x14xf32>
    %c5_i32_116 = arith.constant 5 : i32
    %265 = arith.addi %2, %c5_i32_116 : i32
    %c1_i32_117 = arith.constant 1 : i32
    %266 = arith.addi %265, %c1_i32_117 : i32
    %267 = arith.index_cast %266 : i32 to index
    %268 = memref.load %arg6[%267] : memref<450xf32, #tpu.memory_space<smem>>
    %269 = vector.broadcast %268 : f32 to vector<14x14xf32>
    %270 = arith.mulf %250, %269 : vector<14x14xf32>
    %271 = arith.addf %248, %270 : vector<14x14xf32>
    %c5_i32_118 = arith.constant 5 : i32
    %272 = arith.addi %2, %c5_i32_118 : i32
    %c0_i32_119 = arith.constant 0 : i32
    %273 = arith.addi %272, %c0_i32_119 : i32
    %274 = arith.index_cast %273 : i32 to index
    %275 = memref.load %arg6[%274] : memref<450xf32, #tpu.memory_space<smem>>
    %276 = vector.broadcast %275 : f32 to vector<14x14xf32>
    %277 = arith.mulf %250, %276 : vector<14x14xf32>
    %278 = arith.addf %232, %277 : vector<14x14xf32>
    %c0_120 = arith.constant 0 : index
    %c0_121 = arith.constant 0 : index
    %c1_122 = arith.constant 1 : index
    %c1_123 = arith.constant 1 : index
    %279 = vector.load %arg2[%c0_120, %c0_121, %c1_122, %c1_123] : memref<1x3x16x16xf32, #tpu.memory_space<vmem>>, vector<1x1x14x14xf32>
    %280 = vector.shape_cast %279 : vector<1x1x14x14xf32> to vector<14x14xf32>
    %c10_i32_124 = arith.constant 10 : i32
    %281 = arith.addi %2, %c10_i32_124 : i32
    %c2_i32_125 = arith.constant 2 : i32
    %282 = arith.addi %281, %c2_i32_125 : i32
    %283 = arith.index_cast %282 : i32 to index
    %284 = memref.load %arg6[%283] : memref<450xf32, #tpu.memory_space<smem>>
    %285 = vector.broadcast %284 : f32 to vector<14x14xf32>
    %286 = arith.mulf %280, %285 : vector<14x14xf32>
    %287 = arith.addf %257, %286 : vector<14x14xf32>
    %c10_i32_126 = arith.constant 10 : i32
    %288 = arith.addi %2, %c10_i32_126 : i32
    %c1_i32_127 = arith.constant 1 : i32
    %289 = arith.addi %288, %c1_i32_127 : i32
    %290 = arith.index_cast %289 : i32 to index
    %291 = memref.load %arg6[%290] : memref<450xf32, #tpu.memory_space<smem>>
    %292 = vector.broadcast %291 : f32 to vector<14x14xf32>
    %293 = arith.mulf %280, %292 : vector<14x14xf32>
    %294 = arith.addf %264, %293 : vector<14x14xf32>
    %c5_i32_128 = arith.constant 5 : i32
    %295 = arith.addi %2, %c5_i32_128 : i32
    %c2_i32_129 = arith.constant 2 : i32
    %296 = arith.addi %295, %c2_i32_129 : i32
    %297 = arith.index_cast %296 : i32 to index
    %298 = memref.load %arg6[%297] : memref<450xf32, #tpu.memory_space<smem>>
    %299 = vector.broadcast %298 : f32 to vector<14x14xf32>
    %300 = arith.mulf %280, %299 : vector<14x14xf32>
    %301 = arith.addf %271, %300 : vector<14x14xf32>
    %c5_i32_130 = arith.constant 5 : i32
    %302 = arith.addi %2, %c5_i32_130 : i32
    %c1_i32_131 = arith.constant 1 : i32
    %303 = arith.addi %302, %c1_i32_131 : i32
    %304 = arith.index_cast %303 : i32 to index
    %305 = memref.load %arg6[%304] : memref<450xf32, #tpu.memory_space<smem>>
    %306 = vector.broadcast %305 : f32 to vector<14x14xf32>
    %307 = arith.mulf %280, %306 : vector<14x14xf32>
    %308 = arith.addf %278, %307 : vector<14x14xf32>
    %c0_132 = arith.constant 0 : index
    %c0_133 = arith.constant 0 : index
    %c1_134 = arith.constant 1 : index
    %c1_135 = arith.constant 1 : index
    %309 = vector.load %arg3[%c0_132, %c0_133, %c1_134, %c1_135] : memref<1x3x16x16xf32, #tpu.memory_space<vmem>>, vector<1x1x14x14xf32>
    %310 = vector.shape_cast %309 : vector<1x1x14x14xf32> to vector<14x14xf32>
    %c10_i32_136 = arith.constant 10 : i32
    %311 = arith.addi %2, %c10_i32_136 : i32
    %c3_i32_137 = arith.constant 3 : i32
    %312 = arith.addi %311, %c3_i32_137 : i32
    %313 = arith.index_cast %312 : i32 to index
    %314 = memref.load %arg6[%313] : memref<450xf32, #tpu.memory_space<smem>>
    %315 = vector.broadcast %314 : f32 to vector<14x14xf32>
    %316 = arith.mulf %310, %315 : vector<14x14xf32>
    %317 = arith.addf %287, %316 : vector<14x14xf32>
    %c10_i32_138 = arith.constant 10 : i32
    %318 = arith.addi %2, %c10_i32_138 : i32
    %c2_i32_139 = arith.constant 2 : i32
    %319 = arith.addi %318, %c2_i32_139 : i32
    %320 = arith.index_cast %319 : i32 to index
    %321 = memref.load %arg6[%320] : memref<450xf32, #tpu.memory_space<smem>>
    %322 = vector.broadcast %321 : f32 to vector<14x14xf32>
    %323 = arith.mulf %310, %322 : vector<14x14xf32>
    %324 = arith.addf %294, %323 : vector<14x14xf32>
    %c5_i32_140 = arith.constant 5 : i32
    %325 = arith.addi %2, %c5_i32_140 : i32
    %c3_i32_141 = arith.constant 3 : i32
    %326 = arith.addi %325, %c3_i32_141 : i32
    %327 = arith.index_cast %326 : i32 to index
    %328 = memref.load %arg6[%327] : memref<450xf32, #tpu.memory_space<smem>>
    %329 = vector.broadcast %328 : f32 to vector<14x14xf32>
    %330 = arith.mulf %310, %329 : vector<14x14xf32>
    %331 = arith.addf %301, %330 : vector<14x14xf32>
    %c5_i32_142 = arith.constant 5 : i32
    %332 = arith.addi %2, %c5_i32_142 : i32
    %c2_i32_143 = arith.constant 2 : i32
    %333 = arith.addi %332, %c2_i32_143 : i32
    %334 = arith.index_cast %333 : i32 to index
    %335 = memref.load %arg6[%334] : memref<450xf32, #tpu.memory_space<smem>>
    %336 = vector.broadcast %335 : f32 to vector<14x14xf32>
    %337 = arith.mulf %310, %336 : vector<14x14xf32>
    %338 = arith.addf %308, %337 : vector<14x14xf32>
    %c0_144 = arith.constant 0 : index
    %c0_145 = arith.constant 0 : index
    %c1_146 = arith.constant 1 : index
    %c2_147 = arith.constant 2 : index
    %339 = vector.load %arg2[%c0_144, %c0_145, %c1_146, %c2_147] : memref<1x3x16x16xf32, #tpu.memory_space<vmem>>, vector<1x1x14x14xf32>
    %340 = vector.shape_cast %339 : vector<1x1x14x14xf32> to vector<14x14xf32>
    %c10_i32_148 = arith.constant 10 : i32
    %341 = arith.addi %2, %c10_i32_148 : i32
    %c4_i32_149 = arith.constant 4 : i32
    %342 = arith.addi %341, %c4_i32_149 : i32
    %343 = arith.index_cast %342 : i32 to index
    %344 = memref.load %arg6[%343] : memref<450xf32, #tpu.memory_space<smem>>
    %345 = vector.broadcast %344 : f32 to vector<14x14xf32>
    %346 = arith.mulf %340, %345 : vector<14x14xf32>
    %347 = arith.addf %317, %346 : vector<14x14xf32>
    %c10_i32_150 = arith.constant 10 : i32
    %348 = arith.addi %2, %c10_i32_150 : i32
    %c3_i32_151 = arith.constant 3 : i32
    %349 = arith.addi %348, %c3_i32_151 : i32
    %350 = arith.index_cast %349 : i32 to index
    %351 = memref.load %arg6[%350] : memref<450xf32, #tpu.memory_space<smem>>
    %352 = vector.broadcast %351 : f32 to vector<14x14xf32>
    %353 = arith.mulf %340, %352 : vector<14x14xf32>
    %354 = arith.addf %324, %353 : vector<14x14xf32>
    %c5_i32_152 = arith.constant 5 : i32
    %355 = arith.addi %2, %c5_i32_152 : i32
    %c4_i32_153 = arith.constant 4 : i32
    %356 = arith.addi %355, %c4_i32_153 : i32
    %357 = arith.index_cast %356 : i32 to index
    %358 = memref.load %arg6[%357] : memref<450xf32, #tpu.memory_space<smem>>
    %359 = vector.broadcast %358 : f32 to vector<14x14xf32>
    %360 = arith.mulf %340, %359 : vector<14x14xf32>
    %361 = arith.addf %331, %360 : vector<14x14xf32>
    %c5_i32_154 = arith.constant 5 : i32
    %362 = arith.addi %2, %c5_i32_154 : i32
    %c3_i32_155 = arith.constant 3 : i32
    %363 = arith.addi %362, %c3_i32_155 : i32
    %364 = arith.index_cast %363 : i32 to index
    %365 = memref.load %arg6[%364] : memref<450xf32, #tpu.memory_space<smem>>
    %366 = vector.broadcast %365 : f32 to vector<14x14xf32>
    %367 = arith.mulf %340, %366 : vector<14x14xf32>
    %368 = arith.addf %338, %367 : vector<14x14xf32>
    %c0_156 = arith.constant 0 : index
    %c0_157 = arith.constant 0 : index
    %c1_158 = arith.constant 1 : index
    %c2_159 = arith.constant 2 : index
    %369 = vector.load %arg3[%c0_156, %c0_157, %c1_158, %c2_159] : memref<1x3x16x16xf32, #tpu.memory_space<vmem>>, vector<1x1x14x14xf32>
    %370 = vector.shape_cast %369 : vector<1x1x14x14xf32> to vector<14x14xf32>
    %c10_i32_160 = arith.constant 10 : i32
    %371 = arith.addi %2, %c10_i32_160 : i32
    %c4_i32_161 = arith.constant 4 : i32
    %372 = arith.addi %371, %c4_i32_161 : i32
    %373 = arith.index_cast %372 : i32 to index
    %374 = memref.load %arg6[%373] : memref<450xf32, #tpu.memory_space<smem>>
    %375 = vector.broadcast %374 : f32 to vector<14x14xf32>
    %376 = arith.mulf %370, %375 : vector<14x14xf32>
    %377 = arith.addf %354, %376 : vector<14x14xf32>
    %c5_i32_162 = arith.constant 5 : i32
    %378 = arith.addi %2, %c5_i32_162 : i32
    %c4_i32_163 = arith.constant 4 : i32
    %379 = arith.addi %378, %c4_i32_163 : i32
    %380 = arith.index_cast %379 : i32 to index
    %381 = memref.load %arg6[%380] : memref<450xf32, #tpu.memory_space<smem>>
    %382 = vector.broadcast %381 : f32 to vector<14x14xf32>
    %383 = arith.mulf %370, %382 : vector<14x14xf32>
    %384 = arith.addf %368, %383 : vector<14x14xf32>
    %c0_164 = arith.constant 0 : index
    %c0_165 = arith.constant 0 : index
    %c1_166 = arith.constant 1 : index
    %c0_167 = arith.constant 0 : index
    %385 = vector.load %arg4[%c0_164, %c0_165, %c1_166, %c0_167] : memref<1x3x16x16xf32, #tpu.memory_space<vmem>>, vector<1x1x14x14xf32>
    %386 = vector.shape_cast %385 : vector<1x1x14x14xf32> to vector<14x14xf32>
    %c15_i32 = arith.constant 15 : i32
    %387 = arith.addi %2, %c15_i32 : i32
    %c0_i32_168 = arith.constant 0 : i32
    %388 = arith.addi %387, %c0_i32_168 : i32
    %389 = arith.index_cast %388 : i32 to index
    %390 = memref.load %arg6[%389] : memref<450xf32, #tpu.memory_space<smem>>
    %391 = vector.broadcast %390 : f32 to vector<14x14xf32>
    %392 = arith.mulf %386, %391 : vector<14x14xf32>
    %393 = arith.addf %347, %392 : vector<14x14xf32>
    %c10_i32_169 = arith.constant 10 : i32
    %394 = arith.addi %2, %c10_i32_169 : i32
    %c0_i32_170 = arith.constant 0 : i32
    %395 = arith.addi %394, %c0_i32_170 : i32
    %396 = arith.index_cast %395 : i32 to index
    %397 = memref.load %arg6[%396] : memref<450xf32, #tpu.memory_space<smem>>
    %398 = vector.broadcast %397 : f32 to vector<14x14xf32>
    %399 = arith.mulf %386, %398 : vector<14x14xf32>
    %400 = arith.addf %361, %399 : vector<14x14xf32>
    %c0_171 = arith.constant 0 : index
    %c0_172 = arith.constant 0 : index
    %c1_173 = arith.constant 1 : index
    %c0_174 = arith.constant 0 : index
    %401 = vector.load %arg5[%c0_171, %c0_172, %c1_173, %c0_174] : memref<1x3x16x16xf32, #tpu.memory_space<vmem>>, vector<1x1x14x14xf32>
    %402 = vector.shape_cast %401 : vector<1x1x14x14xf32> to vector<14x14xf32>
    %c15_i32_175 = arith.constant 15 : i32
    %403 = arith.addi %2, %c15_i32_175 : i32
    %c1_i32_176 = arith.constant 1 : i32
    %404 = arith.addi %403, %c1_i32_176 : i32
    %405 = arith.index_cast %404 : i32 to index
    %406 = memref.load %arg6[%405] : memref<450xf32, #tpu.memory_space<smem>>
    %407 = vector.broadcast %406 : f32 to vector<14x14xf32>
    %408 = arith.mulf %402, %407 : vector<14x14xf32>
    %409 = arith.addf %393, %408 : vector<14x14xf32>
    %c15_i32_177 = arith.constant 15 : i32
    %410 = arith.addi %2, %c15_i32_177 : i32
    %c0_i32_178 = arith.constant 0 : i32
    %411 = arith.addi %410, %c0_i32_178 : i32
    %412 = arith.index_cast %411 : i32 to index
    %413 = memref.load %arg6[%412] : memref<450xf32, #tpu.memory_space<smem>>
    %414 = vector.broadcast %413 : f32 to vector<14x14xf32>
    %415 = arith.mulf %402, %414 : vector<14x14xf32>
    %416 = arith.addf %377, %415 : vector<14x14xf32>
    %c10_i32_179 = arith.constant 10 : i32
    %417 = arith.addi %2, %c10_i32_179 : i32
    %c1_i32_180 = arith.constant 1 : i32
    %418 = arith.addi %417, %c1_i32_180 : i32
    %419 = arith.index_cast %418 : i32 to index
    %420 = memref.load %arg6[%419] : memref<450xf32, #tpu.memory_space<smem>>
    %421 = vector.broadcast %420 : f32 to vector<14x14xf32>
    %422 = arith.mulf %402, %421 : vector<14x14xf32>
    %423 = arith.addf %400, %422 : vector<14x14xf32>
    %c10_i32_181 = arith.constant 10 : i32
    %424 = arith.addi %2, %c10_i32_181 : i32
    %c0_i32_182 = arith.constant 0 : i32
    %425 = arith.addi %424, %c0_i32_182 : i32
    %426 = arith.index_cast %425 : i32 to index
    %427 = memref.load %arg6[%426] : memref<450xf32, #tpu.memory_space<smem>>
    %428 = vector.broadcast %427 : f32 to vector<14x14xf32>
    %429 = arith.mulf %402, %428 : vector<14x14xf32>
    %430 = arith.addf %384, %429 : vector<14x14xf32>
    %c0_183 = arith.constant 0 : index
    %c0_184 = arith.constant 0 : index
    %c1_185 = arith.constant 1 : index
    %c1_186 = arith.constant 1 : index
    %431 = vector.load %arg4[%c0_183, %c0_184, %c1_185, %c1_186] : memref<1x3x16x16xf32, #tpu.memory_space<vmem>>, vector<1x1x14x14xf32>
    %432 = vector.shape_cast %431 : vector<1x1x14x14xf32> to vector<14x14xf32>
    %c15_i32_187 = arith.constant 15 : i32
    %433 = arith.addi %2, %c15_i32_187 : i32
    %c2_i32_188 = arith.constant 2 : i32
    %434 = arith.addi %433, %c2_i32_188 : i32
    %435 = arith.index_cast %434 : i32 to index
    %436 = memref.load %arg6[%435] : memref<450xf32, #tpu.memory_space<smem>>
    %437 = vector.broadcast %436 : f32 to vector<14x14xf32>
    %438 = arith.mulf %432, %437 : vector<14x14xf32>
    %439 = arith.addf %409, %438 : vector<14x14xf32>
    %c15_i32_189 = arith.constant 15 : i32
    %440 = arith.addi %2, %c15_i32_189 : i32
    %c1_i32_190 = arith.constant 1 : i32
    %441 = arith.addi %440, %c1_i32_190 : i32
    %442 = arith.index_cast %441 : i32 to index
    %443 = memref.load %arg6[%442] : memref<450xf32, #tpu.memory_space<smem>>
    %444 = vector.broadcast %443 : f32 to vector<14x14xf32>
    %445 = arith.mulf %432, %444 : vector<14x14xf32>
    %446 = arith.addf %416, %445 : vector<14x14xf32>
    %c10_i32_191 = arith.constant 10 : i32
    %447 = arith.addi %2, %c10_i32_191 : i32
    %c2_i32_192 = arith.constant 2 : i32
    %448 = arith.addi %447, %c2_i32_192 : i32
    %449 = arith.index_cast %448 : i32 to index
    %450 = memref.load %arg6[%449] : memref<450xf32, #tpu.memory_space<smem>>
    %451 = vector.broadcast %450 : f32 to vector<14x14xf32>
    %452 = arith.mulf %432, %451 : vector<14x14xf32>
    %453 = arith.addf %423, %452 : vector<14x14xf32>
    %c10_i32_193 = arith.constant 10 : i32
    %454 = arith.addi %2, %c10_i32_193 : i32
    %c1_i32_194 = arith.constant 1 : i32
    %455 = arith.addi %454, %c1_i32_194 : i32
    %456 = arith.index_cast %455 : i32 to index
    %457 = memref.load %arg6[%456] : memref<450xf32, #tpu.memory_space<smem>>
    %458 = vector.broadcast %457 : f32 to vector<14x14xf32>
    %459 = arith.mulf %432, %458 : vector<14x14xf32>
    %460 = arith.addf %430, %459 : vector<14x14xf32>
    %c0_195 = arith.constant 0 : index
    %c0_196 = arith.constant 0 : index
    %c1_197 = arith.constant 1 : index
    %c1_198 = arith.constant 1 : index
    %461 = vector.load %arg5[%c0_195, %c0_196, %c1_197, %c1_198] : memref<1x3x16x16xf32, #tpu.memory_space<vmem>>, vector<1x1x14x14xf32>
    %462 = vector.shape_cast %461 : vector<1x1x14x14xf32> to vector<14x14xf32>
    %c15_i32_199 = arith.constant 15 : i32
    %463 = arith.addi %2, %c15_i32_199 : i32
    %c3_i32_200 = arith.constant 3 : i32
    %464 = arith.addi %463, %c3_i32_200 : i32
    %465 = arith.index_cast %464 : i32 to index
    %466 = memref.load %arg6[%465] : memref<450xf32, #tpu.memory_space<smem>>
    %467 = vector.broadcast %466 : f32 to vector<14x14xf32>
    %468 = arith.mulf %462, %467 : vector<14x14xf32>
    %469 = arith.addf %439, %468 : vector<14x14xf32>
    %c15_i32_201 = arith.constant 15 : i32
    %470 = arith.addi %2, %c15_i32_201 : i32
    %c2_i32_202 = arith.constant 2 : i32
    %471 = arith.addi %470, %c2_i32_202 : i32
    %472 = arith.index_cast %471 : i32 to index
    %473 = memref.load %arg6[%472] : memref<450xf32, #tpu.memory_space<smem>>
    %474 = vector.broadcast %473 : f32 to vector<14x14xf32>
    %475 = arith.mulf %462, %474 : vector<14x14xf32>
    %476 = arith.addf %446, %475 : vector<14x14xf32>
    %c10_i32_203 = arith.constant 10 : i32
    %477 = arith.addi %2, %c10_i32_203 : i32
    %c3_i32_204 = arith.constant 3 : i32
    %478 = arith.addi %477, %c3_i32_204 : i32
    %479 = arith.index_cast %478 : i32 to index
    %480 = memref.load %arg6[%479] : memref<450xf32, #tpu.memory_space<smem>>
    %481 = vector.broadcast %480 : f32 to vector<14x14xf32>
    %482 = arith.mulf %462, %481 : vector<14x14xf32>
    %483 = arith.addf %453, %482 : vector<14x14xf32>
    %c10_i32_205 = arith.constant 10 : i32
    %484 = arith.addi %2, %c10_i32_205 : i32
    %c2_i32_206 = arith.constant 2 : i32
    %485 = arith.addi %484, %c2_i32_206 : i32
    %486 = arith.index_cast %485 : i32 to index
    %487 = memref.load %arg6[%486] : memref<450xf32, #tpu.memory_space<smem>>
    %488 = vector.broadcast %487 : f32 to vector<14x14xf32>
    %489 = arith.mulf %462, %488 : vector<14x14xf32>
    %490 = arith.addf %460, %489 : vector<14x14xf32>
    %c0_207 = arith.constant 0 : index
    %c0_208 = arith.constant 0 : index
    %c1_209 = arith.constant 1 : index
    %c2_210 = arith.constant 2 : index
    %491 = vector.load %arg4[%c0_207, %c0_208, %c1_209, %c2_210] : memref<1x3x16x16xf32, #tpu.memory_space<vmem>>, vector<1x1x14x14xf32>
    %492 = vector.shape_cast %491 : vector<1x1x14x14xf32> to vector<14x14xf32>
    %c15_i32_211 = arith.constant 15 : i32
    %493 = arith.addi %2, %c15_i32_211 : i32
    %c4_i32_212 = arith.constant 4 : i32
    %494 = arith.addi %493, %c4_i32_212 : i32
    %495 = arith.index_cast %494 : i32 to index
    %496 = memref.load %arg6[%495] : memref<450xf32, #tpu.memory_space<smem>>
    %497 = vector.broadcast %496 : f32 to vector<14x14xf32>
    %498 = arith.mulf %492, %497 : vector<14x14xf32>
    %499 = arith.addf %469, %498 : vector<14x14xf32>
    %c15_i32_213 = arith.constant 15 : i32
    %500 = arith.addi %2, %c15_i32_213 : i32
    %c3_i32_214 = arith.constant 3 : i32
    %501 = arith.addi %500, %c3_i32_214 : i32
    %502 = arith.index_cast %501 : i32 to index
    %503 = memref.load %arg6[%502] : memref<450xf32, #tpu.memory_space<smem>>
    %504 = vector.broadcast %503 : f32 to vector<14x14xf32>
    %505 = arith.mulf %492, %504 : vector<14x14xf32>
    %506 = arith.addf %476, %505 : vector<14x14xf32>
    %c10_i32_215 = arith.constant 10 : i32
    %507 = arith.addi %2, %c10_i32_215 : i32
    %c4_i32_216 = arith.constant 4 : i32
    %508 = arith.addi %507, %c4_i32_216 : i32
    %509 = arith.index_cast %508 : i32 to index
    %510 = memref.load %arg6[%509] : memref<450xf32, #tpu.memory_space<smem>>
    %511 = vector.broadcast %510 : f32 to vector<14x14xf32>
    %512 = arith.mulf %492, %511 : vector<14x14xf32>
    %513 = arith.addf %483, %512 : vector<14x14xf32>
    %c10_i32_217 = arith.constant 10 : i32
    %514 = arith.addi %2, %c10_i32_217 : i32
    %c3_i32_218 = arith.constant 3 : i32
    %515 = arith.addi %514, %c3_i32_218 : i32
    %516 = arith.index_cast %515 : i32 to index
    %517 = memref.load %arg6[%516] : memref<450xf32, #tpu.memory_space<smem>>
    %518 = vector.broadcast %517 : f32 to vector<14x14xf32>
    %519 = arith.mulf %492, %518 : vector<14x14xf32>
    %520 = arith.addf %490, %519 : vector<14x14xf32>
    %c0_219 = arith.constant 0 : index
    %c0_220 = arith.constant 0 : index
    %c1_221 = arith.constant 1 : index
    %c2_222 = arith.constant 2 : index
    %521 = vector.load %arg5[%c0_219, %c0_220, %c1_221, %c2_222] : memref<1x3x16x16xf32, #tpu.memory_space<vmem>>, vector<1x1x14x14xf32>
    %522 = vector.shape_cast %521 : vector<1x1x14x14xf32> to vector<14x14xf32>
    %c15_i32_223 = arith.constant 15 : i32
    %523 = arith.addi %2, %c15_i32_223 : i32
    %c4_i32_224 = arith.constant 4 : i32
    %524 = arith.addi %523, %c4_i32_224 : i32
    %525 = arith.index_cast %524 : i32 to index
    %526 = memref.load %arg6[%525] : memref<450xf32, #tpu.memory_space<smem>>
    %527 = vector.broadcast %526 : f32 to vector<14x14xf32>
    %528 = arith.mulf %522, %527 : vector<14x14xf32>
    %529 = arith.addf %506, %528 : vector<14x14xf32>
    %c10_i32_225 = arith.constant 10 : i32
    %530 = arith.addi %2, %c10_i32_225 : i32
    %c4_i32_226 = arith.constant 4 : i32
    %531 = arith.addi %530, %c4_i32_226 : i32
    %532 = arith.index_cast %531 : i32 to index
    %533 = memref.load %arg6[%532] : memref<450xf32, #tpu.memory_space<smem>>
    %534 = vector.broadcast %533 : f32 to vector<14x14xf32>
    %535 = arith.mulf %522, %534 : vector<14x14xf32>
    %536 = arith.addf %520, %535 : vector<14x14xf32>
    %c0_227 = arith.constant 0 : index
    %c0_228 = arith.constant 0 : index
    %c2_229 = arith.constant 2 : index
    %c0_230 = arith.constant 0 : index
    %537 = vector.load %arg2[%c0_227, %c0_228, %c2_229, %c0_230] : memref<1x3x16x16xf32, #tpu.memory_space<vmem>>, vector<1x1x14x14xf32>
    %538 = vector.shape_cast %537 : vector<1x1x14x14xf32> to vector<14x14xf32>
    %c20_i32 = arith.constant 20 : i32
    %539 = arith.addi %2, %c20_i32 : i32
    %c0_i32_231 = arith.constant 0 : i32
    %540 = arith.addi %539, %c0_i32_231 : i32
    %541 = arith.index_cast %540 : i32 to index
    %542 = memref.load %arg6[%541] : memref<450xf32, #tpu.memory_space<smem>>
    %543 = vector.broadcast %542 : f32 to vector<14x14xf32>
    %544 = arith.mulf %538, %543 : vector<14x14xf32>
    %545 = arith.addf %499, %544 : vector<14x14xf32>
    %c15_i32_232 = arith.constant 15 : i32
    %546 = arith.addi %2, %c15_i32_232 : i32
    %c0_i32_233 = arith.constant 0 : i32
    %547 = arith.addi %546, %c0_i32_233 : i32
    %548 = arith.index_cast %547 : i32 to index
    %549 = memref.load %arg6[%548] : memref<450xf32, #tpu.memory_space<smem>>
    %550 = vector.broadcast %549 : f32 to vector<14x14xf32>
    %551 = arith.mulf %538, %550 : vector<14x14xf32>
    %552 = arith.addf %513, %551 : vector<14x14xf32>
    %c0_234 = arith.constant 0 : index
    %c0_235 = arith.constant 0 : index
    %c2_236 = arith.constant 2 : index
    %c0_237 = arith.constant 0 : index
    %553 = vector.load %arg3[%c0_234, %c0_235, %c2_236, %c0_237] : memref<1x3x16x16xf32, #tpu.memory_space<vmem>>, vector<1x1x14x14xf32>
    %554 = vector.shape_cast %553 : vector<1x1x14x14xf32> to vector<14x14xf32>
    %c20_i32_238 = arith.constant 20 : i32
    %555 = arith.addi %2, %c20_i32_238 : i32
    %c1_i32_239 = arith.constant 1 : i32
    %556 = arith.addi %555, %c1_i32_239 : i32
    %557 = arith.index_cast %556 : i32 to index
    %558 = memref.load %arg6[%557] : memref<450xf32, #tpu.memory_space<smem>>
    %559 = vector.broadcast %558 : f32 to vector<14x14xf32>
    %560 = arith.mulf %554, %559 : vector<14x14xf32>
    %561 = arith.addf %545, %560 : vector<14x14xf32>
    %c20_i32_240 = arith.constant 20 : i32
    %562 = arith.addi %2, %c20_i32_240 : i32
    %c0_i32_241 = arith.constant 0 : i32
    %563 = arith.addi %562, %c0_i32_241 : i32
    %564 = arith.index_cast %563 : i32 to index
    %565 = memref.load %arg6[%564] : memref<450xf32, #tpu.memory_space<smem>>
    %566 = vector.broadcast %565 : f32 to vector<14x14xf32>
    %567 = arith.mulf %554, %566 : vector<14x14xf32>
    %568 = arith.addf %529, %567 : vector<14x14xf32>
    %c15_i32_242 = arith.constant 15 : i32
    %569 = arith.addi %2, %c15_i32_242 : i32
    %c1_i32_243 = arith.constant 1 : i32
    %570 = arith.addi %569, %c1_i32_243 : i32
    %571 = arith.index_cast %570 : i32 to index
    %572 = memref.load %arg6[%571] : memref<450xf32, #tpu.memory_space<smem>>
    %573 = vector.broadcast %572 : f32 to vector<14x14xf32>
    %574 = arith.mulf %554, %573 : vector<14x14xf32>
    %575 = arith.addf %552, %574 : vector<14x14xf32>
    %c15_i32_244 = arith.constant 15 : i32
    %576 = arith.addi %2, %c15_i32_244 : i32
    %c0_i32_245 = arith.constant 0 : i32
    %577 = arith.addi %576, %c0_i32_245 : i32
    %578 = arith.index_cast %577 : i32 to index
    %579 = memref.load %arg6[%578] : memref<450xf32, #tpu.memory_space<smem>>
    %580 = vector.broadcast %579 : f32 to vector<14x14xf32>
    %581 = arith.mulf %554, %580 : vector<14x14xf32>
    %582 = arith.addf %536, %581 : vector<14x14xf32>
    %c0_246 = arith.constant 0 : index
    %c0_247 = arith.constant 0 : index
    %c2_248 = arith.constant 2 : index
    %c1_249 = arith.constant 1 : index
    %583 = vector.load %arg2[%c0_246, %c0_247, %c2_248, %c1_249] : memref<1x3x16x16xf32, #tpu.memory_space<vmem>>, vector<1x1x14x14xf32>
    %584 = vector.shape_cast %583 : vector<1x1x14x14xf32> to vector<14x14xf32>
    %c20_i32_250 = arith.constant 20 : i32
    %585 = arith.addi %2, %c20_i32_250 : i32
    %c2_i32_251 = arith.constant 2 : i32
    %586 = arith.addi %585, %c2_i32_251 : i32
    %587 = arith.index_cast %586 : i32 to index
    %588 = memref.load %arg6[%587] : memref<450xf32, #tpu.memory_space<smem>>
    %589 = vector.broadcast %588 : f32 to vector<14x14xf32>
    %590 = arith.mulf %584, %589 : vector<14x14xf32>
    %591 = arith.addf %561, %590 : vector<14x14xf32>
    %c20_i32_252 = arith.constant 20 : i32
    %592 = arith.addi %2, %c20_i32_252 : i32
    %c1_i32_253 = arith.constant 1 : i32
    %593 = arith.addi %592, %c1_i32_253 : i32
    %594 = arith.index_cast %593 : i32 to index
    %595 = memref.load %arg6[%594] : memref<450xf32, #tpu.memory_space<smem>>
    %596 = vector.broadcast %595 : f32 to vector<14x14xf32>
    %597 = arith.mulf %584, %596 : vector<14x14xf32>
    %598 = arith.addf %568, %597 : vector<14x14xf32>
    %c15_i32_254 = arith.constant 15 : i32
    %599 = arith.addi %2, %c15_i32_254 : i32
    %c2_i32_255 = arith.constant 2 : i32
    %600 = arith.addi %599, %c2_i32_255 : i32
    %601 = arith.index_cast %600 : i32 to index
    %602 = memref.load %arg6[%601] : memref<450xf32, #tpu.memory_space<smem>>
    %603 = vector.broadcast %602 : f32 to vector<14x14xf32>
    %604 = arith.mulf %584, %603 : vector<14x14xf32>
    %605 = arith.addf %575, %604 : vector<14x14xf32>
    %c15_i32_256 = arith.constant 15 : i32
    %606 = arith.addi %2, %c15_i32_256 : i32
    %c1_i32_257 = arith.constant 1 : i32
    %607 = arith.addi %606, %c1_i32_257 : i32
    %608 = arith.index_cast %607 : i32 to index
    %609 = memref.load %arg6[%608] : memref<450xf32, #tpu.memory_space<smem>>
    %610 = vector.broadcast %609 : f32 to vector<14x14xf32>
    %611 = arith.mulf %584, %610 : vector<14x14xf32>
    %612 = arith.addf %582, %611 : vector<14x14xf32>
    %c0_258 = arith.constant 0 : index
    %c0_259 = arith.constant 0 : index
    %c2_260 = arith.constant 2 : index
    %c1_261 = arith.constant 1 : index
    %613 = vector.load %arg3[%c0_258, %c0_259, %c2_260, %c1_261] : memref<1x3x16x16xf32, #tpu.memory_space<vmem>>, vector<1x1x14x14xf32>
    %614 = vector.shape_cast %613 : vector<1x1x14x14xf32> to vector<14x14xf32>
    %c20_i32_262 = arith.constant 20 : i32
    %615 = arith.addi %2, %c20_i32_262 : i32
    %c3_i32_263 = arith.constant 3 : i32
    %616 = arith.addi %615, %c3_i32_263 : i32
    %617 = arith.index_cast %616 : i32 to index
    %618 = memref.load %arg6[%617] : memref<450xf32, #tpu.memory_space<smem>>
    %619 = vector.broadcast %618 : f32 to vector<14x14xf32>
    %620 = arith.mulf %614, %619 : vector<14x14xf32>
    %621 = arith.addf %591, %620 : vector<14x14xf32>
    %c20_i32_264 = arith.constant 20 : i32
    %622 = arith.addi %2, %c20_i32_264 : i32
    %c2_i32_265 = arith.constant 2 : i32
    %623 = arith.addi %622, %c2_i32_265 : i32
    %624 = arith.index_cast %623 : i32 to index
    %625 = memref.load %arg6[%624] : memref<450xf32, #tpu.memory_space<smem>>
    %626 = vector.broadcast %625 : f32 to vector<14x14xf32>
    %627 = arith.mulf %614, %626 : vector<14x14xf32>
    %628 = arith.addf %598, %627 : vector<14x14xf32>
    %c15_i32_266 = arith.constant 15 : i32
    %629 = arith.addi %2, %c15_i32_266 : i32
    %c3_i32_267 = arith.constant 3 : i32
    %630 = arith.addi %629, %c3_i32_267 : i32
    %631 = arith.index_cast %630 : i32 to index
    %632 = memref.load %arg6[%631] : memref<450xf32, #tpu.memory_space<smem>>
    %633 = vector.broadcast %632 : f32 to vector<14x14xf32>
    %634 = arith.mulf %614, %633 : vector<14x14xf32>
    %635 = arith.addf %605, %634 : vector<14x14xf32>
    %c15_i32_268 = arith.constant 15 : i32
    %636 = arith.addi %2, %c15_i32_268 : i32
    %c2_i32_269 = arith.constant 2 : i32
    %637 = arith.addi %636, %c2_i32_269 : i32
    %638 = arith.index_cast %637 : i32 to index
    %639 = memref.load %arg6[%638] : memref<450xf32, #tpu.memory_space<smem>>
    %640 = vector.broadcast %639 : f32 to vector<14x14xf32>
    %641 = arith.mulf %614, %640 : vector<14x14xf32>
    %642 = arith.addf %612, %641 : vector<14x14xf32>
    %c0_270 = arith.constant 0 : index
    %c0_271 = arith.constant 0 : index
    %c2_272 = arith.constant 2 : index
    %c2_273 = arith.constant 2 : index
    %643 = vector.load %arg2[%c0_270, %c0_271, %c2_272, %c2_273] : memref<1x3x16x16xf32, #tpu.memory_space<vmem>>, vector<1x1x14x14xf32>
    %644 = vector.shape_cast %643 : vector<1x1x14x14xf32> to vector<14x14xf32>
    %c20_i32_274 = arith.constant 20 : i32
    %645 = arith.addi %2, %c20_i32_274 : i32
    %c4_i32_275 = arith.constant 4 : i32
    %646 = arith.addi %645, %c4_i32_275 : i32
    %647 = arith.index_cast %646 : i32 to index
    %648 = memref.load %arg6[%647] : memref<450xf32, #tpu.memory_space<smem>>
    %649 = vector.broadcast %648 : f32 to vector<14x14xf32>
    %650 = arith.mulf %644, %649 : vector<14x14xf32>
    %651 = arith.addf %621, %650 : vector<14x14xf32>
    %c20_i32_276 = arith.constant 20 : i32
    %652 = arith.addi %2, %c20_i32_276 : i32
    %c3_i32_277 = arith.constant 3 : i32
    %653 = arith.addi %652, %c3_i32_277 : i32
    %654 = arith.index_cast %653 : i32 to index
    %655 = memref.load %arg6[%654] : memref<450xf32, #tpu.memory_space<smem>>
    %656 = vector.broadcast %655 : f32 to vector<14x14xf32>
    %657 = arith.mulf %644, %656 : vector<14x14xf32>
    %658 = arith.addf %628, %657 : vector<14x14xf32>
    %c15_i32_278 = arith.constant 15 : i32
    %659 = arith.addi %2, %c15_i32_278 : i32
    %c4_i32_279 = arith.constant 4 : i32
    %660 = arith.addi %659, %c4_i32_279 : i32
    %661 = arith.index_cast %660 : i32 to index
    %662 = memref.load %arg6[%661] : memref<450xf32, #tpu.memory_space<smem>>
    %663 = vector.broadcast %662 : f32 to vector<14x14xf32>
    %664 = arith.mulf %644, %663 : vector<14x14xf32>
    %665 = arith.addf %635, %664 : vector<14x14xf32>
    %c15_i32_280 = arith.constant 15 : i32
    %666 = arith.addi %2, %c15_i32_280 : i32
    %c3_i32_281 = arith.constant 3 : i32
    %667 = arith.addi %666, %c3_i32_281 : i32
    %668 = arith.index_cast %667 : i32 to index
    %669 = memref.load %arg6[%668] : memref<450xf32, #tpu.memory_space<smem>>
    %670 = vector.broadcast %669 : f32 to vector<14x14xf32>
    %671 = arith.mulf %644, %670 : vector<14x14xf32>
    %672 = arith.addf %642, %671 : vector<14x14xf32>
    %c0_282 = arith.constant 0 : index
    %c0_283 = arith.constant 0 : index
    %c2_284 = arith.constant 2 : index
    %c2_285 = arith.constant 2 : index
    %673 = vector.load %arg3[%c0_282, %c0_283, %c2_284, %c2_285] : memref<1x3x16x16xf32, #tpu.memory_space<vmem>>, vector<1x1x14x14xf32>
    %674 = vector.shape_cast %673 : vector<1x1x14x14xf32> to vector<14x14xf32>
    %c20_i32_286 = arith.constant 20 : i32
    %675 = arith.addi %2, %c20_i32_286 : i32
    %c4_i32_287 = arith.constant 4 : i32
    %676 = arith.addi %675, %c4_i32_287 : i32
    %677 = arith.index_cast %676 : i32 to index
    %678 = memref.load %arg6[%677] : memref<450xf32, #tpu.memory_space<smem>>
    %679 = vector.broadcast %678 : f32 to vector<14x14xf32>
    %680 = arith.mulf %674, %679 : vector<14x14xf32>
    %681 = arith.addf %658, %680 : vector<14x14xf32>
    %c15_i32_288 = arith.constant 15 : i32
    %682 = arith.addi %2, %c15_i32_288 : i32
    %c4_i32_289 = arith.constant 4 : i32
    %683 = arith.addi %682, %c4_i32_289 : i32
    %684 = arith.index_cast %683 : i32 to index
    %685 = memref.load %arg6[%684] : memref<450xf32, #tpu.memory_space<smem>>
    %686 = vector.broadcast %685 : f32 to vector<14x14xf32>
    %687 = arith.mulf %674, %686 : vector<14x14xf32>
    %688 = arith.addf %672, %687 : vector<14x14xf32>
    %c0_290 = arith.constant 0 : index
    %c0_291 = arith.constant 0 : index
    %c2_292 = arith.constant 2 : index
    %c0_293 = arith.constant 0 : index
    %689 = vector.load %arg4[%c0_290, %c0_291, %c2_292, %c0_293] : memref<1x3x16x16xf32, #tpu.memory_space<vmem>>, vector<1x1x14x14xf32>
    %690 = vector.shape_cast %689 : vector<1x1x14x14xf32> to vector<14x14xf32>
    %c20_i32_294 = arith.constant 20 : i32
    %691 = arith.addi %2, %c20_i32_294 : i32
    %c0_i32_295 = arith.constant 0 : i32
    %692 = arith.addi %691, %c0_i32_295 : i32
    %693 = arith.index_cast %692 : i32 to index
    %694 = memref.load %arg6[%693] : memref<450xf32, #tpu.memory_space<smem>>
    %695 = vector.broadcast %694 : f32 to vector<14x14xf32>
    %696 = arith.mulf %690, %695 : vector<14x14xf32>
    %697 = arith.addf %665, %696 : vector<14x14xf32>
    %c0_296 = arith.constant 0 : index
    %c0_297 = arith.constant 0 : index
    %c2_298 = arith.constant 2 : index
    %c0_299 = arith.constant 0 : index
    %698 = vector.load %arg5[%c0_296, %c0_297, %c2_298, %c0_299] : memref<1x3x16x16xf32, #tpu.memory_space<vmem>>, vector<1x1x14x14xf32>
    %699 = vector.shape_cast %698 : vector<1x1x14x14xf32> to vector<14x14xf32>
    %c20_i32_300 = arith.constant 20 : i32
    %700 = arith.addi %2, %c20_i32_300 : i32
    %c1_i32_301 = arith.constant 1 : i32
    %701 = arith.addi %700, %c1_i32_301 : i32
    %702 = arith.index_cast %701 : i32 to index
    %703 = memref.load %arg6[%702] : memref<450xf32, #tpu.memory_space<smem>>
    %704 = vector.broadcast %703 : f32 to vector<14x14xf32>
    %705 = arith.mulf %699, %704 : vector<14x14xf32>
    %706 = arith.addf %697, %705 : vector<14x14xf32>
    %c20_i32_302 = arith.constant 20 : i32
    %707 = arith.addi %2, %c20_i32_302 : i32
    %c0_i32_303 = arith.constant 0 : i32
    %708 = arith.addi %707, %c0_i32_303 : i32
    %709 = arith.index_cast %708 : i32 to index
    %710 = memref.load %arg6[%709] : memref<450xf32, #tpu.memory_space<smem>>
    %711 = vector.broadcast %710 : f32 to vector<14x14xf32>
    %712 = arith.mulf %699, %711 : vector<14x14xf32>
    %713 = arith.addf %688, %712 : vector<14x14xf32>
    %c0_304 = arith.constant 0 : index
    %c0_305 = arith.constant 0 : index
    %c2_306 = arith.constant 2 : index
    %c1_307 = arith.constant 1 : index
    %714 = vector.load %arg4[%c0_304, %c0_305, %c2_306, %c1_307] : memref<1x3x16x16xf32, #tpu.memory_space<vmem>>, vector<1x1x14x14xf32>
    %715 = vector.shape_cast %714 : vector<1x1x14x14xf32> to vector<14x14xf32>
    %c20_i32_308 = arith.constant 20 : i32
    %716 = arith.addi %2, %c20_i32_308 : i32
    %c2_i32_309 = arith.constant 2 : i32
    %717 = arith.addi %716, %c2_i32_309 : i32
    %718 = arith.index_cast %717 : i32 to index
    %719 = memref.load %arg6[%718] : memref<450xf32, #tpu.memory_space<smem>>
    %720 = vector.broadcast %719 : f32 to vector<14x14xf32>
    %721 = arith.mulf %715, %720 : vector<14x14xf32>
    %722 = arith.addf %706, %721 : vector<14x14xf32>
    %c20_i32_310 = arith.constant 20 : i32
    %723 = arith.addi %2, %c20_i32_310 : i32
    %c1_i32_311 = arith.constant 1 : i32
    %724 = arith.addi %723, %c1_i32_311 : i32
    %725 = arith.index_cast %724 : i32 to index
    %726 = memref.load %arg6[%725] : memref<450xf32, #tpu.memory_space<smem>>
    %727 = vector.broadcast %726 : f32 to vector<14x14xf32>
    %728 = arith.mulf %715, %727 : vector<14x14xf32>
    %729 = arith.addf %713, %728 : vector<14x14xf32>
    %c0_312 = arith.constant 0 : index
    %c0_313 = arith.constant 0 : index
    %c2_314 = arith.constant 2 : index
    %c1_315 = arith.constant 1 : index
    %730 = vector.load %arg5[%c0_312, %c0_313, %c2_314, %c1_315] : memref<1x3x16x16xf32, #tpu.memory_space<vmem>>, vector<1x1x14x14xf32>
    %731 = vector.shape_cast %730 : vector<1x1x14x14xf32> to vector<14x14xf32>
    %c20_i32_316 = arith.constant 20 : i32
    %732 = arith.addi %2, %c20_i32_316 : i32
    %c3_i32_317 = arith.constant 3 : i32
    %733 = arith.addi %732, %c3_i32_317 : i32
    %734 = arith.index_cast %733 : i32 to index
    %735 = memref.load %arg6[%734] : memref<450xf32, #tpu.memory_space<smem>>
    %736 = vector.broadcast %735 : f32 to vector<14x14xf32>
    %737 = arith.mulf %731, %736 : vector<14x14xf32>
    %738 = arith.addf %722, %737 : vector<14x14xf32>
    %c20_i32_318 = arith.constant 20 : i32
    %739 = arith.addi %2, %c20_i32_318 : i32
    %c2_i32_319 = arith.constant 2 : i32
    %740 = arith.addi %739, %c2_i32_319 : i32
    %741 = arith.index_cast %740 : i32 to index
    %742 = memref.load %arg6[%741] : memref<450xf32, #tpu.memory_space<smem>>
    %743 = vector.broadcast %742 : f32 to vector<14x14xf32>
    %744 = arith.mulf %731, %743 : vector<14x14xf32>
    %745 = arith.addf %729, %744 : vector<14x14xf32>
    %c0_320 = arith.constant 0 : index
    %c0_321 = arith.constant 0 : index
    %c2_322 = arith.constant 2 : index
    %c2_323 = arith.constant 2 : index
    %746 = vector.load %arg4[%c0_320, %c0_321, %c2_322, %c2_323] : memref<1x3x16x16xf32, #tpu.memory_space<vmem>>, vector<1x1x14x14xf32>
    %747 = vector.shape_cast %746 : vector<1x1x14x14xf32> to vector<14x14xf32>
    %c20_i32_324 = arith.constant 20 : i32
    %748 = arith.addi %2, %c20_i32_324 : i32
    %c4_i32_325 = arith.constant 4 : i32
    %749 = arith.addi %748, %c4_i32_325 : i32
    %750 = arith.index_cast %749 : i32 to index
    %751 = memref.load %arg6[%750] : memref<450xf32, #tpu.memory_space<smem>>
    %752 = vector.broadcast %751 : f32 to vector<14x14xf32>
    %753 = arith.mulf %747, %752 : vector<14x14xf32>
    %754 = arith.addf %738, %753 : vector<14x14xf32>
    %c20_i32_326 = arith.constant 20 : i32
    %755 = arith.addi %2, %c20_i32_326 : i32
    %c3_i32_327 = arith.constant 3 : i32
    %756 = arith.addi %755, %c3_i32_327 : i32
    %757 = arith.index_cast %756 : i32 to index
    %758 = memref.load %arg6[%757] : memref<450xf32, #tpu.memory_space<smem>>
    %759 = vector.broadcast %758 : f32 to vector<14x14xf32>
    %760 = arith.mulf %747, %759 : vector<14x14xf32>
    %761 = arith.addf %745, %760 : vector<14x14xf32>
    %c0_328 = arith.constant 0 : index
    %c0_329 = arith.constant 0 : index
    %c2_330 = arith.constant 2 : index
    %c2_331 = arith.constant 2 : index
    %762 = vector.load %arg5[%c0_328, %c0_329, %c2_330, %c2_331] : memref<1x3x16x16xf32, #tpu.memory_space<vmem>>, vector<1x1x14x14xf32>
    %763 = vector.shape_cast %762 : vector<1x1x14x14xf32> to vector<14x14xf32>
    %c20_i32_332 = arith.constant 20 : i32
    %764 = arith.addi %2, %c20_i32_332 : i32
    %c4_i32_333 = arith.constant 4 : i32
    %765 = arith.addi %764, %c4_i32_333 : i32
    %766 = arith.index_cast %765 : i32 to index
    %767 = memref.load %arg6[%766] : memref<450xf32, #tpu.memory_space<smem>>
    %768 = vector.broadcast %767 : f32 to vector<14x14xf32>
    %769 = arith.mulf %763, %768 : vector<14x14xf32>
    %770 = arith.addf %761, %769 : vector<14x14xf32>
    %c3_i32_334 = arith.constant 3 : i32
    %771 = arith.muli %arg1, %c3_i32_334 : i32
    %c1_i32_335 = arith.constant 1 : i32
    %772 = arith.addi %771, %c1_i32_335 : i32
    %c25_i32_336 = arith.constant 25 : i32
    %773 = arith.muli %772, %c25_i32_336 : i32
    %c0_337 = arith.constant 0 : index
    %c1_338 = arith.constant 1 : index
    %c0_339 = arith.constant 0 : index
    %c0_340 = arith.constant 0 : index
    %774 = vector.load %arg2[%c0_337, %c1_338, %c0_339, %c0_340] : memref<1x3x16x16xf32, #tpu.memory_space<vmem>>, vector<1x1x14x14xf32>
    %775 = vector.shape_cast %774 : vector<1x1x14x14xf32> to vector<14x14xf32>
    %c0_i32_341 = arith.constant 0 : i32
    %776 = arith.addi %773, %c0_i32_341 : i32
    %c0_i32_342 = arith.constant 0 : i32
    %777 = arith.addi %776, %c0_i32_342 : i32
    %778 = arith.index_cast %777 : i32 to index
    %779 = memref.load %arg6[%778] : memref<450xf32, #tpu.memory_space<smem>>
    %780 = vector.broadcast %779 : f32 to vector<14x14xf32>
    %781 = arith.mulf %775, %780 : vector<14x14xf32>
    %782 = arith.addf %651, %781 : vector<14x14xf32>
    %c0_343 = arith.constant 0 : index
    %c1_344 = arith.constant 1 : index
    %c0_345 = arith.constant 0 : index
    %c0_346 = arith.constant 0 : index
    %783 = vector.load %arg3[%c0_343, %c1_344, %c0_345, %c0_346] : memref<1x3x16x16xf32, #tpu.memory_space<vmem>>, vector<1x1x14x14xf32>
    %784 = vector.shape_cast %783 : vector<1x1x14x14xf32> to vector<14x14xf32>
    %c0_i32_347 = arith.constant 0 : i32
    %785 = arith.addi %773, %c0_i32_347 : i32
    %c1_i32_348 = arith.constant 1 : i32
    %786 = arith.addi %785, %c1_i32_348 : i32
    %787 = arith.index_cast %786 : i32 to index
    %788 = memref.load %arg6[%787] : memref<450xf32, #tpu.memory_space<smem>>
    %789 = vector.broadcast %788 : f32 to vector<14x14xf32>
    %790 = arith.mulf %784, %789 : vector<14x14xf32>
    %791 = arith.addf %782, %790 : vector<14x14xf32>
    %c0_i32_349 = arith.constant 0 : i32
    %792 = arith.addi %773, %c0_i32_349 : i32
    %c0_i32_350 = arith.constant 0 : i32
    %793 = arith.addi %792, %c0_i32_350 : i32
    %794 = arith.index_cast %793 : i32 to index
    %795 = memref.load %arg6[%794] : memref<450xf32, #tpu.memory_space<smem>>
    %796 = vector.broadcast %795 : f32 to vector<14x14xf32>
    %797 = arith.mulf %784, %796 : vector<14x14xf32>
    %798 = arith.addf %681, %797 : vector<14x14xf32>
    %c0_351 = arith.constant 0 : index
    %c1_352 = arith.constant 1 : index
    %c0_353 = arith.constant 0 : index
    %c1_354 = arith.constant 1 : index
    %799 = vector.load %arg2[%c0_351, %c1_352, %c0_353, %c1_354] : memref<1x3x16x16xf32, #tpu.memory_space<vmem>>, vector<1x1x14x14xf32>
    %800 = vector.shape_cast %799 : vector<1x1x14x14xf32> to vector<14x14xf32>
    %c0_i32_355 = arith.constant 0 : i32
    %801 = arith.addi %773, %c0_i32_355 : i32
    %c2_i32_356 = arith.constant 2 : i32
    %802 = arith.addi %801, %c2_i32_356 : i32
    %803 = arith.index_cast %802 : i32 to index
    %804 = memref.load %arg6[%803] : memref<450xf32, #tpu.memory_space<smem>>
    %805 = vector.broadcast %804 : f32 to vector<14x14xf32>
    %806 = arith.mulf %800, %805 : vector<14x14xf32>
    %807 = arith.addf %791, %806 : vector<14x14xf32>
    %c0_i32_357 = arith.constant 0 : i32
    %808 = arith.addi %773, %c0_i32_357 : i32
    %c1_i32_358 = arith.constant 1 : i32
    %809 = arith.addi %808, %c1_i32_358 : i32
    %810 = arith.index_cast %809 : i32 to index
    %811 = memref.load %arg6[%810] : memref<450xf32, #tpu.memory_space<smem>>
    %812 = vector.broadcast %811 : f32 to vector<14x14xf32>
    %813 = arith.mulf %800, %812 : vector<14x14xf32>
    %814 = arith.addf %798, %813 : vector<14x14xf32>
    %c0_359 = arith.constant 0 : index
    %c1_360 = arith.constant 1 : index
    %c0_361 = arith.constant 0 : index
    %c1_362 = arith.constant 1 : index
    %815 = vector.load %arg3[%c0_359, %c1_360, %c0_361, %c1_362] : memref<1x3x16x16xf32, #tpu.memory_space<vmem>>, vector<1x1x14x14xf32>
    %816 = vector.shape_cast %815 : vector<1x1x14x14xf32> to vector<14x14xf32>
    %c0_i32_363 = arith.constant 0 : i32
    %817 = arith.addi %773, %c0_i32_363 : i32
    %c3_i32_364 = arith.constant 3 : i32
    %818 = arith.addi %817, %c3_i32_364 : i32
    %819 = arith.index_cast %818 : i32 to index
    %820 = memref.load %arg6[%819] : memref<450xf32, #tpu.memory_space<smem>>
    %821 = vector.broadcast %820 : f32 to vector<14x14xf32>
    %822 = arith.mulf %816, %821 : vector<14x14xf32>
    %823 = arith.addf %807, %822 : vector<14x14xf32>
    %c0_i32_365 = arith.constant 0 : i32
    %824 = arith.addi %773, %c0_i32_365 : i32
    %c2_i32_366 = arith.constant 2 : i32
    %825 = arith.addi %824, %c2_i32_366 : i32
    %826 = arith.index_cast %825 : i32 to index
    %827 = memref.load %arg6[%826] : memref<450xf32, #tpu.memory_space<smem>>
    %828 = vector.broadcast %827 : f32 to vector<14x14xf32>
    %829 = arith.mulf %816, %828 : vector<14x14xf32>
    %830 = arith.addf %814, %829 : vector<14x14xf32>
    %c0_367 = arith.constant 0 : index
    %c1_368 = arith.constant 1 : index
    %c0_369 = arith.constant 0 : index
    %c2_370 = arith.constant 2 : index
    %831 = vector.load %arg2[%c0_367, %c1_368, %c0_369, %c2_370] : memref<1x3x16x16xf32, #tpu.memory_space<vmem>>, vector<1x1x14x14xf32>
    %832 = vector.shape_cast %831 : vector<1x1x14x14xf32> to vector<14x14xf32>
    %c0_i32_371 = arith.constant 0 : i32
    %833 = arith.addi %773, %c0_i32_371 : i32
    %c4_i32_372 = arith.constant 4 : i32
    %834 = arith.addi %833, %c4_i32_372 : i32
    %835 = arith.index_cast %834 : i32 to index
    %836 = memref.load %arg6[%835] : memref<450xf32, #tpu.memory_space<smem>>
    %837 = vector.broadcast %836 : f32 to vector<14x14xf32>
    %838 = arith.mulf %832, %837 : vector<14x14xf32>
    %839 = arith.addf %823, %838 : vector<14x14xf32>
    %c0_i32_373 = arith.constant 0 : i32
    %840 = arith.addi %773, %c0_i32_373 : i32
    %c3_i32_374 = arith.constant 3 : i32
    %841 = arith.addi %840, %c3_i32_374 : i32
    %842 = arith.index_cast %841 : i32 to index
    %843 = memref.load %arg6[%842] : memref<450xf32, #tpu.memory_space<smem>>
    %844 = vector.broadcast %843 : f32 to vector<14x14xf32>
    %845 = arith.mulf %832, %844 : vector<14x14xf32>
    %846 = arith.addf %830, %845 : vector<14x14xf32>
    %c0_375 = arith.constant 0 : index
    %c1_376 = arith.constant 1 : index
    %c0_377 = arith.constant 0 : index
    %c2_378 = arith.constant 2 : index
    %847 = vector.load %arg3[%c0_375, %c1_376, %c0_377, %c2_378] : memref<1x3x16x16xf32, #tpu.memory_space<vmem>>, vector<1x1x14x14xf32>
    %848 = vector.shape_cast %847 : vector<1x1x14x14xf32> to vector<14x14xf32>
    %c0_i32_379 = arith.constant 0 : i32
    %849 = arith.addi %773, %c0_i32_379 : i32
    %c4_i32_380 = arith.constant 4 : i32
    %850 = arith.addi %849, %c4_i32_380 : i32
    %851 = arith.index_cast %850 : i32 to index
    %852 = memref.load %arg6[%851] : memref<450xf32, #tpu.memory_space<smem>>
    %853 = vector.broadcast %852 : f32 to vector<14x14xf32>
    %854 = arith.mulf %848, %853 : vector<14x14xf32>
    %855 = arith.addf %846, %854 : vector<14x14xf32>
    %c0_381 = arith.constant 0 : index
    %c1_382 = arith.constant 1 : index
    %c0_383 = arith.constant 0 : index
    %c0_384 = arith.constant 0 : index
    %856 = vector.load %arg4[%c0_381, %c1_382, %c0_383, %c0_384] : memref<1x3x16x16xf32, #tpu.memory_space<vmem>>, vector<1x1x14x14xf32>
    %857 = vector.shape_cast %856 : vector<1x1x14x14xf32> to vector<14x14xf32>
    %c5_i32_385 = arith.constant 5 : i32
    %858 = arith.addi %773, %c5_i32_385 : i32
    %c0_i32_386 = arith.constant 0 : i32
    %859 = arith.addi %858, %c0_i32_386 : i32
    %860 = arith.index_cast %859 : i32 to index
    %861 = memref.load %arg6[%860] : memref<450xf32, #tpu.memory_space<smem>>
    %862 = vector.broadcast %861 : f32 to vector<14x14xf32>
    %863 = arith.mulf %857, %862 : vector<14x14xf32>
    %864 = arith.addf %839, %863 : vector<14x14xf32>
    %c0_i32_387 = arith.constant 0 : i32
    %865 = arith.addi %773, %c0_i32_387 : i32
    %c0_i32_388 = arith.constant 0 : i32
    %866 = arith.addi %865, %c0_i32_388 : i32
    %867 = arith.index_cast %866 : i32 to index
    %868 = memref.load %arg6[%867] : memref<450xf32, #tpu.memory_space<smem>>
    %869 = vector.broadcast %868 : f32 to vector<14x14xf32>
    %870 = arith.mulf %857, %869 : vector<14x14xf32>
    %871 = arith.addf %754, %870 : vector<14x14xf32>
    %c0_389 = arith.constant 0 : index
    %c1_390 = arith.constant 1 : index
    %c0_391 = arith.constant 0 : index
    %c0_392 = arith.constant 0 : index
    %872 = vector.load %arg5[%c0_389, %c1_390, %c0_391, %c0_392] : memref<1x3x16x16xf32, #tpu.memory_space<vmem>>, vector<1x1x14x14xf32>
    %873 = vector.shape_cast %872 : vector<1x1x14x14xf32> to vector<14x14xf32>
    %c5_i32_393 = arith.constant 5 : i32
    %874 = arith.addi %773, %c5_i32_393 : i32
    %c1_i32_394 = arith.constant 1 : i32
    %875 = arith.addi %874, %c1_i32_394 : i32
    %876 = arith.index_cast %875 : i32 to index
    %877 = memref.load %arg6[%876] : memref<450xf32, #tpu.memory_space<smem>>
    %878 = vector.broadcast %877 : f32 to vector<14x14xf32>
    %879 = arith.mulf %873, %878 : vector<14x14xf32>
    %880 = arith.addf %864, %879 : vector<14x14xf32>
    %c5_i32_395 = arith.constant 5 : i32
    %881 = arith.addi %773, %c5_i32_395 : i32
    %c0_i32_396 = arith.constant 0 : i32
    %882 = arith.addi %881, %c0_i32_396 : i32
    %883 = arith.index_cast %882 : i32 to index
    %884 = memref.load %arg6[%883] : memref<450xf32, #tpu.memory_space<smem>>
    %885 = vector.broadcast %884 : f32 to vector<14x14xf32>
    %886 = arith.mulf %873, %885 : vector<14x14xf32>
    %887 = arith.addf %855, %886 : vector<14x14xf32>
    %c0_i32_397 = arith.constant 0 : i32
    %888 = arith.addi %773, %c0_i32_397 : i32
    %c1_i32_398 = arith.constant 1 : i32
    %889 = arith.addi %888, %c1_i32_398 : i32
    %890 = arith.index_cast %889 : i32 to index
    %891 = memref.load %arg6[%890] : memref<450xf32, #tpu.memory_space<smem>>
    %892 = vector.broadcast %891 : f32 to vector<14x14xf32>
    %893 = arith.mulf %873, %892 : vector<14x14xf32>
    %894 = arith.addf %871, %893 : vector<14x14xf32>
    %c0_i32_399 = arith.constant 0 : i32
    %895 = arith.addi %773, %c0_i32_399 : i32
    %c0_i32_400 = arith.constant 0 : i32
    %896 = arith.addi %895, %c0_i32_400 : i32
    %897 = arith.index_cast %896 : i32 to index
    %898 = memref.load %arg6[%897] : memref<450xf32, #tpu.memory_space<smem>>
    %899 = vector.broadcast %898 : f32 to vector<14x14xf32>
    %900 = arith.mulf %873, %899 : vector<14x14xf32>
    %901 = arith.addf %770, %900 : vector<14x14xf32>
    %c0_401 = arith.constant 0 : index
    %c1_402 = arith.constant 1 : index
    %c0_403 = arith.constant 0 : index
    %c1_404 = arith.constant 1 : index
    %902 = vector.load %arg4[%c0_401, %c1_402, %c0_403, %c1_404] : memref<1x3x16x16xf32, #tpu.memory_space<vmem>>, vector<1x1x14x14xf32>
    %903 = vector.shape_cast %902 : vector<1x1x14x14xf32> to vector<14x14xf32>
    %c5_i32_405 = arith.constant 5 : i32
    %904 = arith.addi %773, %c5_i32_405 : i32
    %c2_i32_406 = arith.constant 2 : i32
    %905 = arith.addi %904, %c2_i32_406 : i32
    %906 = arith.index_cast %905 : i32 to index
    %907 = memref.load %arg6[%906] : memref<450xf32, #tpu.memory_space<smem>>
    %908 = vector.broadcast %907 : f32 to vector<14x14xf32>
    %909 = arith.mulf %903, %908 : vector<14x14xf32>
    %910 = arith.addf %880, %909 : vector<14x14xf32>
    %c5_i32_407 = arith.constant 5 : i32
    %911 = arith.addi %773, %c5_i32_407 : i32
    %c1_i32_408 = arith.constant 1 : i32
    %912 = arith.addi %911, %c1_i32_408 : i32
    %913 = arith.index_cast %912 : i32 to index
    %914 = memref.load %arg6[%913] : memref<450xf32, #tpu.memory_space<smem>>
    %915 = vector.broadcast %914 : f32 to vector<14x14xf32>
    %916 = arith.mulf %903, %915 : vector<14x14xf32>
    %917 = arith.addf %887, %916 : vector<14x14xf32>
    %c0_i32_409 = arith.constant 0 : i32
    %918 = arith.addi %773, %c0_i32_409 : i32
    %c2_i32_410 = arith.constant 2 : i32
    %919 = arith.addi %918, %c2_i32_410 : i32
    %920 = arith.index_cast %919 : i32 to index
    %921 = memref.load %arg6[%920] : memref<450xf32, #tpu.memory_space<smem>>
    %922 = vector.broadcast %921 : f32 to vector<14x14xf32>
    %923 = arith.mulf %903, %922 : vector<14x14xf32>
    %924 = arith.addf %894, %923 : vector<14x14xf32>
    %c0_i32_411 = arith.constant 0 : i32
    %925 = arith.addi %773, %c0_i32_411 : i32
    %c1_i32_412 = arith.constant 1 : i32
    %926 = arith.addi %925, %c1_i32_412 : i32
    %927 = arith.index_cast %926 : i32 to index
    %928 = memref.load %arg6[%927] : memref<450xf32, #tpu.memory_space<smem>>
    %929 = vector.broadcast %928 : f32 to vector<14x14xf32>
    %930 = arith.mulf %903, %929 : vector<14x14xf32>
    %931 = arith.addf %901, %930 : vector<14x14xf32>
    %c0_413 = arith.constant 0 : index
    %c1_414 = arith.constant 1 : index
    %c0_415 = arith.constant 0 : index
    %c1_416 = arith.constant 1 : index
    %932 = vector.load %arg5[%c0_413, %c1_414, %c0_415, %c1_416] : memref<1x3x16x16xf32, #tpu.memory_space<vmem>>, vector<1x1x14x14xf32>
    %933 = vector.shape_cast %932 : vector<1x1x14x14xf32> to vector<14x14xf32>
    %c5_i32_417 = arith.constant 5 : i32
    %934 = arith.addi %773, %c5_i32_417 : i32
    %c3_i32_418 = arith.constant 3 : i32
    %935 = arith.addi %934, %c3_i32_418 : i32
    %936 = arith.index_cast %935 : i32 to index
    %937 = memref.load %arg6[%936] : memref<450xf32, #tpu.memory_space<smem>>
    %938 = vector.broadcast %937 : f32 to vector<14x14xf32>
    %939 = arith.mulf %933, %938 : vector<14x14xf32>
    %940 = arith.addf %910, %939 : vector<14x14xf32>
    %c5_i32_419 = arith.constant 5 : i32
    %941 = arith.addi %773, %c5_i32_419 : i32
    %c2_i32_420 = arith.constant 2 : i32
    %942 = arith.addi %941, %c2_i32_420 : i32
    %943 = arith.index_cast %942 : i32 to index
    %944 = memref.load %arg6[%943] : memref<450xf32, #tpu.memory_space<smem>>
    %945 = vector.broadcast %944 : f32 to vector<14x14xf32>
    %946 = arith.mulf %933, %945 : vector<14x14xf32>
    %947 = arith.addf %917, %946 : vector<14x14xf32>
    %c0_i32_421 = arith.constant 0 : i32
    %948 = arith.addi %773, %c0_i32_421 : i32
    %c3_i32_422 = arith.constant 3 : i32
    %949 = arith.addi %948, %c3_i32_422 : i32
    %950 = arith.index_cast %949 : i32 to index
    %951 = memref.load %arg6[%950] : memref<450xf32, #tpu.memory_space<smem>>
    %952 = vector.broadcast %951 : f32 to vector<14x14xf32>
    %953 = arith.mulf %933, %952 : vector<14x14xf32>
    %954 = arith.addf %924, %953 : vector<14x14xf32>
    %c0_i32_423 = arith.constant 0 : i32
    %955 = arith.addi %773, %c0_i32_423 : i32
    %c2_i32_424 = arith.constant 2 : i32
    %956 = arith.addi %955, %c2_i32_424 : i32
    %957 = arith.index_cast %956 : i32 to index
    %958 = memref.load %arg6[%957] : memref<450xf32, #tpu.memory_space<smem>>
    %959 = vector.broadcast %958 : f32 to vector<14x14xf32>
    %960 = arith.mulf %933, %959 : vector<14x14xf32>
    %961 = arith.addf %931, %960 : vector<14x14xf32>
    %c0_425 = arith.constant 0 : index
    %c1_426 = arith.constant 1 : index
    %c0_427 = arith.constant 0 : index
    %c2_428 = arith.constant 2 : index
    %962 = vector.load %arg4[%c0_425, %c1_426, %c0_427, %c2_428] : memref<1x3x16x16xf32, #tpu.memory_space<vmem>>, vector<1x1x14x14xf32>
    %963 = vector.shape_cast %962 : vector<1x1x14x14xf32> to vector<14x14xf32>
    %c5_i32_429 = arith.constant 5 : i32
    %964 = arith.addi %773, %c5_i32_429 : i32
    %c4_i32_430 = arith.constant 4 : i32
    %965 = arith.addi %964, %c4_i32_430 : i32
    %966 = arith.index_cast %965 : i32 to index
    %967 = memref.load %arg6[%966] : memref<450xf32, #tpu.memory_space<smem>>
    %968 = vector.broadcast %967 : f32 to vector<14x14xf32>
    %969 = arith.mulf %963, %968 : vector<14x14xf32>
    %970 = arith.addf %940, %969 : vector<14x14xf32>
    %c5_i32_431 = arith.constant 5 : i32
    %971 = arith.addi %773, %c5_i32_431 : i32
    %c3_i32_432 = arith.constant 3 : i32
    %972 = arith.addi %971, %c3_i32_432 : i32
    %973 = arith.index_cast %972 : i32 to index
    %974 = memref.load %arg6[%973] : memref<450xf32, #tpu.memory_space<smem>>
    %975 = vector.broadcast %974 : f32 to vector<14x14xf32>
    %976 = arith.mulf %963, %975 : vector<14x14xf32>
    %977 = arith.addf %947, %976 : vector<14x14xf32>
    %c0_i32_433 = arith.constant 0 : i32
    %978 = arith.addi %773, %c0_i32_433 : i32
    %c4_i32_434 = arith.constant 4 : i32
    %979 = arith.addi %978, %c4_i32_434 : i32
    %980 = arith.index_cast %979 : i32 to index
    %981 = memref.load %arg6[%980] : memref<450xf32, #tpu.memory_space<smem>>
    %982 = vector.broadcast %981 : f32 to vector<14x14xf32>
    %983 = arith.mulf %963, %982 : vector<14x14xf32>
    %984 = arith.addf %954, %983 : vector<14x14xf32>
    %c0_i32_435 = arith.constant 0 : i32
    %985 = arith.addi %773, %c0_i32_435 : i32
    %c3_i32_436 = arith.constant 3 : i32
    %986 = arith.addi %985, %c3_i32_436 : i32
    %987 = arith.index_cast %986 : i32 to index
    %988 = memref.load %arg6[%987] : memref<450xf32, #tpu.memory_space<smem>>
    %989 = vector.broadcast %988 : f32 to vector<14x14xf32>
    %990 = arith.mulf %963, %989 : vector<14x14xf32>
    %991 = arith.addf %961, %990 : vector<14x14xf32>
    %c0_437 = arith.constant 0 : index
    %c1_438 = arith.constant 1 : index
    %c0_439 = arith.constant 0 : index
    %c2_440 = arith.constant 2 : index
    %992 = vector.load %arg5[%c0_437, %c1_438, %c0_439, %c2_440] : memref<1x3x16x16xf32, #tpu.memory_space<vmem>>, vector<1x1x14x14xf32>
    %993 = vector.shape_cast %992 : vector<1x1x14x14xf32> to vector<14x14xf32>
    %c5_i32_441 = arith.constant 5 : i32
    %994 = arith.addi %773, %c5_i32_441 : i32
    %c4_i32_442 = arith.constant 4 : i32
    %995 = arith.addi %994, %c4_i32_442 : i32
    %996 = arith.index_cast %995 : i32 to index
    %997 = memref.load %arg6[%996] : memref<450xf32, #tpu.memory_space<smem>>
    %998 = vector.broadcast %997 : f32 to vector<14x14xf32>
    %999 = arith.mulf %993, %998 : vector<14x14xf32>
    %1000 = arith.addf %977, %999 : vector<14x14xf32>
    %c0_i32_443 = arith.constant 0 : i32
    %1001 = arith.addi %773, %c0_i32_443 : i32
    %c4_i32_444 = arith.constant 4 : i32
    %1002 = arith.addi %1001, %c4_i32_444 : i32
    %1003 = arith.index_cast %1002 : i32 to index
    %1004 = memref.load %arg6[%1003] : memref<450xf32, #tpu.memory_space<smem>>
    %1005 = vector.broadcast %1004 : f32 to vector<14x14xf32>
    %1006 = arith.mulf %993, %1005 : vector<14x14xf32>
    %1007 = arith.addf %991, %1006 : vector<14x14xf32>
    %c0_445 = arith.constant 0 : index
    %c1_446 = arith.constant 1 : index
    %c1_447 = arith.constant 1 : index
    %c0_448 = arith.constant 0 : index
    %1008 = vector.load %arg2[%c0_445, %c1_446, %c1_447, %c0_448] : memref<1x3x16x16xf32, #tpu.memory_space<vmem>>, vector<1x1x14x14xf32>
    %1009 = vector.shape_cast %1008 : vector<1x1x14x14xf32> to vector<14x14xf32>
    %c10_i32_449 = arith.constant 10 : i32
    %1010 = arith.addi %773, %c10_i32_449 : i32
    %c0_i32_450 = arith.constant 0 : i32
    %1011 = arith.addi %1010, %c0_i32_450 : i32
    %1012 = arith.index_cast %1011 : i32 to index
    %1013 = memref.load %arg6[%1012] : memref<450xf32, #tpu.memory_space<smem>>
    %1014 = vector.broadcast %1013 : f32 to vector<14x14xf32>
    %1015 = arith.mulf %1009, %1014 : vector<14x14xf32>
    %1016 = arith.addf %970, %1015 : vector<14x14xf32>
    %c5_i32_451 = arith.constant 5 : i32
    %1017 = arith.addi %773, %c5_i32_451 : i32
    %c0_i32_452 = arith.constant 0 : i32
    %1018 = arith.addi %1017, %c0_i32_452 : i32
    %1019 = arith.index_cast %1018 : i32 to index
    %1020 = memref.load %arg6[%1019] : memref<450xf32, #tpu.memory_space<smem>>
    %1021 = vector.broadcast %1020 : f32 to vector<14x14xf32>
    %1022 = arith.mulf %1009, %1021 : vector<14x14xf32>
    %1023 = arith.addf %984, %1022 : vector<14x14xf32>
    %c0_453 = arith.constant 0 : index
    %c1_454 = arith.constant 1 : index
    %c1_455 = arith.constant 1 : index
    %c0_456 = arith.constant 0 : index
    %1024 = vector.load %arg3[%c0_453, %c1_454, %c1_455, %c0_456] : memref<1x3x16x16xf32, #tpu.memory_space<vmem>>, vector<1x1x14x14xf32>
    %1025 = vector.shape_cast %1024 : vector<1x1x14x14xf32> to vector<14x14xf32>
    %c10_i32_457 = arith.constant 10 : i32
    %1026 = arith.addi %773, %c10_i32_457 : i32
    %c1_i32_458 = arith.constant 1 : i32
    %1027 = arith.addi %1026, %c1_i32_458 : i32
    %1028 = arith.index_cast %1027 : i32 to index
    %1029 = memref.load %arg6[%1028] : memref<450xf32, #tpu.memory_space<smem>>
    %1030 = vector.broadcast %1029 : f32 to vector<14x14xf32>
    %1031 = arith.mulf %1025, %1030 : vector<14x14xf32>
    %1032 = arith.addf %1016, %1031 : vector<14x14xf32>
    %c10_i32_459 = arith.constant 10 : i32
    %1033 = arith.addi %773, %c10_i32_459 : i32
    %c0_i32_460 = arith.constant 0 : i32
    %1034 = arith.addi %1033, %c0_i32_460 : i32
    %1035 = arith.index_cast %1034 : i32 to index
    %1036 = memref.load %arg6[%1035] : memref<450xf32, #tpu.memory_space<smem>>
    %1037 = vector.broadcast %1036 : f32 to vector<14x14xf32>
    %1038 = arith.mulf %1025, %1037 : vector<14x14xf32>
    %1039 = arith.addf %1000, %1038 : vector<14x14xf32>
    %c5_i32_461 = arith.constant 5 : i32
    %1040 = arith.addi %773, %c5_i32_461 : i32
    %c1_i32_462 = arith.constant 1 : i32
    %1041 = arith.addi %1040, %c1_i32_462 : i32
    %1042 = arith.index_cast %1041 : i32 to index
    %1043 = memref.load %arg6[%1042] : memref<450xf32, #tpu.memory_space<smem>>
    %1044 = vector.broadcast %1043 : f32 to vector<14x14xf32>
    %1045 = arith.mulf %1025, %1044 : vector<14x14xf32>
    %1046 = arith.addf %1023, %1045 : vector<14x14xf32>
    %c5_i32_463 = arith.constant 5 : i32
    %1047 = arith.addi %773, %c5_i32_463 : i32
    %c0_i32_464 = arith.constant 0 : i32
    %1048 = arith.addi %1047, %c0_i32_464 : i32
    %1049 = arith.index_cast %1048 : i32 to index
    %1050 = memref.load %arg6[%1049] : memref<450xf32, #tpu.memory_space<smem>>
    %1051 = vector.broadcast %1050 : f32 to vector<14x14xf32>
    %1052 = arith.mulf %1025, %1051 : vector<14x14xf32>
    %1053 = arith.addf %1007, %1052 : vector<14x14xf32>
    %c0_465 = arith.constant 0 : index
    %c1_466 = arith.constant 1 : index
    %c1_467 = arith.constant 1 : index
    %c1_468 = arith.constant 1 : index
    %1054 = vector.load %arg2[%c0_465, %c1_466, %c1_467, %c1_468] : memref<1x3x16x16xf32, #tpu.memory_space<vmem>>, vector<1x1x14x14xf32>
    %1055 = vector.shape_cast %1054 : vector<1x1x14x14xf32> to vector<14x14xf32>
    %c10_i32_469 = arith.constant 10 : i32
    %1056 = arith.addi %773, %c10_i32_469 : i32
    %c2_i32_470 = arith.constant 2 : i32
    %1057 = arith.addi %1056, %c2_i32_470 : i32
    %1058 = arith.index_cast %1057 : i32 to index
    %1059 = memref.load %arg6[%1058] : memref<450xf32, #tpu.memory_space<smem>>
    %1060 = vector.broadcast %1059 : f32 to vector<14x14xf32>
    %1061 = arith.mulf %1055, %1060 : vector<14x14xf32>
    %1062 = arith.addf %1032, %1061 : vector<14x14xf32>
    %c10_i32_471 = arith.constant 10 : i32
    %1063 = arith.addi %773, %c10_i32_471 : i32
    %c1_i32_472 = arith.constant 1 : i32
    %1064 = arith.addi %1063, %c1_i32_472 : i32
    %1065 = arith.index_cast %1064 : i32 to index
    %1066 = memref.load %arg6[%1065] : memref<450xf32, #tpu.memory_space<smem>>
    %1067 = vector.broadcast %1066 : f32 to vector<14x14xf32>
    %1068 = arith.mulf %1055, %1067 : vector<14x14xf32>
    %1069 = arith.addf %1039, %1068 : vector<14x14xf32>
    %c5_i32_473 = arith.constant 5 : i32
    %1070 = arith.addi %773, %c5_i32_473 : i32
    %c2_i32_474 = arith.constant 2 : i32
    %1071 = arith.addi %1070, %c2_i32_474 : i32
    %1072 = arith.index_cast %1071 : i32 to index
    %1073 = memref.load %arg6[%1072] : memref<450xf32, #tpu.memory_space<smem>>
    %1074 = vector.broadcast %1073 : f32 to vector<14x14xf32>
    %1075 = arith.mulf %1055, %1074 : vector<14x14xf32>
    %1076 = arith.addf %1046, %1075 : vector<14x14xf32>
    %c5_i32_475 = arith.constant 5 : i32
    %1077 = arith.addi %773, %c5_i32_475 : i32
    %c1_i32_476 = arith.constant 1 : i32
    %1078 = arith.addi %1077, %c1_i32_476 : i32
    %1079 = arith.index_cast %1078 : i32 to index
    %1080 = memref.load %arg6[%1079] : memref<450xf32, #tpu.memory_space<smem>>
    %1081 = vector.broadcast %1080 : f32 to vector<14x14xf32>
    %1082 = arith.mulf %1055, %1081 : vector<14x14xf32>
    %1083 = arith.addf %1053, %1082 : vector<14x14xf32>
    %c0_477 = arith.constant 0 : index
    %c1_478 = arith.constant 1 : index
    %c1_479 = arith.constant 1 : index
    %c1_480 = arith.constant 1 : index
    %1084 = vector.load %arg3[%c0_477, %c1_478, %c1_479, %c1_480] : memref<1x3x16x16xf32, #tpu.memory_space<vmem>>, vector<1x1x14x14xf32>
    %1085 = vector.shape_cast %1084 : vector<1x1x14x14xf32> to vector<14x14xf32>
    %c10_i32_481 = arith.constant 10 : i32
    %1086 = arith.addi %773, %c10_i32_481 : i32
    %c3_i32_482 = arith.constant 3 : i32
    %1087 = arith.addi %1086, %c3_i32_482 : i32
    %1088 = arith.index_cast %1087 : i32 to index
    %1089 = memref.load %arg6[%1088] : memref<450xf32, #tpu.memory_space<smem>>
    %1090 = vector.broadcast %1089 : f32 to vector<14x14xf32>
    %1091 = arith.mulf %1085, %1090 : vector<14x14xf32>
    %1092 = arith.addf %1062, %1091 : vector<14x14xf32>
    %c10_i32_483 = arith.constant 10 : i32
    %1093 = arith.addi %773, %c10_i32_483 : i32
    %c2_i32_484 = arith.constant 2 : i32
    %1094 = arith.addi %1093, %c2_i32_484 : i32
    %1095 = arith.index_cast %1094 : i32 to index
    %1096 = memref.load %arg6[%1095] : memref<450xf32, #tpu.memory_space<smem>>
    %1097 = vector.broadcast %1096 : f32 to vector<14x14xf32>
    %1098 = arith.mulf %1085, %1097 : vector<14x14xf32>
    %1099 = arith.addf %1069, %1098 : vector<14x14xf32>
    %c5_i32_485 = arith.constant 5 : i32
    %1100 = arith.addi %773, %c5_i32_485 : i32
    %c3_i32_486 = arith.constant 3 : i32
    %1101 = arith.addi %1100, %c3_i32_486 : i32
    %1102 = arith.index_cast %1101 : i32 to index
    %1103 = memref.load %arg6[%1102] : memref<450xf32, #tpu.memory_space<smem>>
    %1104 = vector.broadcast %1103 : f32 to vector<14x14xf32>
    %1105 = arith.mulf %1085, %1104 : vector<14x14xf32>
    %1106 = arith.addf %1076, %1105 : vector<14x14xf32>
    %c5_i32_487 = arith.constant 5 : i32
    %1107 = arith.addi %773, %c5_i32_487 : i32
    %c2_i32_488 = arith.constant 2 : i32
    %1108 = arith.addi %1107, %c2_i32_488 : i32
    %1109 = arith.index_cast %1108 : i32 to index
    %1110 = memref.load %arg6[%1109] : memref<450xf32, #tpu.memory_space<smem>>
    %1111 = vector.broadcast %1110 : f32 to vector<14x14xf32>
    %1112 = arith.mulf %1085, %1111 : vector<14x14xf32>
    %1113 = arith.addf %1083, %1112 : vector<14x14xf32>
    %c0_489 = arith.constant 0 : index
    %c1_490 = arith.constant 1 : index
    %c1_491 = arith.constant 1 : index
    %c2_492 = arith.constant 2 : index
    %1114 = vector.load %arg2[%c0_489, %c1_490, %c1_491, %c2_492] : memref<1x3x16x16xf32, #tpu.memory_space<vmem>>, vector<1x1x14x14xf32>
    %1115 = vector.shape_cast %1114 : vector<1x1x14x14xf32> to vector<14x14xf32>
    %c10_i32_493 = arith.constant 10 : i32
    %1116 = arith.addi %773, %c10_i32_493 : i32
    %c4_i32_494 = arith.constant 4 : i32
    %1117 = arith.addi %1116, %c4_i32_494 : i32
    %1118 = arith.index_cast %1117 : i32 to index
    %1119 = memref.load %arg6[%1118] : memref<450xf32, #tpu.memory_space<smem>>
    %1120 = vector.broadcast %1119 : f32 to vector<14x14xf32>
    %1121 = arith.mulf %1115, %1120 : vector<14x14xf32>
    %1122 = arith.addf %1092, %1121 : vector<14x14xf32>
    %c10_i32_495 = arith.constant 10 : i32
    %1123 = arith.addi %773, %c10_i32_495 : i32
    %c3_i32_496 = arith.constant 3 : i32
    %1124 = arith.addi %1123, %c3_i32_496 : i32
    %1125 = arith.index_cast %1124 : i32 to index
    %1126 = memref.load %arg6[%1125] : memref<450xf32, #tpu.memory_space<smem>>
    %1127 = vector.broadcast %1126 : f32 to vector<14x14xf32>
    %1128 = arith.mulf %1115, %1127 : vector<14x14xf32>
    %1129 = arith.addf %1099, %1128 : vector<14x14xf32>
    %c5_i32_497 = arith.constant 5 : i32
    %1130 = arith.addi %773, %c5_i32_497 : i32
    %c4_i32_498 = arith.constant 4 : i32
    %1131 = arith.addi %1130, %c4_i32_498 : i32
    %1132 = arith.index_cast %1131 : i32 to index
    %1133 = memref.load %arg6[%1132] : memref<450xf32, #tpu.memory_space<smem>>
    %1134 = vector.broadcast %1133 : f32 to vector<14x14xf32>
    %1135 = arith.mulf %1115, %1134 : vector<14x14xf32>
    %1136 = arith.addf %1106, %1135 : vector<14x14xf32>
    %c5_i32_499 = arith.constant 5 : i32
    %1137 = arith.addi %773, %c5_i32_499 : i32
    %c3_i32_500 = arith.constant 3 : i32
    %1138 = arith.addi %1137, %c3_i32_500 : i32
    %1139 = arith.index_cast %1138 : i32 to index
    %1140 = memref.load %arg6[%1139] : memref<450xf32, #tpu.memory_space<smem>>
    %1141 = vector.broadcast %1140 : f32 to vector<14x14xf32>
    %1142 = arith.mulf %1115, %1141 : vector<14x14xf32>
    %1143 = arith.addf %1113, %1142 : vector<14x14xf32>
    %c0_501 = arith.constant 0 : index
    %c1_502 = arith.constant 1 : index
    %c1_503 = arith.constant 1 : index
    %c2_504 = arith.constant 2 : index
    %1144 = vector.load %arg3[%c0_501, %c1_502, %c1_503, %c2_504] : memref<1x3x16x16xf32, #tpu.memory_space<vmem>>, vector<1x1x14x14xf32>
    %1145 = vector.shape_cast %1144 : vector<1x1x14x14xf32> to vector<14x14xf32>
    %c10_i32_505 = arith.constant 10 : i32
    %1146 = arith.addi %773, %c10_i32_505 : i32
    %c4_i32_506 = arith.constant 4 : i32
    %1147 = arith.addi %1146, %c4_i32_506 : i32
    %1148 = arith.index_cast %1147 : i32 to index
    %1149 = memref.load %arg6[%1148] : memref<450xf32, #tpu.memory_space<smem>>
    %1150 = vector.broadcast %1149 : f32 to vector<14x14xf32>
    %1151 = arith.mulf %1145, %1150 : vector<14x14xf32>
    %1152 = arith.addf %1129, %1151 : vector<14x14xf32>
    %c5_i32_507 = arith.constant 5 : i32
    %1153 = arith.addi %773, %c5_i32_507 : i32
    %c4_i32_508 = arith.constant 4 : i32
    %1154 = arith.addi %1153, %c4_i32_508 : i32
    %1155 = arith.index_cast %1154 : i32 to index
    %1156 = memref.load %arg6[%1155] : memref<450xf32, #tpu.memory_space<smem>>
    %1157 = vector.broadcast %1156 : f32 to vector<14x14xf32>
    %1158 = arith.mulf %1145, %1157 : vector<14x14xf32>
    %1159 = arith.addf %1143, %1158 : vector<14x14xf32>
    %c0_509 = arith.constant 0 : index
    %c1_510 = arith.constant 1 : index
    %c1_511 = arith.constant 1 : index
    %c0_512 = arith.constant 0 : index
    %1160 = vector.load %arg4[%c0_509, %c1_510, %c1_511, %c0_512] : memref<1x3x16x16xf32, #tpu.memory_space<vmem>>, vector<1x1x14x14xf32>
    %1161 = vector.shape_cast %1160 : vector<1x1x14x14xf32> to vector<14x14xf32>
    %c15_i32_513 = arith.constant 15 : i32
    %1162 = arith.addi %773, %c15_i32_513 : i32
    %c0_i32_514 = arith.constant 0 : i32
    %1163 = arith.addi %1162, %c0_i32_514 : i32
    %1164 = arith.index_cast %1163 : i32 to index
    %1165 = memref.load %arg6[%1164] : memref<450xf32, #tpu.memory_space<smem>>
    %1166 = vector.broadcast %1165 : f32 to vector<14x14xf32>
    %1167 = arith.mulf %1161, %1166 : vector<14x14xf32>
    %1168 = arith.addf %1122, %1167 : vector<14x14xf32>
    %c10_i32_515 = arith.constant 10 : i32
    %1169 = arith.addi %773, %c10_i32_515 : i32
    %c0_i32_516 = arith.constant 0 : i32
    %1170 = arith.addi %1169, %c0_i32_516 : i32
    %1171 = arith.index_cast %1170 : i32 to index
    %1172 = memref.load %arg6[%1171] : memref<450xf32, #tpu.memory_space<smem>>
    %1173 = vector.broadcast %1172 : f32 to vector<14x14xf32>
    %1174 = arith.mulf %1161, %1173 : vector<14x14xf32>
    %1175 = arith.addf %1136, %1174 : vector<14x14xf32>
    %c0_517 = arith.constant 0 : index
    %c1_518 = arith.constant 1 : index
    %c1_519 = arith.constant 1 : index
    %c0_520 = arith.constant 0 : index
    %1176 = vector.load %arg5[%c0_517, %c1_518, %c1_519, %c0_520] : memref<1x3x16x16xf32, #tpu.memory_space<vmem>>, vector<1x1x14x14xf32>
    %1177 = vector.shape_cast %1176 : vector<1x1x14x14xf32> to vector<14x14xf32>
    %c15_i32_521 = arith.constant 15 : i32
    %1178 = arith.addi %773, %c15_i32_521 : i32
    %c1_i32_522 = arith.constant 1 : i32
    %1179 = arith.addi %1178, %c1_i32_522 : i32
    %1180 = arith.index_cast %1179 : i32 to index
    %1181 = memref.load %arg6[%1180] : memref<450xf32, #tpu.memory_space<smem>>
    %1182 = vector.broadcast %1181 : f32 to vector<14x14xf32>
    %1183 = arith.mulf %1177, %1182 : vector<14x14xf32>
    %1184 = arith.addf %1168, %1183 : vector<14x14xf32>
    %c15_i32_523 = arith.constant 15 : i32
    %1185 = arith.addi %773, %c15_i32_523 : i32
    %c0_i32_524 = arith.constant 0 : i32
    %1186 = arith.addi %1185, %c0_i32_524 : i32
    %1187 = arith.index_cast %1186 : i32 to index
    %1188 = memref.load %arg6[%1187] : memref<450xf32, #tpu.memory_space<smem>>
    %1189 = vector.broadcast %1188 : f32 to vector<14x14xf32>
    %1190 = arith.mulf %1177, %1189 : vector<14x14xf32>
    %1191 = arith.addf %1152, %1190 : vector<14x14xf32>
    %c10_i32_525 = arith.constant 10 : i32
    %1192 = arith.addi %773, %c10_i32_525 : i32
    %c1_i32_526 = arith.constant 1 : i32
    %1193 = arith.addi %1192, %c1_i32_526 : i32
    %1194 = arith.index_cast %1193 : i32 to index
    %1195 = memref.load %arg6[%1194] : memref<450xf32, #tpu.memory_space<smem>>
    %1196 = vector.broadcast %1195 : f32 to vector<14x14xf32>
    %1197 = arith.mulf %1177, %1196 : vector<14x14xf32>
    %1198 = arith.addf %1175, %1197 : vector<14x14xf32>
    %c10_i32_527 = arith.constant 10 : i32
    %1199 = arith.addi %773, %c10_i32_527 : i32
    %c0_i32_528 = arith.constant 0 : i32
    %1200 = arith.addi %1199, %c0_i32_528 : i32
    %1201 = arith.index_cast %1200 : i32 to index
    %1202 = memref.load %arg6[%1201] : memref<450xf32, #tpu.memory_space<smem>>
    %1203 = vector.broadcast %1202 : f32 to vector<14x14xf32>
    %1204 = arith.mulf %1177, %1203 : vector<14x14xf32>
    %1205 = arith.addf %1159, %1204 : vector<14x14xf32>
    %c0_529 = arith.constant 0 : index
    %c1_530 = arith.constant 1 : index
    %c1_531 = arith.constant 1 : index
    %c1_532 = arith.constant 1 : index
    %1206 = vector.load %arg4[%c0_529, %c1_530, %c1_531, %c1_532] : memref<1x3x16x16xf32, #tpu.memory_space<vmem>>, vector<1x1x14x14xf32>
    %1207 = vector.shape_cast %1206 : vector<1x1x14x14xf32> to vector<14x14xf32>
    %c15_i32_533 = arith.constant 15 : i32
    %1208 = arith.addi %773, %c15_i32_533 : i32
    %c2_i32_534 = arith.constant 2 : i32
    %1209 = arith.addi %1208, %c2_i32_534 : i32
    %1210 = arith.index_cast %1209 : i32 to index
    %1211 = memref.load %arg6[%1210] : memref<450xf32, #tpu.memory_space<smem>>
    %1212 = vector.broadcast %1211 : f32 to vector<14x14xf32>
    %1213 = arith.mulf %1207, %1212 : vector<14x14xf32>
    %1214 = arith.addf %1184, %1213 : vector<14x14xf32>
    %c15_i32_535 = arith.constant 15 : i32
    %1215 = arith.addi %773, %c15_i32_535 : i32
    %c1_i32_536 = arith.constant 1 : i32
    %1216 = arith.addi %1215, %c1_i32_536 : i32
    %1217 = arith.index_cast %1216 : i32 to index
    %1218 = memref.load %arg6[%1217] : memref<450xf32, #tpu.memory_space<smem>>
    %1219 = vector.broadcast %1218 : f32 to vector<14x14xf32>
    %1220 = arith.mulf %1207, %1219 : vector<14x14xf32>
    %1221 = arith.addf %1191, %1220 : vector<14x14xf32>
    %c10_i32_537 = arith.constant 10 : i32
    %1222 = arith.addi %773, %c10_i32_537 : i32
    %c2_i32_538 = arith.constant 2 : i32
    %1223 = arith.addi %1222, %c2_i32_538 : i32
    %1224 = arith.index_cast %1223 : i32 to index
    %1225 = memref.load %arg6[%1224] : memref<450xf32, #tpu.memory_space<smem>>
    %1226 = vector.broadcast %1225 : f32 to vector<14x14xf32>
    %1227 = arith.mulf %1207, %1226 : vector<14x14xf32>
    %1228 = arith.addf %1198, %1227 : vector<14x14xf32>
    %c10_i32_539 = arith.constant 10 : i32
    %1229 = arith.addi %773, %c10_i32_539 : i32
    %c1_i32_540 = arith.constant 1 : i32
    %1230 = arith.addi %1229, %c1_i32_540 : i32
    %1231 = arith.index_cast %1230 : i32 to index
    %1232 = memref.load %arg6[%1231] : memref<450xf32, #tpu.memory_space<smem>>
    %1233 = vector.broadcast %1232 : f32 to vector<14x14xf32>
    %1234 = arith.mulf %1207, %1233 : vector<14x14xf32>
    %1235 = arith.addf %1205, %1234 : vector<14x14xf32>
    %c0_541 = arith.constant 0 : index
    %c1_542 = arith.constant 1 : index
    %c1_543 = arith.constant 1 : index
    %c1_544 = arith.constant 1 : index
    %1236 = vector.load %arg5[%c0_541, %c1_542, %c1_543, %c1_544] : memref<1x3x16x16xf32, #tpu.memory_space<vmem>>, vector<1x1x14x14xf32>
    %1237 = vector.shape_cast %1236 : vector<1x1x14x14xf32> to vector<14x14xf32>
    %c15_i32_545 = arith.constant 15 : i32
    %1238 = arith.addi %773, %c15_i32_545 : i32
    %c3_i32_546 = arith.constant 3 : i32
    %1239 = arith.addi %1238, %c3_i32_546 : i32
    %1240 = arith.index_cast %1239 : i32 to index
    %1241 = memref.load %arg6[%1240] : memref<450xf32, #tpu.memory_space<smem>>
    %1242 = vector.broadcast %1241 : f32 to vector<14x14xf32>
    %1243 = arith.mulf %1237, %1242 : vector<14x14xf32>
    %1244 = arith.addf %1214, %1243 : vector<14x14xf32>
    %c15_i32_547 = arith.constant 15 : i32
    %1245 = arith.addi %773, %c15_i32_547 : i32
    %c2_i32_548 = arith.constant 2 : i32
    %1246 = arith.addi %1245, %c2_i32_548 : i32
    %1247 = arith.index_cast %1246 : i32 to index
    %1248 = memref.load %arg6[%1247] : memref<450xf32, #tpu.memory_space<smem>>
    %1249 = vector.broadcast %1248 : f32 to vector<14x14xf32>
    %1250 = arith.mulf %1237, %1249 : vector<14x14xf32>
    %1251 = arith.addf %1221, %1250 : vector<14x14xf32>
    %c10_i32_549 = arith.constant 10 : i32
    %1252 = arith.addi %773, %c10_i32_549 : i32
    %c3_i32_550 = arith.constant 3 : i32
    %1253 = arith.addi %1252, %c3_i32_550 : i32
    %1254 = arith.index_cast %1253 : i32 to index
    %1255 = memref.load %arg6[%1254] : memref<450xf32, #tpu.memory_space<smem>>
    %1256 = vector.broadcast %1255 : f32 to vector<14x14xf32>
    %1257 = arith.mulf %1237, %1256 : vector<14x14xf32>
    %1258 = arith.addf %1228, %1257 : vector<14x14xf32>
    %c10_i32_551 = arith.constant 10 : i32
    %1259 = arith.addi %773, %c10_i32_551 : i32
    %c2_i32_552 = arith.constant 2 : i32
    %1260 = arith.addi %1259, %c2_i32_552 : i32
    %1261 = arith.index_cast %1260 : i32 to index
    %1262 = memref.load %arg6[%1261] : memref<450xf32, #tpu.memory_space<smem>>
    %1263 = vector.broadcast %1262 : f32 to vector<14x14xf32>
    %1264 = arith.mulf %1237, %1263 : vector<14x14xf32>
    %1265 = arith.addf %1235, %1264 : vector<14x14xf32>
    %c0_553 = arith.constant 0 : index
    %c1_554 = arith.constant 1 : index
    %c1_555 = arith.constant 1 : index
    %c2_556 = arith.constant 2 : index
    %1266 = vector.load %arg4[%c0_553, %c1_554, %c1_555, %c2_556] : memref<1x3x16x16xf32, #tpu.memory_space<vmem>>, vector<1x1x14x14xf32>
    %1267 = vector.shape_cast %1266 : vector<1x1x14x14xf32> to vector<14x14xf32>
    %c15_i32_557 = arith.constant 15 : i32
    %1268 = arith.addi %773, %c15_i32_557 : i32
    %c4_i32_558 = arith.constant 4 : i32
    %1269 = arith.addi %1268, %c4_i32_558 : i32
    %1270 = arith.index_cast %1269 : i32 to index
    %1271 = memref.load %arg6[%1270] : memref<450xf32, #tpu.memory_space<smem>>
    %1272 = vector.broadcast %1271 : f32 to vector<14x14xf32>
    %1273 = arith.mulf %1267, %1272 : vector<14x14xf32>
    %1274 = arith.addf %1244, %1273 : vector<14x14xf32>
    %c15_i32_559 = arith.constant 15 : i32
    %1275 = arith.addi %773, %c15_i32_559 : i32
    %c3_i32_560 = arith.constant 3 : i32
    %1276 = arith.addi %1275, %c3_i32_560 : i32
    %1277 = arith.index_cast %1276 : i32 to index
    %1278 = memref.load %arg6[%1277] : memref<450xf32, #tpu.memory_space<smem>>
    %1279 = vector.broadcast %1278 : f32 to vector<14x14xf32>
    %1280 = arith.mulf %1267, %1279 : vector<14x14xf32>
    %1281 = arith.addf %1251, %1280 : vector<14x14xf32>
    %c10_i32_561 = arith.constant 10 : i32
    %1282 = arith.addi %773, %c10_i32_561 : i32
    %c4_i32_562 = arith.constant 4 : i32
    %1283 = arith.addi %1282, %c4_i32_562 : i32
    %1284 = arith.index_cast %1283 : i32 to index
    %1285 = memref.load %arg6[%1284] : memref<450xf32, #tpu.memory_space<smem>>
    %1286 = vector.broadcast %1285 : f32 to vector<14x14xf32>
    %1287 = arith.mulf %1267, %1286 : vector<14x14xf32>
    %1288 = arith.addf %1258, %1287 : vector<14x14xf32>
    %c10_i32_563 = arith.constant 10 : i32
    %1289 = arith.addi %773, %c10_i32_563 : i32
    %c3_i32_564 = arith.constant 3 : i32
    %1290 = arith.addi %1289, %c3_i32_564 : i32
    %1291 = arith.index_cast %1290 : i32 to index
    %1292 = memref.load %arg6[%1291] : memref<450xf32, #tpu.memory_space<smem>>
    %1293 = vector.broadcast %1292 : f32 to vector<14x14xf32>
    %1294 = arith.mulf %1267, %1293 : vector<14x14xf32>
    %1295 = arith.addf %1265, %1294 : vector<14x14xf32>
    %c0_565 = arith.constant 0 : index
    %c1_566 = arith.constant 1 : index
    %c1_567 = arith.constant 1 : index
    %c2_568 = arith.constant 2 : index
    %1296 = vector.load %arg5[%c0_565, %c1_566, %c1_567, %c2_568] : memref<1x3x16x16xf32, #tpu.memory_space<vmem>>, vector<1x1x14x14xf32>
    %1297 = vector.shape_cast %1296 : vector<1x1x14x14xf32> to vector<14x14xf32>
    %c15_i32_569 = arith.constant 15 : i32
    %1298 = arith.addi %773, %c15_i32_569 : i32
    %c4_i32_570 = arith.constant 4 : i32
    %1299 = arith.addi %1298, %c4_i32_570 : i32
    %1300 = arith.index_cast %1299 : i32 to index
    %1301 = memref.load %arg6[%1300] : memref<450xf32, #tpu.memory_space<smem>>
    %1302 = vector.broadcast %1301 : f32 to vector<14x14xf32>
    %1303 = arith.mulf %1297, %1302 : vector<14x14xf32>
    %1304 = arith.addf %1281, %1303 : vector<14x14xf32>
    %c10_i32_571 = arith.constant 10 : i32
    %1305 = arith.addi %773, %c10_i32_571 : i32
    %c4_i32_572 = arith.constant 4 : i32
    %1306 = arith.addi %1305, %c4_i32_572 : i32
    %1307 = arith.index_cast %1306 : i32 to index
    %1308 = memref.load %arg6[%1307] : memref<450xf32, #tpu.memory_space<smem>>
    %1309 = vector.broadcast %1308 : f32 to vector<14x14xf32>
    %1310 = arith.mulf %1297, %1309 : vector<14x14xf32>
    %1311 = arith.addf %1295, %1310 : vector<14x14xf32>
    %c0_573 = arith.constant 0 : index
    %c1_574 = arith.constant 1 : index
    %c2_575 = arith.constant 2 : index
    %c0_576 = arith.constant 0 : index
    %1312 = vector.load %arg2[%c0_573, %c1_574, %c2_575, %c0_576] : memref<1x3x16x16xf32, #tpu.memory_space<vmem>>, vector<1x1x14x14xf32>
    %1313 = vector.shape_cast %1312 : vector<1x1x14x14xf32> to vector<14x14xf32>
    %c20_i32_577 = arith.constant 20 : i32
    %1314 = arith.addi %773, %c20_i32_577 : i32
    %c0_i32_578 = arith.constant 0 : i32
    %1315 = arith.addi %1314, %c0_i32_578 : i32
    %1316 = arith.index_cast %1315 : i32 to index
    %1317 = memref.load %arg6[%1316] : memref<450xf32, #tpu.memory_space<smem>>
    %1318 = vector.broadcast %1317 : f32 to vector<14x14xf32>
    %1319 = arith.mulf %1313, %1318 : vector<14x14xf32>
    %1320 = arith.addf %1274, %1319 : vector<14x14xf32>
    %c15_i32_579 = arith.constant 15 : i32
    %1321 = arith.addi %773, %c15_i32_579 : i32
    %c0_i32_580 = arith.constant 0 : i32
    %1322 = arith.addi %1321, %c0_i32_580 : i32
    %1323 = arith.index_cast %1322 : i32 to index
    %1324 = memref.load %arg6[%1323] : memref<450xf32, #tpu.memory_space<smem>>
    %1325 = vector.broadcast %1324 : f32 to vector<14x14xf32>
    %1326 = arith.mulf %1313, %1325 : vector<14x14xf32>
    %1327 = arith.addf %1288, %1326 : vector<14x14xf32>
    %c0_581 = arith.constant 0 : index
    %c1_582 = arith.constant 1 : index
    %c2_583 = arith.constant 2 : index
    %c0_584 = arith.constant 0 : index
    %1328 = vector.load %arg3[%c0_581, %c1_582, %c2_583, %c0_584] : memref<1x3x16x16xf32, #tpu.memory_space<vmem>>, vector<1x1x14x14xf32>
    %1329 = vector.shape_cast %1328 : vector<1x1x14x14xf32> to vector<14x14xf32>
    %c20_i32_585 = arith.constant 20 : i32
    %1330 = arith.addi %773, %c20_i32_585 : i32
    %c1_i32_586 = arith.constant 1 : i32
    %1331 = arith.addi %1330, %c1_i32_586 : i32
    %1332 = arith.index_cast %1331 : i32 to index
    %1333 = memref.load %arg6[%1332] : memref<450xf32, #tpu.memory_space<smem>>
    %1334 = vector.broadcast %1333 : f32 to vector<14x14xf32>
    %1335 = arith.mulf %1329, %1334 : vector<14x14xf32>
    %1336 = arith.addf %1320, %1335 : vector<14x14xf32>
    %c20_i32_587 = arith.constant 20 : i32
    %1337 = arith.addi %773, %c20_i32_587 : i32
    %c0_i32_588 = arith.constant 0 : i32
    %1338 = arith.addi %1337, %c0_i32_588 : i32
    %1339 = arith.index_cast %1338 : i32 to index
    %1340 = memref.load %arg6[%1339] : memref<450xf32, #tpu.memory_space<smem>>
    %1341 = vector.broadcast %1340 : f32 to vector<14x14xf32>
    %1342 = arith.mulf %1329, %1341 : vector<14x14xf32>
    %1343 = arith.addf %1304, %1342 : vector<14x14xf32>
    %c15_i32_589 = arith.constant 15 : i32
    %1344 = arith.addi %773, %c15_i32_589 : i32
    %c1_i32_590 = arith.constant 1 : i32
    %1345 = arith.addi %1344, %c1_i32_590 : i32
    %1346 = arith.index_cast %1345 : i32 to index
    %1347 = memref.load %arg6[%1346] : memref<450xf32, #tpu.memory_space<smem>>
    %1348 = vector.broadcast %1347 : f32 to vector<14x14xf32>
    %1349 = arith.mulf %1329, %1348 : vector<14x14xf32>
    %1350 = arith.addf %1327, %1349 : vector<14x14xf32>
    %c15_i32_591 = arith.constant 15 : i32
    %1351 = arith.addi %773, %c15_i32_591 : i32
    %c0_i32_592 = arith.constant 0 : i32
    %1352 = arith.addi %1351, %c0_i32_592 : i32
    %1353 = arith.index_cast %1352 : i32 to index
    %1354 = memref.load %arg6[%1353] : memref<450xf32, #tpu.memory_space<smem>>
    %1355 = vector.broadcast %1354 : f32 to vector<14x14xf32>
    %1356 = arith.mulf %1329, %1355 : vector<14x14xf32>
    %1357 = arith.addf %1311, %1356 : vector<14x14xf32>
    %c0_593 = arith.constant 0 : index
    %c1_594 = arith.constant 1 : index
    %c2_595 = arith.constant 2 : index
    %c1_596 = arith.constant 1 : index
    %1358 = vector.load %arg2[%c0_593, %c1_594, %c2_595, %c1_596] : memref<1x3x16x16xf32, #tpu.memory_space<vmem>>, vector<1x1x14x14xf32>
    %1359 = vector.shape_cast %1358 : vector<1x1x14x14xf32> to vector<14x14xf32>
    %c20_i32_597 = arith.constant 20 : i32
    %1360 = arith.addi %773, %c20_i32_597 : i32
    %c2_i32_598 = arith.constant 2 : i32
    %1361 = arith.addi %1360, %c2_i32_598 : i32
    %1362 = arith.index_cast %1361 : i32 to index
    %1363 = memref.load %arg6[%1362] : memref<450xf32, #tpu.memory_space<smem>>
    %1364 = vector.broadcast %1363 : f32 to vector<14x14xf32>
    %1365 = arith.mulf %1359, %1364 : vector<14x14xf32>
    %1366 = arith.addf %1336, %1365 : vector<14x14xf32>
    %c20_i32_599 = arith.constant 20 : i32
    %1367 = arith.addi %773, %c20_i32_599 : i32
    %c1_i32_600 = arith.constant 1 : i32
    %1368 = arith.addi %1367, %c1_i32_600 : i32
    %1369 = arith.index_cast %1368 : i32 to index
    %1370 = memref.load %arg6[%1369] : memref<450xf32, #tpu.memory_space<smem>>
    %1371 = vector.broadcast %1370 : f32 to vector<14x14xf32>
    %1372 = arith.mulf %1359, %1371 : vector<14x14xf32>
    %1373 = arith.addf %1343, %1372 : vector<14x14xf32>
    %c15_i32_601 = arith.constant 15 : i32
    %1374 = arith.addi %773, %c15_i32_601 : i32
    %c2_i32_602 = arith.constant 2 : i32
    %1375 = arith.addi %1374, %c2_i32_602 : i32
    %1376 = arith.index_cast %1375 : i32 to index
    %1377 = memref.load %arg6[%1376] : memref<450xf32, #tpu.memory_space<smem>>
    %1378 = vector.broadcast %1377 : f32 to vector<14x14xf32>
    %1379 = arith.mulf %1359, %1378 : vector<14x14xf32>
    %1380 = arith.addf %1350, %1379 : vector<14x14xf32>
    %c15_i32_603 = arith.constant 15 : i32
    %1381 = arith.addi %773, %c15_i32_603 : i32
    %c1_i32_604 = arith.constant 1 : i32
    %1382 = arith.addi %1381, %c1_i32_604 : i32
    %1383 = arith.index_cast %1382 : i32 to index
    %1384 = memref.load %arg6[%1383] : memref<450xf32, #tpu.memory_space<smem>>
    %1385 = vector.broadcast %1384 : f32 to vector<14x14xf32>
    %1386 = arith.mulf %1359, %1385 : vector<14x14xf32>
    %1387 = arith.addf %1357, %1386 : vector<14x14xf32>
    %c0_605 = arith.constant 0 : index
    %c1_606 = arith.constant 1 : index
    %c2_607 = arith.constant 2 : index
    %c1_608 = arith.constant 1 : index
    %1388 = vector.load %arg3[%c0_605, %c1_606, %c2_607, %c1_608] : memref<1x3x16x16xf32, #tpu.memory_space<vmem>>, vector<1x1x14x14xf32>
    %1389 = vector.shape_cast %1388 : vector<1x1x14x14xf32> to vector<14x14xf32>
    %c20_i32_609 = arith.constant 20 : i32
    %1390 = arith.addi %773, %c20_i32_609 : i32
    %c3_i32_610 = arith.constant 3 : i32
    %1391 = arith.addi %1390, %c3_i32_610 : i32
    %1392 = arith.index_cast %1391 : i32 to index
    %1393 = memref.load %arg6[%1392] : memref<450xf32, #tpu.memory_space<smem>>
    %1394 = vector.broadcast %1393 : f32 to vector<14x14xf32>
    %1395 = arith.mulf %1389, %1394 : vector<14x14xf32>
    %1396 = arith.addf %1366, %1395 : vector<14x14xf32>
    %c20_i32_611 = arith.constant 20 : i32
    %1397 = arith.addi %773, %c20_i32_611 : i32
    %c2_i32_612 = arith.constant 2 : i32
    %1398 = arith.addi %1397, %c2_i32_612 : i32
    %1399 = arith.index_cast %1398 : i32 to index
    %1400 = memref.load %arg6[%1399] : memref<450xf32, #tpu.memory_space<smem>>
    %1401 = vector.broadcast %1400 : f32 to vector<14x14xf32>
    %1402 = arith.mulf %1389, %1401 : vector<14x14xf32>
    %1403 = arith.addf %1373, %1402 : vector<14x14xf32>
    %c15_i32_613 = arith.constant 15 : i32
    %1404 = arith.addi %773, %c15_i32_613 : i32
    %c3_i32_614 = arith.constant 3 : i32
    %1405 = arith.addi %1404, %c3_i32_614 : i32
    %1406 = arith.index_cast %1405 : i32 to index
    %1407 = memref.load %arg6[%1406] : memref<450xf32, #tpu.memory_space<smem>>
    %1408 = vector.broadcast %1407 : f32 to vector<14x14xf32>
    %1409 = arith.mulf %1389, %1408 : vector<14x14xf32>
    %1410 = arith.addf %1380, %1409 : vector<14x14xf32>
    %c15_i32_615 = arith.constant 15 : i32
    %1411 = arith.addi %773, %c15_i32_615 : i32
    %c2_i32_616 = arith.constant 2 : i32
    %1412 = arith.addi %1411, %c2_i32_616 : i32
    %1413 = arith.index_cast %1412 : i32 to index
    %1414 = memref.load %arg6[%1413] : memref<450xf32, #tpu.memory_space<smem>>
    %1415 = vector.broadcast %1414 : f32 to vector<14x14xf32>
    %1416 = arith.mulf %1389, %1415 : vector<14x14xf32>
    %1417 = arith.addf %1387, %1416 : vector<14x14xf32>
    %c0_617 = arith.constant 0 : index
    %c1_618 = arith.constant 1 : index
    %c2_619 = arith.constant 2 : index
    %c2_620 = arith.constant 2 : index
    %1418 = vector.load %arg2[%c0_617, %c1_618, %c2_619, %c2_620] : memref<1x3x16x16xf32, #tpu.memory_space<vmem>>, vector<1x1x14x14xf32>
    %1419 = vector.shape_cast %1418 : vector<1x1x14x14xf32> to vector<14x14xf32>
    %c20_i32_621 = arith.constant 20 : i32
    %1420 = arith.addi %773, %c20_i32_621 : i32
    %c4_i32_622 = arith.constant 4 : i32
    %1421 = arith.addi %1420, %c4_i32_622 : i32
    %1422 = arith.index_cast %1421 : i32 to index
    %1423 = memref.load %arg6[%1422] : memref<450xf32, #tpu.memory_space<smem>>
    %1424 = vector.broadcast %1423 : f32 to vector<14x14xf32>
    %1425 = arith.mulf %1419, %1424 : vector<14x14xf32>
    %1426 = arith.addf %1396, %1425 : vector<14x14xf32>
    %c20_i32_623 = arith.constant 20 : i32
    %1427 = arith.addi %773, %c20_i32_623 : i32
    %c3_i32_624 = arith.constant 3 : i32
    %1428 = arith.addi %1427, %c3_i32_624 : i32
    %1429 = arith.index_cast %1428 : i32 to index
    %1430 = memref.load %arg6[%1429] : memref<450xf32, #tpu.memory_space<smem>>
    %1431 = vector.broadcast %1430 : f32 to vector<14x14xf32>
    %1432 = arith.mulf %1419, %1431 : vector<14x14xf32>
    %1433 = arith.addf %1403, %1432 : vector<14x14xf32>
    %c15_i32_625 = arith.constant 15 : i32
    %1434 = arith.addi %773, %c15_i32_625 : i32
    %c4_i32_626 = arith.constant 4 : i32
    %1435 = arith.addi %1434, %c4_i32_626 : i32
    %1436 = arith.index_cast %1435 : i32 to index
    %1437 = memref.load %arg6[%1436] : memref<450xf32, #tpu.memory_space<smem>>
    %1438 = vector.broadcast %1437 : f32 to vector<14x14xf32>
    %1439 = arith.mulf %1419, %1438 : vector<14x14xf32>
    %1440 = arith.addf %1410, %1439 : vector<14x14xf32>
    %c15_i32_627 = arith.constant 15 : i32
    %1441 = arith.addi %773, %c15_i32_627 : i32
    %c3_i32_628 = arith.constant 3 : i32
    %1442 = arith.addi %1441, %c3_i32_628 : i32
    %1443 = arith.index_cast %1442 : i32 to index
    %1444 = memref.load %arg6[%1443] : memref<450xf32, #tpu.memory_space<smem>>
    %1445 = vector.broadcast %1444 : f32 to vector<14x14xf32>
    %1446 = arith.mulf %1419, %1445 : vector<14x14xf32>
    %1447 = arith.addf %1417, %1446 : vector<14x14xf32>
    %c0_629 = arith.constant 0 : index
    %c1_630 = arith.constant 1 : index
    %c2_631 = arith.constant 2 : index
    %c2_632 = arith.constant 2 : index
    %1448 = vector.load %arg3[%c0_629, %c1_630, %c2_631, %c2_632] : memref<1x3x16x16xf32, #tpu.memory_space<vmem>>, vector<1x1x14x14xf32>
    %1449 = vector.shape_cast %1448 : vector<1x1x14x14xf32> to vector<14x14xf32>
    %c20_i32_633 = arith.constant 20 : i32
    %1450 = arith.addi %773, %c20_i32_633 : i32
    %c4_i32_634 = arith.constant 4 : i32
    %1451 = arith.addi %1450, %c4_i32_634 : i32
    %1452 = arith.index_cast %1451 : i32 to index
    %1453 = memref.load %arg6[%1452] : memref<450xf32, #tpu.memory_space<smem>>
    %1454 = vector.broadcast %1453 : f32 to vector<14x14xf32>
    %1455 = arith.mulf %1449, %1454 : vector<14x14xf32>
    %1456 = arith.addf %1433, %1455 : vector<14x14xf32>
    %c15_i32_635 = arith.constant 15 : i32
    %1457 = arith.addi %773, %c15_i32_635 : i32
    %c4_i32_636 = arith.constant 4 : i32
    %1458 = arith.addi %1457, %c4_i32_636 : i32
    %1459 = arith.index_cast %1458 : i32 to index
    %1460 = memref.load %arg6[%1459] : memref<450xf32, #tpu.memory_space<smem>>
    %1461 = vector.broadcast %1460 : f32 to vector<14x14xf32>
    %1462 = arith.mulf %1449, %1461 : vector<14x14xf32>
    %1463 = arith.addf %1447, %1462 : vector<14x14xf32>
    %c0_637 = arith.constant 0 : index
    %c1_638 = arith.constant 1 : index
    %c2_639 = arith.constant 2 : index
    %c0_640 = arith.constant 0 : index
    %1464 = vector.load %arg4[%c0_637, %c1_638, %c2_639, %c0_640] : memref<1x3x16x16xf32, #tpu.memory_space<vmem>>, vector<1x1x14x14xf32>
    %1465 = vector.shape_cast %1464 : vector<1x1x14x14xf32> to vector<14x14xf32>
    %c20_i32_641 = arith.constant 20 : i32
    %1466 = arith.addi %773, %c20_i32_641 : i32
    %c0_i32_642 = arith.constant 0 : i32
    %1467 = arith.addi %1466, %c0_i32_642 : i32
    %1468 = arith.index_cast %1467 : i32 to index
    %1469 = memref.load %arg6[%1468] : memref<450xf32, #tpu.memory_space<smem>>
    %1470 = vector.broadcast %1469 : f32 to vector<14x14xf32>
    %1471 = arith.mulf %1465, %1470 : vector<14x14xf32>
    %1472 = arith.addf %1440, %1471 : vector<14x14xf32>
    %c0_643 = arith.constant 0 : index
    %c1_644 = arith.constant 1 : index
    %c2_645 = arith.constant 2 : index
    %c0_646 = arith.constant 0 : index
    %1473 = vector.load %arg5[%c0_643, %c1_644, %c2_645, %c0_646] : memref<1x3x16x16xf32, #tpu.memory_space<vmem>>, vector<1x1x14x14xf32>
    %1474 = vector.shape_cast %1473 : vector<1x1x14x14xf32> to vector<14x14xf32>
    %c20_i32_647 = arith.constant 20 : i32
    %1475 = arith.addi %773, %c20_i32_647 : i32
    %c1_i32_648 = arith.constant 1 : i32
    %1476 = arith.addi %1475, %c1_i32_648 : i32
    %1477 = arith.index_cast %1476 : i32 to index
    %1478 = memref.load %arg6[%1477] : memref<450xf32, #tpu.memory_space<smem>>
    %1479 = vector.broadcast %1478 : f32 to vector<14x14xf32>
    %1480 = arith.mulf %1474, %1479 : vector<14x14xf32>
    %1481 = arith.addf %1472, %1480 : vector<14x14xf32>
    %c20_i32_649 = arith.constant 20 : i32
    %1482 = arith.addi %773, %c20_i32_649 : i32
    %c0_i32_650 = arith.constant 0 : i32
    %1483 = arith.addi %1482, %c0_i32_650 : i32
    %1484 = arith.index_cast %1483 : i32 to index
    %1485 = memref.load %arg6[%1484] : memref<450xf32, #tpu.memory_space<smem>>
    %1486 = vector.broadcast %1485 : f32 to vector<14x14xf32>
    %1487 = arith.mulf %1474, %1486 : vector<14x14xf32>
    %1488 = arith.addf %1463, %1487 : vector<14x14xf32>
    %c0_651 = arith.constant 0 : index
    %c1_652 = arith.constant 1 : index
    %c2_653 = arith.constant 2 : index
    %c1_654 = arith.constant 1 : index
    %1489 = vector.load %arg4[%c0_651, %c1_652, %c2_653, %c1_654] : memref<1x3x16x16xf32, #tpu.memory_space<vmem>>, vector<1x1x14x14xf32>
    %1490 = vector.shape_cast %1489 : vector<1x1x14x14xf32> to vector<14x14xf32>
    %c20_i32_655 = arith.constant 20 : i32
    %1491 = arith.addi %773, %c20_i32_655 : i32
    %c2_i32_656 = arith.constant 2 : i32
    %1492 = arith.addi %1491, %c2_i32_656 : i32
    %1493 = arith.index_cast %1492 : i32 to index
    %1494 = memref.load %arg6[%1493] : memref<450xf32, #tpu.memory_space<smem>>
    %1495 = vector.broadcast %1494 : f32 to vector<14x14xf32>
    %1496 = arith.mulf %1490, %1495 : vector<14x14xf32>
    %1497 = arith.addf %1481, %1496 : vector<14x14xf32>
    %c20_i32_657 = arith.constant 20 : i32
    %1498 = arith.addi %773, %c20_i32_657 : i32
    %c1_i32_658 = arith.constant 1 : i32
    %1499 = arith.addi %1498, %c1_i32_658 : i32
    %1500 = arith.index_cast %1499 : i32 to index
    %1501 = memref.load %arg6[%1500] : memref<450xf32, #tpu.memory_space<smem>>
    %1502 = vector.broadcast %1501 : f32 to vector<14x14xf32>
    %1503 = arith.mulf %1490, %1502 : vector<14x14xf32>
    %1504 = arith.addf %1488, %1503 : vector<14x14xf32>
    %c0_659 = arith.constant 0 : index
    %c1_660 = arith.constant 1 : index
    %c2_661 = arith.constant 2 : index
    %c1_662 = arith.constant 1 : index
    %1505 = vector.load %arg5[%c0_659, %c1_660, %c2_661, %c1_662] : memref<1x3x16x16xf32, #tpu.memory_space<vmem>>, vector<1x1x14x14xf32>
    %1506 = vector.shape_cast %1505 : vector<1x1x14x14xf32> to vector<14x14xf32>
    %c20_i32_663 = arith.constant 20 : i32
    %1507 = arith.addi %773, %c20_i32_663 : i32
    %c3_i32_664 = arith.constant 3 : i32
    %1508 = arith.addi %1507, %c3_i32_664 : i32
    %1509 = arith.index_cast %1508 : i32 to index
    %1510 = memref.load %arg6[%1509] : memref<450xf32, #tpu.memory_space<smem>>
    %1511 = vector.broadcast %1510 : f32 to vector<14x14xf32>
    %1512 = arith.mulf %1506, %1511 : vector<14x14xf32>
    %1513 = arith.addf %1497, %1512 : vector<14x14xf32>
    %c20_i32_665 = arith.constant 20 : i32
    %1514 = arith.addi %773, %c20_i32_665 : i32
    %c2_i32_666 = arith.constant 2 : i32
    %1515 = arith.addi %1514, %c2_i32_666 : i32
    %1516 = arith.index_cast %1515 : i32 to index
    %1517 = memref.load %arg6[%1516] : memref<450xf32, #tpu.memory_space<smem>>
    %1518 = vector.broadcast %1517 : f32 to vector<14x14xf32>
    %1519 = arith.mulf %1506, %1518 : vector<14x14xf32>
    %1520 = arith.addf %1504, %1519 : vector<14x14xf32>
    %c0_667 = arith.constant 0 : index
    %c1_668 = arith.constant 1 : index
    %c2_669 = arith.constant 2 : index
    %c2_670 = arith.constant 2 : index
    %1521 = vector.load %arg4[%c0_667, %c1_668, %c2_669, %c2_670] : memref<1x3x16x16xf32, #tpu.memory_space<vmem>>, vector<1x1x14x14xf32>
    %1522 = vector.shape_cast %1521 : vector<1x1x14x14xf32> to vector<14x14xf32>
    %c20_i32_671 = arith.constant 20 : i32
    %1523 = arith.addi %773, %c20_i32_671 : i32
    %c4_i32_672 = arith.constant 4 : i32
    %1524 = arith.addi %1523, %c4_i32_672 : i32
    %1525 = arith.index_cast %1524 : i32 to index
    %1526 = memref.load %arg6[%1525] : memref<450xf32, #tpu.memory_space<smem>>
    %1527 = vector.broadcast %1526 : f32 to vector<14x14xf32>
    %1528 = arith.mulf %1522, %1527 : vector<14x14xf32>
    %1529 = arith.addf %1513, %1528 : vector<14x14xf32>
    %c20_i32_673 = arith.constant 20 : i32
    %1530 = arith.addi %773, %c20_i32_673 : i32
    %c3_i32_674 = arith.constant 3 : i32
    %1531 = arith.addi %1530, %c3_i32_674 : i32
    %1532 = arith.index_cast %1531 : i32 to index
    %1533 = memref.load %arg6[%1532] : memref<450xf32, #tpu.memory_space<smem>>
    %1534 = vector.broadcast %1533 : f32 to vector<14x14xf32>
    %1535 = arith.mulf %1522, %1534 : vector<14x14xf32>
    %1536 = arith.addf %1520, %1535 : vector<14x14xf32>
    %c0_675 = arith.constant 0 : index
    %c1_676 = arith.constant 1 : index
    %c2_677 = arith.constant 2 : index
    %c2_678 = arith.constant 2 : index
    %1537 = vector.load %arg5[%c0_675, %c1_676, %c2_677, %c2_678] : memref<1x3x16x16xf32, #tpu.memory_space<vmem>>, vector<1x1x14x14xf32>
    %1538 = vector.shape_cast %1537 : vector<1x1x14x14xf32> to vector<14x14xf32>
    %c20_i32_679 = arith.constant 20 : i32
    %1539 = arith.addi %773, %c20_i32_679 : i32
    %c4_i32_680 = arith.constant 4 : i32
    %1540 = arith.addi %1539, %c4_i32_680 : i32
    %1541 = arith.index_cast %1540 : i32 to index
    %1542 = memref.load %arg6[%1541] : memref<450xf32, #tpu.memory_space<smem>>
    %1543 = vector.broadcast %1542 : f32 to vector<14x14xf32>
    %1544 = arith.mulf %1538, %1543 : vector<14x14xf32>
    %1545 = arith.addf %1536, %1544 : vector<14x14xf32>
    %c3_i32_681 = arith.constant 3 : i32
    %1546 = arith.muli %arg1, %c3_i32_681 : i32
    %c2_i32_682 = arith.constant 2 : i32
    %1547 = arith.addi %1546, %c2_i32_682 : i32
    %c25_i32_683 = arith.constant 25 : i32
    %1548 = arith.muli %1547, %c25_i32_683 : i32
    %c0_684 = arith.constant 0 : index
    %c2_685 = arith.constant 2 : index
    %c0_686 = arith.constant 0 : index
    %c0_687 = arith.constant 0 : index
    %1549 = vector.load %arg2[%c0_684, %c2_685, %c0_686, %c0_687] : memref<1x3x16x16xf32, #tpu.memory_space<vmem>>, vector<1x1x14x14xf32>
    %1550 = vector.shape_cast %1549 : vector<1x1x14x14xf32> to vector<14x14xf32>
    %c0_i32_688 = arith.constant 0 : i32
    %1551 = arith.addi %1548, %c0_i32_688 : i32
    %c0_i32_689 = arith.constant 0 : i32
    %1552 = arith.addi %1551, %c0_i32_689 : i32
    %1553 = arith.index_cast %1552 : i32 to index
    %1554 = memref.load %arg6[%1553] : memref<450xf32, #tpu.memory_space<smem>>
    %1555 = vector.broadcast %1554 : f32 to vector<14x14xf32>
    %1556 = arith.mulf %1550, %1555 : vector<14x14xf32>
    %1557 = arith.addf %1426, %1556 : vector<14x14xf32>
    %c0_690 = arith.constant 0 : index
    %c2_691 = arith.constant 2 : index
    %c0_692 = arith.constant 0 : index
    %c0_693 = arith.constant 0 : index
    %1558 = vector.load %arg3[%c0_690, %c2_691, %c0_692, %c0_693] : memref<1x3x16x16xf32, #tpu.memory_space<vmem>>, vector<1x1x14x14xf32>
    %1559 = vector.shape_cast %1558 : vector<1x1x14x14xf32> to vector<14x14xf32>
    %c0_i32_694 = arith.constant 0 : i32
    %1560 = arith.addi %1548, %c0_i32_694 : i32
    %c1_i32_695 = arith.constant 1 : i32
    %1561 = arith.addi %1560, %c1_i32_695 : i32
    %1562 = arith.index_cast %1561 : i32 to index
    %1563 = memref.load %arg6[%1562] : memref<450xf32, #tpu.memory_space<smem>>
    %1564 = vector.broadcast %1563 : f32 to vector<14x14xf32>
    %1565 = arith.mulf %1559, %1564 : vector<14x14xf32>
    %1566 = arith.addf %1557, %1565 : vector<14x14xf32>
    %c0_i32_696 = arith.constant 0 : i32
    %1567 = arith.addi %1548, %c0_i32_696 : i32
    %c0_i32_697 = arith.constant 0 : i32
    %1568 = arith.addi %1567, %c0_i32_697 : i32
    %1569 = arith.index_cast %1568 : i32 to index
    %1570 = memref.load %arg6[%1569] : memref<450xf32, #tpu.memory_space<smem>>
    %1571 = vector.broadcast %1570 : f32 to vector<14x14xf32>
    %1572 = arith.mulf %1559, %1571 : vector<14x14xf32>
    %1573 = arith.addf %1456, %1572 : vector<14x14xf32>
    %c0_698 = arith.constant 0 : index
    %c2_699 = arith.constant 2 : index
    %c0_700 = arith.constant 0 : index
    %c1_701 = arith.constant 1 : index
    %1574 = vector.load %arg2[%c0_698, %c2_699, %c0_700, %c1_701] : memref<1x3x16x16xf32, #tpu.memory_space<vmem>>, vector<1x1x14x14xf32>
    %1575 = vector.shape_cast %1574 : vector<1x1x14x14xf32> to vector<14x14xf32>
    %c0_i32_702 = arith.constant 0 : i32
    %1576 = arith.addi %1548, %c0_i32_702 : i32
    %c2_i32_703 = arith.constant 2 : i32
    %1577 = arith.addi %1576, %c2_i32_703 : i32
    %1578 = arith.index_cast %1577 : i32 to index
    %1579 = memref.load %arg6[%1578] : memref<450xf32, #tpu.memory_space<smem>>
    %1580 = vector.broadcast %1579 : f32 to vector<14x14xf32>
    %1581 = arith.mulf %1575, %1580 : vector<14x14xf32>
    %1582 = arith.addf %1566, %1581 : vector<14x14xf32>
    %c0_i32_704 = arith.constant 0 : i32
    %1583 = arith.addi %1548, %c0_i32_704 : i32
    %c1_i32_705 = arith.constant 1 : i32
    %1584 = arith.addi %1583, %c1_i32_705 : i32
    %1585 = arith.index_cast %1584 : i32 to index
    %1586 = memref.load %arg6[%1585] : memref<450xf32, #tpu.memory_space<smem>>
    %1587 = vector.broadcast %1586 : f32 to vector<14x14xf32>
    %1588 = arith.mulf %1575, %1587 : vector<14x14xf32>
    %1589 = arith.addf %1573, %1588 : vector<14x14xf32>
    %c0_706 = arith.constant 0 : index
    %c2_707 = arith.constant 2 : index
    %c0_708 = arith.constant 0 : index
    %c1_709 = arith.constant 1 : index
    %1590 = vector.load %arg3[%c0_706, %c2_707, %c0_708, %c1_709] : memref<1x3x16x16xf32, #tpu.memory_space<vmem>>, vector<1x1x14x14xf32>
    %1591 = vector.shape_cast %1590 : vector<1x1x14x14xf32> to vector<14x14xf32>
    %c0_i32_710 = arith.constant 0 : i32
    %1592 = arith.addi %1548, %c0_i32_710 : i32
    %c3_i32_711 = arith.constant 3 : i32
    %1593 = arith.addi %1592, %c3_i32_711 : i32
    %1594 = arith.index_cast %1593 : i32 to index
    %1595 = memref.load %arg6[%1594] : memref<450xf32, #tpu.memory_space<smem>>
    %1596 = vector.broadcast %1595 : f32 to vector<14x14xf32>
    %1597 = arith.mulf %1591, %1596 : vector<14x14xf32>
    %1598 = arith.addf %1582, %1597 : vector<14x14xf32>
    %c0_i32_712 = arith.constant 0 : i32
    %1599 = arith.addi %1548, %c0_i32_712 : i32
    %c2_i32_713 = arith.constant 2 : i32
    %1600 = arith.addi %1599, %c2_i32_713 : i32
    %1601 = arith.index_cast %1600 : i32 to index
    %1602 = memref.load %arg6[%1601] : memref<450xf32, #tpu.memory_space<smem>>
    %1603 = vector.broadcast %1602 : f32 to vector<14x14xf32>
    %1604 = arith.mulf %1591, %1603 : vector<14x14xf32>
    %1605 = arith.addf %1589, %1604 : vector<14x14xf32>
    %c0_714 = arith.constant 0 : index
    %c2_715 = arith.constant 2 : index
    %c0_716 = arith.constant 0 : index
    %c2_717 = arith.constant 2 : index
    %1606 = vector.load %arg2[%c0_714, %c2_715, %c0_716, %c2_717] : memref<1x3x16x16xf32, #tpu.memory_space<vmem>>, vector<1x1x14x14xf32>
    %1607 = vector.shape_cast %1606 : vector<1x1x14x14xf32> to vector<14x14xf32>
    %c0_i32_718 = arith.constant 0 : i32
    %1608 = arith.addi %1548, %c0_i32_718 : i32
    %c4_i32_719 = arith.constant 4 : i32
    %1609 = arith.addi %1608, %c4_i32_719 : i32
    %1610 = arith.index_cast %1609 : i32 to index
    %1611 = memref.load %arg6[%1610] : memref<450xf32, #tpu.memory_space<smem>>
    %1612 = vector.broadcast %1611 : f32 to vector<14x14xf32>
    %1613 = arith.mulf %1607, %1612 : vector<14x14xf32>
    %1614 = arith.addf %1598, %1613 : vector<14x14xf32>
    %c0_i32_720 = arith.constant 0 : i32
    %1615 = arith.addi %1548, %c0_i32_720 : i32
    %c3_i32_721 = arith.constant 3 : i32
    %1616 = arith.addi %1615, %c3_i32_721 : i32
    %1617 = arith.index_cast %1616 : i32 to index
    %1618 = memref.load %arg6[%1617] : memref<450xf32, #tpu.memory_space<smem>>
    %1619 = vector.broadcast %1618 : f32 to vector<14x14xf32>
    %1620 = arith.mulf %1607, %1619 : vector<14x14xf32>
    %1621 = arith.addf %1605, %1620 : vector<14x14xf32>
    %c0_722 = arith.constant 0 : index
    %c2_723 = arith.constant 2 : index
    %c0_724 = arith.constant 0 : index
    %c2_725 = arith.constant 2 : index
    %1622 = vector.load %arg3[%c0_722, %c2_723, %c0_724, %c2_725] : memref<1x3x16x16xf32, #tpu.memory_space<vmem>>, vector<1x1x14x14xf32>
    %1623 = vector.shape_cast %1622 : vector<1x1x14x14xf32> to vector<14x14xf32>
    %c0_i32_726 = arith.constant 0 : i32
    %1624 = arith.addi %1548, %c0_i32_726 : i32
    %c4_i32_727 = arith.constant 4 : i32
    %1625 = arith.addi %1624, %c4_i32_727 : i32
    %1626 = arith.index_cast %1625 : i32 to index
    %1627 = memref.load %arg6[%1626] : memref<450xf32, #tpu.memory_space<smem>>
    %1628 = vector.broadcast %1627 : f32 to vector<14x14xf32>
    %1629 = arith.mulf %1623, %1628 : vector<14x14xf32>
    %1630 = arith.addf %1621, %1629 : vector<14x14xf32>
    %c0_728 = arith.constant 0 : index
    %c2_729 = arith.constant 2 : index
    %c0_730 = arith.constant 0 : index
    %c0_731 = arith.constant 0 : index
    %1631 = vector.load %arg4[%c0_728, %c2_729, %c0_730, %c0_731] : memref<1x3x16x16xf32, #tpu.memory_space<vmem>>, vector<1x1x14x14xf32>
    %1632 = vector.shape_cast %1631 : vector<1x1x14x14xf32> to vector<14x14xf32>
    %c5_i32_732 = arith.constant 5 : i32
    %1633 = arith.addi %1548, %c5_i32_732 : i32
    %c0_i32_733 = arith.constant 0 : i32
    %1634 = arith.addi %1633, %c0_i32_733 : i32
    %1635 = arith.index_cast %1634 : i32 to index
    %1636 = memref.load %arg6[%1635] : memref<450xf32, #tpu.memory_space<smem>>
    %1637 = vector.broadcast %1636 : f32 to vector<14x14xf32>
    %1638 = arith.mulf %1632, %1637 : vector<14x14xf32>
    %1639 = arith.addf %1614, %1638 : vector<14x14xf32>
    %c0_i32_734 = arith.constant 0 : i32
    %1640 = arith.addi %1548, %c0_i32_734 : i32
    %c0_i32_735 = arith.constant 0 : i32
    %1641 = arith.addi %1640, %c0_i32_735 : i32
    %1642 = arith.index_cast %1641 : i32 to index
    %1643 = memref.load %arg6[%1642] : memref<450xf32, #tpu.memory_space<smem>>
    %1644 = vector.broadcast %1643 : f32 to vector<14x14xf32>
    %1645 = arith.mulf %1632, %1644 : vector<14x14xf32>
    %1646 = arith.addf %1529, %1645 : vector<14x14xf32>
    %c0_736 = arith.constant 0 : index
    %c2_737 = arith.constant 2 : index
    %c0_738 = arith.constant 0 : index
    %c0_739 = arith.constant 0 : index
    %1647 = vector.load %arg5[%c0_736, %c2_737, %c0_738, %c0_739] : memref<1x3x16x16xf32, #tpu.memory_space<vmem>>, vector<1x1x14x14xf32>
    %1648 = vector.shape_cast %1647 : vector<1x1x14x14xf32> to vector<14x14xf32>
    %c5_i32_740 = arith.constant 5 : i32
    %1649 = arith.addi %1548, %c5_i32_740 : i32
    %c1_i32_741 = arith.constant 1 : i32
    %1650 = arith.addi %1649, %c1_i32_741 : i32
    %1651 = arith.index_cast %1650 : i32 to index
    %1652 = memref.load %arg6[%1651] : memref<450xf32, #tpu.memory_space<smem>>
    %1653 = vector.broadcast %1652 : f32 to vector<14x14xf32>
    %1654 = arith.mulf %1648, %1653 : vector<14x14xf32>
    %1655 = arith.addf %1639, %1654 : vector<14x14xf32>
    %c5_i32_742 = arith.constant 5 : i32
    %1656 = arith.addi %1548, %c5_i32_742 : i32
    %c0_i32_743 = arith.constant 0 : i32
    %1657 = arith.addi %1656, %c0_i32_743 : i32
    %1658 = arith.index_cast %1657 : i32 to index
    %1659 = memref.load %arg6[%1658] : memref<450xf32, #tpu.memory_space<smem>>
    %1660 = vector.broadcast %1659 : f32 to vector<14x14xf32>
    %1661 = arith.mulf %1648, %1660 : vector<14x14xf32>
    %1662 = arith.addf %1630, %1661 : vector<14x14xf32>
    %c0_i32_744 = arith.constant 0 : i32
    %1663 = arith.addi %1548, %c0_i32_744 : i32
    %c1_i32_745 = arith.constant 1 : i32
    %1664 = arith.addi %1663, %c1_i32_745 : i32
    %1665 = arith.index_cast %1664 : i32 to index
    %1666 = memref.load %arg6[%1665] : memref<450xf32, #tpu.memory_space<smem>>
    %1667 = vector.broadcast %1666 : f32 to vector<14x14xf32>
    %1668 = arith.mulf %1648, %1667 : vector<14x14xf32>
    %1669 = arith.addf %1646, %1668 : vector<14x14xf32>
    %c0_i32_746 = arith.constant 0 : i32
    %1670 = arith.addi %1548, %c0_i32_746 : i32
    %c0_i32_747 = arith.constant 0 : i32
    %1671 = arith.addi %1670, %c0_i32_747 : i32
    %1672 = arith.index_cast %1671 : i32 to index
    %1673 = memref.load %arg6[%1672] : memref<450xf32, #tpu.memory_space<smem>>
    %1674 = vector.broadcast %1673 : f32 to vector<14x14xf32>
    %1675 = arith.mulf %1648, %1674 : vector<14x14xf32>
    %1676 = arith.addf %1545, %1675 : vector<14x14xf32>
    %c0_748 = arith.constant 0 : index
    %c2_749 = arith.constant 2 : index
    %c0_750 = arith.constant 0 : index
    %c1_751 = arith.constant 1 : index
    %1677 = vector.load %arg4[%c0_748, %c2_749, %c0_750, %c1_751] : memref<1x3x16x16xf32, #tpu.memory_space<vmem>>, vector<1x1x14x14xf32>
    %1678 = vector.shape_cast %1677 : vector<1x1x14x14xf32> to vector<14x14xf32>
    %c5_i32_752 = arith.constant 5 : i32
    %1679 = arith.addi %1548, %c5_i32_752 : i32
    %c2_i32_753 = arith.constant 2 : i32
    %1680 = arith.addi %1679, %c2_i32_753 : i32
    %1681 = arith.index_cast %1680 : i32 to index
    %1682 = memref.load %arg6[%1681] : memref<450xf32, #tpu.memory_space<smem>>
    %1683 = vector.broadcast %1682 : f32 to vector<14x14xf32>
    %1684 = arith.mulf %1678, %1683 : vector<14x14xf32>
    %1685 = arith.addf %1655, %1684 : vector<14x14xf32>
    %c5_i32_754 = arith.constant 5 : i32
    %1686 = arith.addi %1548, %c5_i32_754 : i32
    %c1_i32_755 = arith.constant 1 : i32
    %1687 = arith.addi %1686, %c1_i32_755 : i32
    %1688 = arith.index_cast %1687 : i32 to index
    %1689 = memref.load %arg6[%1688] : memref<450xf32, #tpu.memory_space<smem>>
    %1690 = vector.broadcast %1689 : f32 to vector<14x14xf32>
    %1691 = arith.mulf %1678, %1690 : vector<14x14xf32>
    %1692 = arith.addf %1662, %1691 : vector<14x14xf32>
    %c0_i32_756 = arith.constant 0 : i32
    %1693 = arith.addi %1548, %c0_i32_756 : i32
    %c2_i32_757 = arith.constant 2 : i32
    %1694 = arith.addi %1693, %c2_i32_757 : i32
    %1695 = arith.index_cast %1694 : i32 to index
    %1696 = memref.load %arg6[%1695] : memref<450xf32, #tpu.memory_space<smem>>
    %1697 = vector.broadcast %1696 : f32 to vector<14x14xf32>
    %1698 = arith.mulf %1678, %1697 : vector<14x14xf32>
    %1699 = arith.addf %1669, %1698 : vector<14x14xf32>
    %c0_i32_758 = arith.constant 0 : i32
    %1700 = arith.addi %1548, %c0_i32_758 : i32
    %c1_i32_759 = arith.constant 1 : i32
    %1701 = arith.addi %1700, %c1_i32_759 : i32
    %1702 = arith.index_cast %1701 : i32 to index
    %1703 = memref.load %arg6[%1702] : memref<450xf32, #tpu.memory_space<smem>>
    %1704 = vector.broadcast %1703 : f32 to vector<14x14xf32>
    %1705 = arith.mulf %1678, %1704 : vector<14x14xf32>
    %1706 = arith.addf %1676, %1705 : vector<14x14xf32>
    %c0_760 = arith.constant 0 : index
    %c2_761 = arith.constant 2 : index
    %c0_762 = arith.constant 0 : index
    %c1_763 = arith.constant 1 : index
    %1707 = vector.load %arg5[%c0_760, %c2_761, %c0_762, %c1_763] : memref<1x3x16x16xf32, #tpu.memory_space<vmem>>, vector<1x1x14x14xf32>
    %1708 = vector.shape_cast %1707 : vector<1x1x14x14xf32> to vector<14x14xf32>
    %c5_i32_764 = arith.constant 5 : i32
    %1709 = arith.addi %1548, %c5_i32_764 : i32
    %c3_i32_765 = arith.constant 3 : i32
    %1710 = arith.addi %1709, %c3_i32_765 : i32
    %1711 = arith.index_cast %1710 : i32 to index
    %1712 = memref.load %arg6[%1711] : memref<450xf32, #tpu.memory_space<smem>>
    %1713 = vector.broadcast %1712 : f32 to vector<14x14xf32>
    %1714 = arith.mulf %1708, %1713 : vector<14x14xf32>
    %1715 = arith.addf %1685, %1714 : vector<14x14xf32>
    %c5_i32_766 = arith.constant 5 : i32
    %1716 = arith.addi %1548, %c5_i32_766 : i32
    %c2_i32_767 = arith.constant 2 : i32
    %1717 = arith.addi %1716, %c2_i32_767 : i32
    %1718 = arith.index_cast %1717 : i32 to index
    %1719 = memref.load %arg6[%1718] : memref<450xf32, #tpu.memory_space<smem>>
    %1720 = vector.broadcast %1719 : f32 to vector<14x14xf32>
    %1721 = arith.mulf %1708, %1720 : vector<14x14xf32>
    %1722 = arith.addf %1692, %1721 : vector<14x14xf32>
    %c0_i32_768 = arith.constant 0 : i32
    %1723 = arith.addi %1548, %c0_i32_768 : i32
    %c3_i32_769 = arith.constant 3 : i32
    %1724 = arith.addi %1723, %c3_i32_769 : i32
    %1725 = arith.index_cast %1724 : i32 to index
    %1726 = memref.load %arg6[%1725] : memref<450xf32, #tpu.memory_space<smem>>
    %1727 = vector.broadcast %1726 : f32 to vector<14x14xf32>
    %1728 = arith.mulf %1708, %1727 : vector<14x14xf32>
    %1729 = arith.addf %1699, %1728 : vector<14x14xf32>
    %c0_i32_770 = arith.constant 0 : i32
    %1730 = arith.addi %1548, %c0_i32_770 : i32
    %c2_i32_771 = arith.constant 2 : i32
    %1731 = arith.addi %1730, %c2_i32_771 : i32
    %1732 = arith.index_cast %1731 : i32 to index
    %1733 = memref.load %arg6[%1732] : memref<450xf32, #tpu.memory_space<smem>>
    %1734 = vector.broadcast %1733 : f32 to vector<14x14xf32>
    %1735 = arith.mulf %1708, %1734 : vector<14x14xf32>
    %1736 = arith.addf %1706, %1735 : vector<14x14xf32>
    %c0_772 = arith.constant 0 : index
    %c2_773 = arith.constant 2 : index
    %c0_774 = arith.constant 0 : index
    %c2_775 = arith.constant 2 : index
    %1737 = vector.load %arg4[%c0_772, %c2_773, %c0_774, %c2_775] : memref<1x3x16x16xf32, #tpu.memory_space<vmem>>, vector<1x1x14x14xf32>
    %1738 = vector.shape_cast %1737 : vector<1x1x14x14xf32> to vector<14x14xf32>
    %c5_i32_776 = arith.constant 5 : i32
    %1739 = arith.addi %1548, %c5_i32_776 : i32
    %c4_i32_777 = arith.constant 4 : i32
    %1740 = arith.addi %1739, %c4_i32_777 : i32
    %1741 = arith.index_cast %1740 : i32 to index
    %1742 = memref.load %arg6[%1741] : memref<450xf32, #tpu.memory_space<smem>>
    %1743 = vector.broadcast %1742 : f32 to vector<14x14xf32>
    %1744 = arith.mulf %1738, %1743 : vector<14x14xf32>
    %1745 = arith.addf %1715, %1744 : vector<14x14xf32>
    %c5_i32_778 = arith.constant 5 : i32
    %1746 = arith.addi %1548, %c5_i32_778 : i32
    %c3_i32_779 = arith.constant 3 : i32
    %1747 = arith.addi %1746, %c3_i32_779 : i32
    %1748 = arith.index_cast %1747 : i32 to index
    %1749 = memref.load %arg6[%1748] : memref<450xf32, #tpu.memory_space<smem>>
    %1750 = vector.broadcast %1749 : f32 to vector<14x14xf32>
    %1751 = arith.mulf %1738, %1750 : vector<14x14xf32>
    %1752 = arith.addf %1722, %1751 : vector<14x14xf32>
    %c0_i32_780 = arith.constant 0 : i32
    %1753 = arith.addi %1548, %c0_i32_780 : i32
    %c4_i32_781 = arith.constant 4 : i32
    %1754 = arith.addi %1753, %c4_i32_781 : i32
    %1755 = arith.index_cast %1754 : i32 to index
    %1756 = memref.load %arg6[%1755] : memref<450xf32, #tpu.memory_space<smem>>
    %1757 = vector.broadcast %1756 : f32 to vector<14x14xf32>
    %1758 = arith.mulf %1738, %1757 : vector<14x14xf32>
    %1759 = arith.addf %1729, %1758 : vector<14x14xf32>
    %c0_i32_782 = arith.constant 0 : i32
    %1760 = arith.addi %1548, %c0_i32_782 : i32
    %c3_i32_783 = arith.constant 3 : i32
    %1761 = arith.addi %1760, %c3_i32_783 : i32
    %1762 = arith.index_cast %1761 : i32 to index
    %1763 = memref.load %arg6[%1762] : memref<450xf32, #tpu.memory_space<smem>>
    %1764 = vector.broadcast %1763 : f32 to vector<14x14xf32>
    %1765 = arith.mulf %1738, %1764 : vector<14x14xf32>
    %1766 = arith.addf %1736, %1765 : vector<14x14xf32>
    %c0_784 = arith.constant 0 : index
    %c2_785 = arith.constant 2 : index
    %c0_786 = arith.constant 0 : index
    %c2_787 = arith.constant 2 : index
    %1767 = vector.load %arg5[%c0_784, %c2_785, %c0_786, %c2_787] : memref<1x3x16x16xf32, #tpu.memory_space<vmem>>, vector<1x1x14x14xf32>
    %1768 = vector.shape_cast %1767 : vector<1x1x14x14xf32> to vector<14x14xf32>
    %c5_i32_788 = arith.constant 5 : i32
    %1769 = arith.addi %1548, %c5_i32_788 : i32
    %c4_i32_789 = arith.constant 4 : i32
    %1770 = arith.addi %1769, %c4_i32_789 : i32
    %1771 = arith.index_cast %1770 : i32 to index
    %1772 = memref.load %arg6[%1771] : memref<450xf32, #tpu.memory_space<smem>>
    %1773 = vector.broadcast %1772 : f32 to vector<14x14xf32>
    %1774 = arith.mulf %1768, %1773 : vector<14x14xf32>
    %1775 = arith.addf %1752, %1774 : vector<14x14xf32>
    %c0_i32_790 = arith.constant 0 : i32
    %1776 = arith.addi %1548, %c0_i32_790 : i32
    %c4_i32_791 = arith.constant 4 : i32
    %1777 = arith.addi %1776, %c4_i32_791 : i32
    %1778 = arith.index_cast %1777 : i32 to index
    %1779 = memref.load %arg6[%1778] : memref<450xf32, #tpu.memory_space<smem>>
    %1780 = vector.broadcast %1779 : f32 to vector<14x14xf32>
    %1781 = arith.mulf %1768, %1780 : vector<14x14xf32>
    %1782 = arith.addf %1766, %1781 : vector<14x14xf32>
    %c0_792 = arith.constant 0 : index
    %c2_793 = arith.constant 2 : index
    %c1_794 = arith.constant 1 : index
    %c0_795 = arith.constant 0 : index
    %1783 = vector.load %arg2[%c0_792, %c2_793, %c1_794, %c0_795] : memref<1x3x16x16xf32, #tpu.memory_space<vmem>>, vector<1x1x14x14xf32>
    %1784 = vector.shape_cast %1783 : vector<1x1x14x14xf32> to vector<14x14xf32>
    %c10_i32_796 = arith.constant 10 : i32
    %1785 = arith.addi %1548, %c10_i32_796 : i32
    %c0_i32_797 = arith.constant 0 : i32
    %1786 = arith.addi %1785, %c0_i32_797 : i32
    %1787 = arith.index_cast %1786 : i32 to index
    %1788 = memref.load %arg6[%1787] : memref<450xf32, #tpu.memory_space<smem>>
    %1789 = vector.broadcast %1788 : f32 to vector<14x14xf32>
    %1790 = arith.mulf %1784, %1789 : vector<14x14xf32>
    %1791 = arith.addf %1745, %1790 : vector<14x14xf32>
    %c5_i32_798 = arith.constant 5 : i32
    %1792 = arith.addi %1548, %c5_i32_798 : i32
    %c0_i32_799 = arith.constant 0 : i32
    %1793 = arith.addi %1792, %c0_i32_799 : i32
    %1794 = arith.index_cast %1793 : i32 to index
    %1795 = memref.load %arg6[%1794] : memref<450xf32, #tpu.memory_space<smem>>
    %1796 = vector.broadcast %1795 : f32 to vector<14x14xf32>
    %1797 = arith.mulf %1784, %1796 : vector<14x14xf32>
    %1798 = arith.addf %1759, %1797 : vector<14x14xf32>
    %c0_800 = arith.constant 0 : index
    %c2_801 = arith.constant 2 : index
    %c1_802 = arith.constant 1 : index
    %c0_803 = arith.constant 0 : index
    %1799 = vector.load %arg3[%c0_800, %c2_801, %c1_802, %c0_803] : memref<1x3x16x16xf32, #tpu.memory_space<vmem>>, vector<1x1x14x14xf32>
    %1800 = vector.shape_cast %1799 : vector<1x1x14x14xf32> to vector<14x14xf32>
    %c10_i32_804 = arith.constant 10 : i32
    %1801 = arith.addi %1548, %c10_i32_804 : i32
    %c1_i32_805 = arith.constant 1 : i32
    %1802 = arith.addi %1801, %c1_i32_805 : i32
    %1803 = arith.index_cast %1802 : i32 to index
    %1804 = memref.load %arg6[%1803] : memref<450xf32, #tpu.memory_space<smem>>
    %1805 = vector.broadcast %1804 : f32 to vector<14x14xf32>
    %1806 = arith.mulf %1800, %1805 : vector<14x14xf32>
    %1807 = arith.addf %1791, %1806 : vector<14x14xf32>
    %c10_i32_806 = arith.constant 10 : i32
    %1808 = arith.addi %1548, %c10_i32_806 : i32
    %c0_i32_807 = arith.constant 0 : i32
    %1809 = arith.addi %1808, %c0_i32_807 : i32
    %1810 = arith.index_cast %1809 : i32 to index
    %1811 = memref.load %arg6[%1810] : memref<450xf32, #tpu.memory_space<smem>>
    %1812 = vector.broadcast %1811 : f32 to vector<14x14xf32>
    %1813 = arith.mulf %1800, %1812 : vector<14x14xf32>
    %1814 = arith.addf %1775, %1813 : vector<14x14xf32>
    %c5_i32_808 = arith.constant 5 : i32
    %1815 = arith.addi %1548, %c5_i32_808 : i32
    %c1_i32_809 = arith.constant 1 : i32
    %1816 = arith.addi %1815, %c1_i32_809 : i32
    %1817 = arith.index_cast %1816 : i32 to index
    %1818 = memref.load %arg6[%1817] : memref<450xf32, #tpu.memory_space<smem>>
    %1819 = vector.broadcast %1818 : f32 to vector<14x14xf32>
    %1820 = arith.mulf %1800, %1819 : vector<14x14xf32>
    %1821 = arith.addf %1798, %1820 : vector<14x14xf32>
    %c5_i32_810 = arith.constant 5 : i32
    %1822 = arith.addi %1548, %c5_i32_810 : i32
    %c0_i32_811 = arith.constant 0 : i32
    %1823 = arith.addi %1822, %c0_i32_811 : i32
    %1824 = arith.index_cast %1823 : i32 to index
    %1825 = memref.load %arg6[%1824] : memref<450xf32, #tpu.memory_space<smem>>
    %1826 = vector.broadcast %1825 : f32 to vector<14x14xf32>
    %1827 = arith.mulf %1800, %1826 : vector<14x14xf32>
    %1828 = arith.addf %1782, %1827 : vector<14x14xf32>
    %c0_812 = arith.constant 0 : index
    %c2_813 = arith.constant 2 : index
    %c1_814 = arith.constant 1 : index
    %c1_815 = arith.constant 1 : index
    %1829 = vector.load %arg2[%c0_812, %c2_813, %c1_814, %c1_815] : memref<1x3x16x16xf32, #tpu.memory_space<vmem>>, vector<1x1x14x14xf32>
    %1830 = vector.shape_cast %1829 : vector<1x1x14x14xf32> to vector<14x14xf32>
    %c10_i32_816 = arith.constant 10 : i32
    %1831 = arith.addi %1548, %c10_i32_816 : i32
    %c2_i32_817 = arith.constant 2 : i32
    %1832 = arith.addi %1831, %c2_i32_817 : i32
    %1833 = arith.index_cast %1832 : i32 to index
    %1834 = memref.load %arg6[%1833] : memref<450xf32, #tpu.memory_space<smem>>
    %1835 = vector.broadcast %1834 : f32 to vector<14x14xf32>
    %1836 = arith.mulf %1830, %1835 : vector<14x14xf32>
    %1837 = arith.addf %1807, %1836 : vector<14x14xf32>
    %c10_i32_818 = arith.constant 10 : i32
    %1838 = arith.addi %1548, %c10_i32_818 : i32
    %c1_i32_819 = arith.constant 1 : i32
    %1839 = arith.addi %1838, %c1_i32_819 : i32
    %1840 = arith.index_cast %1839 : i32 to index
    %1841 = memref.load %arg6[%1840] : memref<450xf32, #tpu.memory_space<smem>>
    %1842 = vector.broadcast %1841 : f32 to vector<14x14xf32>
    %1843 = arith.mulf %1830, %1842 : vector<14x14xf32>
    %1844 = arith.addf %1814, %1843 : vector<14x14xf32>
    %c5_i32_820 = arith.constant 5 : i32
    %1845 = arith.addi %1548, %c5_i32_820 : i32
    %c2_i32_821 = arith.constant 2 : i32
    %1846 = arith.addi %1845, %c2_i32_821 : i32
    %1847 = arith.index_cast %1846 : i32 to index
    %1848 = memref.load %arg6[%1847] : memref<450xf32, #tpu.memory_space<smem>>
    %1849 = vector.broadcast %1848 : f32 to vector<14x14xf32>
    %1850 = arith.mulf %1830, %1849 : vector<14x14xf32>
    %1851 = arith.addf %1821, %1850 : vector<14x14xf32>
    %c5_i32_822 = arith.constant 5 : i32
    %1852 = arith.addi %1548, %c5_i32_822 : i32
    %c1_i32_823 = arith.constant 1 : i32
    %1853 = arith.addi %1852, %c1_i32_823 : i32
    %1854 = arith.index_cast %1853 : i32 to index
    %1855 = memref.load %arg6[%1854] : memref<450xf32, #tpu.memory_space<smem>>
    %1856 = vector.broadcast %1855 : f32 to vector<14x14xf32>
    %1857 = arith.mulf %1830, %1856 : vector<14x14xf32>
    %1858 = arith.addf %1828, %1857 : vector<14x14xf32>
    %c0_824 = arith.constant 0 : index
    %c2_825 = arith.constant 2 : index
    %c1_826 = arith.constant 1 : index
    %c1_827 = arith.constant 1 : index
    %1859 = vector.load %arg3[%c0_824, %c2_825, %c1_826, %c1_827] : memref<1x3x16x16xf32, #tpu.memory_space<vmem>>, vector<1x1x14x14xf32>
    %1860 = vector.shape_cast %1859 : vector<1x1x14x14xf32> to vector<14x14xf32>
    %c10_i32_828 = arith.constant 10 : i32
    %1861 = arith.addi %1548, %c10_i32_828 : i32
    %c3_i32_829 = arith.constant 3 : i32
    %1862 = arith.addi %1861, %c3_i32_829 : i32
    %1863 = arith.index_cast %1862 : i32 to index
    %1864 = memref.load %arg6[%1863] : memref<450xf32, #tpu.memory_space<smem>>
    %1865 = vector.broadcast %1864 : f32 to vector<14x14xf32>
    %1866 = arith.mulf %1860, %1865 : vector<14x14xf32>
    %1867 = arith.addf %1837, %1866 : vector<14x14xf32>
    %c10_i32_830 = arith.constant 10 : i32
    %1868 = arith.addi %1548, %c10_i32_830 : i32
    %c2_i32_831 = arith.constant 2 : i32
    %1869 = arith.addi %1868, %c2_i32_831 : i32
    %1870 = arith.index_cast %1869 : i32 to index
    %1871 = memref.load %arg6[%1870] : memref<450xf32, #tpu.memory_space<smem>>
    %1872 = vector.broadcast %1871 : f32 to vector<14x14xf32>
    %1873 = arith.mulf %1860, %1872 : vector<14x14xf32>
    %1874 = arith.addf %1844, %1873 : vector<14x14xf32>
    %c5_i32_832 = arith.constant 5 : i32
    %1875 = arith.addi %1548, %c5_i32_832 : i32
    %c3_i32_833 = arith.constant 3 : i32
    %1876 = arith.addi %1875, %c3_i32_833 : i32
    %1877 = arith.index_cast %1876 : i32 to index
    %1878 = memref.load %arg6[%1877] : memref<450xf32, #tpu.memory_space<smem>>
    %1879 = vector.broadcast %1878 : f32 to vector<14x14xf32>
    %1880 = arith.mulf %1860, %1879 : vector<14x14xf32>
    %1881 = arith.addf %1851, %1880 : vector<14x14xf32>
    %c5_i32_834 = arith.constant 5 : i32
    %1882 = arith.addi %1548, %c5_i32_834 : i32
    %c2_i32_835 = arith.constant 2 : i32
    %1883 = arith.addi %1882, %c2_i32_835 : i32
    %1884 = arith.index_cast %1883 : i32 to index
    %1885 = memref.load %arg6[%1884] : memref<450xf32, #tpu.memory_space<smem>>
    %1886 = vector.broadcast %1885 : f32 to vector<14x14xf32>
    %1887 = arith.mulf %1860, %1886 : vector<14x14xf32>
    %1888 = arith.addf %1858, %1887 : vector<14x14xf32>
    %c0_836 = arith.constant 0 : index
    %c2_837 = arith.constant 2 : index
    %c1_838 = arith.constant 1 : index
    %c2_839 = arith.constant 2 : index
    %1889 = vector.load %arg2[%c0_836, %c2_837, %c1_838, %c2_839] : memref<1x3x16x16xf32, #tpu.memory_space<vmem>>, vector<1x1x14x14xf32>
    %1890 = vector.shape_cast %1889 : vector<1x1x14x14xf32> to vector<14x14xf32>
    %c10_i32_840 = arith.constant 10 : i32
    %1891 = arith.addi %1548, %c10_i32_840 : i32
    %c4_i32_841 = arith.constant 4 : i32
    %1892 = arith.addi %1891, %c4_i32_841 : i32
    %1893 = arith.index_cast %1892 : i32 to index
    %1894 = memref.load %arg6[%1893] : memref<450xf32, #tpu.memory_space<smem>>
    %1895 = vector.broadcast %1894 : f32 to vector<14x14xf32>
    %1896 = arith.mulf %1890, %1895 : vector<14x14xf32>
    %1897 = arith.addf %1867, %1896 : vector<14x14xf32>
    %c10_i32_842 = arith.constant 10 : i32
    %1898 = arith.addi %1548, %c10_i32_842 : i32
    %c3_i32_843 = arith.constant 3 : i32
    %1899 = arith.addi %1898, %c3_i32_843 : i32
    %1900 = arith.index_cast %1899 : i32 to index
    %1901 = memref.load %arg6[%1900] : memref<450xf32, #tpu.memory_space<smem>>
    %1902 = vector.broadcast %1901 : f32 to vector<14x14xf32>
    %1903 = arith.mulf %1890, %1902 : vector<14x14xf32>
    %1904 = arith.addf %1874, %1903 : vector<14x14xf32>
    %c5_i32_844 = arith.constant 5 : i32
    %1905 = arith.addi %1548, %c5_i32_844 : i32
    %c4_i32_845 = arith.constant 4 : i32
    %1906 = arith.addi %1905, %c4_i32_845 : i32
    %1907 = arith.index_cast %1906 : i32 to index
    %1908 = memref.load %arg6[%1907] : memref<450xf32, #tpu.memory_space<smem>>
    %1909 = vector.broadcast %1908 : f32 to vector<14x14xf32>
    %1910 = arith.mulf %1890, %1909 : vector<14x14xf32>
    %1911 = arith.addf %1881, %1910 : vector<14x14xf32>
    %c5_i32_846 = arith.constant 5 : i32
    %1912 = arith.addi %1548, %c5_i32_846 : i32
    %c3_i32_847 = arith.constant 3 : i32
    %1913 = arith.addi %1912, %c3_i32_847 : i32
    %1914 = arith.index_cast %1913 : i32 to index
    %1915 = memref.load %arg6[%1914] : memref<450xf32, #tpu.memory_space<smem>>
    %1916 = vector.broadcast %1915 : f32 to vector<14x14xf32>
    %1917 = arith.mulf %1890, %1916 : vector<14x14xf32>
    %1918 = arith.addf %1888, %1917 : vector<14x14xf32>
    %c0_848 = arith.constant 0 : index
    %c2_849 = arith.constant 2 : index
    %c1_850 = arith.constant 1 : index
    %c2_851 = arith.constant 2 : index
    %1919 = vector.load %arg3[%c0_848, %c2_849, %c1_850, %c2_851] : memref<1x3x16x16xf32, #tpu.memory_space<vmem>>, vector<1x1x14x14xf32>
    %1920 = vector.shape_cast %1919 : vector<1x1x14x14xf32> to vector<14x14xf32>
    %c10_i32_852 = arith.constant 10 : i32
    %1921 = arith.addi %1548, %c10_i32_852 : i32
    %c4_i32_853 = arith.constant 4 : i32
    %1922 = arith.addi %1921, %c4_i32_853 : i32
    %1923 = arith.index_cast %1922 : i32 to index
    %1924 = memref.load %arg6[%1923] : memref<450xf32, #tpu.memory_space<smem>>
    %1925 = vector.broadcast %1924 : f32 to vector<14x14xf32>
    %1926 = arith.mulf %1920, %1925 : vector<14x14xf32>
    %1927 = arith.addf %1904, %1926 : vector<14x14xf32>
    %c5_i32_854 = arith.constant 5 : i32
    %1928 = arith.addi %1548, %c5_i32_854 : i32
    %c4_i32_855 = arith.constant 4 : i32
    %1929 = arith.addi %1928, %c4_i32_855 : i32
    %1930 = arith.index_cast %1929 : i32 to index
    %1931 = memref.load %arg6[%1930] : memref<450xf32, #tpu.memory_space<smem>>
    %1932 = vector.broadcast %1931 : f32 to vector<14x14xf32>
    %1933 = arith.mulf %1920, %1932 : vector<14x14xf32>
    %1934 = arith.addf %1918, %1933 : vector<14x14xf32>
    %c0_856 = arith.constant 0 : index
    %c2_857 = arith.constant 2 : index
    %c1_858 = arith.constant 1 : index
    %c0_859 = arith.constant 0 : index
    %1935 = vector.load %arg4[%c0_856, %c2_857, %c1_858, %c0_859] : memref<1x3x16x16xf32, #tpu.memory_space<vmem>>, vector<1x1x14x14xf32>
    %1936 = vector.shape_cast %1935 : vector<1x1x14x14xf32> to vector<14x14xf32>
    %c15_i32_860 = arith.constant 15 : i32
    %1937 = arith.addi %1548, %c15_i32_860 : i32
    %c0_i32_861 = arith.constant 0 : i32
    %1938 = arith.addi %1937, %c0_i32_861 : i32
    %1939 = arith.index_cast %1938 : i32 to index
    %1940 = memref.load %arg6[%1939] : memref<450xf32, #tpu.memory_space<smem>>
    %1941 = vector.broadcast %1940 : f32 to vector<14x14xf32>
    %1942 = arith.mulf %1936, %1941 : vector<14x14xf32>
    %1943 = arith.addf %1897, %1942 : vector<14x14xf32>
    %c10_i32_862 = arith.constant 10 : i32
    %1944 = arith.addi %1548, %c10_i32_862 : i32
    %c0_i32_863 = arith.constant 0 : i32
    %1945 = arith.addi %1944, %c0_i32_863 : i32
    %1946 = arith.index_cast %1945 : i32 to index
    %1947 = memref.load %arg6[%1946] : memref<450xf32, #tpu.memory_space<smem>>
    %1948 = vector.broadcast %1947 : f32 to vector<14x14xf32>
    %1949 = arith.mulf %1936, %1948 : vector<14x14xf32>
    %1950 = arith.addf %1911, %1949 : vector<14x14xf32>
    %c0_864 = arith.constant 0 : index
    %c2_865 = arith.constant 2 : index
    %c1_866 = arith.constant 1 : index
    %c0_867 = arith.constant 0 : index
    %1951 = vector.load %arg5[%c0_864, %c2_865, %c1_866, %c0_867] : memref<1x3x16x16xf32, #tpu.memory_space<vmem>>, vector<1x1x14x14xf32>
    %1952 = vector.shape_cast %1951 : vector<1x1x14x14xf32> to vector<14x14xf32>
    %c15_i32_868 = arith.constant 15 : i32
    %1953 = arith.addi %1548, %c15_i32_868 : i32
    %c1_i32_869 = arith.constant 1 : i32
    %1954 = arith.addi %1953, %c1_i32_869 : i32
    %1955 = arith.index_cast %1954 : i32 to index
    %1956 = memref.load %arg6[%1955] : memref<450xf32, #tpu.memory_space<smem>>
    %1957 = vector.broadcast %1956 : f32 to vector<14x14xf32>
    %1958 = arith.mulf %1952, %1957 : vector<14x14xf32>
    %1959 = arith.addf %1943, %1958 : vector<14x14xf32>
    %c15_i32_870 = arith.constant 15 : i32
    %1960 = arith.addi %1548, %c15_i32_870 : i32
    %c0_i32_871 = arith.constant 0 : i32
    %1961 = arith.addi %1960, %c0_i32_871 : i32
    %1962 = arith.index_cast %1961 : i32 to index
    %1963 = memref.load %arg6[%1962] : memref<450xf32, #tpu.memory_space<smem>>
    %1964 = vector.broadcast %1963 : f32 to vector<14x14xf32>
    %1965 = arith.mulf %1952, %1964 : vector<14x14xf32>
    %1966 = arith.addf %1927, %1965 : vector<14x14xf32>
    %c10_i32_872 = arith.constant 10 : i32
    %1967 = arith.addi %1548, %c10_i32_872 : i32
    %c1_i32_873 = arith.constant 1 : i32
    %1968 = arith.addi %1967, %c1_i32_873 : i32
    %1969 = arith.index_cast %1968 : i32 to index
    %1970 = memref.load %arg6[%1969] : memref<450xf32, #tpu.memory_space<smem>>
    %1971 = vector.broadcast %1970 : f32 to vector<14x14xf32>
    %1972 = arith.mulf %1952, %1971 : vector<14x14xf32>
    %1973 = arith.addf %1950, %1972 : vector<14x14xf32>
    %c10_i32_874 = arith.constant 10 : i32
    %1974 = arith.addi %1548, %c10_i32_874 : i32
    %c0_i32_875 = arith.constant 0 : i32
    %1975 = arith.addi %1974, %c0_i32_875 : i32
    %1976 = arith.index_cast %1975 : i32 to index
    %1977 = memref.load %arg6[%1976] : memref<450xf32, #tpu.memory_space<smem>>
    %1978 = vector.broadcast %1977 : f32 to vector<14x14xf32>
    %1979 = arith.mulf %1952, %1978 : vector<14x14xf32>
    %1980 = arith.addf %1934, %1979 : vector<14x14xf32>
    %c0_876 = arith.constant 0 : index
    %c2_877 = arith.constant 2 : index
    %c1_878 = arith.constant 1 : index
    %c1_879 = arith.constant 1 : index
    %1981 = vector.load %arg4[%c0_876, %c2_877, %c1_878, %c1_879] : memref<1x3x16x16xf32, #tpu.memory_space<vmem>>, vector<1x1x14x14xf32>
    %1982 = vector.shape_cast %1981 : vector<1x1x14x14xf32> to vector<14x14xf32>
    %c15_i32_880 = arith.constant 15 : i32
    %1983 = arith.addi %1548, %c15_i32_880 : i32
    %c2_i32_881 = arith.constant 2 : i32
    %1984 = arith.addi %1983, %c2_i32_881 : i32
    %1985 = arith.index_cast %1984 : i32 to index
    %1986 = memref.load %arg6[%1985] : memref<450xf32, #tpu.memory_space<smem>>
    %1987 = vector.broadcast %1986 : f32 to vector<14x14xf32>
    %1988 = arith.mulf %1982, %1987 : vector<14x14xf32>
    %1989 = arith.addf %1959, %1988 : vector<14x14xf32>
    %c15_i32_882 = arith.constant 15 : i32
    %1990 = arith.addi %1548, %c15_i32_882 : i32
    %c1_i32_883 = arith.constant 1 : i32
    %1991 = arith.addi %1990, %c1_i32_883 : i32
    %1992 = arith.index_cast %1991 : i32 to index
    %1993 = memref.load %arg6[%1992] : memref<450xf32, #tpu.memory_space<smem>>
    %1994 = vector.broadcast %1993 : f32 to vector<14x14xf32>
    %1995 = arith.mulf %1982, %1994 : vector<14x14xf32>
    %1996 = arith.addf %1966, %1995 : vector<14x14xf32>
    %c10_i32_884 = arith.constant 10 : i32
    %1997 = arith.addi %1548, %c10_i32_884 : i32
    %c2_i32_885 = arith.constant 2 : i32
    %1998 = arith.addi %1997, %c2_i32_885 : i32
    %1999 = arith.index_cast %1998 : i32 to index
    %2000 = memref.load %arg6[%1999] : memref<450xf32, #tpu.memory_space<smem>>
    %2001 = vector.broadcast %2000 : f32 to vector<14x14xf32>
    %2002 = arith.mulf %1982, %2001 : vector<14x14xf32>
    %2003 = arith.addf %1973, %2002 : vector<14x14xf32>
    %c10_i32_886 = arith.constant 10 : i32
    %2004 = arith.addi %1548, %c10_i32_886 : i32
    %c1_i32_887 = arith.constant 1 : i32
    %2005 = arith.addi %2004, %c1_i32_887 : i32
    %2006 = arith.index_cast %2005 : i32 to index
    %2007 = memref.load %arg6[%2006] : memref<450xf32, #tpu.memory_space<smem>>
    %2008 = vector.broadcast %2007 : f32 to vector<14x14xf32>
    %2009 = arith.mulf %1982, %2008 : vector<14x14xf32>
    %2010 = arith.addf %1980, %2009 : vector<14x14xf32>
    %c0_888 = arith.constant 0 : index
    %c2_889 = arith.constant 2 : index
    %c1_890 = arith.constant 1 : index
    %c1_891 = arith.constant 1 : index
    %2011 = vector.load %arg5[%c0_888, %c2_889, %c1_890, %c1_891] : memref<1x3x16x16xf32, #tpu.memory_space<vmem>>, vector<1x1x14x14xf32>
    %2012 = vector.shape_cast %2011 : vector<1x1x14x14xf32> to vector<14x14xf32>
    %c15_i32_892 = arith.constant 15 : i32
    %2013 = arith.addi %1548, %c15_i32_892 : i32
    %c3_i32_893 = arith.constant 3 : i32
    %2014 = arith.addi %2013, %c3_i32_893 : i32
    %2015 = arith.index_cast %2014 : i32 to index
    %2016 = memref.load %arg6[%2015] : memref<450xf32, #tpu.memory_space<smem>>
    %2017 = vector.broadcast %2016 : f32 to vector<14x14xf32>
    %2018 = arith.mulf %2012, %2017 : vector<14x14xf32>
    %2019 = arith.addf %1989, %2018 : vector<14x14xf32>
    %c15_i32_894 = arith.constant 15 : i32
    %2020 = arith.addi %1548, %c15_i32_894 : i32
    %c2_i32_895 = arith.constant 2 : i32
    %2021 = arith.addi %2020, %c2_i32_895 : i32
    %2022 = arith.index_cast %2021 : i32 to index
    %2023 = memref.load %arg6[%2022] : memref<450xf32, #tpu.memory_space<smem>>
    %2024 = vector.broadcast %2023 : f32 to vector<14x14xf32>
    %2025 = arith.mulf %2012, %2024 : vector<14x14xf32>
    %2026 = arith.addf %1996, %2025 : vector<14x14xf32>
    %c10_i32_896 = arith.constant 10 : i32
    %2027 = arith.addi %1548, %c10_i32_896 : i32
    %c3_i32_897 = arith.constant 3 : i32
    %2028 = arith.addi %2027, %c3_i32_897 : i32
    %2029 = arith.index_cast %2028 : i32 to index
    %2030 = memref.load %arg6[%2029] : memref<450xf32, #tpu.memory_space<smem>>
    %2031 = vector.broadcast %2030 : f32 to vector<14x14xf32>
    %2032 = arith.mulf %2012, %2031 : vector<14x14xf32>
    %2033 = arith.addf %2003, %2032 : vector<14x14xf32>
    %c10_i32_898 = arith.constant 10 : i32
    %2034 = arith.addi %1548, %c10_i32_898 : i32
    %c2_i32_899 = arith.constant 2 : i32
    %2035 = arith.addi %2034, %c2_i32_899 : i32
    %2036 = arith.index_cast %2035 : i32 to index
    %2037 = memref.load %arg6[%2036] : memref<450xf32, #tpu.memory_space<smem>>
    %2038 = vector.broadcast %2037 : f32 to vector<14x14xf32>
    %2039 = arith.mulf %2012, %2038 : vector<14x14xf32>
    %2040 = arith.addf %2010, %2039 : vector<14x14xf32>
    %c0_900 = arith.constant 0 : index
    %c2_901 = arith.constant 2 : index
    %c1_902 = arith.constant 1 : index
    %c2_903 = arith.constant 2 : index
    %2041 = vector.load %arg4[%c0_900, %c2_901, %c1_902, %c2_903] : memref<1x3x16x16xf32, #tpu.memory_space<vmem>>, vector<1x1x14x14xf32>
    %2042 = vector.shape_cast %2041 : vector<1x1x14x14xf32> to vector<14x14xf32>
    %c15_i32_904 = arith.constant 15 : i32
    %2043 = arith.addi %1548, %c15_i32_904 : i32
    %c4_i32_905 = arith.constant 4 : i32
    %2044 = arith.addi %2043, %c4_i32_905 : i32
    %2045 = arith.index_cast %2044 : i32 to index
    %2046 = memref.load %arg6[%2045] : memref<450xf32, #tpu.memory_space<smem>>
    %2047 = vector.broadcast %2046 : f32 to vector<14x14xf32>
    %2048 = arith.mulf %2042, %2047 : vector<14x14xf32>
    %2049 = arith.addf %2019, %2048 : vector<14x14xf32>
    %c15_i32_906 = arith.constant 15 : i32
    %2050 = arith.addi %1548, %c15_i32_906 : i32
    %c3_i32_907 = arith.constant 3 : i32
    %2051 = arith.addi %2050, %c3_i32_907 : i32
    %2052 = arith.index_cast %2051 : i32 to index
    %2053 = memref.load %arg6[%2052] : memref<450xf32, #tpu.memory_space<smem>>
    %2054 = vector.broadcast %2053 : f32 to vector<14x14xf32>
    %2055 = arith.mulf %2042, %2054 : vector<14x14xf32>
    %2056 = arith.addf %2026, %2055 : vector<14x14xf32>
    %c10_i32_908 = arith.constant 10 : i32
    %2057 = arith.addi %1548, %c10_i32_908 : i32
    %c4_i32_909 = arith.constant 4 : i32
    %2058 = arith.addi %2057, %c4_i32_909 : i32
    %2059 = arith.index_cast %2058 : i32 to index
    %2060 = memref.load %arg6[%2059] : memref<450xf32, #tpu.memory_space<smem>>
    %2061 = vector.broadcast %2060 : f32 to vector<14x14xf32>
    %2062 = arith.mulf %2042, %2061 : vector<14x14xf32>
    %2063 = arith.addf %2033, %2062 : vector<14x14xf32>
    %c10_i32_910 = arith.constant 10 : i32
    %2064 = arith.addi %1548, %c10_i32_910 : i32
    %c3_i32_911 = arith.constant 3 : i32
    %2065 = arith.addi %2064, %c3_i32_911 : i32
    %2066 = arith.index_cast %2065 : i32 to index
    %2067 = memref.load %arg6[%2066] : memref<450xf32, #tpu.memory_space<smem>>
    %2068 = vector.broadcast %2067 : f32 to vector<14x14xf32>
    %2069 = arith.mulf %2042, %2068 : vector<14x14xf32>
    %2070 = arith.addf %2040, %2069 : vector<14x14xf32>
    %c0_912 = arith.constant 0 : index
    %c2_913 = arith.constant 2 : index
    %c1_914 = arith.constant 1 : index
    %c2_915 = arith.constant 2 : index
    %2071 = vector.load %arg5[%c0_912, %c2_913, %c1_914, %c2_915] : memref<1x3x16x16xf32, #tpu.memory_space<vmem>>, vector<1x1x14x14xf32>
    %2072 = vector.shape_cast %2071 : vector<1x1x14x14xf32> to vector<14x14xf32>
    %c15_i32_916 = arith.constant 15 : i32
    %2073 = arith.addi %1548, %c15_i32_916 : i32
    %c4_i32_917 = arith.constant 4 : i32
    %2074 = arith.addi %2073, %c4_i32_917 : i32
    %2075 = arith.index_cast %2074 : i32 to index
    %2076 = memref.load %arg6[%2075] : memref<450xf32, #tpu.memory_space<smem>>
    %2077 = vector.broadcast %2076 : f32 to vector<14x14xf32>
    %2078 = arith.mulf %2072, %2077 : vector<14x14xf32>
    %2079 = arith.addf %2056, %2078 : vector<14x14xf32>
    %c10_i32_918 = arith.constant 10 : i32
    %2080 = arith.addi %1548, %c10_i32_918 : i32
    %c4_i32_919 = arith.constant 4 : i32
    %2081 = arith.addi %2080, %c4_i32_919 : i32
    %2082 = arith.index_cast %2081 : i32 to index
    %2083 = memref.load %arg6[%2082] : memref<450xf32, #tpu.memory_space<smem>>
    %2084 = vector.broadcast %2083 : f32 to vector<14x14xf32>
    %2085 = arith.mulf %2072, %2084 : vector<14x14xf32>
    %2086 = arith.addf %2070, %2085 : vector<14x14xf32>
    %c0_920 = arith.constant 0 : index
    %c2_921 = arith.constant 2 : index
    %c2_922 = arith.constant 2 : index
    %c0_923 = arith.constant 0 : index
    %2087 = vector.load %arg2[%c0_920, %c2_921, %c2_922, %c0_923] : memref<1x3x16x16xf32, #tpu.memory_space<vmem>>, vector<1x1x14x14xf32>
    %2088 = vector.shape_cast %2087 : vector<1x1x14x14xf32> to vector<14x14xf32>
    %c20_i32_924 = arith.constant 20 : i32
    %2089 = arith.addi %1548, %c20_i32_924 : i32
    %c0_i32_925 = arith.constant 0 : i32
    %2090 = arith.addi %2089, %c0_i32_925 : i32
    %2091 = arith.index_cast %2090 : i32 to index
    %2092 = memref.load %arg6[%2091] : memref<450xf32, #tpu.memory_space<smem>>
    %2093 = vector.broadcast %2092 : f32 to vector<14x14xf32>
    %2094 = arith.mulf %2088, %2093 : vector<14x14xf32>
    %2095 = arith.addf %2049, %2094 : vector<14x14xf32>
    %c15_i32_926 = arith.constant 15 : i32
    %2096 = arith.addi %1548, %c15_i32_926 : i32
    %c0_i32_927 = arith.constant 0 : i32
    %2097 = arith.addi %2096, %c0_i32_927 : i32
    %2098 = arith.index_cast %2097 : i32 to index
    %2099 = memref.load %arg6[%2098] : memref<450xf32, #tpu.memory_space<smem>>
    %2100 = vector.broadcast %2099 : f32 to vector<14x14xf32>
    %2101 = arith.mulf %2088, %2100 : vector<14x14xf32>
    %2102 = arith.addf %2063, %2101 : vector<14x14xf32>
    %c0_928 = arith.constant 0 : index
    %c2_929 = arith.constant 2 : index
    %c2_930 = arith.constant 2 : index
    %c0_931 = arith.constant 0 : index
    %2103 = vector.load %arg3[%c0_928, %c2_929, %c2_930, %c0_931] : memref<1x3x16x16xf32, #tpu.memory_space<vmem>>, vector<1x1x14x14xf32>
    %2104 = vector.shape_cast %2103 : vector<1x1x14x14xf32> to vector<14x14xf32>
    %c20_i32_932 = arith.constant 20 : i32
    %2105 = arith.addi %1548, %c20_i32_932 : i32
    %c1_i32_933 = arith.constant 1 : i32
    %2106 = arith.addi %2105, %c1_i32_933 : i32
    %2107 = arith.index_cast %2106 : i32 to index
    %2108 = memref.load %arg6[%2107] : memref<450xf32, #tpu.memory_space<smem>>
    %2109 = vector.broadcast %2108 : f32 to vector<14x14xf32>
    %2110 = arith.mulf %2104, %2109 : vector<14x14xf32>
    %2111 = arith.addf %2095, %2110 : vector<14x14xf32>
    %c20_i32_934 = arith.constant 20 : i32
    %2112 = arith.addi %1548, %c20_i32_934 : i32
    %c0_i32_935 = arith.constant 0 : i32
    %2113 = arith.addi %2112, %c0_i32_935 : i32
    %2114 = arith.index_cast %2113 : i32 to index
    %2115 = memref.load %arg6[%2114] : memref<450xf32, #tpu.memory_space<smem>>
    %2116 = vector.broadcast %2115 : f32 to vector<14x14xf32>
    %2117 = arith.mulf %2104, %2116 : vector<14x14xf32>
    %2118 = arith.addf %2079, %2117 : vector<14x14xf32>
    %c15_i32_936 = arith.constant 15 : i32
    %2119 = arith.addi %1548, %c15_i32_936 : i32
    %c1_i32_937 = arith.constant 1 : i32
    %2120 = arith.addi %2119, %c1_i32_937 : i32
    %2121 = arith.index_cast %2120 : i32 to index
    %2122 = memref.load %arg6[%2121] : memref<450xf32, #tpu.memory_space<smem>>
    %2123 = vector.broadcast %2122 : f32 to vector<14x14xf32>
    %2124 = arith.mulf %2104, %2123 : vector<14x14xf32>
    %2125 = arith.addf %2102, %2124 : vector<14x14xf32>
    %c15_i32_938 = arith.constant 15 : i32
    %2126 = arith.addi %1548, %c15_i32_938 : i32
    %c0_i32_939 = arith.constant 0 : i32
    %2127 = arith.addi %2126, %c0_i32_939 : i32
    %2128 = arith.index_cast %2127 : i32 to index
    %2129 = memref.load %arg6[%2128] : memref<450xf32, #tpu.memory_space<smem>>
    %2130 = vector.broadcast %2129 : f32 to vector<14x14xf32>
    %2131 = arith.mulf %2104, %2130 : vector<14x14xf32>
    %2132 = arith.addf %2086, %2131 : vector<14x14xf32>
    %c0_940 = arith.constant 0 : index
    %c2_941 = arith.constant 2 : index
    %c2_942 = arith.constant 2 : index
    %c1_943 = arith.constant 1 : index
    %2133 = vector.load %arg2[%c0_940, %c2_941, %c2_942, %c1_943] : memref<1x3x16x16xf32, #tpu.memory_space<vmem>>, vector<1x1x14x14xf32>
    %2134 = vector.shape_cast %2133 : vector<1x1x14x14xf32> to vector<14x14xf32>
    %c20_i32_944 = arith.constant 20 : i32
    %2135 = arith.addi %1548, %c20_i32_944 : i32
    %c2_i32_945 = arith.constant 2 : i32
    %2136 = arith.addi %2135, %c2_i32_945 : i32
    %2137 = arith.index_cast %2136 : i32 to index
    %2138 = memref.load %arg6[%2137] : memref<450xf32, #tpu.memory_space<smem>>
    %2139 = vector.broadcast %2138 : f32 to vector<14x14xf32>
    %2140 = arith.mulf %2134, %2139 : vector<14x14xf32>
    %2141 = arith.addf %2111, %2140 : vector<14x14xf32>
    %c20_i32_946 = arith.constant 20 : i32
    %2142 = arith.addi %1548, %c20_i32_946 : i32
    %c1_i32_947 = arith.constant 1 : i32
    %2143 = arith.addi %2142, %c1_i32_947 : i32
    %2144 = arith.index_cast %2143 : i32 to index
    %2145 = memref.load %arg6[%2144] : memref<450xf32, #tpu.memory_space<smem>>
    %2146 = vector.broadcast %2145 : f32 to vector<14x14xf32>
    %2147 = arith.mulf %2134, %2146 : vector<14x14xf32>
    %2148 = arith.addf %2118, %2147 : vector<14x14xf32>
    %c15_i32_948 = arith.constant 15 : i32
    %2149 = arith.addi %1548, %c15_i32_948 : i32
    %c2_i32_949 = arith.constant 2 : i32
    %2150 = arith.addi %2149, %c2_i32_949 : i32
    %2151 = arith.index_cast %2150 : i32 to index
    %2152 = memref.load %arg6[%2151] : memref<450xf32, #tpu.memory_space<smem>>
    %2153 = vector.broadcast %2152 : f32 to vector<14x14xf32>
    %2154 = arith.mulf %2134, %2153 : vector<14x14xf32>
    %2155 = arith.addf %2125, %2154 : vector<14x14xf32>
    %c15_i32_950 = arith.constant 15 : i32
    %2156 = arith.addi %1548, %c15_i32_950 : i32
    %c1_i32_951 = arith.constant 1 : i32
    %2157 = arith.addi %2156, %c1_i32_951 : i32
    %2158 = arith.index_cast %2157 : i32 to index
    %2159 = memref.load %arg6[%2158] : memref<450xf32, #tpu.memory_space<smem>>
    %2160 = vector.broadcast %2159 : f32 to vector<14x14xf32>
    %2161 = arith.mulf %2134, %2160 : vector<14x14xf32>
    %2162 = arith.addf %2132, %2161 : vector<14x14xf32>
    %c0_952 = arith.constant 0 : index
    %c2_953 = arith.constant 2 : index
    %c2_954 = arith.constant 2 : index
    %c1_955 = arith.constant 1 : index
    %2163 = vector.load %arg3[%c0_952, %c2_953, %c2_954, %c1_955] : memref<1x3x16x16xf32, #tpu.memory_space<vmem>>, vector<1x1x14x14xf32>
    %2164 = vector.shape_cast %2163 : vector<1x1x14x14xf32> to vector<14x14xf32>
    %c20_i32_956 = arith.constant 20 : i32
    %2165 = arith.addi %1548, %c20_i32_956 : i32
    %c3_i32_957 = arith.constant 3 : i32
    %2166 = arith.addi %2165, %c3_i32_957 : i32
    %2167 = arith.index_cast %2166 : i32 to index
    %2168 = memref.load %arg6[%2167] : memref<450xf32, #tpu.memory_space<smem>>
    %2169 = vector.broadcast %2168 : f32 to vector<14x14xf32>
    %2170 = arith.mulf %2164, %2169 : vector<14x14xf32>
    %2171 = arith.addf %2141, %2170 : vector<14x14xf32>
    %c20_i32_958 = arith.constant 20 : i32
    %2172 = arith.addi %1548, %c20_i32_958 : i32
    %c2_i32_959 = arith.constant 2 : i32
    %2173 = arith.addi %2172, %c2_i32_959 : i32
    %2174 = arith.index_cast %2173 : i32 to index
    %2175 = memref.load %arg6[%2174] : memref<450xf32, #tpu.memory_space<smem>>
    %2176 = vector.broadcast %2175 : f32 to vector<14x14xf32>
    %2177 = arith.mulf %2164, %2176 : vector<14x14xf32>
    %2178 = arith.addf %2148, %2177 : vector<14x14xf32>
    %c15_i32_960 = arith.constant 15 : i32
    %2179 = arith.addi %1548, %c15_i32_960 : i32
    %c3_i32_961 = arith.constant 3 : i32
    %2180 = arith.addi %2179, %c3_i32_961 : i32
    %2181 = arith.index_cast %2180 : i32 to index
    %2182 = memref.load %arg6[%2181] : memref<450xf32, #tpu.memory_space<smem>>
    %2183 = vector.broadcast %2182 : f32 to vector<14x14xf32>
    %2184 = arith.mulf %2164, %2183 : vector<14x14xf32>
    %2185 = arith.addf %2155, %2184 : vector<14x14xf32>
    %c15_i32_962 = arith.constant 15 : i32
    %2186 = arith.addi %1548, %c15_i32_962 : i32
    %c2_i32_963 = arith.constant 2 : i32
    %2187 = arith.addi %2186, %c2_i32_963 : i32
    %2188 = arith.index_cast %2187 : i32 to index
    %2189 = memref.load %arg6[%2188] : memref<450xf32, #tpu.memory_space<smem>>
    %2190 = vector.broadcast %2189 : f32 to vector<14x14xf32>
    %2191 = arith.mulf %2164, %2190 : vector<14x14xf32>
    %2192 = arith.addf %2162, %2191 : vector<14x14xf32>
    %c0_964 = arith.constant 0 : index
    %c2_965 = arith.constant 2 : index
    %c2_966 = arith.constant 2 : index
    %c2_967 = arith.constant 2 : index
    %2193 = vector.load %arg2[%c0_964, %c2_965, %c2_966, %c2_967] : memref<1x3x16x16xf32, #tpu.memory_space<vmem>>, vector<1x1x14x14xf32>
    %2194 = vector.shape_cast %2193 : vector<1x1x14x14xf32> to vector<14x14xf32>
    %c20_i32_968 = arith.constant 20 : i32
    %2195 = arith.addi %1548, %c20_i32_968 : i32
    %c4_i32_969 = arith.constant 4 : i32
    %2196 = arith.addi %2195, %c4_i32_969 : i32
    %2197 = arith.index_cast %2196 : i32 to index
    %2198 = memref.load %arg6[%2197] : memref<450xf32, #tpu.memory_space<smem>>
    %2199 = vector.broadcast %2198 : f32 to vector<14x14xf32>
    %2200 = arith.mulf %2194, %2199 : vector<14x14xf32>
    %2201 = arith.addf %2171, %2200 : vector<14x14xf32>
    %c20_i32_970 = arith.constant 20 : i32
    %2202 = arith.addi %1548, %c20_i32_970 : i32
    %c3_i32_971 = arith.constant 3 : i32
    %2203 = arith.addi %2202, %c3_i32_971 : i32
    %2204 = arith.index_cast %2203 : i32 to index
    %2205 = memref.load %arg6[%2204] : memref<450xf32, #tpu.memory_space<smem>>
    %2206 = vector.broadcast %2205 : f32 to vector<14x14xf32>
    %2207 = arith.mulf %2194, %2206 : vector<14x14xf32>
    %2208 = arith.addf %2178, %2207 : vector<14x14xf32>
    %c15_i32_972 = arith.constant 15 : i32
    %2209 = arith.addi %1548, %c15_i32_972 : i32
    %c4_i32_973 = arith.constant 4 : i32
    %2210 = arith.addi %2209, %c4_i32_973 : i32
    %2211 = arith.index_cast %2210 : i32 to index
    %2212 = memref.load %arg6[%2211] : memref<450xf32, #tpu.memory_space<smem>>
    %2213 = vector.broadcast %2212 : f32 to vector<14x14xf32>
    %2214 = arith.mulf %2194, %2213 : vector<14x14xf32>
    %2215 = arith.addf %2185, %2214 : vector<14x14xf32>
    %c15_i32_974 = arith.constant 15 : i32
    %2216 = arith.addi %1548, %c15_i32_974 : i32
    %c3_i32_975 = arith.constant 3 : i32
    %2217 = arith.addi %2216, %c3_i32_975 : i32
    %2218 = arith.index_cast %2217 : i32 to index
    %2219 = memref.load %arg6[%2218] : memref<450xf32, #tpu.memory_space<smem>>
    %2220 = vector.broadcast %2219 : f32 to vector<14x14xf32>
    %2221 = arith.mulf %2194, %2220 : vector<14x14xf32>
    %2222 = arith.addf %2192, %2221 : vector<14x14xf32>
    %c0_976 = arith.constant 0 : index
    %c2_977 = arith.constant 2 : index
    %c2_978 = arith.constant 2 : index
    %c2_979 = arith.constant 2 : index
    %2223 = vector.load %arg3[%c0_976, %c2_977, %c2_978, %c2_979] : memref<1x3x16x16xf32, #tpu.memory_space<vmem>>, vector<1x1x14x14xf32>
    %2224 = vector.shape_cast %2223 : vector<1x1x14x14xf32> to vector<14x14xf32>
    %c20_i32_980 = arith.constant 20 : i32
    %2225 = arith.addi %1548, %c20_i32_980 : i32
    %c4_i32_981 = arith.constant 4 : i32
    %2226 = arith.addi %2225, %c4_i32_981 : i32
    %2227 = arith.index_cast %2226 : i32 to index
    %2228 = memref.load %arg6[%2227] : memref<450xf32, #tpu.memory_space<smem>>
    %2229 = vector.broadcast %2228 : f32 to vector<14x14xf32>
    %2230 = arith.mulf %2224, %2229 : vector<14x14xf32>
    %2231 = arith.addf %2208, %2230 : vector<14x14xf32>
    %c15_i32_982 = arith.constant 15 : i32
    %2232 = arith.addi %1548, %c15_i32_982 : i32
    %c4_i32_983 = arith.constant 4 : i32
    %2233 = arith.addi %2232, %c4_i32_983 : i32
    %2234 = arith.index_cast %2233 : i32 to index
    %2235 = memref.load %arg6[%2234] : memref<450xf32, #tpu.memory_space<smem>>
    %2236 = vector.broadcast %2235 : f32 to vector<14x14xf32>
    %2237 = arith.mulf %2224, %2236 : vector<14x14xf32>
    %2238 = arith.addf %2222, %2237 : vector<14x14xf32>
    %c0_984 = arith.constant 0 : index
    %c2_985 = arith.constant 2 : index
    %c2_986 = arith.constant 2 : index
    %c0_987 = arith.constant 0 : index
    %2239 = vector.load %arg4[%c0_984, %c2_985, %c2_986, %c0_987] : memref<1x3x16x16xf32, #tpu.memory_space<vmem>>, vector<1x1x14x14xf32>
    %2240 = vector.shape_cast %2239 : vector<1x1x14x14xf32> to vector<14x14xf32>
    %c20_i32_988 = arith.constant 20 : i32
    %2241 = arith.addi %1548, %c20_i32_988 : i32
    %c0_i32_989 = arith.constant 0 : i32
    %2242 = arith.addi %2241, %c0_i32_989 : i32
    %2243 = arith.index_cast %2242 : i32 to index
    %2244 = memref.load %arg6[%2243] : memref<450xf32, #tpu.memory_space<smem>>
    %2245 = vector.broadcast %2244 : f32 to vector<14x14xf32>
    %2246 = arith.mulf %2240, %2245 : vector<14x14xf32>
    %2247 = arith.addf %2215, %2246 : vector<14x14xf32>
    %c0_990 = arith.constant 0 : index
    %c2_991 = arith.constant 2 : index
    %c2_992 = arith.constant 2 : index
    %c0_993 = arith.constant 0 : index
    %2248 = vector.load %arg5[%c0_990, %c2_991, %c2_992, %c0_993] : memref<1x3x16x16xf32, #tpu.memory_space<vmem>>, vector<1x1x14x14xf32>
    %2249 = vector.shape_cast %2248 : vector<1x1x14x14xf32> to vector<14x14xf32>
    %c20_i32_994 = arith.constant 20 : i32
    %2250 = arith.addi %1548, %c20_i32_994 : i32
    %c1_i32_995 = arith.constant 1 : i32
    %2251 = arith.addi %2250, %c1_i32_995 : i32
    %2252 = arith.index_cast %2251 : i32 to index
    %2253 = memref.load %arg6[%2252] : memref<450xf32, #tpu.memory_space<smem>>
    %2254 = vector.broadcast %2253 : f32 to vector<14x14xf32>
    %2255 = arith.mulf %2249, %2254 : vector<14x14xf32>
    %2256 = arith.addf %2247, %2255 : vector<14x14xf32>
    %c20_i32_996 = arith.constant 20 : i32
    %2257 = arith.addi %1548, %c20_i32_996 : i32
    %c0_i32_997 = arith.constant 0 : i32
    %2258 = arith.addi %2257, %c0_i32_997 : i32
    %2259 = arith.index_cast %2258 : i32 to index
    %2260 = memref.load %arg6[%2259] : memref<450xf32, #tpu.memory_space<smem>>
    %2261 = vector.broadcast %2260 : f32 to vector<14x14xf32>
    %2262 = arith.mulf %2249, %2261 : vector<14x14xf32>
    %2263 = arith.addf %2238, %2262 : vector<14x14xf32>
    %c0_998 = arith.constant 0 : index
    %c2_999 = arith.constant 2 : index
    %c2_1000 = arith.constant 2 : index
    %c1_1001 = arith.constant 1 : index
    %2264 = vector.load %arg4[%c0_998, %c2_999, %c2_1000, %c1_1001] : memref<1x3x16x16xf32, #tpu.memory_space<vmem>>, vector<1x1x14x14xf32>
    %2265 = vector.shape_cast %2264 : vector<1x1x14x14xf32> to vector<14x14xf32>
    %c20_i32_1002 = arith.constant 20 : i32
    %2266 = arith.addi %1548, %c20_i32_1002 : i32
    %c2_i32_1003 = arith.constant 2 : i32
    %2267 = arith.addi %2266, %c2_i32_1003 : i32
    %2268 = arith.index_cast %2267 : i32 to index
    %2269 = memref.load %arg6[%2268] : memref<450xf32, #tpu.memory_space<smem>>
    %2270 = vector.broadcast %2269 : f32 to vector<14x14xf32>
    %2271 = arith.mulf %2265, %2270 : vector<14x14xf32>
    %2272 = arith.addf %2256, %2271 : vector<14x14xf32>
    %c20_i32_1004 = arith.constant 20 : i32
    %2273 = arith.addi %1548, %c20_i32_1004 : i32
    %c1_i32_1005 = arith.constant 1 : i32
    %2274 = arith.addi %2273, %c1_i32_1005 : i32
    %2275 = arith.index_cast %2274 : i32 to index
    %2276 = memref.load %arg6[%2275] : memref<450xf32, #tpu.memory_space<smem>>
    %2277 = vector.broadcast %2276 : f32 to vector<14x14xf32>
    %2278 = arith.mulf %2265, %2277 : vector<14x14xf32>
    %2279 = arith.addf %2263, %2278 : vector<14x14xf32>
    %c0_1006 = arith.constant 0 : index
    %c2_1007 = arith.constant 2 : index
    %c2_1008 = arith.constant 2 : index
    %c1_1009 = arith.constant 1 : index
    %2280 = vector.load %arg5[%c0_1006, %c2_1007, %c2_1008, %c1_1009] : memref<1x3x16x16xf32, #tpu.memory_space<vmem>>, vector<1x1x14x14xf32>
    %2281 = vector.shape_cast %2280 : vector<1x1x14x14xf32> to vector<14x14xf32>
    %c20_i32_1010 = arith.constant 20 : i32
    %2282 = arith.addi %1548, %c20_i32_1010 : i32
    %c3_i32_1011 = arith.constant 3 : i32
    %2283 = arith.addi %2282, %c3_i32_1011 : i32
    %2284 = arith.index_cast %2283 : i32 to index
    %2285 = memref.load %arg6[%2284] : memref<450xf32, #tpu.memory_space<smem>>
    %2286 = vector.broadcast %2285 : f32 to vector<14x14xf32>
    %2287 = arith.mulf %2281, %2286 : vector<14x14xf32>
    %2288 = arith.addf %2272, %2287 : vector<14x14xf32>
    %c20_i32_1012 = arith.constant 20 : i32
    %2289 = arith.addi %1548, %c20_i32_1012 : i32
    %c2_i32_1013 = arith.constant 2 : i32
    %2290 = arith.addi %2289, %c2_i32_1013 : i32
    %2291 = arith.index_cast %2290 : i32 to index
    %2292 = memref.load %arg6[%2291] : memref<450xf32, #tpu.memory_space<smem>>
    %2293 = vector.broadcast %2292 : f32 to vector<14x14xf32>
    %2294 = arith.mulf %2281, %2293 : vector<14x14xf32>
    %2295 = arith.addf %2279, %2294 : vector<14x14xf32>
    %c0_1014 = arith.constant 0 : index
    %c2_1015 = arith.constant 2 : index
    %c2_1016 = arith.constant 2 : index
    %c2_1017 = arith.constant 2 : index
    %2296 = vector.load %arg4[%c0_1014, %c2_1015, %c2_1016, %c2_1017] : memref<1x3x16x16xf32, #tpu.memory_space<vmem>>, vector<1x1x14x14xf32>
    %2297 = vector.shape_cast %2296 : vector<1x1x14x14xf32> to vector<14x14xf32>
    %c20_i32_1018 = arith.constant 20 : i32
    %2298 = arith.addi %1548, %c20_i32_1018 : i32
    %c4_i32_1019 = arith.constant 4 : i32
    %2299 = arith.addi %2298, %c4_i32_1019 : i32
    %2300 = arith.index_cast %2299 : i32 to index
    %2301 = memref.load %arg6[%2300] : memref<450xf32, #tpu.memory_space<smem>>
    %2302 = vector.broadcast %2301 : f32 to vector<14x14xf32>
    %2303 = arith.mulf %2297, %2302 : vector<14x14xf32>
    %2304 = arith.addf %2288, %2303 : vector<14x14xf32>
    %c20_i32_1020 = arith.constant 20 : i32
    %2305 = arith.addi %1548, %c20_i32_1020 : i32
    %c3_i32_1021 = arith.constant 3 : i32
    %2306 = arith.addi %2305, %c3_i32_1021 : i32
    %2307 = arith.index_cast %2306 : i32 to index
    %2308 = memref.load %arg6[%2307] : memref<450xf32, #tpu.memory_space<smem>>
    %2309 = vector.broadcast %2308 : f32 to vector<14x14xf32>
    %2310 = arith.mulf %2297, %2309 : vector<14x14xf32>
    %2311 = arith.addf %2295, %2310 : vector<14x14xf32>
    %c0_1022 = arith.constant 0 : index
    %c2_1023 = arith.constant 2 : index
    %c2_1024 = arith.constant 2 : index
    %c2_1025 = arith.constant 2 : index
    %2312 = vector.load %arg5[%c0_1022, %c2_1023, %c2_1024, %c2_1025] : memref<1x3x16x16xf32, #tpu.memory_space<vmem>>, vector<1x1x14x14xf32>
    %2313 = vector.shape_cast %2312 : vector<1x1x14x14xf32> to vector<14x14xf32>
    %c20_i32_1026 = arith.constant 20 : i32
    %2314 = arith.addi %1548, %c20_i32_1026 : i32
    %c4_i32_1027 = arith.constant 4 : i32
    %2315 = arith.addi %2314, %c4_i32_1027 : i32
    %2316 = arith.index_cast %2315 : i32 to index
    %2317 = memref.load %arg6[%2316] : memref<450xf32, #tpu.memory_space<smem>>
    %2318 = vector.broadcast %2317 : f32 to vector<14x14xf32>
    %2319 = arith.mulf %2313, %2318 : vector<14x14xf32>
    %2320 = arith.addf %2311, %2319 : vector<14x14xf32>
    %2321 = arith.maximumf %2201, %2231 : vector<14x14xf32>
    %2322 = arith.maximumf %2304, %2320 : vector<14x14xf32>
    %2323 = arith.maximumf %2321, %2322 : vector<14x14xf32>
    %2324 = arith.index_cast %arg1 : i32 to index
    %2325 = memref.load %arg7[%2324] : memref<6xf32, #tpu.memory_space<smem>>
    %2326 = vector.broadcast %2325 : f32 to vector<14x14xf32>
    %2327 = arith.addf %2323, %2326 : vector<14x14xf32>
    %cst = arith.constant 0.000000e+00 : f32
    %2328 = vector.broadcast %cst : f32 to vector<14x14xf32>
    %2329 = arith.maximumf %2327, %2328 : vector<14x14xf32>
    %c0_1028 = arith.constant 0 : index
    %c0_1029 = arith.constant 0 : index
    %c0_1030 = arith.constant 0 : index
    %c0_1031 = arith.constant 0 : index
    %2330 = vector.load %arg8[%c0_1028, %c0_1029, %c0_1030, %c0_1031] : memref<1x1x14x14xf32, #tpu.memory_space<vmem>>, vector<1x1x14x14xf32>
    %2331 = vector.shape_cast %2330 : vector<1x1x14x14xf32> to vector<14x14xf32>
    %2332 = vector.shape_cast %2329 : vector<14x14xf32> to vector<1x1x14x14xf32>
    tpu.vector_store %arg8[%c0_1028, %c0_1029, %c0_1030, %c0_1031], %2332 {strides = array<i32>} : memref<1x1x14x14xf32, #tpu.memory_space<vmem>>, vector<1x1x14x14xf32>,
    return
  }
  func.func @transform_0(%arg0: i32, %arg1: i32) -> (i32, i32, i32, i32) {
    %c0_i32 = arith.constant 0 : i32
    %c0_i32_0 = arith.constant 0 : i32
    %c0_i32_1 = arith.constant 0 : i32
    %c0_i32_2 = arith.constant 0 : i32
    return %arg0, %c0_i32, %c0_i32_0, %c0_i32_1 : i32, i32, i32, i32
  }
  func.func @transform_1(%arg0: i32, %arg1: i32) -> (i32, i32, i32, i32) {
    %c0_i32 = arith.constant 0 : i32
    %c0_i32_0 = arith.constant 0 : i32
    %c0_i32_1 = arith.constant 0 : i32
    %c0_i32_2 = arith.constant 0 : i32
    return %arg0, %c0_i32, %c0_i32_0, %c0_i32_1 : i32, i32, i32, i32
  }
  func.func @transform_2(%arg0: i32, %arg1: i32) -> (i32, i32, i32, i32) {
    %c0_i32 = arith.constant 0 : i32
    %c0_i32_0 = arith.constant 0 : i32
    %c0_i32_1 = arith.constant 0 : i32
    %c0_i32_2 = arith.constant 0 : i32
    return %arg0, %c0_i32, %c0_i32_0, %c0_i32_1 : i32, i32, i32, i32
  }
  func.func @transform_3(%arg0: i32, %arg1: i32) -> (i32, i32, i32, i32) {
    %c0_i32 = arith.constant 0 : i32
    %c0_i32_0 = arith.constant 0 : i32
    %c0_i32_1 = arith.constant 0 : i32
    %c0_i32_2 = arith.constant 0 : i32
    return %arg0, %c0_i32, %c0_i32_0, %c0_i32_1 : i32, i32, i32, i32
  }
  func.func @transform_4(%arg0: i32, %arg1: i32) -> i32 {
    %c0_i32 = arith.constant 0 : i32
    %c0_i32_0 = arith.constant 0 : i32
    return %c0_i32 : i32
  }
  func.func @transform_5(%arg0: i32, %arg1: i32) -> i32 {
    %c0_i32 = arith.constant 0 : i32
    %c0_i32_0 = arith.constant 0 : i32
    return %c0_i32 : i32
  }
  func.func @transform_6(%arg0: i32, %arg1: i32) -> (i32, i32, i32, i32) {
    %c0_i32 = arith.constant 0 : i32
    %c0_i32_0 = arith.constant 0 : i32
    %c0_i32_1 = arith.constant 0 : i32
    return %arg0, %arg1, %c0_i32, %c0_i32_0 : i32, i32, i32, i32
  }
}

</mosaic_0001>

<bundles_post_ra>
// kernel: tpu_custom_call.1
= control target key start
LH: loop header
LB: loop body
LE: loop exit
PB: predicated region body
PF: predicated region fallthrough
CT: control target
= control target key end

     0   :  { %s7889_s0 = inlined_call_operand.hbm [shape: f32[2,3,16,16], index: 0, kind: input, shape index: {}]   ;;  %s7890_s1 = inlined_call_operand.hbm [shape: f32[2,3,16,16], index: 1, kind: input, shape index: {}]   ;;  %s7891_s2 = inlined_call_operand.hbm [shape: f32[2,3,16,16], index: 2, kind: input, shape index: {}]   ;;  %s7892_s3 = inlined_call_operand.hbm [shape: f32[2,3,16,16], index: 3, kind: input, shape index: {}]   ;;  %s7893_s4 = inlined_call_operand.vmem [shape: f32[450], index: 4, kind: input, shape index: {}]   ;;  %s7894_s5 = inlined_call_operand.vmem [shape: f32[6], index: 5, kind: input, shape index: {}]   ;;  %s7895_s6 = inlined_call_operand.vmem [shape: f32[2,6,14,14], index: 6, kind: output, shape index: {}]  }
   0x1   :  { %7951 = sst [smem:[#allocation231_spill]] %s7889_s0 }
   0x2   :  { %7952 = sst [smem:[#allocation232_spill]] %s7890_s1 }
   0x3   :  { %7953 = sst [smem:[#allocation233_spill]] %s7893_s4 }
   0x4   :  { %11 = vsyncpa [#allocation3], 0 }
   0x5   :  { %13 = vsyncpa [#allocation3 + $0x1], 0 }
   0x6   :  { %14 = vsyncpa [#allocation6], 0 }
   0x7   :  { %16 = vsyncpa [#allocation6 + $0x1], 0 }
   0x8   :  { %17 = vsyncpa [#allocation9], 0 }
   0x9   :  { %19 = vsyncpa [#allocation9 + $0x1], 0 }
   0xa   :  { %20 = vsyncpa [#allocation4], 0 }
   0xb   :  { %21 = vsyncpa [#allocation12], 0  ;;  %s4333_s21 = smov 0   ;;  %s4335_s22 = smov 0  }
   0xc   :  { %s4337_s23 = smov 0   ;;  %s4339_s24 = smov 0  }
   0xd   :  { %s4341_s25 = smov 0   ;;  %s4343_s26 = smov 0  }
   0xe   :  { %s4345_s27 = smov 0   ;;  %s4347_s28 = smov 0  }
   0xf LB: > { %7954 = sst [smem:[#allocation18_spill]] %s4278_s26  ;;  %s36_s29 = sadd.s32 1, %s4278_s26  ;;  %s4286_s28 = sphi %s4347_s28, %s27_s28   ;;  %s4282_s27 = sphi %s4345_s27, %s8525_s27   ;;  %s4278_s26 = sphi %s4343_s26, %s8524_s26   ;;  %s4274_s25 = sphi %s4341_s25, %s8523_s25   ;;  %s4270_s24 = sphi %s4339_s24, %s8522_s24   ;;  %s4266_s23 = sphi %s4337_s23, %s8528_s23   ;;  %s4262_s22 = sphi %s4335_s22, %s8527_s22   ;;  %s4258_s21 = sphi %s4333_s21, %s8526_s21  }
  0x10   : > { %7955 = sst [smem:[#allocation19_spill]] %s4282_s27  ;;  %s39_s30 = sadd.s32 1, %s4282_s27 }
  0x11   : > { %p37_p0 = scmp.ge.s32.totalorder %s36_s29, 6  ;;  %s46_s7 = sadd.s32 1, %s4266_s23 }
  0x12   : > { %p53_p1 = scmp.ne.s32.totalorder %s4266_s23, %s4262_s22  ;;  %p54_p2 = scmp.eq.s32.totalorder %s4286_s28, 0 }
  0x13   : > { %s8530_s29 = smov (%p37_p0, %s36_s29), 0  ;;  %s8532_s30 = smov (!%p37_p0, %s39_s30), %s4282_s27 }
  0x14   : > { %7956 = sst [smem:[#allocation20_spill]] %s8530_s29  ;;  %p55_p3 = por %p54_p2, %p53_p1 }
  0x15   : > { %p41_p4 = scmp.ge.s32.totalorder %s8532_s30, 2  ;;  %p3933_p5 = scmp.lt.s32.totalorder %s4286_s28, 12 }
  0x16   : > { %s4384_s8 = sand.u32 1, %s4266_s23   ;;  %s4387_s9 = smul.u32 768, %s4282_s27 }
  0x17   : > { %s8534_s30 = smov (%p41_p4, %s8532_s30), 0  ;;  %s4392_s10 = smul.u32 48, %s4384_s8 }
  0x18   : > { %7957 = sst [smem:[#allocation21_spill]] %s8534_s30  ;;  %p4394_p6 = pnand %p3933_p5, %p55_p3 }
  0x19   : > { %s43_s12 = ssub.s32 %s4282_s27, %s8534_s30  ;;  %s274_s13 = sand.u32 1, %s4286_s28  }
  0x1a   : > { %s7958_s11 = scalar_select %p4394_p6, 1, 0 }
  0x1b   : > { %p44_p7 = scmp.eq.s32.totalorder %s43_s12, 0  ;;  %s7959_s1 = sld [smem:[#allocation232_spill]] }
  0x1c   : > { %s278_s18 = scalar_lea.vmem [#allocation5], %s4392_s10  ;;  %s4413_s20 = scalar_lea.sflag [#allocation6], %s274_s13 }
  0x1d   : > { %s4402_s14 = scalar_select %p44_p7, %s4266_s23, %s46_s7  }
  0x1e   : > { %s285_s19 = sshll.u32 %s278_s18, 4  ;;  %p4419_p9 = pneg %p4394_p6  ;;  %s4411_s19 = int_to_ptr.vmem [resolvable:$true] %s285_s19 }
  0x20   : > { %s7960_s7 = scalar_select %p4419_p9, 1, 0 }
  0x21   : > { %s4408_s17 = scalar_lea.hbm %s7959_s1, %s4387_s9  ;;  %s4059_s16 = scalar_lea.hbm %s7959_s1, 1536 }
  0x22   : > { %s4054_s30 = scalar_lea.hbm %s4408_s17, 768  ;;  %p4060_p12 = scmp.lt.u32.totalorder %s4408_s17, %s7959_s1 }
  0x23   : > { %p4055_p8 = scmp.ne.s32.totalorder %s4408_s17, %s4054_s30  ;;  %p4061_p13 = scmp.lt.u32.totalorder %s4059_s16, %s4054_s30 }
  0x24   : > { %p4063_p1 = scmp.lt.u32.totalorder %s4054_s30, %s4408_s17 }
  0x25   : > { %p4057_p10 = pnand %p4419_p9, %p4055_p8  ;;  %p4062_p0 = por %p4061_p13, %p4060_p12 }
  0x27   : > { %p4058_p11 = pneg %p4057_p10  ;;  %p4064_p2 = por %p4063_p1, %p4062_p0 }
  0x29   : > { %p4065_p3 = pnand %p4064_p2, %p4058_p11 }
  0x2b   : > { %4068 = shalt.err (!%p4065_p3)
}
  0x2c   : > { %s4069_s13 = scalar_lea.vmem %s4411_s19, 768  ;;  %s4288_s12 = smov [#allocation5]  }
  0x2d   : > { %p4070_p4 = scmp.ne.s32.totalorder %s4411_s19, %s4069_s13  ;;  %s4074_s15 = sshll.u32 %s4288_s12, 4  ;;  %s4075_s15 = int_to_ptr.vmem [resolvable:$false] %s4074_s15 }
  0x2e   : > { %s4076_s29 = scalar_lea.vmem %s4075_s15, 1536  ;;  %p4077_p8 = scmp.lt.s32.totalorder %s4411_s19, %s4075_s15 }
  0x2f   : > { %p4072_p5 = pnand %p4070_p4, %p4419_p9  ;;  %p4078_p10 = scmp.lt.s32.totalorder %s4076_s29, %s4069_s13 }
  0x31   : > { %p4073_p7 = pneg %p4072_p5  ;;  %p4079_p12 = por %p4078_p10, %p4077_p8 }
  0x33   : > { %p4080_p13 = pnand %p4079_p12, %p4073_p7 }
  0x35   : > { %4083 = shalt.err (!%p4080_p13)
}
  0x36   : > { %s7898_s30 = smov 128   ;;  %s7900_s16 = smov 8  }
  0x37   : > { %3924 = dma.hbm_to_vmem [thread:$0]  (!%p4394_p6), %s4408_s17, 768, %s4411_s19, %s4413_s20, %s7898_s30, %s7898_s30, %s7900_s16  }
  0x38   : > { %s7897_s18 = sadd.s32 4294967295, %s4286_s28   ;;  %p59_p11 = scmp.ne.s32.totalorder %s4262_s22, %s4258_s21 }
  0x39   : > { %p4451_p0 = scmp.eq.s32.totalorder %s7897_s18, 0  ;;  %p3822_p1 = scmp.ge.s32.totalorder %s4286_s28, 1 }
  0x3a   : > { %p218_p2 = scmp.lt.s32.totalorder %s4286_s28, 13  ;;  %s7964_s4 = sld [smem:[#allocation233_spill]] }
  0x3b   : > { %s7961_s13 = scalar_select %p4451_p0, 1, 0 }
  0x3c   : > { %p4459_p3 = por %p4451_p0, %p59_p11  ;;  %p4463_p4 = pnand %p3822_p1, %p218_p2 }
  0x3d   : > { %s242_s30 = sshll.u32 %s7894_s5, 4  ;;  %s7966_s0 = sld [smem:[#allocation231_spill]]  ;;  %s243_s30 = int_to_ptr.vmem [resolvable:$true] %s242_s30 }
  0x3e   : > { %s7962_s12 = scalar_select %p4459_p3, 1, 0 }
  0x3f   : > { %s7963_s15 = scalar_select %p4463_p4, 1, 0 }
  0x40   : > { %s231_s19 = sshll.u32 %s7964_s4, 4  ;;  %p3911_p5 = pneg %p4463_p4  ;;  %s232_s19 = int_to_ptr.vmem [resolvable:$true] %s231_s19 }
  0x41   : > { %s257_s21 = scalar_lea.vmem [#allocation2], %s4392_s10  ;;  %s4084_s26 = scalar_lea.vmem %s232_s19, 64 }
  0x42   : > { %p4477_p7 = pnand %p3911_p5, %p4451_p0  ;;  %s264_s4 = sshll.u32 %s257_s21, 4  ;;  %s4494_s4 = int_to_ptr.vmem [resolvable:$true] %s264_s4 }
  0x43   : > { %s4485_s17 = scalar_lea.hbm %s7966_s0, %s4387_s9  ;;  %p4085_p8 = scmp.ne.s32.totalorder %s232_s19, %s4084_s26 }
  0x44   : > { %p4086_p10 = pneg %p4477_p7  ;;  %p4092_p11 = scmp.lt.s32.totalorder %s232_s19, %s232_s19 }
  0x45   : > { %p4093_p1 = scmp.lt.s32.totalorder %s4084_s26, %s4084_s26 }
  0x46   : > { %p4087_p12 = pnand %p4086_p10, %p4085_p8 }
  0x47   : > { %p4094_p2 = por %p4093_p1, %p4092_p11 }
  0x48   : > { %p4088_p13 = pneg %p4087_p12 }
  0x4a   : > { %p4095_p5 = pnand %p4094_p2, %p4088_p13 }
  0x4c   : > { %4098 = shalt.err (!%p4095_p5)
}
  0x4d   : > { %s4291_s18 = smov [#allocation10]   ;;  %s4099_s1 = scalar_lea.vmem %s243_s30, 16 }
  0x4e   : > { %3914 = dma.vmem_to_smem (!%p4477_p7), %s232_s19, 64, %s4291_s18, [#allocation4]  }
  0x4f   : > { %p4100_p0 = scmp.ne.s32.totalorder %s243_s30, %s4099_s1  ;;  %p4107_p6 = scmp.lt.s32.totalorder %s243_s30, %s243_s30 }
  0x50   : > { %p4108_p9 = scmp.lt.s32.totalorder %s4099_s1, %s4099_s1 }
  0x51   : > { %p4102_p3 = pnand %p4100_p0, %p4086_p10 }
  0x52   : > { %p4109_p8 = por %p4108_p9, %p4107_p6 }
  0x53   : > { %p4103_p4 = pneg %p4102_p3 }
  0x55   : > { %p4110_p12 = pnand %p4109_p8, %p4103_p4 }
  0x57   : > { %4113 = shalt.err (!%p4110_p12)
}
  0x58   : > { %s4292_s27 = smov [#allocation11]   ;;  %s254_s26 = scalar_lea.sflag [#allocation3], %s4384_s8 }
  0x59   : > { %3917 = dma.vmem_to_smem (!%p4477_p7), %s243_s30, 16, %s4292_s27, [#allocation12]  }
  0x5a   : > { %s4114_s19 = scalar_lea.hbm %s4485_s17, 768  ;;  %p7967_p3 = scmp.ne.s32.totalorder %s7960_s7, 0 }
  0x5b   : > { %p4115_p0 = scmp.ne.s32.totalorder %s4485_s17, %s4114_s19  ;;  %s4119_s18 = scalar_lea.hbm %s7966_s0, 1536 }
  0x5c   : > { %p4120_p9 = scmp.lt.u32.totalorder %s4485_s17, %s7966_s0  ;;  %p4121_p4 = scmp.lt.u32.totalorder %s4119_s18, %s4114_s19 }
  0x5d   : > { %p4117_p10 = pnand %p4115_p0, %p7967_p3  ;;  %p4123_p11 = scmp.lt.u32.totalorder %s4114_s19, %s4485_s17 }
  0x5e   : > { %p4122_p13 = por %p4121_p4, %p4120_p9 }
  0x5f   : > { %p4118_p6 = pneg %p4117_p10 }
  0x60   : > { %p4124_p7 = por %p4123_p11, %p4122_p13 }
  0x62   : > { %p4125_p1 = pnand %p4124_p7, %p4118_p6 }
  0x64   : > { %4128 = shalt.err (!%p4125_p1)
}
  0x65   : > { %s4129_s30 = scalar_lea.vmem %s4494_s4, 768  ;;  %s4293_s27 = smov [#allocation2]  }
  0x66   : > { %p4130_p2 = scmp.ne.s32.totalorder %s4494_s4, %s4129_s30  ;;  %s4134_s29 = sshll.u32 %s4293_s27, 4  ;;  %s4135_s29 = int_to_ptr.vmem [resolvable:$false] %s4134_s29 }
  0x67   : > { %s4136_s21 = scalar_lea.vmem %s4135_s29, 1536  ;;  %p4137_p12 = scmp.lt.s32.totalorder %s4494_s4, %s4135_s29 }
  0x68   : > { %p4132_p5 = pnand %p4130_p2, %p7967_p3  ;;  %p4138_p0 = scmp.lt.s32.totalorder %s4136_s21, %s4129_s30 }
  0x6a   : > { %p4133_p8 = pneg %p4132_p5  ;;  %p4139_p10 = por %p4138_p0, %p4137_p12 }
  0x6c   : > { %p4140_p9 = pnand %p4139_p10, %p4133_p8 }
  0x6e   : > { %4143 = shalt.err (!%p4140_p9)
}
  0x6f   : > { %p7968_p6 = scmp.ne.s32.totalorder %s7958_s11, 0  ;;  %s7969_s19 = smov 8  }
  0x70   : > { %s7970_s18 = smov 128   ;;  %s4527_s30 = scalar_lea.hbm %s7891_s2, %s4387_s9 }
  0x71   : > { %3921 = dma.hbm_to_vmem [thread:$0]  (!%p7968_p6), %s4485_s17, 768, %s4494_s4, %s254_s26, %s7970_s18, %s7970_s18, %s7969_s19  }
  0x72   : > { %s299_s27 = scalar_lea.vmem [#allocation7], %s4392_s10  ;;  %s4144_s21 = scalar_lea.hbm %s4527_s30, 768 }
  0x73   : > { %s306_s29 = sshll.u32 %s299_s27, 4  ;;  %p4145_p4 = scmp.ne.s32.totalorder %s4527_s30, %s4144_s21  ;;  %s4530_s29 = int_to_ptr.vmem [resolvable:$true] %s306_s29 }
  0x74   : > { %s4149_s17 = scalar_lea.hbm %s7891_s2, 1536  ;;  %p4150_p7 = scmp.lt.u32.totalorder %s4527_s30, %s7891_s2 }
  0x75   : > { %p4147_p13 = pnand %p4145_p4, %p7967_p3  ;;  %p4151_p1 = scmp.lt.u32.totalorder %s4149_s17, %s4144_s21 }
  0x76   : > { %p4153_p5 = scmp.lt.u32.totalorder %s4144_s21, %s4527_s30 }
  0x77   : > { %p4148_p11 = pneg %p4147_p13  ;;  %p4152_p2 = por %p4151_p1, %p4150_p7 }
  0x79   : > { %p4154_p8 = por %p4153_p5, %p4152_p2 }
  0x7b   : > { %p4155_p12 = pnand %p4154_p8, %p4148_p11 }
  0x7d   : > { %4158 = shalt.err (!%p4155_p12)
}
  0x7e   : > { %s4159_s1 = scalar_lea.vmem %s4530_s29, 768  ;;  %s4294_s0 = smov [#allocation7]  }
  0x7f   : > { %p4160_p0 = scmp.ne.s32.totalorder %s4530_s29, %s4159_s1  ;;  %s4164_s27 = sshll.u32 %s4294_s0, 4  ;;  %s4165_s27 = int_to_ptr.vmem [resolvable:$false] %s4164_s27 }
  0x80   : > { %s4166_s4 = scalar_lea.vmem %s4165_s27, 1536  ;;  %p4167_p4 = scmp.lt.s32.totalorder %s4530_s29, %s4165_s27 }
  0x81   : > { %p4162_p10 = pnand %p4160_p0, %p7967_p3  ;;  %p4168_p13 = scmp.lt.s32.totalorder %s4166_s4, %s4159_s1 }
  0x83   : > { %p4163_p9 = pneg %p4162_p10  ;;  %p4169_p7 = por %p4168_p13, %p4167_p4 }
  0x85   : > { %p4170_p1 = pnand %p4169_p7, %p4163_p9 }
  0x87   : > { %4173 = shalt.err (!%p4170_p1)
}
  0x88   : > { %3927 = dma.hbm_to_vmem [thread:$0]  (!%p7968_p6), %s4527_s30, 768, %s4530_s29, %s4413_s20, %s7970_s18, %s7970_s18, %s7969_s19  }
  0x89   : > { %s4561_s26 = scalar_lea.hbm %s7892_s3, %s4387_s9  ;;  %s320_s16 = scalar_lea.vmem [#allocation8], %s4392_s10 }
  0x8a   : > { %s327_s1 = sshll.u32 %s320_s16, 4  ;;  %s317_s0 = scalar_lea.sflag [#allocation9], %s4384_s8  ;;  %s4564_s1 = int_to_ptr.vmem [resolvable:$true] %s327_s1 }
  0x8b   : > { %s4174_s27 = scalar_lea.hbm %s4561_s26, 768  ;;  %s4179_s29 = scalar_lea.hbm %s7892_s3, 1536 }
  0x8c   : > { %p4175_p11 = scmp.ne.s32.totalorder %s4561_s26, %s4174_s27  ;;  %p4180_p8 = scmp.lt.u32.totalorder %s4561_s26, %s7892_s3 }
  0x8d   : > { %p4181_p12 = scmp.lt.u32.totalorder %s4179_s29, %s4174_s27  ;;  %p4183_p10 = scmp.lt.u32.totalorder %s4174_s27, %s4561_s26 }
  0x8e   : > { %p4177_p2 = pnand %p4175_p11, %p7967_p3 }
  0x8f   : > { %p4182_p0 = por %p4181_p12, %p4180_p8 }
  0x90   : > { %p4178_p5 = pneg %p4177_p2 }
  0x91   : > { %p4184_p9 = por %p4183_p10, %p4182_p0 }
  0x93   : > { %p4185_p4 = pnand %p4184_p9, %p4178_p5 }
  0x95   : > { %4188 = shalt.err (!%p4185_p4)
}
  0x96   : > { %s4189_s10 = scalar_lea.vmem %s4564_s1, 768  ;;  %s4295_s21 = smov [#allocation8]  }
  0x97   : > { %p4190_p13 = scmp.ne.s32.totalorder %s4564_s1, %s4189_s10  ;;  %s4194_s17 = sshll.u32 %s4295_s21, 4  ;;  %s4195_s17 = int_to_ptr.vmem [resolvable:$false] %s4194_s17 }
  0x98   : > { %s4196_s16 = scalar_lea.vmem %s4195_s17, 1536  ;;  %p4197_p11 = scmp.lt.s32.totalorder %s4564_s1, %s4195_s17 }
  0x99   : > { %p4192_p7 = pnand %p4190_p13, %p7967_p3  ;;  %p4198_p2 = scmp.lt.s32.totalorder %s4196_s16, %s4189_s10 }
  0x9b   : > { %p4193_p1 = pneg %p4192_p7  ;;  %p4199_p8 = por %p4198_p2, %p4197_p11 }
  0x9d   : > { %p4200_p12 = pnand %p4199_p8, %p4193_p1 }
  0x9f   : > { %4203 = shalt.err (!%p4200_p12)
}
  0xa0   : > { %3930 = dma.hbm_to_vmem [thread:$0]  (!%p7968_p6), %s4561_s26, 768, %s4564_s1, %s317_s0, %s7970_s18, %s7970_s18, %s7969_s19  }
  0xa1   : > { %p7971_p3 = scmp.ne.s32.totalorder %s7963_s15, 0 }
  0xa3   : > { %339 = sbr.rel (%p7971_p3) target bundleno = 1166 (0x48e), region = 44 }
  0xaa   : > { %s341_s7 = sand.u32 1, %s4262_s22   ;;  %p7972_p5 = scmp.ne.s32.totalorder %s7962_s12, 0 }
  0xab   : > { %s3893_s27 = smul.u32 48, %s341_s7  ;;  %s342_s20 = scalar_lea.sflag [#allocation3], %s341_s7 }
  0xad   : > { %s4596_s30 = scalar_lea.vmem [#allocation2], %s3893_s27 }
  0xae   : > { %4237 = dma.done.wait (%p7972_p5), %s342_s20, 768  }
  0xaf   : > { %4239 = vsyncadd (%p7972_p5), %s342_s20, 4294966528  ;;  %s7973_s8 = sadd.s32 4294967295, %s4286_s28   ;;  %s4604_s18 = scalar_lea.vmem [#allocation5], %s3893_s27 }
  0xb0   : > { %s350_s11 = sand.u32 1, %s7973_s8  }
  0xb1   : > { %s351_s19 = scalar_lea.sflag [#allocation6], %s350_s11 }
  0xb2   : > { %4241 = dma.done.wait (%p7972_p5), %s351_s19, 1536  }
  0xb3   : > { %4243 = vsyncadd (%p7972_p5), %s351_s19, 4294965760  ;;  %s4610_s15 = scalar_lea.vmem [#allocation7], %s3893_s27  ;;  %s369_s26 = scalar_lea.sflag [#allocation9], %s341_s7 }
  0xb4   : > { %s4612_s1 = scalar_lea.vmem [#allocation8], %s3893_s27 }
  0xb5   : > { %4245 = dma.done.wait (%p7972_p5), %s369_s26, 768  }
  0xb6   : > { %4247 = vsyncadd (%p7972_p5), %s369_s26, 4294966528  ;;  %p7974_p6 = scmp.ne.s32.totalorder %s7961_s13, 0 }
  0xb8   : > { %4249 = dma.done.wait (%p7974_p6), [#allocation4], 64  }
  0xb9   : > { %4251 = vsyncadd (%p7974_p6), [#allocation4], 4294967232 }
  0xba   : > { %4253 = dma.done.wait (%p7974_p6), [#allocation12], 16  }
  0xbb   : > { %4255 = vsyncadd (%p7974_p6), [#allocation12], 4294967280 }
  0xbc   : > { %385 = sfence }
  0xbd   : > { %s4627_s0 = smul.u32 75, %s4270_s24  ;;  %v439_v0 = vld [vmem:[%s4596_s30] sm:$0xff]  ;;  %v440_v3 = vld [vmem:[%s4596_s30 + $0x8] sm:$0x3f]  ;;  %s4296_s17 = smov 127   ;;  %vm3630_vm0 = vcmask 113664  }
  0xbe   : > { %v4646_v8 = vld [vmem:[%s4604_s18] sm:$0xff]  ;;  %v4651_v10 = vld [vmem:[%s4604_s18 + $0x8] sm:$0x3f]  ;;  %s4297_s19 = smov 126   ;;  %p429_p0 = scmp.lt.s32.totalorder %s4274_s25, 1  ;;  %vm3632_vm1 = vcmask 111616  }
  0xbf   : > { %s456_s12 = sadd.s32 2, %s4627_s0  ;;  %s447_s29 = sadd.s32 1, %s4627_s0  ;;  %v4693_v28 = vld [vmem:[%s4612_s1] sm:$0xff]  ;;  %v4696_v29 = vld [vmem:[%s4612_s1 + $0x8] sm:$0x3f] }
  0xc0   : > { %s457_s9 = sld [smem:[#allocation10 + %s456_s12]]  ;;  %s483_s10 = sadd.s32 3, %s4627_s0  ;;  %v4713_v34 = vld [vmem:[%s4610_s15] sm:$0xff]  ;;  %v4718_v36 = vld [vmem:[%s4610_s15 + $0x8] sm:$0x3f] }
  0xc1   : > { %s448_s4 = sld [smem:[#allocation10 + %s447_s29]]  ;;  %s510_s13 = sadd.s32 4, %s4627_s0  ;;  %v4779_v58 = vld [vmem:[%s4604_s18 + $0x1] sm:$0xff] }
  0xc2   : > { %s484_s21 = sld [smem:[#allocation10 + %s483_s10]]  ;;  %s562_s27 = sadd.s32 6, %s4627_s0 }
  0xc3   : > { %s511_s16 = sld [smem:[#allocation10 + %s510_s13]]  ;;  %s579_s20 = sadd.s32 7, %s4627_s0 }
  0xc4   : > { %s441_s7 = sld [smem:[#allocation10 + %s4627_s0]]  ;;  %s630_s26 = sadd.s32 8, %s4627_s0 }
  0xc5   : > { %s563_s8 = sld [smem:[#allocation10 + %s562_s27]]  ;;  %s681_s29 = sadd.s32 9, %s4627_s0 }
  0xc6   : > { %v4633_v1 = vstv %s457_s9  ;;  %s580_s11 = sld [smem:[#allocation10 + %s579_s20]]  ;;  %s892_s27 = sadd.s32 14, %s4627_s0 }
  0xc7   : > { %v4635_v2 = vstv %s448_s4  ;;  %v459_v4 = vmul.f32 %v4633_v1, %v439_v0  ;;  %v460_v6 = vmul.f32 %v4633_v1, %v440_v3  ;;  %v498_v13 = vmul.f32 %v4633_v1, %v4646_v8  ;;  %s631_s12 = sld [smem:[#allocation10 + %s630_s26]]  ;;  %s790_s4 = sadd.s32 12, %s4627_s0 }
  0xc8   : > { %v471_v5 = vmul.f32 %v4635_v2, %v439_v0  ;;  %v472_v7 = vmul.f32 %v4635_v2, %v440_v3  ;;  %v4648_v9 = vstv %s484_s21  ;;  %v499_v14 = vmul.f32 %v4633_v1, %v4651_v10  ;;  %s682_s9 = sld [smem:[#allocation10 + %s681_s29]]  ;;  %s771_s21 = sadd.s32 11, %s4627_s0 }
  0xc9   : > { %463 = vrot.lane.b32.xlu0 %v459_v4, %s4296_s17  ;;  %v486_v11 = vmul.f32 %v4648_v9, %v4646_v8  ;;  %v487_v12 = vmul.f32 %v4648_v9, %v4651_v10  ;;  %v4667_v15 = vstv %s511_s16  ;;  %v450_v19 = vmul.f32 %v4635_v2, %v4646_v8  ;;  %s791_s10 = sld [smem:[#allocation10 + %s790_s4]]  ;;  %s841_s16 = sadd.s32 13, %s4627_s0 }
  0xca   : > { %475 = vrot.lane.b32.xlu1 %v471_v5, %s4296_s17  ;;  %v513_v16 = vmul.f32 %v4667_v15, %v439_v0  ;;  %v514_v17 = vmul.f32 %v4667_v15, %v440_v3  ;;  %v4674_v18 = vstv %s441_s7  ;;  %v451_v20 = vmul.f32 %v4635_v2, %v4651_v10  ;;  %s772_s13 = sld [smem:[#allocation10 + %s771_s21]]  ;;  %s1001_s26 = sadd.s32 17, %s4627_s0 }
  0xcb   : > { %v525_v21 = vmul.f32 %v4648_v9, %v439_v0  ;;  %v526_v22 = vmul.f32 %v4648_v9, %v440_v3  ;;  %v443_v23 = vmul.f32 %v4674_v18, %v439_v0  ;;  %v444_v24 = vmul.f32 %v4674_v18, %v440_v3  ;;  %s842_s7 = sld [smem:[#allocation10 + %s841_s16]]  ;;  %s982_s29 = sadd.s32 16, %s4627_s0 }
  0xcc   : > { %v537_v26 = vmul.f32 %v4667_v15, %v4646_v8  ;;  %v4690_v27 = vstv %s563_s8  ;;  %v538_v31 = vmul.f32 %v4667_v15, %v4651_v10  ;;  %v4715_v35 = vstv %s580_s11  ;;  %s893_s20 = sld [smem:[#allocation10 + %s892_s27]]  ;;  %s551_s8 = sadd.s32 5, %s4627_s0 }
  0xcd   : > { %465 = vrot.lane.b32.xlu0 %v460_v6, %s4296_s17  ;;  %v4686_v25 = vadd.f32 %v450_v19, %v443_v23  ;;  %v4698_v30 = vadd.f32 %v451_v20, %v444_v24  ;;  %v4706_v32 = vmul.f32 %v4690_v27, %v4693_v28  ;;  %v4710_v33 = vmul.f32 %v4690_v27, %v4696_v29  ;;  %v4844_v19 = vld [vmem:[%s4596_s30 + $0x9] sm:$0x3f]  ;;  %s552_s11 = sld [smem:[#allocation10 + %s551_s8]]  ;;  %s1052_s4 = sadd.s32 18, %s4627_s0 }
  0xce   : > { %477 = vrot.lane.b32.xlu1 %v472_v7, %s4296_s17  ;;  %v558_v37 = vmul.f32 %v4713_v34, %v4674_v18  ;;  %v582_v38 = vmul.f32 %v4715_v35, %v4713_v34  ;;  %v583_v39 = vmul.f32 %v4715_v35, %v4718_v36  ;;  %v573_v40 = vmul.f32 %v4693_v28, %v4635_v2  ;;  %s1103_s21 = sadd.s32 19, %s4627_s0  ;;  %s758_s16 = sadd.s32 10, %s4627_s0 }
  0xcf   : > { %v574_v41 = vmul.f32 %v4696_v29, %v4635_v2  ;;  %v559_v42 = vmul.f32 %v4718_v36, %v4674_v18  ;;  %v594_v45 = vmul.f32 %v4690_v27, %v4713_v34  ;;  %v595_v46 = vmul.f32 %v4690_v27, %v4718_v36  ;;  %s1212_s27 = sadd.s32 22, %s4627_s0  ;;  %s1193_s8 = sadd.s32 21, %s4627_s0 }
  0xd0   : > { %v4735_v43 = vadd.f32 %v573_v40, %v558_v37  ;;  %v606_v47 = vmul.f32 %v4713_v34, %v4633_v1  ;;  %v607_v48 = vmul.f32 %v4718_v36, %v4633_v1  ;;  %v618_v49 = vmul.f32 %v4713_v34, %v4635_v2  ;;  %p431_p10 = scmp.lt.s32.totalorder %s4270_s24, 5  ;;  %s8536_s25 = smov (!%p429_p0, %s4274_s25), 1 }
  0xd1   : > { %490 = vrot.lane.b32.xlu0 %v486_v11, %s4296_s17  ;;  %v4737_v44 = vadd.f32 %v574_v41, %v559_v42  ;;  %v619_v50 = vmul.f32 %v4718_v36, %v4635_v2  ;;  %v4757_v51 = vstv %s631_s12  ;;  %v645_v54 = vmul.f32 %v4715_v35, %v4693_v28  ;;  %v4800_v2 = vld [vmem:[%s4604_s18 + $0x9] sm:$0x3f]  ;;  %s1002_s12 = sld [smem:[#allocation10 + %s1001_s26]]  ;;  %s1263_s26 = sadd.s32 23, %s4627_s0 }
  0xd2   : > { %492 = vrot.lane.b32.xlu1 %v487_v12, %s4296_s17  ;;  %v633_v52 = vmul.f32 %v4757_v51, %v4693_v28  ;;  %v634_v53 = vmul.f32 %v4757_v51, %v4696_v29  ;;  %v646_v55 = vmul.f32 %v4715_v35, %v4696_v29  ;;  %v657_v56 = vmul.f32 %v4693_v28, %v4648_v9 }
  0xd3   : > { %v658_v57 = vmul.f32 %v4696_v29, %v4648_v9  ;;  %v669_v59 = vmul.f32 %v4693_v28, %v4633_v1  ;;  %v670_v60 = vmul.f32 %v4696_v29, %v4633_v1  ;;  %v4789_v61 = vmul.f32 %v4779_v58, %v4690_v27 }
  0xd4   : > { %v4791_v62 = vstv %s682_s9  ;;  %v4804_v1 = vmul.f32 %v4800_v2, %v4690_v27  ;;  %v696_v3 = vmul.f32 %v4757_v51, %v4713_v34  ;;  %v697_v4 = vmul.f32 %v4757_v51, %v4718_v36  ;;  %s983_s9 = sld [smem:[#allocation10 + %s982_s29]]  ;;  %s1314_s29 = sadd.s32 24, %s4627_s0 }
  0xd5   : > { %502 = vrot.lane.b32.xlu0 %v498_v13, %s4296_s17  ;;  %v684_v63 = vmul.f32 %v4791_v62, %v4713_v34  ;;  %v685_v0 = vmul.f32 %v4791_v62, %v4718_v36  ;;  %v708_v5 = vmul.f32 %v4713_v34, %v4667_v15  ;;  %v709_v6 = vmul.f32 %v4718_v36, %v4667_v15 }
  0xd6   : > { %504 = vrot.lane.b32.xlu1 %v499_v14, %s4296_s17  ;;  %v720_v7 = vmul.f32 %v4713_v34, %v4648_v9  ;;  %v721_v11 = vmul.f32 %v4718_v36, %v4648_v9  ;;  %v732_v12 = vmul.f32 %v4791_v62, %v4693_v28  ;;  %v733_v13 = vmul.f32 %v4791_v62, %v4696_v29 }
  0xd7   : > { %v744_v9 = vmul.f32 %v4693_v28, %v4667_v15  ;;  %v745_v14 = vmul.f32 %v4696_v29, %v4667_v15  ;;  %v830_v37 = vmul.f32 %v4844_v19, %v4690_v27  ;;  %v868_v42 = vmul.f32 %v4779_v58, %v4757_v51 }
  0xd9   : > { %517 = vrot.lane.b32.xlu0 %v513_v16, %s4297_s19  ;;  %v4839_v16 = vld [vmem:[%s4596_s30 + $0x1] sm:$0xff] }
  0xda   : > { %519 = vrot.lane.b32.xlu1 %v514_v17, %s4297_s19  ;;  %v4841_v17 = vstv %s791_s10  ;;  %v817_v24 = vmul.f32 %v4839_v16, %v4715_v35  ;;  %s1053_s10 = sld [smem:[#allocation10 + %s1052_s4]]  ;;  %s1489_s4 = smul.u32 3, %s4270_s24 }
  0xdb   : > { %v793_v20 = vmul.f32 %v4841_v17, %v4839_v16  ;;  %v857_v41 = vmul.f32 %v4841_v17, %v4800_v2 }
  0xdd   : > { %529 = vrot.lane.b32.xlu0 %v525_v21, %s4297_s19  ;;  %v794_v21 = vmul.f32 %v4841_v17, %v4844_v19 }
  0xde   : > { %531 = vrot.lane.b32.xlu1 %v526_v22, %s4297_s19  ;;  %v4852_v22 = vstv %s772_s13  ;;  %s1104_s13 = sld [smem:[#allocation10 + %s1103_s21]] }
  0xdf   : > { %v805_v15 = vmul.f32 %v4852_v22, %v4839_v16  ;;  %v806_v23 = vmul.f32 %v4852_v22, %v4844_v19 }
  0xe1   : > { %541 = vrot.lane.b32.xlu0 %v537_v26, %s4297_s19  ;;  %v818_v26 = vmul.f32 %v4844_v19, %v4715_v35 }
  0xe2   : > { %543 = vrot.lane.b32.xlu1 %v538_v31, %s4297_s19  ;;  %v829_v31 = vmul.f32 %v4839_v16, %v4690_v27  ;;  %v856_v27 = vmul.f32 %v4841_v17, %v4779_v58 }
  0xe5   : > { %586 = vrot.lane.b32.xlu0 %v582_v38, %s4296_s17  ;;  %v4873_v38 = vstv %s842_s7  ;;  %s759_s7 = sld [smem:[#allocation10 + %s758_s16]] }
  0xe6   : > { %588 = vrot.lane.b32.xlu1 %v583_v39, %s4296_s17  ;;  %v844_v39 = vmul.f32 %v4873_v38, %v4779_v58  ;;  %v845_v40 = vmul.f32 %v4873_v38, %v4800_v2 }
  0xe9   : > { %598 = vrot.lane.b32.xlu0 %v594_v45, %s4296_s17  ;;  %v869_v45 = vmul.f32 %v4800_v2, %v4757_v51 }
  0xea   : > { %600 = vrot.lane.b32.xlu1 %v595_v46, %s4296_s17  ;;  %v880_v46 = vmul.f32 %v4779_v58, %v4715_v35 }
  0xed   : > { %610 = vrot.lane.b32.xlu0 %v606_v47, %s4296_s17  ;;  %v881_v47 = vmul.f32 %v4800_v2, %v4715_v35  ;;  %v907_v35 = vmul.f32 %v4873_v38, %v4839_v16 }
  0xee   : > { %612 = vrot.lane.b32.xlu1 %v607_v48, %s4296_s17  ;;  %v4900_v48 = vstv %s893_s20  ;;  %s5103_s20 = sld [smem:[#allocation10 + %s1212_s27]] }
  0xf1   : > { %622 = vrot.lane.b32.xlu0 %v618_v49, %s4296_s17  ;;  %v895_v49 = vmul.f32 %v4900_v48, %v4839_v16 }
  0xf2   : > { %624 = vrot.lane.b32.xlu1 %v619_v50, %s4296_s17  ;;  %v896_v50 = vmul.f32 %v4900_v48, %v4844_v19 }
  0xf5   : > { %637 = vrot.lane.b32.xlu0 %v633_v52, %s4296_s17 }
  0xf6   : > { %639 = vrot.lane.b32.xlu1 %v634_v53, %s4296_s17 }
  0xf9   : > { %649 = vrot.lane.b32.xlu0 %v645_v54, %s4296_s17  ;;  %v908_v54 = vmul.f32 %v4873_v38, %v4844_v19 }
  0xfa   : > { %651 = vrot.lane.b32.xlu1 %v646_v55, %s4296_s17 }
  0xfd   : > { %661 = vrot.lane.b32.xlu0 %v657_v56, %s4296_s17 }
  0xfe   : > { %663 = vrot.lane.b32.xlu1 %v658_v57, %s4296_s17  ;;  %v919_v57 = vmul.f32 %v4839_v16, %v4791_v62 }
 0x101   : > { %673 = vrot.lane.b32.xlu0 %v669_v59, %s4296_s17  ;;  %v920_v59 = vmul.f32 %v4844_v19, %v4791_v62 }
 0x102   : > { %675 = vrot.lane.b32.xlu1 %v670_v60, %s4296_s17 }
 0x105   : > { %688 = vrot.lane.b32.xlu0 %v684_v63, %s4297_s19 }
 0x106   : > { %690 = vrot.lane.b32.xlu1 %v685_v0, %s4297_s19  ;;  %v931_v0 = vmul.f32 %v4839_v16, %v4757_v51 }
 0x109   : > { %700 = vrot.lane.b32.xlu0 %v696_v3, %s4297_s19  ;;  %v932_v3 = vmul.f32 %v4844_v19, %v4757_v51  ;;  %v943_v51 = vmul.f32 %v4900_v48, %v4779_v58 }
 0x10a   : > { %702 = vrot.lane.b32.xlu1 %v697_v4, %s4297_s19 }
 0x10d   : > { %712 = vrot.lane.b32.xlu0 %v708_v5, %s4297_s19 }
 0x10e   : > { %714 = vrot.lane.b32.xlu1 %v709_v6, %s4297_s19  ;;  %v4928_v6 = vstv %s552_s11  ;;  %s5120_s11 = sld [smem:[#allocation10 + %s1193_s8]] }
 0x111   : > { %724 = vrot.lane.b32.xlu0 %v720_v7, %s4297_s19 }
 0x112   : > { %726 = vrot.lane.b32.xlu1 %v721_v11, %s4297_s19  ;;  %v454_v11 = vmul.f32 %v4646_v8, %v4674_v18  ;;  %v554_v8 = vmul.f32 %v4928_v6, %v4713_v34  ;;  %v956_v34 = vmul.f32 %v4800_v2, %v4791_v62 }
 0x115   : > { %736 = vrot.lane.b32.xlu0 %v732_v12, %s4297_s19 }
 0x116   : > { %738 = vrot.lane.b32.xlu1 %v733_v13, %s4297_s19  ;;  %v455_v13 = vmul.f32 %v4651_v10, %v4674_v18 }
 0x119   : > { %748 = vrot.lane.b32.xlu0 %v744_v9, %s4297_s19  ;;  %v944_v9 = vmul.f32 %v4900_v48, %v4800_v2 }
 0x11a   : > { %750 = vrot.lane.b32.xlu1 %v745_v14, %s4297_s19 }
 0x11d   : > { %797 = vrot.lane.b32.xlu0 %v793_v20, %s4296_s17 }
 0x11e   : > { %799 = vrot.lane.b32.xlu1 %v794_v21, %s4296_s17 }
 0x121   : > { %809 = vrot.lane.b32.xlu0 %v805_v15, %s4296_s17 }
 0x122   : > { %811 = vrot.lane.b32.xlu1 %v806_v23, %s4296_s17  ;;  %v955_v23 = vmul.f32 %v4779_v58, %v4791_v62 }
 0x125   : > { %821 = vrot.lane.b32.xlu0 %v817_v24, %s4296_s17  ;;  %v4953_v24 = vstv %s1002_s12  ;;  %s1264_s12 = sld [smem:[#allocation10 + %s1263_s26]] }
 0x126   : > { %823 = vrot.lane.b32.xlu1 %v818_v26, %s4296_s17 }
 0x129   : > { %833 = vrot.lane.b32.xlu0 %v829_v31, %s4296_s17 }
 0x12a   : > { %835 = vrot.lane.b32.xlu1 %v830_v37, %s4296_s17 }
 0x12d   : > { %848 = vrot.lane.b32.xlu0 %v844_v39, %s4296_s17  ;;  %v4956_v39 = vld [vmem:[%s4610_s15 + $0x1] sm:$0xff] }
 0x12e   : > { %850 = vrot.lane.b32.xlu1 %v845_v40, %s4296_s17  ;;  %v4959_v40 = vld [vmem:[%s4610_s15 + $0x9] sm:$0x3f] }
 0x131   : > { %860 = vrot.lane.b32.xlu0 %v856_v27, %s4296_s17 }
 0x132   : > { %862 = vrot.lane.b32.xlu1 %v857_v41, %s4296_s17 }
 0x135   : > { %872 = vrot.lane.b32.xlu0 %v868_v42, %s4296_s17 }
 0x136   : > { %874 = vrot.lane.b32.xlu1 %v869_v45, %s4296_s17 }
 0x139   : > { %884 = vrot.lane.b32.xlu0 %v880_v46, %s4296_s17 }
 0x13a   : > { %886 = vrot.lane.b32.xlu1 %v881_v47, %s4296_s17  ;;  %v569_v47 = vmul.f32 %v4693_v28, %v4928_v6 }
 0x13b   : > { %v464_v52 = vpop.permute.xlu0 %463 }
 0x13c   : > { %v476_v53 = vpop.permute.xlu1 %475  ;;  %v469_v7 = vadd.f32 %v464_v52, %v4686_v25 }
 0x13d   : > { %899 = vrot.lane.b32.xlu0 %v895_v49, %s4297_s19  ;;  %v481_v26 = vadd.f32 %v476_v53, %v454_v11  ;;  %v1004_v49 = vmul.f32 %v4953_v24, %v4956_v39 }
 0x13e   : > { %901 = vrot.lane.b32.xlu1 %v896_v50, %s4297_s19  ;;  %v1005_v50 = vmul.f32 %v4953_v24, %v4959_v40 }
 0x13f   : > { %v466_v55 = vpop.permute.xlu0 %465 }
 0x140   : > { %v478_v56 = vpop.permute.xlu1 %477  ;;  %v470_v12 = vadd.f32 %v466_v55, %v4698_v30  ;;  %v555_v30 = vmul.f32 %v4928_v6, %v4718_v36 }
 0x141   : > { %911 = vrot.lane.b32.xlu0 %v907_v35, %s4297_s19  ;;  %v482_v36 = vadd.f32 %v478_v56, %v455_v13  ;;  %v1041_v13 = vmul.f32 %v4959_v40, %v4852_v22 }
 0x142   : > { %913 = vrot.lane.b32.xlu1 %v908_v54, %s4297_s19 }
 0x143   : > { %v491_v60 = vpop.permute.xlu0 %490 }
 0x144   : > { %v493_v63 = vpop.permute.xlu1 %492  ;;  %v496_v14 = vadd.f32 %v491_v60, %v469_v7 }
 0x145   : > { %923 = vrot.lane.b32.xlu0 %v919_v57, %s4297_s19  ;;  %v497_v25 = vadd.f32 %v493_v63, %v470_v12  ;;  %v1040_v12 = vmul.f32 %v4956_v39, %v4852_v22 }
 0x146   : > { %925 = vrot.lane.b32.xlu1 %v920_v59, %s4297_s19 }
 0x147   : > { %v503_v4 = vpop.permute.xlu0 %502 }
 0x148   : > { %v505_v5 = vpop.permute.xlu1 %504  ;;  %v508_v42 = vadd.f32 %v503_v4, %v481_v26  ;;  %v1028_v4 = vmul.f32 %v4956_v39, %v4841_v17 }
 0x149   : > { %935 = vrot.lane.b32.xlu0 %v931_v0, %s4297_s19  ;;  %v509_v45 = vadd.f32 %v505_v5, %v482_v36  ;;  %v1029_v5 = vmul.f32 %v4959_v40, %v4841_v17 }
 0x14a   : > { %937 = vrot.lane.b32.xlu1 %v932_v3, %s4297_s19 }
 0x14b   : > { %v518_v10 = vpop.permute.xlu0 %517 }
 0x14c   : > { %v520_v20 = vpop.permute.xlu1 %519  ;;  %v523_v21 = vadd.f32 %v518_v10, %v496_v14  ;;  %v5012_v14 = vld [vmem:[%s4612_s1 + $0x9] sm:$0x3f] }
 0x14d   : > { %v524_v15 = vadd.f32 %v520_v20, %v497_v25  ;;  %947 = vrot.lane.b32.xlu0 %v943_v51, %s4297_s19  ;;  %v5007_v51 = vld [vmem:[%s4612_s1 + $0x1] sm:$0xff] }
 0x14e   : > { %949 = vrot.lane.b32.xlu1 %v944_v9, %s4297_s19  ;;  %v556_v31 = vadd.f32 %v554_v8, %v523_v21  ;;  %v5009_v9 = vstv %s1053_s10  ;;  %v1079_v36 = vmul.f32 %v5007_v51, %v4873_v38  ;;  %s1490_s10 = sadd.s32 1, %s1489_s4 }
 0x14f   : > { %v557_v37 = vadd.f32 %v555_v30, %v524_v15  ;;  %v530_v27 = vpop.permute.xlu0 %529  ;;  %v1055_v30 = vmul.f32 %v5009_v9, %v5007_v51  ;;  %v1056_v10 = vmul.f32 %v5009_v9, %v5012_v14  ;;  %v1067_v15 = vmul.f32 %v4953_v24, %v5007_v51  ;;  %s5351_s21 = smul.u32 25, %s1490_s10 }
 0x150   : > { %v532_v41 = vpop.permute.xlu1 %531  ;;  %v4962_v46 = vadd.f32 %v4706_v32, %v556_v31  ;;  %v535_v52 = vadd.f32 %v530_v27, %v508_v42  ;;  %v570_v32 = vmul.f32 %v4696_v29, %v4928_v6  ;;  %v1080_v31 = vmul.f32 %v5012_v14, %v4873_v38 }
 0x151   : > { %v4965_v62 = vadd.f32 %v4710_v33, %v557_v37  ;;  %959 = vrot.lane.b32.xlu0 %v955_v23, %s4297_s19  ;;  %v536_v53 = vadd.f32 %v532_v41, %v509_v45  ;;  %v4977_v33 = vstv %s983_s9  ;;  %v1068_v23 = vmul.f32 %v4953_v24, %v5012_v14  ;;  %s1315_s9 = sld [smem:[#allocation10 + %s1314_s29]] }
 0x152   : > { %961 = vrot.lane.b32.xlu1 %v956_v34, %s4297_s19  ;;  %v1016_v57 = vmul.f32 %v4977_v33, %v4956_v39  ;;  %v1017_v59 = vmul.f32 %v4977_v33, %v4959_v40  ;;  %v1091_v41 = vmul.f32 %v5007_v51, %v4841_v17  ;;  %v1092_v42 = vmul.f32 %v5012_v14, %v4841_v17 }
 0x153   : > { %v542_v35 = vpop.permute.xlu0 %541  ;;  %v5052_v45 = vstv %s1104_s13  ;;  %s1515_s13 = sadd.s32 2, %s5351_s21 }
 0x154   : > { %v544_v54 = vpop.permute.xlu1 %543  ;;  %v547_v55 = vadd.f32 %v542_v35, %v535_v52  ;;  %v1107_v52 = vmul.f32 %v5052_v45, %v4959_v40  ;;  %v5064_v35 = vstv %s759_s7  ;;  %s1516_s16 = sld [smem:[#allocation10 + %s1515_s13]]  ;;  %s1504_s7 = sadd.s32 1, %s5351_s21 }
 0x155   : > { %v548_v56 = vadd.f32 %v544_v54, %v536_v53  ;;  %1008 = vrot.lane.b32.xlu0 %v1004_v49, %s4296_s17  ;;  %s1505_s27 = sld [smem:[#allocation10 + %s1504_s7]]  ;;  %s1695_s13 = sadd.s32 8, %s5351_s21 }
 0x156   : > { %1010 = vrot.lane.b32.xlu1 %v1005_v50, %s4296_s17  ;;  %v4986_v60 = vadd.f32 %v569_v47, %v547_v55  ;;  %v1106_v50 = vmul.f32 %v5052_v45, %v4956_v39  ;;  %v1118_v55 = vmul.f32 %v5009_v9, %v4956_v39  ;;  %s1746_s7 = sadd.s32 9, %s5351_s21 }
 0x157   : > { %v4988_v63 = vadd.f32 %v570_v32, %v548_v56  ;;  %v587_v0 = vpop.permute.xlu0 %586  ;;  %v1119_v56 = vmul.f32 %v5009_v9, %v4959_v40 }
 0x158   : > { %v589_v3 = vpop.permute.xlu1 %588  ;;  %v592_v17 = vadd.f32 %v587_v0, %v4962_v46  ;;  %v762_v46 = vmul.f32 %v5064_v35, %v4844_v19 }
 0x159   : > { %1020 = vrot.lane.b32.xlu0 %v1016_v57, %s4296_s17  ;;  %v593_v54 = vadd.f32 %v589_v3, %v4965_v62  ;;  %v774_v3 = vmul.f32 %v4852_v22, %v4779_v58 }
 0x15a   : > { %1022 = vrot.lane.b32.xlu1 %v1017_v59, %s4296_s17 }
 0x15b   : > { %v4996_v7 = vpop.permute.xlu0 %598 }
 0x15c   : > { %v4998_v11 = vpop.permute.xlu1 %600 }
 0x15d   : > { %1032 = vrot.lane.b32.xlu0 %v1028_v4, %s4296_s17  ;;  %v761_v4 = vmul.f32 %v5064_v35, %v4839_v16 }
 0x15e   : > { %1034 = vrot.lane.b32.xlu1 %v1029_v5, %s4296_s17 }
 0x15f   : > { %v5014_v25 = vpop.permute.xlu0 %610 }
 0x160   : > { %v5016_v8 = vpop.permute.xlu1 %612 }
 0x161   : > { %1044 = vrot.lane.b32.xlu0 %v1040_v12, %s4296_s17  ;;  %v775_v12 = vmul.f32 %v4852_v22, %v4800_v2 }
 0x162   : > { %1046 = vrot.lane.b32.xlu1 %v1041_v13, %s4296_s17 }
 0x163   : > { %v5024_v20 = vpop.permute.xlu0 %622 }
 0x164   : > { %v5026_v21 = vpop.permute.xlu1 %624 }
 0x165   : > { %1059 = vrot.lane.b32.xlu0 %v1055_v30, %s4296_s17  ;;  %v1130_v30 = vmul.f32 %v4956_v39, %v4900_v48 }
 0x166   : > { %1061 = vrot.lane.b32.xlu1 %v1056_v10, %s4296_s17  ;;  %v1131_v10 = vmul.f32 %v4959_v40, %v4900_v48 }
 0x167   : > { %v638_v34 = vpop.permute.xlu0 %637 }
 0x168   : > { %v640_v26 = vpop.permute.xlu1 %639  ;;  %v643_v57 = vadd.f32 %v638_v34, %v592_v17 }
 0x169   : > { %1071 = vrot.lane.b32.xlu0 %v1067_v15, %s4296_s17  ;;  %v644_v59 = vadd.f32 %v640_v26, %v593_v54 }
 0x16a   : > { %1073 = vrot.lane.b32.xlu1 %v1068_v23, %s4296_s17 }
 0x16b   : > { %v5042_v37 = vpop.permute.xlu0 %649 }
 0x16c   : > { %v5044_v27 = vpop.permute.xlu1 %651 }
 0x16d   : > { %1083 = vrot.lane.b32.xlu0 %v1079_v36, %s4296_s17  ;;  %v616_v36 = vadd.f32 %v5014_v25, %v4735_v43 }
 0x16e   : > { %1085 = vrot.lane.b32.xlu1 %v1080_v31, %s4296_s17  ;;  %v617_v31 = vadd.f32 %v5016_v8, %v4737_v44  ;;  %v765_v44 = vmul.f32 %v4839_v16, %v4928_v6  ;;  %v766_v8 = vmul.f32 %v4844_v19, %v4928_v6  ;;  %v1154_v16 = vmul.f32 %v5052_v45, %v5007_v51 }
 0x16f   : > { %v662_v47 = vpop.permute.xlu0 %661  ;;  %v1155_v19 = vmul.f32 %v5052_v45, %v5012_v14 }
 0x170   : > { %v664_v49 = vpop.permute.xlu1 %663  ;;  %v667_v43 = vadd.f32 %v662_v47, %v616_v36 }
 0x171   : > { %1095 = vrot.lane.b32.xlu0 %v1091_v41, %s4296_s17  ;;  %v668_v25 = vadd.f32 %v664_v49, %v617_v31 }
 0x172   : > { %1097 = vrot.lane.b32.xlu1 %v1092_v42, %s4296_s17 }
 0x173   : > { %v5060_v53 = vpop.permute.xlu0 %673 }
 0x174   : > { %v5062_v32 = vpop.permute.xlu1 %675 }
 0x175   : > { %1110 = vrot.lane.b32.xlu0 %v1106_v50, %s4297_s19  ;;  %v1142_v50 = vmul.f32 %v4956_v39, %v4873_v38 }
 0x176   : > { %1112 = vrot.lane.b32.xlu1 %v1107_v52, %s4297_s19  ;;  %v1143_v52 = vmul.f32 %v4959_v40, %v4873_v38  ;;  %v578_v38 = vmul.f32 %v4696_v29, %v4674_v18  ;;  %v605_v40 = vadd.f32 %v4998_v11, %v4988_v63  ;;  %v779_v63 = vmul.f32 %v4800_v2, %v5064_v35 }
 0x177   : > { %v689_v62 = vpop.permute.xlu0 %688  ;;  %v1167_v11 = vmul.f32 %v5012_v14, %v4900_v48 }
 0x178   : > { %v691_v0 = vpop.permute.xlu1 %690  ;;  %v694_v5 = vadd.f32 %v689_v62, %v643_v57  ;;  %v778_v57 = vmul.f32 %v4779_v58, %v5064_v35 }
 0x179   : > { %v695_v13 = vadd.f32 %v691_v0, %v644_v59  ;;  %1122 = vrot.lane.b32.xlu0 %v1118_v55, %s4297_s19  ;;  %v577_v55 = vmul.f32 %v4693_v28, %v4674_v18  ;;  %v604_v28 = vadd.f32 %v4996_v7, %v4986_v60  ;;  %v1166_v7 = vmul.f32 %v5007_v51, %v4900_v48  ;;  %v5150_v0 = vld [vmem:[%s4596_s30 + $0x2] sm:$0xff] }
 0x17a   : > { %1124 = vrot.lane.b32.xlu1 %v1119_v56, %s4297_s19  ;;  %v763_v15 = vadd.f32 %v761_v4, %v694_v5  ;;  %v656_v4 = vadd.f32 %v5044_v27, %v605_v40  ;;  %v786_v51 = vmul.f32 %v4779_v58, %v4928_v6 }
 0x17b   : > { %v764_v23 = vadd.f32 %v762_v46, %v695_v13  ;;  %v701_v34 = vpop.permute.xlu0 %700  ;;  %v655_v59 = vadd.f32 %v5042_v37, %v604_v28  ;;  %v5145_v37 = vstv %s5103_s20  ;;  %s1542_s20 = sadd.s32 3, %s5351_s21 }
 0x17c   : > { %v703_v26 = vpop.permute.xlu1 %702  ;;  %v5093_v41 = vadd.f32 %v774_v3, %v763_v15  ;;  %v5153_v3 = vld [vmem:[%s4596_s30 + $0xa] sm:$0x3f]  ;;  %s1543_s8 = sld [smem:[#allocation10 + %s1542_s20]]  ;;  %s1855_s20 = sadd.s32 12, %s5351_s21 }
 0x17d   : > { %v5095_v42 = vadd.f32 %v775_v12, %v764_v23  ;;  %1134 = vrot.lane.b32.xlu0 %v1130_v30, %s4297_s19  ;;  %v706_v27 = vadd.f32 %v701_v34, %v655_v59  ;;  %v707_v62 = vadd.f32 %v703_v26, %v656_v4  ;;  %v1215_v30 = vmul.f32 %v5145_v37, %v5150_v0 }
 0x17e   : > { %1136 = vrot.lane.b32.xlu1 %v1131_v10, %s4297_s19  ;;  %v1216_v58 = vmul.f32 %v5145_v37, %v5153_v3  ;;  %v5168_v10 = vstv %s5120_s11  ;;  %s1569_s11 = sadd.s32 4, %s5351_s21 }
 0x17f   : > { %v713_v17 = vpop.permute.xlu0 %712  ;;  %s1570_s26 = sld [smem:[#allocation10 + %s1569_s11]]  ;;  %s1836_s11 = sadd.s32 11, %s5351_s21 }
 0x180   : > { %v715_v54 = vpop.permute.xlu1 %714  ;;  %v718_v39 = vadd.f32 %v713_v17, %v667_v43 }
 0x181   : > { %v719_v56 = vadd.f32 %v715_v54, %v668_v25  ;;  %1146 = vrot.lane.b32.xlu0 %v1142_v50, %s4297_s19 }
 0x182   : > { %1148 = vrot.lane.b32.xlu1 %v1143_v52, %s4297_s19  ;;  %v767_v18 = vadd.f32 %v765_v44, %v718_v39  ;;  %v1239_v44 = vmul.f32 %v5150_v0, %v4953_v24  ;;  %v1252_v39 = vmul.f32 %v5153_v3, %v4977_v33 }
 0x183   : > { %v768_v29 = vadd.f32 %v766_v8, %v719_v56  ;;  %v725_v47 = vpop.permute.xlu0 %724  ;;  %v1240_v8 = vmul.f32 %v5153_v3, %v4953_v24  ;;  %v5206_v56 = vld [vmem:[%s4604_s18 + $0x2] sm:$0xff] }
 0x184   : > { %v727_v49 = vpop.permute.xlu1 %726  ;;  %v5131_v46 = vadd.f32 %v4789_v61, %v767_v18  ;;  %v628_v61 = vadd.f32 %v5024_v20, %v577_v55  ;;  %v1251_v55 = vmul.f32 %v5150_v0, %v4977_v33 }
 0x185   : > { %v5134_v60 = vadd.f32 %v4804_v1, %v768_v29  ;;  %1158 = vrot.lane.b32.xlu0 %v1154_v16, %s4297_s19  ;;  %v629_v1 = vadd.f32 %v5026_v21, %v578_v38  ;;  %v787_v21 = vmul.f32 %v4800_v2, %v4928_v6  ;;  %v1227_v2 = vmul.f32 %v5168_v10, %v5150_v0  ;;  %v5211_v16 = vld [vmem:[%s4604_s18 + $0xa] sm:$0x3f] }
 0x186   : > { %1160 = vrot.lane.b32.xlu1 %v1155_v19, %s4297_s19  ;;  %v679_v48 = vadd.f32 %v5060_v53, %v628_v61  ;;  %v1228_v6 = vmul.f32 %v5168_v10, %v5153_v3  ;;  %v5208_v38 = vstv %s1264_s12  ;;  %s1644_s12 = sadd.s32 7, %s5351_s21 }
 0x187   : > { %v737_v5 = vpop.permute.xlu0 %736  ;;  %v680_v14 = vadd.f32 %v5062_v32, %v629_v1  ;;  %v1266_v40 = vmul.f32 %v5208_v38, %v5206_v56  ;;  %v1267_v18 = vmul.f32 %v5208_v38, %v5211_v16  ;;  %v1302_v1 = vmul.f32 %v5206_v56, %v4953_v24  ;;  %s1645_s29 = sld [smem:[#allocation10 + %s1644_s12]]  ;;  %s1906_s12 = sadd.s32 13, %s5351_s21 }
 0x188   : > { %v739_v12 = vpop.permute.xlu1 %738  ;;  %v742_v20 = vadd.f32 %v737_v5, %v706_v27  ;;  %v730_v53 = vadd.f32 %v725_v47, %v679_v48  ;;  %v1303_v27 = vmul.f32 %v5211_v16, %v4953_v24  ;;  %v1329_v24 = vmul.f32 %v5208_v38, %v5150_v0 }
 0x189   : > { %v743_v13 = vadd.f32 %v739_v12, %v707_v62  ;;  %1170 = vrot.lane.b32.xlu0 %v1166_v7, %s4297_s19  ;;  %v731_v15 = vadd.f32 %v727_v49, %v680_v14  ;;  %v1278_v49 = vmul.f32 %v5145_v37, %v5206_v56  ;;  %v1291_v7 = vmul.f32 %v5211_v16, %v5009_v9 }
 0x18a   : > { %1172 = vrot.lane.b32.xlu1 %v1167_v11, %s4297_s19  ;;  %v5170_v32 = vadd.f32 %v778_v57, %v742_v20  ;;  %v1279_v57 = vmul.f32 %v5145_v37, %v5211_v16  ;;  %v5254_v62 = vstv %s1315_s9  ;;  %s1625_s9 = sadd.s32 6, %s5351_s21 }
 0x18b   : > { %v5172_v23 = vadd.f32 %v779_v63, %v743_v13  ;;  %v749_v34 = vpop.permute.xlu0 %748  ;;  %v1290_v63 = vmul.f32 %v5206_v56, %v5009_v9  ;;  %v1318_v48 = vmul.f32 %v5254_v62, %v5153_v3  ;;  %v1330_v13 = vmul.f32 %v5208_v38, %v5153_v3  ;;  %s1626_s10 = sld [smem:[#allocation10 + %s1625_s9]]  ;;  %s1957_s9 = sadd.s32 14, %s5351_s21 }
 0x18c   : > { %v751_v26 = vpop.permute.xlu1 %750  ;;  %v754_v36 = vadd.f32 %v749_v34, %v730_v53  ;;  %v1342_v53 = vmul.f32 %v5153_v3, %v5052_v45 }
 0x18d   : > { %v755_v31 = vadd.f32 %v751_v26, %v731_v15  ;;  %1219 = vrot.lane.b32.xlu0 %v1215_v30, %s4296_s17  ;;  %v1353_v26 = vmul.f32 %v5150_v0, %v5009_v9 }
 0x18e   : > { %1221 = vrot.lane.b32.xlu1 %v1216_v58, %s4296_s17  ;;  %v5181_v50 = vadd.f32 %v786_v51, %v754_v36  ;;  %v1317_v51 = vmul.f32 %v5254_v62, %v5150_v0  ;;  %v1341_v58 = vmul.f32 %v5150_v0, %v5052_v45  ;;  %v1354_v36 = vmul.f32 %v5153_v3, %v5009_v9 }
 0x18f   : > { %v5183_v52 = vadd.f32 %v787_v21, %v755_v31  ;;  %v5185_v43 = vpop.permute.xlu0 %797  ;;  %v1377_v9 = vmul.f32 %v5206_v56, %v5052_v45  ;;  %v1378_v3 = vmul.f32 %v5211_v16, %v5052_v45 }
 0x190   : > { %v5187_v25 = vpop.permute.xlu1 %799 }
 0x191   : > { %1231 = vrot.lane.b32.xlu0 %v1227_v2, %s4296_s17 }
 0x192   : > { %1233 = vrot.lane.b32.xlu1 %v1228_v6, %s4296_s17  ;;  %v1365_v6 = vmul.f32 %v5254_v62, %v5206_v56 }
 0x193   : > { %v5195_v17 = vpop.permute.xlu0 %809 }
 0x194   : > { %v5197_v54 = vpop.permute.xlu1 %811 }
 0x195   : > { %1243 = vrot.lane.b32.xlu0 %v1239_v44, %s4296_s17  ;;  %v1366_v44 = vmul.f32 %v5254_v62, %v5211_v16 }
 0x196   : > { %1245 = vrot.lane.b32.xlu1 %v1240_v8, %s4296_s17 }
 0x197   : > { %v5213_v19 = vpop.permute.xlu0 %821 }
 0x198   : > { %v5215_v28 = vpop.permute.xlu1 %823 }
 0x199   : > { %1255 = vrot.lane.b32.xlu0 %v1251_v55, %s4296_s17  ;;  %v1389_v55 = vld [vmem:[%s4610_s15 + $0x2] sm:$0xff] }
 0x19a   : > { %1257 = vrot.lane.b32.xlu1 %v1252_v39, %s4296_s17  ;;  %v1390_v39 = vld [vmem:[%s4610_s15 + $0xa] sm:$0x3f]  ;;  %v1417_v16 = vmul.f32 %v1389_v55, %v5168_v10 }
 0x19b   : > { %v5223_v29 = vpop.permute.xlu0 %833  ;;  %v1406_v56 = vmul.f32 %v1390_v39, %v5145_v37 }
 0x19c   : > { %v5225_v47 = vpop.permute.xlu1 %835 }
 0x19d   : > { %1270 = vrot.lane.b32.xlu0 %v1266_v40, %s4296_s17 }
 0x19e   : > { %1272 = vrot.lane.b32.xlu1 %v1267_v18, %s4296_s17 }
 0x19f   : > { %v5234_v59 = vpop.permute.xlu0 %848 }
 0x1a0   : > { %v5236_v4 = vpop.permute.xlu1 %850 }
 0x1a1   : > { %1282 = vrot.lane.b32.xlu0 %v1278_v49, %s4296_s17  ;;  %v1405_v49 = vmul.f32 %v1389_v55, %v5145_v37 }
 0x1a2   : > { %1284 = vrot.lane.b32.xlu1 %v1279_v57, %s4296_s17 }
 0x1a3   : > { %v5244_v11 = vpop.permute.xlu0 %860 }
 0x1a4   : > { %v5246_v61 = vpop.permute.xlu1 %862 }
 0x1a5   : > { %1294 = vrot.lane.b32.xlu0 %v1290_v63, %s4296_s17  ;;  %v1418_v63 = vmul.f32 %v1390_v39, %v5168_v10 }
 0x1a6   : > { %1296 = vrot.lane.b32.xlu1 %v1291_v7, %s4296_s17  ;;  %v1395_v7 = vld [vmem:[%s4612_s1 + $0x2] sm:$0xff] }
 0x1a7   : > { %v5256_v5 = vpop.permute.xlu0 %872 }
 0x1a8   : > { %v5258_v12 = vpop.permute.xlu1 %874 }
 0x1a9   : > { %1306 = vrot.lane.b32.xlu0 %v1302_v1, %s4296_s17  ;;  %v1396_v1 = vld [vmem:[%s4612_s1 + $0xa] sm:$0x3f] }
 0x1aa   : > { %1308 = vrot.lane.b32.xlu1 %v1303_v27, %s4296_s17 }
 0x1ab   : > { %v5266_v14 = vpop.permute.xlu0 %884 }
 0x1ac   : > { %v5268_v20 = vpop.permute.xlu1 %886 }
 0x1ad   : > { %1321 = vrot.lane.b32.xlu0 %v1317_v51, %s4297_s19 }
 0x1ae   : > { %1323 = vrot.lane.b32.xlu1 %v1318_v48, %s4297_s19  ;;  %v1429_v48 = vmul.f32 %v1395_v7, %v5208_v38 }
 0x1af   : > { %v5276_v21 = vpop.permute.xlu0 %899 }
 0x1b0   : > { %v5278_v30 = vpop.permute.xlu1 %901 }
 0x1b1   : > { %1333 = vrot.lane.b32.xlu0 %v1329_v24, %s4297_s19  ;;  %v1430_v24 = vmul.f32 %v1396_v1, %v5208_v38 }
 0x1b2   : > { %1335 = vrot.lane.b32.xlu1 %v1330_v13, %s4297_s19 }
 0x1b3   : > { %v5286_v15 = vpop.permute.xlu0 %911 }
 0x1b4   : > { %v5288_v34 = vpop.permute.xlu1 %913 }
 0x1b5   : > { %1345 = vrot.lane.b32.xlu0 %v1341_v58, %s4297_s19 }
 0x1b6   : > { %1347 = vrot.lane.b32.xlu1 %v1342_v53, %s4297_s19  ;;  %v1441_v53 = vmul.f32 %v1395_v7, %v5145_v37 }
 0x1b7   : > { %v5296_v31 = vpop.permute.xlu0 %923 }
 0x1b8   : > { %v5298_v2 = vpop.permute.xlu1 %925 }
 0x1b9   : > { %1357 = vrot.lane.b32.xlu0 %v1353_v26, %s4297_s19  ;;  %v1442_v26 = vmul.f32 %v1396_v1, %v5145_v37  ;;  %v1465_v37 = vmul.f32 %v1389_v55, %v5208_v38 }
 0x1ba   : > { %1359 = vrot.lane.b32.xlu1 %v1354_v36, %s4297_s19 }
 0x1bb   : > { %v5306_v8 = vpop.permute.xlu0 %935 }
 0x1bc   : > { %v5308_v0 = vpop.permute.xlu1 %937 }
 0x1bd   : > { %1369 = vrot.lane.b32.xlu0 %v1365_v6, %s4297_s19 }
 0x1be   : > { %1371 = vrot.lane.b32.xlu1 %v1366_v44, %s4297_s19  ;;  %v1453_v44 = vmul.f32 %v1389_v55, %v5254_v62  ;;  %v3836_v55 = vld [vmem:[%s4596_s30 + $0x18] sm:$0x3f] }
 0x1bf   : > { %v5318_v40 = vpop.permute.xlu0 %947 }
 0x1c0   : > { %v5320_v18 = vpop.permute.xlu1 %949 }
 0x1c1   : > { %1381 = vrot.lane.b32.xlu0 %v1377_v9, %s4297_s19  ;;  %v1454_v9 = vmul.f32 %v1390_v39, %v5254_v62 }
 0x1c2   : > { %1383 = vrot.lane.b32.xlu1 %v1378_v3, %s4297_s19 }
 0x1c3   : > { %v5326_v57 = vpop.permute.xlu0 %959 }
 0x1c4   : > { %7975 = vst [vmem:[#allocation22_spill] sm:$0xff] %v5326_v57  ;;  %v5328_v45 = vpop.permute.xlu1 %961 }
 0x1c5   : > { %7976 = vst [vmem:[#allocation23_spill] sm:$0xff] %v5328_v45  ;;  %1409 = vrot.lane.b32.xlu0 %v1405_v49, %s4296_s17 }
 0x1c6   : > { %1411 = vrot.lane.b32.xlu1 %v1406_v56, %s4296_s17  ;;  %v1466_v56 = vmul.f32 %v1390_v39, %v5208_v38 }
 0x1c7   : > { %v5337_v27 = vpop.permute.xlu0 %1008 }
 0x1c8   : > { %7977 = vst [vmem:[#allocation24_spill] sm:$0xff] %v5337_v27  ;;  %v5339_v51 = vpop.permute.xlu1 %1010 }
 0x1c9   : > { %7978 = vst [vmem:[#allocation25_spill] sm:$0xff] %v5339_v51  ;;  %1421 = vrot.lane.b32.xlu0 %v1417_v16, %s4296_s17  ;;  %v4009_v51 = vld [vmem:[%s4612_s1 + $0x9] sm:$0x3f] }
 0x1ca   : > { %1423 = vrot.lane.b32.xlu1 %v1418_v63, %s4296_s17 }
 0x1cb   : > { %v5347_v13 = vpop.permute.xlu0 %1020 }
 0x1cc   : > { %7979 = vst [vmem:[#allocation26_spill] sm:$0xff] %v5347_v13  ;;  %v5349_v58 = vpop.permute.xlu1 %1022 }
 0x1cd   : > { %7980 = vst [vmem:[#allocation27_spill] sm:$0xff] %v5349_v58  ;;  %1433 = vrot.lane.b32.xlu0 %v1429_v48, %s4296_s17  ;;  %v1477_v48 = vmul.f32 %v1395_v7, %v5254_v62 }
 0x1ce   : > { %1435 = vrot.lane.b32.xlu1 %v1430_v24, %s4296_s17  ;;  %v1478_v24 = vmul.f32 %v1396_v1, %v5254_v62  ;;  %v5396_v62 = vstv %s1505_s27  ;;  %s1747_s27 = sld [smem:[#allocation10 + %s1746_s7]]  ;;  %s2047_s7 = sadd.s32 16, %s5351_s21 }
 0x1cf   : > { %v5357_v36 = vpop.permute.xlu0 %1032 }
 0x1d0   : > { %7981 = vst [vmem:[#allocation28_spill] sm:$0xff] %v5357_v36  ;;  %v5359_v6 = vpop.permute.xlu1 %1034 }
 0x1d1   : > { %7982 = vst [vmem:[#allocation29_spill] sm:$0xff] %v5359_v6  ;;  %1445 = vrot.lane.b32.xlu0 %v1441_v53, %s4296_s17  ;;  %v3835_v53 = vld [vmem:[%s4596_s30 + $0x10] sm:$0xff]  ;;  %v4008_v6 = vld [vmem:[%s4610_s15 + $0x9] sm:$0x3f] }
 0x1d2   : > { %1447 = vrot.lane.b32.xlu1 %v1442_v26, %s4296_s17  ;;  %v5385_v26 = vstv %s1516_s16  ;;  %s1696_s16 = sld [smem:[#allocation10 + %s1695_s13]]  ;;  %s2066_s13 = sadd.s32 17, %s5351_s21  ;;  %v6344_v27 = vmul.f32 %v4008_v6, %v5064_v35 }
 0x1d3   : > { %v5366_v3 = vpop.permute.xlu0 %1044  ;;  %v1519_v7 = vmul.f32 %v3836_v55, %v5385_v26 }
 0x1d4   : > { %7983 = vst [vmem:[#allocation30_spill] sm:$0xff] %v5366_v3  ;;  %v5368_v49 = vpop.permute.xlu1 %1046 }
 0x1d5   : > { %7984 = vst [vmem:[#allocation31_spill] sm:$0xff] %v5368_v49  ;;  %1457 = vrot.lane.b32.xlu0 %v1453_v44, %s4297_s19  ;;  %v1518_v44 = vmul.f32 %v3835_v53, %v5385_v26 }
 0x1d6   : > { %1459 = vrot.lane.b32.xlu1 %v1454_v9, %s4297_s19 }
 0x1d7   : > { %v5375_v16 = vpop.permute.xlu0 %1059 }
 0x1d8   : > { %7985 = vst [vmem:[#allocation32_spill] sm:$0xff] %v5375_v16  ;;  %v5377_v63 = vpop.permute.xlu1 %1061 }
 0x1d9   : > { %7986 = vst [vmem:[#allocation33_spill] sm:$0xff] %v5377_v63  ;;  %1469 = vrot.lane.b32.xlu0 %v1465_v37, %s4297_s19  ;;  %v1530_v37 = vmul.f32 %v3835_v53, %v5396_v62  ;;  %v5512_v63 = vld [vmem:[%s4612_s1 + $0x18] sm:$0x3f] }
 0x1da   : > { %1471 = vrot.lane.b32.xlu1 %v1466_v56, %s4297_s19  ;;  %v1531_v56 = vmul.f32 %v3836_v55, %v5396_v62 }
 0x1db   : > { %v5388_v38 = vpop.permute.xlu0 %1071 }
 0x1dc   : > { %7987 = vst [vmem:[#allocation34_spill] sm:$0xff] %v5388_v38  ;;  %v5390_v39 = vpop.permute.xlu1 %1073 }
 0x1dd   : > { %7988 = vst [vmem:[#allocation35_spill] sm:$0xff] %v5390_v39  ;;  %1481 = vrot.lane.b32.xlu0 %v1477_v48, %s4297_s19  ;;  %v3837_v48 = vld [vmem:[%s4604_s18 + $0x10] sm:$0xff]  ;;  %v3838_v39 = vld [vmem:[%s4604_s18 + $0x18] sm:$0x3f] }
 0x1de   : > { %1483 = vrot.lane.b32.xlu1 %v1478_v24, %s4297_s19  ;;  %v5408_v24 = vstv %s1543_s8  ;;  %s1856_s8 = sld [smem:[#allocation10 + %s1855_s20]]  ;;  %s2117_s20 = sadd.s32 18, %s5351_s21 }
 0x1df   : > { %v5398_v1 = vpop.permute.xlu0 %1083 }
 0x1e0   : > { %7989 = vst [vmem:[#allocation36_spill] sm:$0xff] %v5398_v1  ;;  %v5400_v9 = vpop.permute.xlu1 %1085 }
 0x1e1   : > { %7990 = vst [vmem:[#allocation37_spill] sm:$0xff] %v5400_v9  ;;  %1522 = vrot.lane.b32.xlu0 %v1518_v44, %s4296_s17  ;;  %v1545_v44 = vmul.f32 %v3837_v48, %v5408_v24 }
 0x1e2   : > { %1524 = vrot.lane.b32.xlu1 %v1519_v7, %s4296_s17  ;;  %v1546_v7 = vmul.f32 %v3838_v39, %v5408_v24 }
 0x1e3   : > { %v5411_v38 = vpop.permute.xlu0 %1095 }
 0x1e4   : > { %7991 = vst [vmem:[#allocation38_spill] sm:$0xff] %v5411_v38  ;;  %v5413_v49 = vpop.permute.xlu1 %1097  ;;  %v1557_v38 = vmul.f32 %v3837_v48, %v5385_v26 }
 0x1e5   : > { %7992 = vst [vmem:[#allocation39_spill] sm:$0xff] %v5413_v49  ;;  %1534 = vrot.lane.b32.xlu0 %v1530_v37, %s4296_s17  ;;  %v1558_v49 = vmul.f32 %v3838_v39, %v5385_v26  ;;  %v5427_v37 = vstv %s1570_s26  ;;  %s1837_s26 = sld [smem:[#allocation10 + %s1836_s11]]  ;;  %s2168_s11 = sadd.s32 19, %s5351_s21 }
 0x1e6   : > { %1536 = vrot.lane.b32.xlu1 %v1531_v56, %s4296_s17 }
 0x1e7   : > { %v5419_v3 = vpop.permute.xlu0 %1110 }
 0x1e8   : > { %7993 = vst [vmem:[#allocation40_spill] sm:$0xff] %v5419_v3  ;;  %v5421_v9 = vpop.permute.xlu1 %1112 }
 0x1e9   : > { %7994 = vst [vmem:[#allocation41_spill] sm:$0xff] %v5421_v9  ;;  %1549 = vrot.lane.b32.xlu0 %v1545_v44, %s4296_s17  ;;  %v1572_v9 = vmul.f32 %v3835_v53, %v5427_v37  ;;  %v1573_v44 = vmul.f32 %v3836_v55, %v5427_v37 }
 0x1ea   : > { %1551 = vrot.lane.b32.xlu1 %v1546_v7, %s4296_s17 }
 0x1eb   : > { %v5429_v56 = vpop.permute.xlu0 %1122 }
 0x1ec   : > { %7995 = vst [vmem:[#allocation42_spill] sm:$0xff] %v5429_v56  ;;  %v5431_v1 = vpop.permute.xlu1 %1124 }
 0x1ed   : > { %7996 = vst [vmem:[#allocation43_spill] sm:$0xff] %v5431_v1  ;;  %1561 = vrot.lane.b32.xlu0 %v1557_v38, %s4296_s17  ;;  %v1584_v38 = vmul.f32 %v3835_v53, %v5408_v24  ;;  %v5461_v53 = vld [vmem:[%s4610_s15 + $0x18] sm:$0x3f] }
 0x1ee   : > { %1563 = vrot.lane.b32.xlu1 %v1558_v49, %s4296_s17  ;;  %v1585_v49 = vmul.f32 %v3836_v55, %v5408_v24 }
 0x1ef   : > { %v5438_v7 = vpop.permute.xlu0 %1134 }
 0x1f0   : > { %7997 = vst [vmem:[#allocation44_spill] sm:$0xff] %v5438_v7  ;;  %v5440_v3 = vpop.permute.xlu1 %1136  ;;  %v5456_v7 = vld [vmem:[%s4610_s15 + $0x10] sm:$0xff] }
 0x1f1   : > { %7998 = vst [vmem:[#allocation45_spill] sm:$0xff] %v5440_v3  ;;  %1576 = vrot.lane.b32.xlu0 %v1572_v9, %s4297_s19  ;;  %v1596_v3 = vmul.f32 %v3837_v48, %v5427_v37  ;;  %v1597_v9 = vmul.f32 %v3838_v39, %v5427_v37  ;;  %v5473_v48 = vstv %s1626_s10  ;;  %s1958_s10 = sld [smem:[#allocation10 + %s1957_s9]]  ;;  %s2258_s9 = sadd.s32 21, %s5351_s21 }
 0x1f2   : > { %1578 = vrot.lane.b32.xlu1 %v1573_v44, %s4297_s19  ;;  %v5458_v44 = vstv %s1645_s29  ;;  %8003 = vst [vmem:[#allocation50_spill] sm:$0xff] %v5473_v48  ;;  %s1907_s29 = sld [smem:[#allocation10 + %s1906_s12]]  ;;  %s2277_s12 = sadd.s32 22, %s5351_s21 }
 0x1f3   : > { %v5447_v1 = vpop.permute.xlu0 %1146  ;;  %v1648_v39 = vmul.f32 %v5461_v53, %v5458_v44 }
 0x1f4   : > { %7999 = vst [vmem:[#allocation46_spill] sm:$0xff] %v5447_v1  ;;  %v5449_v56 = vpop.permute.xlu1 %1148 }
 0x1f5   : > { %8000 = vst [vmem:[#allocation47_spill] sm:$0xff] %v5449_v56  ;;  %1588 = vrot.lane.b32.xlu0 %v1584_v38, %s4297_s19  ;;  %v1647_v38 = vmul.f32 %v5456_v7, %v5458_v44 }
 0x1f6   : > { %1590 = vrot.lane.b32.xlu1 %v1585_v49, %s4297_s19 }
 0x1f7   : > { %v5463_v55 = vpop.permute.xlu0 %1158 }
 0x1f8   : > { %8001 = vst [vmem:[#allocation48_spill] sm:$0xff] %v5463_v55  ;;  %v5465_v1 = vpop.permute.xlu1 %1160 }
 0x1f9   : > { %8002 = vst [vmem:[#allocation49_spill] sm:$0xff] %v5465_v1  ;;  %1600 = vrot.lane.b32.xlu0 %v1596_v3, %s4297_s19  ;;  %v1659_v3 = vmul.f32 %v5456_v7, %v5473_v48 }
 0x1fa   : > { %1602 = vrot.lane.b32.xlu1 %v1597_v9, %s4297_s19  ;;  %v1660_v9 = vmul.f32 %v5461_v53, %v5473_v48 }
 0x1fb   : > { %v5475_v49 = vpop.permute.xlu0 %1170 }
 0x1fc   : > { %8004 = vst [vmem:[#allocation51_spill] sm:$0xff] %v5475_v49  ;;  %v5477_v56 = vpop.permute.xlu1 %1172 }
 0x1fd   : > { %8005 = vst [vmem:[#allocation52_spill] sm:$0xff] %v5477_v56  ;;  %1651 = vrot.lane.b32.xlu0 %v1647_v38, %s4296_s17  ;;  %v1671_v38 = vmul.f32 %v5456_v7, %v5385_v26 }
 0x1fe   : > { %1653 = vrot.lane.b32.xlu1 %v1648_v39, %s4296_s17  ;;  %v1672_v39 = vmul.f32 %v5461_v53, %v5385_v26 }
 0x1ff   : > { %v5486_v1 = vpop.permute.xlu0 %1219 }
 0x200   : > { %8006 = vst [vmem:[#allocation53_spill] sm:$0xff] %v5486_v1  ;;  %v5488_v55 = vpop.permute.xlu1 %1221  ;;  %v5509_v1 = vstv %s1696_s16  ;;  %s2067_s16 = sld [smem:[#allocation10 + %s2066_s13]]  ;;  %s2328_s13 = sadd.s32 23, %s5351_s21 }
 0x201   : > { %8007 = vst [vmem:[#allocation54_spill] sm:$0xff] %v5488_v55  ;;  %1663 = vrot.lane.b32.xlu0 %v1659_v3, %s4296_s17  ;;  %v1683_v3 = vmul.f32 %v5456_v7, %v5396_v62  ;;  %v5507_v55 = vld [vmem:[%s4612_s1 + $0x10] sm:$0xff] }
 0x202   : > { %1665 = vrot.lane.b32.xlu1 %v1660_v9, %s4296_s17  ;;  %v1684_v9 = vmul.f32 %v5461_v53, %v5396_v62 }
 0x203   : > { %v5496_v56 = vpop.permute.xlu0 %1231 }
 0x204   : > { %8008 = vst [vmem:[#allocation55_spill] sm:$0xff] %v5496_v56  ;;  %v5498_v49 = vpop.permute.xlu1 %1233 }
 0x205   : > { %8009 = vst [vmem:[#allocation56_spill] sm:$0xff] %v5498_v49  ;;  %1675 = vrot.lane.b32.xlu0 %v1671_v38, %s4296_s17  ;;  %v1698_v38 = vmul.f32 %v5507_v55, %v5509_v1 }
 0x206   : > { %1677 = vrot.lane.b32.xlu1 %v1672_v39, %s4296_s17  ;;  %v1699_v39 = vmul.f32 %v5512_v63, %v5509_v1 }
 0x207   : > { %v5514_v56 = vpop.permute.xlu0 %1243 }
 0x208   : > { %8010 = vst [vmem:[#allocation57_spill] sm:$0xff] %v5514_v56  ;;  %v5516_v49 = vpop.permute.xlu1 %1245 }
 0x209   : > { %8011 = vst [vmem:[#allocation58_spill] sm:$0xff] %v5516_v49  ;;  %1687 = vrot.lane.b32.xlu0 %v1683_v3, %s4296_s17  ;;  %v1710_v3 = vmul.f32 %v5507_v55, %v5458_v44 }
 0x20a   : > { %1689 = vrot.lane.b32.xlu1 %v1684_v9, %s4296_s17  ;;  %v1711_v9 = vmul.f32 %v5512_v63, %v5458_v44 }
 0x20b   : > { %v5524_v58 = vpop.permute.xlu0 %1255 }
 0x20c   : > { %8012 = vst [vmem:[#allocation59_spill] sm:$0xff] %v5524_v58  ;;  %v5526_v16 = vpop.permute.xlu1 %1257 }
 0x20d   : > { %8013 = vst [vmem:[#allocation60_spill] sm:$0xff] %v5526_v16  ;;  %1702 = vrot.lane.b32.xlu0 %v1698_v38, %s4296_s17  ;;  %v1722_v38 = vmul.f32 %v5507_v55, %v5408_v24 }
 0x20e   : > { %1704 = vrot.lane.b32.xlu1 %v1699_v39, %s4296_s17  ;;  %v1723_v39 = vmul.f32 %v5512_v63, %v5408_v24 }
 0x20f   : > { %v5535_v49 = vpop.permute.xlu0 %1270 }
 0x210   : > { %8014 = vst [vmem:[#allocation61_spill] sm:$0xff] %v5535_v49  ;;  %v5537_v56 = vpop.permute.xlu1 %1272 }
 0x211   : > { %8015 = vst [vmem:[#allocation62_spill] sm:$0xff] %v5537_v56  ;;  %1714 = vrot.lane.b32.xlu0 %v1710_v3, %s4296_s17  ;;  %v1734_v56 = vmul.f32 %v5507_v55, %v5385_v26  ;;  %v1735_v3 = vmul.f32 %v5512_v63, %v5385_v26 }
 0x212   : > { %1716 = vrot.lane.b32.xlu1 %v1711_v9, %s4296_s17  ;;  %v5555_v9 = vstv %s1747_s27  ;;  %s2048_s27 = sld [smem:[#allocation10 + %s2047_s7]]  ;;  %s2379_s7 = sadd.s32 24, %s5351_s21 }
 0x213   : > { %v5545_v16 = vpop.permute.xlu0 %1282 }
 0x214   : > { %8016 = vst [vmem:[#allocation63_spill] sm:$0xff] %v5545_v16  ;;  %v5547_v58 = vpop.permute.xlu1 %1284 }
 0x215   : > { %8017 = vst [vmem:[#allocation64_spill] sm:$0xff] %v5547_v58  ;;  %1726 = vrot.lane.b32.xlu0 %v1722_v38, %s4296_s17  ;;  %v1749_v38 = vmul.f32 %v5456_v7, %v5555_v9 }
 0x216   : > { %1728 = vrot.lane.b32.xlu1 %v1723_v39, %s4296_s17  ;;  %v1750_v39 = vmul.f32 %v5461_v53, %v5555_v9 }
 0x217   : > { %v5557_v49 = vpop.permute.xlu0 %1294 }
 0x218   : > { %8018 = vst [vmem:[#allocation65_spill] sm:$0xff] %v5557_v49  ;;  %v5559_v13 = vpop.permute.xlu1 %1296 }
 0x219   : > { %8019 = vst [vmem:[#allocation66_spill] sm:$0xff] %v5559_v13  ;;  %1738 = vrot.lane.b32.xlu0 %v1734_v56, %s4296_s17  ;;  %v1761_v56 = vmul.f32 %v5456_v7, %v5509_v1 }
 0x21a   : > { %1740 = vrot.lane.b32.xlu1 %v1735_v3, %s4296_s17  ;;  %v1762_v3 = vmul.f32 %v5461_v53, %v5509_v1 }
 0x21b   : > { %v5567_v58 = vpop.permute.xlu0 %1306 }
 0x21c   : > { %8020 = vst [vmem:[#allocation67_spill] sm:$0xff] %v5567_v58  ;;  %v5569_v26 = vpop.permute.xlu1 %1308 }
 0x21d   : > { %8021 = vst [vmem:[#allocation68_spill] sm:$0xff] %v5569_v26  ;;  %1753 = vrot.lane.b32.xlu0 %v1749_v38, %s4297_s19  ;;  %v1773_v38 = vmul.f32 %v5456_v7, %v5427_v37 }
 0x21e   : > { %1755 = vrot.lane.b32.xlu1 %v1750_v39, %s4297_s19  ;;  %v1774_v39 = vmul.f32 %v5461_v53, %v5427_v37 }
 0x21f   : > { %v5577_v16 = vpop.permute.xlu0 %1321 }
 0x220   : > { %8022 = vst [vmem:[#allocation69_spill] sm:$0xff] %v5577_v16  ;;  %v5579_v13 = vpop.permute.xlu1 %1323 }
 0x221   : > { %8023 = vst [vmem:[#allocation70_spill] sm:$0xff] %v5579_v13  ;;  %1765 = vrot.lane.b32.xlu0 %v1761_v56, %s4297_s19  ;;  %v1785_v56 = vmul.f32 %v5456_v7, %v5408_v24  ;;  %v1798_v7 = vmul.f32 %v5512_v63, %v5555_v9 }
 0x222   : > { %1767 = vrot.lane.b32.xlu1 %v1762_v3, %s4297_s19  ;;  %v1786_v3 = vmul.f32 %v5461_v53, %v5408_v24 }
 0x223   : > { %v5587_v26 = vpop.permute.xlu0 %1333 }
 0x224   : > { %8024 = vst [vmem:[#allocation71_spill] sm:$0xff] %v5587_v26  ;;  %v5589_v58 = vpop.permute.xlu1 %1335  ;;  %v5625_v26 = vld [vmem:[%s4596_s30 + $0x19] sm:$0x3f] }
 0x225   : > { %8025 = vst [vmem:[#allocation72_spill] sm:$0xff] %v5589_v58  ;;  %1777 = vrot.lane.b32.xlu0 %v1773_v38, %s4297_s19  ;;  %v1797_v38 = vmul.f32 %v5507_v55, %v5555_v9  ;;  %v5622_v58 = vstv %s1856_s8  ;;  %s2118_s8 = sld [smem:[#allocation10 + %s2117_s20]]  ;;  %s2554_s20 = sadd.s32 2, %s1489_s4 }
 0x226   : > { %1779 = vrot.lane.b32.xlu1 %v1774_v39, %s4297_s19  ;;  %v1809_v39 = vmul.f32 %v5507_v55, %v5427_v37 }
 0x227   : > { %v5598_v13 = vpop.permute.xlu0 %1345 }
 0x228   : > { %8026 = vst [vmem:[#allocation73_spill] sm:$0xff] %v5598_v13  ;;  %v5600_v16 = vpop.permute.xlu1 %1347 }
 0x229   : > { %8027 = vst [vmem:[#allocation74_spill] sm:$0xff] %v5600_v16  ;;  %1789 = vrot.lane.b32.xlu0 %v1785_v56, %s4297_s19  ;;  %v1810_v56 = vmul.f32 %v5512_v63, %v5427_v37  ;;  %v1859_v63 = vmul.f32 %v5625_v26, %v5622_v58  ;;  %v5637_v37 = vstv %s1837_s26  ;;  %v5676_v16 = vld [vmem:[%s4604_s18 + $0x19] sm:$0x3f]  ;;  %s2169_s26 = sld [smem:[#allocation10 + %s2168_s11]] }
 0x22a   : > { %1791 = vrot.lane.b32.xlu1 %v1786_v3, %s4297_s19  ;;  %v5620_v3 = vld [vmem:[%s4596_s30 + $0x11] sm:$0xff]  ;;  %8032 = vst [vmem:[#allocation79_spill] sm:$0xff] %v5637_v37 }
 0x22b   : > { %v5609_v24 = vpop.permute.xlu0 %1357  ;;  %v1858_v55 = vmul.f32 %v5620_v3, %v5622_v58 }
 0x22c   : > { %8028 = vst [vmem:[#allocation75_spill] sm:$0xff] %v5609_v24  ;;  %v5611_v53 = vpop.permute.xlu1 %1359 }
 0x22d   : > { %8029 = vst [vmem:[#allocation76_spill] sm:$0xff] %v5611_v53  ;;  %1801 = vrot.lane.b32.xlu0 %v1797_v38, %s4297_s19 }
 0x22e   : > { %1803 = vrot.lane.b32.xlu1 %v1798_v7, %s4297_s19 }
 0x22f   : > { %v5627_v24 = vpop.permute.xlu0 %1369 }
 0x230   : > { %8030 = vst [vmem:[#allocation77_spill] sm:$0xff] %v5627_v24  ;;  %v5629_v53 = vpop.permute.xlu1 %1371 }
 0x231   : > { %8031 = vst [vmem:[#allocation78_spill] sm:$0xff] %v5629_v53  ;;  %1813 = vrot.lane.b32.xlu0 %v1809_v39, %s4297_s19  ;;  %v1870_v39 = vmul.f32 %v5620_v3, %v5637_v37 }
 0x232   : > { %1815 = vrot.lane.b32.xlu1 %v1810_v56, %s4297_s19  ;;  %v1871_v56 = vmul.f32 %v5625_v26, %v5637_v37 }
 0x233   : > { %v5639_v38 = vpop.permute.xlu0 %1381 }
 0x234   : > { %8033 = vst [vmem:[#allocation80_spill] sm:$0xff] %v5639_v38  ;;  %v5641_v7 = vpop.permute.xlu1 %1383 }
 0x235   : > { %8034 = vst [vmem:[#allocation81_spill] sm:$0xff] %v5641_v7  ;;  %1862 = vrot.lane.b32.xlu0 %v1858_v55, %s4296_s17  ;;  %v1882_v55 = vmul.f32 %v5620_v3, %v5458_v44 }
 0x236   : > { %1864 = vrot.lane.b32.xlu1 %v1859_v63, %s4296_s17  ;;  %v1883_v63 = vmul.f32 %v5625_v26, %v5458_v44 }
 0x237   : > { %v5650_v53 = vpop.permute.xlu0 %1409 }
 0x238   : > { %8035 = vst [vmem:[#allocation82_spill] sm:$0xff] %v5650_v53  ;;  %v5652_v24 = vpop.permute.xlu1 %1411  ;;  %v5673_v53 = vstv %s1907_s29  ;;  %s2278_s29 = sld [smem:[#allocation10 + %s2277_s12]] }
 0x239   : > { %8036 = vst [vmem:[#allocation83_spill] sm:$0xff] %v5652_v24  ;;  %1874 = vrot.lane.b32.xlu0 %v1870_v39, %s4296_s17  ;;  %v1894_v39 = vmul.f32 %v5620_v3, %v5473_v48  ;;  %v5671_v24 = vld [vmem:[%s4604_s18 + $0x11] sm:$0xff] }
 0x23a   : > { %1876 = vrot.lane.b32.xlu1 %v1871_v56, %s4296_s17  ;;  %v1895_v56 = vmul.f32 %v5625_v26, %v5473_v48 }
 0x23b   : > { %v5660_v7 = vpop.permute.xlu0 %1421 }
 0x23c   : > { %8037 = vst [vmem:[#allocation84_spill] sm:$0xff] %v5660_v7  ;;  %v5662_v38 = vpop.permute.xlu1 %1423 }
 0x23d   : > { %8038 = vst [vmem:[#allocation85_spill] sm:$0xff] %v5662_v38  ;;  %1886 = vrot.lane.b32.xlu0 %v1882_v55, %s4296_s17  ;;  %v1909_v55 = vmul.f32 %v5671_v24, %v5673_v53 }
 0x23e   : > { %1888 = vrot.lane.b32.xlu1 %v1883_v63, %s4296_s17  ;;  %v1910_v63 = vmul.f32 %v5676_v16, %v5673_v53 }
 0x23f   : > { %v5678_v7 = vpop.permute.xlu0 %1433 }
 0x240   : > { %8039 = vst [vmem:[#allocation86_spill] sm:$0xff] %v5678_v7  ;;  %v5680_v38 = vpop.permute.xlu1 %1435 }
 0x241   : > { %8040 = vst [vmem:[#allocation87_spill] sm:$0xff] %v5680_v38  ;;  %1898 = vrot.lane.b32.xlu0 %v1894_v39, %s4296_s17  ;;  %v1921_v39 = vmul.f32 %v5671_v24, %v5622_v58 }
 0x242   : > { %1900 = vrot.lane.b32.xlu1 %v1895_v56, %s4296_s17  ;;  %v1922_v56 = vmul.f32 %v5676_v16, %v5622_v58 }
 0x243   : > { %v5688_v13 = vpop.permute.xlu0 %1445 }
 0x244   : > { %8041 = vst [vmem:[#allocation88_spill] sm:$0xff] %v5688_v13  ;;  %v5690_v49 = vpop.permute.xlu1 %1447 }
 0x245   : > { %8042 = vst [vmem:[#allocation89_spill] sm:$0xff] %v5690_v49  ;;  %1913 = vrot.lane.b32.xlu0 %v1909_v55, %s4296_s17  ;;  %v1933_v55 = vmul.f32 %v5671_v24, %v5509_v1 }
 0x246   : > { %1915 = vrot.lane.b32.xlu1 %v1910_v63, %s4296_s17  ;;  %v1934_v63 = vmul.f32 %v5676_v16, %v5509_v1 }
 0x247   : > { %v5699_v38 = vpop.permute.xlu0 %1457 }
 0x248   : > { %8043 = vst [vmem:[#allocation90_spill] sm:$0xff] %v5699_v38  ;;  %v5701_v7 = vpop.permute.xlu1 %1459 }
 0x249   : > { %8044 = vst [vmem:[#allocation91_spill] sm:$0xff] %v5701_v7  ;;  %1925 = vrot.lane.b32.xlu0 %v1921_v39, %s4296_s17  ;;  %v1945_v7 = vmul.f32 %v5671_v24, %v5458_v44  ;;  %v1946_v39 = vmul.f32 %v5676_v16, %v5458_v44 }
 0x24a   : > { %1927 = vrot.lane.b32.xlu1 %v1922_v56, %s4296_s17  ;;  %v5719_v56 = vstv %s1958_s10  ;;  %s2259_s10 = sld [smem:[#allocation10 + %s2258_s9]] }
 0x24b   : > { %v5709_v49 = vpop.permute.xlu0 %1469 }
 0x24c   : > { %8045 = vst [vmem:[#allocation92_spill] sm:$0xff] %v5709_v49  ;;  %v5711_v13 = vpop.permute.xlu1 %1471 }
 0x24d   : > { %8046 = vst [vmem:[#allocation93_spill] sm:$0xff] %v5711_v13  ;;  %1937 = vrot.lane.b32.xlu0 %v1933_v55, %s4296_s17  ;;  %v1960_v55 = vmul.f32 %v5620_v3, %v5719_v56 }
 0x24e   : > { %1939 = vrot.lane.b32.xlu1 %v1934_v63, %s4296_s17  ;;  %v1961_v63 = vmul.f32 %v5625_v26, %v5719_v56 }
 0x24f   : > { %v5721_v38 = vpop.permute.xlu0 %1481 }
 0x250   : > { %8047 = vst [vmem:[#allocation94_spill] sm:$0xff] %v5721_v38  ;;  %v5723_v48 = vpop.permute.xlu1 %1483 }
 0x251   : > { %8048 = vst [vmem:[#allocation95_spill] sm:$0xff] %v5723_v48  ;;  %1949 = vrot.lane.b32.xlu0 %v1945_v7, %s4296_s17  ;;  %v1972_v7 = vmul.f32 %v5620_v3, %v5673_v53 }
 0x252   : > { %1951 = vrot.lane.b32.xlu1 %v1946_v39, %s4296_s17  ;;  %v1973_v39 = vmul.f32 %v5625_v26, %v5673_v53 }
 0x253   : > { %v5731_v13 = vpop.permute.xlu0 %1522 }
 0x254   : > { %8049 = vst [vmem:[#allocation96_spill] sm:$0xff] %v5731_v13  ;;  %v5733_v44 = vpop.permute.xlu1 %1524 }
 0x255   : > { %8050 = vst [vmem:[#allocation97_spill] sm:$0xff] %v5733_v44  ;;  %1964 = vrot.lane.b32.xlu0 %v1960_v55, %s4297_s19  ;;  %v1984_v55 = vmul.f32 %v5620_v3, %v5555_v9 }
 0x256   : > { %1966 = vrot.lane.b32.xlu1 %v1961_v63, %s4297_s19  ;;  %v1985_v63 = vmul.f32 %v5625_v26, %v5555_v9 }
 0x257   : > { %v5741_v48 = vpop.permute.xlu0 %1534 }
 0x258   : > { %8051 = vst [vmem:[#allocation98_spill] sm:$0xff] %v5741_v48  ;;  %v5743_v38 = vpop.permute.xlu1 %1536 }
 0x259   : > { %8052 = vst [vmem:[#allocation99_spill] sm:$0xff] %v5743_v38  ;;  %1976 = vrot.lane.b32.xlu0 %v1972_v7, %s4297_s19  ;;  %v1996_v7 = vmul.f32 %v5620_v3, %v5509_v1  ;;  %v2009_v3 = vmul.f32 %v5676_v16, %v5719_v56 }
 0x25a   : > { %1978 = vrot.lane.b32.xlu1 %v1973_v39, %s4297_s19  ;;  %v1997_v39 = vmul.f32 %v5625_v26, %v5509_v1 }
 0x25b   : > { %v5751_v49 = vpop.permute.xlu0 %1549 }
 0x25c   : > { %8053 = vst [vmem:[#allocation100_spill] sm:$0xff] %v5751_v49  ;;  %v5753_v44 = vpop.permute.xlu1 %1551 }
 0x25d   : > { %8054 = vst [vmem:[#allocation101_spill] sm:$0xff] %v5753_v44  ;;  %1988 = vrot.lane.b32.xlu0 %v1984_v55, %s4297_s19  ;;  %v2008_v55 = vmul.f32 %v5671_v24, %v5719_v56  ;;  %v5840_v44 = vld [vmem:[%s4612_s1 + $0x19] sm:$0x3f] }
 0x25e   : > { %1990 = vrot.lane.b32.xlu1 %v1985_v63, %s4297_s19  ;;  %v2020_v63 = vmul.f32 %v5671_v24, %v5555_v9 }
 0x25f   : > { %v5762_v38 = vpop.permute.xlu0 %1561 }
 0x260   : > { %8055 = vst [vmem:[#allocation102_spill] sm:$0xff] %v5762_v38  ;;  %v5764_v48 = vpop.permute.xlu1 %1563  ;;  %v5789_v38 = vld [vmem:[%s4610_s15 + $0x19] sm:$0x3f] }
 0x261   : > { %8056 = vst [vmem:[#allocation103_spill] sm:$0xff] %v5764_v48  ;;  %2000 = vrot.lane.b32.xlu0 %v1996_v7, %s4297_s19  ;;  %v2021_v7 = vmul.f32 %v5676_v16, %v5555_v9  ;;  %v5786_v48 = vstv %s2067_s16  ;;  %v5801_v9 = vstv %s2048_s27  ;;  %s2329_s16 = sld [smem:[#allocation10 + %s2328_s13]] }
 0x262   : > { %2002 = vrot.lane.b32.xlu1 %v1997_v39, %s4297_s19  ;;  %v5784_v39 = vld [vmem:[%s4610_s15 + $0x11] sm:$0xff]  ;;  %v2070_v16 = vmul.f32 %v5789_v38, %v5786_v48  ;;  %8061 = vst [vmem:[#allocation108_spill] sm:$0xff] %v5801_v9  ;;  %s2380_s27 = sld [smem:[#allocation10 + %s2379_s7]] }
 0x263   : > { %v5773_v1 = vpop.permute.xlu0 %1576  ;;  %v2069_v24 = vmul.f32 %v5784_v39, %v5786_v48 }
 0x264   : > { %8057 = vst [vmem:[#allocation104_spill] sm:$0xff] %v5773_v1  ;;  %v5775_v26 = vpop.permute.xlu1 %1578 }
 0x265   : > { %8058 = vst [vmem:[#allocation105_spill] sm:$0xff] %v5775_v26  ;;  %2012 = vrot.lane.b32.xlu0 %v2008_v55, %s4297_s19 }
 0x266   : > { %2014 = vrot.lane.b32.xlu1 %v2009_v3, %s4297_s19 }
 0x267   : > { %v5791_v1 = vpop.permute.xlu0 %1588 }
 0x268   : > { %8059 = vst [vmem:[#allocation106_spill] sm:$0xff] %v5791_v1  ;;  %v5793_v26 = vpop.permute.xlu1 %1590 }
 0x269   : > { %8060 = vst [vmem:[#allocation107_spill] sm:$0xff] %v5793_v26  ;;  %2024 = vrot.lane.b32.xlu0 %v2020_v63, %s4297_s19  ;;  %v2081_v63 = vmul.f32 %v5784_v39, %v5801_v9 }
 0x26a   : > { %2026 = vrot.lane.b32.xlu1 %v2021_v7, %s4297_s19  ;;  %v2082_v7 = vmul.f32 %v5789_v38, %v5801_v9 }
 0x26b   : > { %v5803_v55 = vpop.permute.xlu0 %1600 }
 0x26c   : > { %8062 = vst [vmem:[#allocation109_spill] sm:$0xff] %v5803_v55  ;;  %v5805_v3 = vpop.permute.xlu1 %1602 }
 0x26d   : > { %8063 = vst [vmem:[#allocation110_spill] sm:$0xff] %v5805_v3  ;;  %2073 = vrot.lane.b32.xlu0 %v2069_v24, %s4296_s17  ;;  %v2093_v24 = vmul.f32 %v5784_v39, %v5622_v58 }
 0x26e   : > { %2075 = vrot.lane.b32.xlu1 %v2070_v16, %s4296_s17  ;;  %v2094_v16 = vmul.f32 %v5789_v38, %v5622_v58 }
 0x26f   : > { %v5814_v26 = vpop.permute.xlu0 %1651 }
 0x270   : > { %8064 = vst [vmem:[#allocation111_spill] sm:$0xff] %v5814_v26  ;;  %v5816_v1 = vpop.permute.xlu1 %1653  ;;  %v5837_v26 = vstv %s2118_s8  ;;  %s6143_s8 = smul.u32 25, %s2554_s20 }
 0x271   : > { %8065 = vst [vmem:[#allocation112_spill] sm:$0xff] %v5816_v1  ;;  %2085 = vrot.lane.b32.xlu0 %v2081_v63, %s4296_s17  ;;  %v2105_v63 = vmul.f32 %v5784_v39, %v5637_v37  ;;  %v5835_v1 = vld [vmem:[%s4612_s1 + $0x11] sm:$0xff] }
 0x272   : > { %2087 = vrot.lane.b32.xlu1 %v2082_v7, %s4296_s17  ;;  %v2106_v7 = vmul.f32 %v5789_v38, %v5637_v37  ;;  %s2579_s4 = sadd.s32 2, %s6143_s8 }
 0x273   : > { %v5824_v3 = vpop.permute.xlu0 %1663  ;;  %s2580_s11 = sld [smem:[#allocation10 + %s2579_s4]]  ;;  %s969_s4 = sadd.s32 15, %s4627_s0 }
 0x274   : > { %8066 = vst [vmem:[#allocation113_spill] sm:$0xff] %v5824_v3  ;;  %v5826_v55 = vpop.permute.xlu1 %1665 }
 0x275   : > { %8067 = vst [vmem:[#allocation114_spill] sm:$0xff] %v5826_v55  ;;  %2097 = vrot.lane.b32.xlu0 %v2093_v24, %s4296_s17  ;;  %v2120_v24 = vmul.f32 %v5835_v1, %v5837_v26 }
 0x276   : > { %2099 = vrot.lane.b32.xlu1 %v2094_v16, %s4296_s17  ;;  %v2121_v16 = vmul.f32 %v5840_v44, %v5837_v26 }
 0x277   : > { %v5842_v3 = vpop.permute.xlu0 %1675 }
 0x278   : > { %8068 = vst [vmem:[#allocation115_spill] sm:$0xff] %v5842_v3  ;;  %v5844_v55 = vpop.permute.xlu1 %1677 }
 0x279   : > { %8069 = vst [vmem:[#allocation116_spill] sm:$0xff] %v5844_v55  ;;  %2109 = vrot.lane.b32.xlu0 %v2105_v63, %s4296_s17  ;;  %v2132_v63 = vmul.f32 %v5835_v1, %v5786_v48 }
 0x27a   : > { %2111 = vrot.lane.b32.xlu1 %v2106_v7, %s4296_s17  ;;  %v2133_v7 = vmul.f32 %v5840_v44, %v5786_v48 }
 0x27b   : > { %v5852_v49 = vpop.permute.xlu0 %1687 }
 0x27c   : > { %8070 = vst [vmem:[#allocation117_spill] sm:$0xff] %v5852_v49  ;;  %v5854_v13 = vpop.permute.xlu1 %1689 }
 0x27d   : > { %8071 = vst [vmem:[#allocation118_spill] sm:$0xff] %v5854_v13  ;;  %2124 = vrot.lane.b32.xlu0 %v2120_v24, %s4296_s17  ;;  %v2144_v24 = vmul.f32 %v5835_v1, %v5673_v53 }
 0x27e   : > { %2126 = vrot.lane.b32.xlu1 %v2121_v16, %s4296_s17  ;;  %v2145_v16 = vmul.f32 %v5840_v44, %v5673_v53 }
 0x27f   : > { %v5863_v55 = vpop.permute.xlu0 %1702 }
 0x280   : > { %8072 = vst [vmem:[#allocation119_spill] sm:$0xff] %v5863_v55  ;;  %v5865_v3 = vpop.permute.xlu1 %1704 }
 0x281   : > { %8073 = vst [vmem:[#allocation120_spill] sm:$0xff] %v5865_v3  ;;  %2136 = vrot.lane.b32.xlu0 %v2132_v63, %s4296_s17  ;;  %v2156_v3 = vmul.f32 %v5835_v1, %v5622_v58  ;;  %v2157_v63 = vmul.f32 %v5840_v44, %v5622_v58 }
 0x282   : > { %2138 = vrot.lane.b32.xlu1 %v2133_v7, %s4296_s17  ;;  %v5883_v7 = vstv %s2169_s26  ;;  %s2568_s26 = sadd.s32 1, %s6143_s8 }
 0x283   : > { %v5873_v13 = vpop.permute.xlu0 %1714  ;;  %s2569_s12 = sld [smem:[#allocation10 + %s2568_s26]] }
 0x284   : > { %8074 = vst [vmem:[#allocation121_spill] sm:$0xff] %v5873_v13  ;;  %v5875_v49 = vpop.permute.xlu1 %1716  ;;  %s970_s26 = sld [smem:[#allocation10 + %s969_s4]]  ;;  %s2900_s4 = sadd.s32 11, %s6143_s8 }
 0x285   : > { %8075 = vst [vmem:[#allocation122_spill] sm:$0xff] %v5875_v49  ;;  %2148 = vrot.lane.b32.xlu0 %v2144_v24, %s4296_s17  ;;  %v2171_v24 = vmul.f32 %v5784_v39, %v5883_v7 }
 0x286   : > { %2150 = vrot.lane.b32.xlu1 %v2145_v16, %s4296_s17  ;;  %v2172_v16 = vmul.f32 %v5789_v38, %v5883_v7 }
 0x287   : > { %v5885_v55 = vpop.permute.xlu0 %1726 }
 0x288   : > { %8076 = vst [vmem:[#allocation123_spill] sm:$0xff] %v5885_v55  ;;  %v5887_v37 = vpop.permute.xlu1 %1728 }
 0x289   : > { %8077 = vst [vmem:[#allocation124_spill] sm:$0xff] %v5887_v37  ;;  %2160 = vrot.lane.b32.xlu0 %v2156_v3, %s4296_s17  ;;  %v2183_v3 = vmul.f32 %v5784_v39, %v5837_v26 }
 0x28a   : > { %2162 = vrot.lane.b32.xlu1 %v2157_v63, %s4296_s17  ;;  %v2184_v63 = vmul.f32 %v5789_v38, %v5837_v26 }
 0x28b   : > { %v5895_v49 = vpop.permute.xlu0 %1738 }
 0x28c   : > { %8078 = vst [vmem:[#allocation125_spill] sm:$0xff] %v5895_v49  ;;  %v5897_v58 = vpop.permute.xlu1 %1740 }
 0x28d   : > { %8079 = vst [vmem:[#allocation126_spill] sm:$0xff] %v5897_v58  ;;  %2175 = vrot.lane.b32.xlu0 %v2171_v24, %s4297_s19  ;;  %v2195_v24 = vmul.f32 %v5784_v39, %v5719_v56 }
 0x28e   : > { %2177 = vrot.lane.b32.xlu1 %v2172_v16, %s4297_s19  ;;  %v2196_v16 = vmul.f32 %v5789_v38, %v5719_v56 }
 0x28f   : > { %v5905_v37 = vpop.permute.xlu0 %1753 }
 0x290   : > { %8080 = vst [vmem:[#allocation127_spill] sm:$0xff] %v5905_v37  ;;  %v5907_v55 = vpop.permute.xlu1 %1755 }
 0x291   : > { %8081 = vst [vmem:[#allocation128_spill] sm:$0xff] %v5907_v55  ;;  %2187 = vrot.lane.b32.xlu0 %v2183_v3, %s4297_s19  ;;  %v2207_v3 = vmul.f32 %v5784_v39, %v5673_v53  ;;  %v2220_v39 = vmul.f32 %v5840_v44, %v5883_v7 }
 0x292   : > { %2189 = vrot.lane.b32.xlu1 %v2184_v63, %s4297_s19  ;;  %v2208_v63 = vmul.f32 %v5789_v38, %v5673_v53 }
 0x293   : > { %v5915_v58 = vpop.permute.xlu0 %1765 }
 0x294   : > { %8082 = vst [vmem:[#allocation129_spill] sm:$0xff] %v5915_v58  ;;  %v5917_v49 = vpop.permute.xlu1 %1767  ;;  %v5953_v58 = vld [vmem:[%s4596_s30 + $0x1a] sm:$0x3f] }
 0x295   : > { %8083 = vst [vmem:[#allocation130_spill] sm:$0xff] %v5917_v49  ;;  %2199 = vrot.lane.b32.xlu0 %v2195_v24, %s4297_s19  ;;  %v2219_v24 = vmul.f32 %v5835_v1, %v5883_v7  ;;  %v5950_v49 = vstv %s2278_s29  ;;  %s2606_s29 = sadd.s32 3, %s6143_s8 }
 0x296   : > { %2201 = vrot.lane.b32.xlu1 %v2196_v16, %s4297_s19  ;;  %v2231_v16 = vmul.f32 %v5835_v1, %v5719_v56  ;;  %s2607_s9 = sld [smem:[#allocation10 + %s2606_s29]] }
 0x297   : > { %v5926_v13 = vpop.permute.xlu0 %1777 }
 0x298   : > { %8084 = vst [vmem:[#allocation131_spill] sm:$0xff] %v5926_v13  ;;  %v5928_v55 = vpop.permute.xlu1 %1779 }
 0x299   : > { %8085 = vst [vmem:[#allocation132_spill] sm:$0xff] %v5928_v55  ;;  %2211 = vrot.lane.b32.xlu0 %v2207_v3, %s4297_s19  ;;  %v2232_v3 = vmul.f32 %v5840_v44, %v5719_v56  ;;  %v2281_v56 = vmul.f32 %v5953_v58, %v5950_v49  ;;  %v5965_v44 = vstv %s2259_s10  ;;  %v6004_v55 = vld [vmem:[%s4604_s18 + $0x1a] sm:$0x3f]  ;;  %s2633_s10 = sadd.s32 4, %s6143_s8 }
 0x29a   : > { %2213 = vrot.lane.b32.xlu1 %v2208_v63, %s4297_s19  ;;  %v5948_v63 = vld [vmem:[%s4596_s30 + $0x12] sm:$0xff]  ;;  %8090 = vst [vmem:[#allocation137_spill] sm:$0xff] %v5965_v44  ;;  %s2634_s13 = sld [smem:[#allocation10 + %s2633_s10]]  ;;  %s2810_s10 = sadd.s32 9, %s6143_s8 }
 0x29b   : > { %v5937_v53 = vpop.permute.xlu0 %1789  ;;  %v2280_v1 = vmul.f32 %v5948_v63, %v5950_v49 }
 0x29c   : > { %8086 = vst [vmem:[#allocation133_spill] sm:$0xff] %v5937_v53  ;;  %v5939_v38 = vpop.permute.xlu1 %1791 }
 0x29d   : > { %8087 = vst [vmem:[#allocation134_spill] sm:$0xff] %v5939_v38  ;;  %2223 = vrot.lane.b32.xlu0 %v2219_v24, %s4297_s19 }
 0x29e   : > { %2225 = vrot.lane.b32.xlu1 %v2220_v39, %s4297_s19 }
 0x29f   : > { %v5955_v53 = vpop.permute.xlu0 %1801 }
 0x2a0   : > { %8088 = vst [vmem:[#allocation135_spill] sm:$0xff] %v5955_v53  ;;  %v5957_v38 = vpop.permute.xlu1 %1803 }
 0x2a1   : > { %8089 = vst [vmem:[#allocation136_spill] sm:$0xff] %v5957_v38  ;;  %2235 = vrot.lane.b32.xlu0 %v2231_v16, %s4297_s19  ;;  %v2292_v16 = vmul.f32 %v5948_v63, %v5965_v44 }
 0x2a2   : > { %2237 = vrot.lane.b32.xlu1 %v2232_v3, %s4297_s19  ;;  %v2293_v3 = vmul.f32 %v5953_v58, %v5965_v44 }
 0x2a3   : > { %v5967_v24 = vpop.permute.xlu0 %1813 }
 0x2a4   : > { %8091 = vst [vmem:[#allocation138_spill] sm:$0xff] %v5967_v24  ;;  %v5969_v39 = vpop.permute.xlu1 %1815 }
 0x2a5   : > { %8092 = vst [vmem:[#allocation139_spill] sm:$0xff] %v5969_v39  ;;  %2284 = vrot.lane.b32.xlu0 %v2280_v1, %s4296_s17  ;;  %v2304_v1 = vmul.f32 %v5948_v63, %v5786_v48 }
 0x2a6   : > { %2286 = vrot.lane.b32.xlu1 %v2281_v56, %s4296_s17  ;;  %v2305_v56 = vmul.f32 %v5953_v58, %v5786_v48 }
 0x2a7   : > { %v5978_v38 = vpop.permute.xlu0 %1862 }
 0x2a8   : > { %8093 = vst [vmem:[#allocation140_spill] sm:$0xff] %v5978_v38  ;;  %v5980_v53 = vpop.permute.xlu1 %1864  ;;  %v6001_v38 = vstv %s2329_s16  ;;  %s2708_s16 = sadd.s32 7, %s6143_s8 }
 0x2a9   : > { %8094 = vst [vmem:[#allocation141_spill] sm:$0xff] %v5980_v53  ;;  %2296 = vrot.lane.b32.xlu0 %v2292_v16, %s4296_s17  ;;  %v2316_v16 = vmul.f32 %v5948_v63, %v5801_v9  ;;  %v5999_v53 = vld [vmem:[%s4604_s18 + $0x12] sm:$0xff]  ;;  %s2709_s7 = sld [smem:[#allocation10 + %s2708_s16]]  ;;  %s1611_s16 = sadd.s32 5, %s5351_s21 }
 0x2aa   : > { %2298 = vrot.lane.b32.xlu1 %v2293_v3, %s4296_s17  ;;  %v2317_v3 = vmul.f32 %v5953_v58, %v5801_v9 }
 0x2ab   : > { %v5988_v39 = vpop.permute.xlu0 %1874 }
 0x2ac   : > { %8095 = vst [vmem:[#allocation142_spill] sm:$0xff] %v5988_v39  ;;  %v5990_v24 = vpop.permute.xlu1 %1876 }
 0x2ad   : > { %8096 = vst [vmem:[#allocation143_spill] sm:$0xff] %v5990_v24  ;;  %2308 = vrot.lane.b32.xlu0 %v2304_v1, %s4296_s17  ;;  %v2331_v1 = vmul.f32 %v5999_v53, %v6001_v38 }
 0x2ae   : > { %2310 = vrot.lane.b32.xlu1 %v2305_v56, %s4296_s17  ;;  %v2332_v56 = vmul.f32 %v6004_v55, %v6001_v38 }
 0x2af   : > { %v6006_v39 = vpop.permute.xlu0 %1886 }
 0x2b0   : > { %8097 = vst [vmem:[#allocation144_spill] sm:$0xff] %v6006_v39  ;;  %v6008_v24 = vpop.permute.xlu1 %1888 }
 0x2b1   : > { %8098 = vst [vmem:[#allocation145_spill] sm:$0xff] %v6008_v24  ;;  %2320 = vrot.lane.b32.xlu0 %v2316_v16, %s4296_s17  ;;  %v2343_v16 = vmul.f32 %v5999_v53, %v5950_v49 }
 0x2b2   : > { %2322 = vrot.lane.b32.xlu1 %v2317_v3, %s4296_s17  ;;  %v2344_v3 = vmul.f32 %v6004_v55, %v5950_v49 }
 0x2b3   : > { %v6016_v13 = vpop.permute.xlu0 %1898 }
 0x2b4   : > { %8099 = vst [vmem:[#allocation146_spill] sm:$0xff] %v6016_v13  ;;  %v6018_v37 = vpop.permute.xlu1 %1900 }
 0x2b5   : > { %8100 = vst [vmem:[#allocation147_spill] sm:$0xff] %v6018_v37  ;;  %2335 = vrot.lane.b32.xlu0 %v2331_v1, %s4296_s17  ;;  %v2355_v1 = vmul.f32 %v5999_v53, %v5837_v26 }
 0x2b6   : > { %2337 = vrot.lane.b32.xlu1 %v2332_v56, %s4296_s17  ;;  %v2356_v56 = vmul.f32 %v6004_v55, %v5837_v26 }
 0x2b7   : > { %v6027_v24 = vpop.permute.xlu0 %1913 }
 0x2b8   : > { %8101 = vst [vmem:[#allocation148_spill] sm:$0xff] %v6027_v24  ;;  %v6029_v39 = vpop.permute.xlu1 %1915 }
 0x2b9   : > { %8102 = vst [vmem:[#allocation149_spill] sm:$0xff] %v6029_v39  ;;  %2347 = vrot.lane.b32.xlu0 %v2343_v16, %s4296_s17  ;;  %v2367_v39 = vmul.f32 %v5999_v53, %v5786_v48  ;;  %v2368_v16 = vmul.f32 %v6004_v55, %v5786_v48  ;;  %v2394_v48 = vmul.f32 %v5948_v63, %v6001_v38 }
 0x2ba   : > { %2349 = vrot.lane.b32.xlu1 %v2344_v3, %s4296_s17  ;;  %v6047_v3 = vstv %s2380_s27  ;;  %s2689_s27 = sadd.s32 6, %s6143_s8 }
 0x2bb   : > { %v6037_v37 = vpop.permute.xlu0 %1925  ;;  %s2690_s20 = sld [smem:[#allocation10 + %s2689_s27]]  ;;  %s2919_s27 = sadd.s32 12, %s6143_s8 }
 0x2bc   : > { %8103 = vst [vmem:[#allocation150_spill] sm:$0xff] %v6037_v37  ;;  %v6039_v13 = vpop.permute.xlu1 %1927 }
 0x2bd   : > { %8104 = vst [vmem:[#allocation151_spill] sm:$0xff] %v6039_v13  ;;  %2359 = vrot.lane.b32.xlu0 %v2355_v1, %s4296_s17  ;;  %v2382_v1 = vmul.f32 %v5948_v63, %v6047_v3 }
 0x2be   : > { %2361 = vrot.lane.b32.xlu1 %v2356_v56, %s4296_s17  ;;  %v2383_v56 = vmul.f32 %v5953_v58, %v6047_v3 }
 0x2bf   : > { %v6049_v24 = vpop.permute.xlu0 %1937 }
 0x2c0   : > { %8105 = vst [vmem:[#allocation152_spill] sm:$0xff] %v6049_v24  ;;  %v6051_v9 = vpop.permute.xlu1 %1939 }
 0x2c1   : > { %8106 = vst [vmem:[#allocation153_spill] sm:$0xff] %v6051_v9  ;;  %2371 = vrot.lane.b32.xlu0 %v2367_v39, %s4296_s17  ;;  %v2395_v39 = vmul.f32 %v5953_v58, %v6001_v38 }
 0x2c2   : > { %2373 = vrot.lane.b32.xlu1 %v2368_v16, %s4296_s17 }
 0x2c3   : > { %v6059_v13 = vpop.permute.xlu0 %1949 }
 0x2c4   : > { %8107 = vst [vmem:[#allocation154_spill] sm:$0xff] %v6059_v13  ;;  %v6061_v37 = vpop.permute.xlu1 %1951 }
 0x2c5   : > { %8108 = vst [vmem:[#allocation155_spill] sm:$0xff] %v6061_v37  ;;  %2386 = vrot.lane.b32.xlu0 %v2382_v1, %s4297_s19  ;;  %v2406_v37 = vmul.f32 %v5948_v63, %v5883_v7  ;;  %v2407_v1 = vmul.f32 %v5953_v58, %v5883_v7 }
 0x2c6   : > { %2388 = vrot.lane.b32.xlu1 %v2383_v56, %s4297_s19 }
 0x2c7   : > { %v6069_v16 = vpop.permute.xlu0 %1964 }
 0x2c8   : > { %8109 = vst [vmem:[#allocation156_spill] sm:$0xff] %v6069_v16  ;;  %v6071_v9 = vpop.permute.xlu1 %1966 }
 0x2c9   : > { %8110 = vst [vmem:[#allocation157_spill] sm:$0xff] %v6071_v9  ;;  %2398 = vrot.lane.b32.xlu0 %v2394_v48, %s4297_s19  ;;  %v2418_v48 = vmul.f32 %v5948_v63, %v5837_v26 }
 0x2ca   : > { %2400 = vrot.lane.b32.xlu1 %v2395_v39, %s4297_s19  ;;  %v2419_v39 = vmul.f32 %v5953_v58, %v5837_v26  ;;  %v2442_v26 = vmul.f32 %v5999_v53, %v5883_v7  ;;  %v2443_v58 = vmul.f32 %v6004_v55, %v5883_v7 }
 0x2cb   : > { %v6079_v56 = vpop.permute.xlu0 %1976 }
 0x2cc   : > { %8111 = vst [vmem:[#allocation158_spill] sm:$0xff] %v6079_v56  ;;  %v6081_v13 = vpop.permute.xlu1 %1978 }
 0x2cd   : > { %8112 = vst [vmem:[#allocation159_spill] sm:$0xff] %v6081_v13  ;;  %2410 = vrot.lane.b32.xlu0 %v2406_v37, %s4297_s19  ;;  %v2430_v37 = vmul.f32 %v5999_v53, %v6047_v3 }
 0x2ce   : > { %2412 = vrot.lane.b32.xlu1 %v2407_v1, %s4297_s19  ;;  %v2431_v1 = vmul.f32 %v6004_v55, %v6047_v3 }
 0x2cf   : > { %v6089_v24 = vpop.permute.xlu0 %1988 }
 0x2d0   : > { %8113 = vst [vmem:[#allocation160_spill] sm:$0xff] %v6089_v24  ;;  %v6091_v9 = vpop.permute.xlu1 %1990 }
 0x2d1   : > { %8114 = vst [vmem:[#allocation161_spill] sm:$0xff] %v6091_v9  ;;  %2422 = vrot.lane.b32.xlu0 %v2418_v48, %s4297_s19  ;;  %v3855_v48 = vld [vmem:[%s4610_s15 + $0x12] sm:$0xff] }
 0x2d2   : > { %2424 = vrot.lane.b32.xlu1 %v2419_v39, %s4297_s19  ;;  %v3856_v39 = vld [vmem:[%s4610_s15 + $0x1a] sm:$0x3f]  ;;  %v2482_v55 = vmul.f32 %v3855_v48, %v5965_v44 }
 0x2d3   : > { %v6099_v13 = vpop.permute.xlu0 %2000  ;;  %v2471_v53 = vmul.f32 %v3856_v39, %v5950_v49  ;;  %v2483_v7 = vmul.f32 %v3856_v39, %v5965_v44 }
 0x2d4   : > { %8115 = vst [vmem:[#allocation162_spill] sm:$0xff] %v6099_v13  ;;  %v6101_v63 = vpop.permute.xlu1 %2002 }
 0x2d5   : > { %8116 = vst [vmem:[#allocation163_spill] sm:$0xff] %v6101_v63  ;;  %2434 = vrot.lane.b32.xlu0 %v2430_v37, %s4297_s19  ;;  %v2470_v37 = vmul.f32 %v3855_v48, %v5950_v49 }
 0x2d6   : > { %2436 = vrot.lane.b32.xlu1 %v2431_v1, %s4297_s19 }
 0x2d7   : > { %v6111_v56 = vpop.permute.xlu0 %2012 }
 0x2d8   : > { %8117 = vst [vmem:[#allocation164_spill] sm:$0xff] %v6111_v56  ;;  %v6113_v13 = vpop.permute.xlu1 %2014 }
 0x2d9   : > { %8118 = vst [vmem:[#allocation165_spill] sm:$0xff] %v6113_v13  ;;  %2446 = vrot.lane.b32.xlu0 %v2442_v26, %s4297_s19  ;;  %v3857_v13 = vld [vmem:[%s4612_s1 + $0x12] sm:$0xff]  ;;  %v3858_v26 = vld [vmem:[%s4612_s1 + $0x1a] sm:$0x3f] }
 0x2da   : > { %2448 = vrot.lane.b32.xlu1 %v2443_v58, %s4297_s19 }
 0x2db   : > { %v6119_v1 = vpop.permute.xlu0 %2024 }
 0x2dc   : > { %8119 = vst [vmem:[#allocation166_spill] sm:$0xff] %v6119_v1  ;;  %v6121_v63 = vpop.permute.xlu1 %2026 }
 0x2dd   : > { %8120 = vst [vmem:[#allocation167_spill] sm:$0xff] %v6121_v63  ;;  %2474 = vrot.lane.b32.xlu0 %v2470_v37, %s4296_s17  ;;  %v2494_v37 = vmul.f32 %v3857_v13, %v6001_v38 }
 0x2de   : > { %2476 = vrot.lane.b32.xlu1 %v2471_v53, %s4296_s17  ;;  %v2495_v53 = vmul.f32 %v3858_v26, %v6001_v38 }
 0x2df   : > { %v6129_v56 = vpop.permute.xlu0 %2073 }
 0x2e0   : > { %8121 = vst [vmem:[#allocation168_spill] sm:$0xff] %v6129_v56  ;;  %v6131_v58 = vpop.permute.xlu1 %2075 }
 0x2e1   : > { %8122 = vst [vmem:[#allocation169_spill] sm:$0xff] %v6131_v58  ;;  %2486 = vrot.lane.b32.xlu0 %v2482_v55, %s4296_s17  ;;  %v2506_v55 = vmul.f32 %v3857_v13, %v5950_v49 }
 0x2e2   : > { %2488 = vrot.lane.b32.xlu1 %v2483_v7, %s4296_s17  ;;  %v2507_v7 = vmul.f32 %v3858_v26, %v5950_v49  ;;  %v2530_v49 = vmul.f32 %v3855_v48, %v6001_v38 }
 0x2e3   : > { %v6139_v63 = vpop.permute.xlu0 %2085 }
 0x2e4   : > { %8123 = vst [vmem:[#allocation170_spill] sm:$0xff] %v6139_v63  ;;  %v6141_v1 = vpop.permute.xlu1 %2087 }
 0x2e5   : > { %8124 = vst [vmem:[#allocation171_spill] sm:$0xff] %v6141_v1  ;;  %2498 = vrot.lane.b32.xlu0 %v2494_v37, %s4296_s17  ;;  %v2518_v1 = vmul.f32 %v3855_v48, %v6047_v3  ;;  %v2519_v37 = vmul.f32 %v3856_v39, %v6047_v3  ;;  %v3860_v48 = vld [vmem:[%s4596_s30 + $0x28] sm:$0x3f] }
 0x2e6   : > { %2500 = vrot.lane.b32.xlu1 %v2495_v53, %s4296_s17 }
 0x2e7   : > { %v6149_v58 = vpop.permute.xlu0 %2097 }
 0x2e8   : > { %8125 = vst [vmem:[#allocation172_spill] sm:$0xff] %v6149_v58  ;;  %v6151_v56 = vpop.permute.xlu1 %2099  ;;  %v3862_v58 = vld [vmem:[%s4604_s18 + $0x28] sm:$0x3f] }
 0x2e9   : > { %8126 = vst [vmem:[#allocation173_spill] sm:$0xff] %v6151_v56  ;;  %2510 = vrot.lane.b32.xlu0 %v2506_v55, %s4296_s17  ;;  %v2531_v55 = vmul.f32 %v3856_v39, %v6001_v38 }
 0x2ea   : > { %2512 = vrot.lane.b32.xlu1 %v2507_v7, %s4296_s17 }
 0x2eb   : > { %v6158_v53 = vpop.permute.xlu0 %2109 }
 0x2ec   : > { %8127 = vst [vmem:[#allocation174_spill] sm:$0xff] %v6158_v53  ;;  %v6160_v63 = vpop.permute.xlu1 %2111  ;;  %v6177_v53 = vstv %s2580_s11  ;;  %s2759_s11 = sadd.s32 8, %s6143_s8 }
 0x2ed   : > { %8128 = vst [vmem:[#allocation175_spill] sm:$0xff] %v6160_v63  ;;  %2522 = vrot.lane.b32.xlu0 %v2518_v1, %s4297_s19  ;;  %v2542_v63 = vmul.f32 %v3857_v13, %v6047_v3  ;;  %v2543_v1 = vmul.f32 %v3858_v26, %v6047_v3  ;;  %v2583_v13 = vmul.f32 %v3860_v48, %v6177_v53  ;;  %v6188_v3 = vstv %s2569_s12  ;;  %s1180_s12 = sadd.s32 20, %s4627_s0  ;;  %s2760_s29 = sld [smem:[#allocation10 + %s2759_s11]] }
 0x2ee   : > { %2524 = vrot.lane.b32.xlu1 %v2519_v37, %s4297_s19  ;;  %v3859_v37 = vld [vmem:[%s4596_s30 + $0x20] sm:$0xff]  ;;  %8133 = vst [vmem:[#allocation180_spill] sm:$0xff] %v6188_v3  ;;  %s6317_s0 = sld [smem:[#allocation10 + %s5351_s21]]  ;;  %s1823_s11 = sadd.s32 10, %s5351_s21 }
 0x2ef   : > { %v6167_v7 = vpop.permute.xlu0 %2124 }
 0x2f0   : > { %8129 = vst [vmem:[#allocation176_spill] sm:$0xff] %v6167_v7  ;;  %v6169_v56 = vpop.permute.xlu1 %2126 }
 0x2f1   : > { %8130 = vst [vmem:[#allocation177_spill] sm:$0xff] %v6169_v56  ;;  %2534 = vrot.lane.b32.xlu0 %v2530_v49, %s4297_s19  ;;  %v2582_v49 = vmul.f32 %v3859_v37, %v6177_v53 }
 0x2f2   : > { %2536 = vrot.lane.b32.xlu1 %v2531_v55, %s4297_s19 }
 0x2f3   : > { %v6180_v38 = vpop.permute.xlu0 %2136  ;;  %v6303_v24 = vstv %s2760_s29  ;;  %s2970_s29 = sadd.s32 13, %s6143_s8 }
 0x2f4   : > { %8131 = vst [vmem:[#allocation178_spill] sm:$0xff] %v6180_v38  ;;  %v6182_v39 = vpop.permute.xlu1 %2138  ;;  %v6200_v38 = vstv %s2607_s9  ;;  %s1181_s9 = sld [smem:[#allocation10 + %s1180_s12]]  ;;  %8157 = vst [vmem:[#allocation204_spill] sm:$0xff] %v6303_v24 }
 0x2f5   : > { %8132 = vst [vmem:[#allocation179_spill] sm:$0xff] %v6182_v39  ;;  %2546 = vrot.lane.b32.xlu0 %v2542_v63, %s4297_s19  ;;  %v2594_v39 = vmul.f32 %v3859_v37, %v6188_v3  ;;  %v2595_v63 = vmul.f32 %v3860_v48, %v6188_v3  ;;  %s6649_s12 = sld [smem:[#allocation10 + %s1823_s11]]  ;;  %s3111_s11 = sadd.s32 16, %s6143_s8 }
 0x2f6   : > { %2548 = vrot.lane.b32.xlu1 %v2543_v1, %s4297_s19  ;;  %v3861_v1 = vld [vmem:[%s4604_s18 + $0x20] sm:$0xff] }
 0x2f7   : > { %v6190_v26 = vpop.permute.xlu0 %2148 }
 0x2f8   : > { %8134 = vst [vmem:[#allocation181_spill] sm:$0xff] %v6190_v26  ;;  %v6192_v55 = vpop.permute.xlu1 %2150 }
 0x2f9   : > { %8135 = vst [vmem:[#allocation182_spill] sm:$0xff] %v6192_v55  ;;  %2586 = vrot.lane.b32.xlu0 %v2582_v49, %s4296_s17  ;;  %v2609_v49 = vmul.f32 %v3861_v1, %v6200_v38 }
 0x2fa   : > { %2588 = vrot.lane.b32.xlu1 %v2583_v13, %s4296_s17  ;;  %v2610_v13 = vmul.f32 %v3862_v58, %v6200_v38 }
 0x2fb   : > { %v6203_v56 = vpop.permute.xlu0 %2160 }
 0x2fc   : > { %8136 = vst [vmem:[#allocation183_spill] sm:$0xff] %v6203_v56  ;;  %v6205_v26 = vpop.permute.xlu1 %2162  ;;  %v2621_v56 = vmul.f32 %v3861_v1, %v6177_v53 }
 0x2fd   : > { %8137 = vst [vmem:[#allocation184_spill] sm:$0xff] %v6205_v26  ;;  %2598 = vrot.lane.b32.xlu0 %v2594_v39, %s4296_s17  ;;  %v2622_v26 = vmul.f32 %v3862_v58, %v6177_v53  ;;  %v6219_v39 = vstv %s2634_s13  ;;  %s6393_s13 = sld [smem:[#allocation10 + %s2810_s10]] }
 0x2fe   : > { %2600 = vrot.lane.b32.xlu1 %v2595_v63, %s4296_s17  ;;  %8140 = vst [vmem:[#allocation187_spill] sm:$0xff] %v6219_v39 }
 0x2ff   : > { %v6211_v55 = vpop.permute.xlu0 %2175 }
 0x300   : > { %8138 = vst [vmem:[#allocation185_spill] sm:$0xff] %v6211_v55  ;;  %v6213_v7 = vpop.permute.xlu1 %2177 }
 0x301   : > { %8139 = vst [vmem:[#allocation186_spill] sm:$0xff] %v6213_v7  ;;  %2613 = vrot.lane.b32.xlu0 %v2609_v49, %s4296_s17  ;;  %v2636_v7 = vmul.f32 %v3859_v37, %v6219_v39  ;;  %v2637_v49 = vmul.f32 %v3860_v48, %v6219_v39 }
 0x302   : > { %2615 = vrot.lane.b32.xlu1 %v2610_v13, %s4296_s17 }
 0x303   : > { %v6221_v63 = vpop.permute.xlu0 %2187 }
 0x304   : > { %8141 = vst [vmem:[#allocation188_spill] sm:$0xff] %v6221_v63  ;;  %v6223_v9 = vpop.permute.xlu1 %2189 }
 0x305   : > { %8142 = vst [vmem:[#allocation189_spill] sm:$0xff] %v6223_v9  ;;  %2625 = vrot.lane.b32.xlu0 %v2621_v56, %s4296_s17  ;;  %v2648_v56 = vmul.f32 %v3859_v37, %v6200_v38  ;;  %v6250_v37 = vstv %s2709_s7  ;;  %s6524_s7 = sld [smem:[#allocation10 + %s1611_s16]] }
 0x306   : > { %2627 = vrot.lane.b32.xlu1 %v2622_v26, %s4296_s17  ;;  %v2649_v26 = vmul.f32 %v3860_v48, %v6200_v38  ;;  %8147 = vst [vmem:[#allocation194_spill] sm:$0xff] %v6250_v37  ;;  %v6253_v48 = vld [vmem:[%s4610_s15 + $0x28] sm:$0x3f] }
 0x307   : > { %v6230_v13 = vpop.permute.xlu0 %2199 }
 0x308   : > { %8143 = vst [vmem:[#allocation190_spill] sm:$0xff] %v6230_v13  ;;  %v6232_v55 = vpop.permute.xlu1 %2201 }
 0x309   : > { %8144 = vst [vmem:[#allocation191_spill] sm:$0xff] %v6232_v55  ;;  %2640 = vrot.lane.b32.xlu0 %v2636_v7, %s4297_s19  ;;  %v2660_v55 = vmul.f32 %v3861_v1, %v6219_v39  ;;  %v2661_v7 = vmul.f32 %v3862_v58, %v6219_v39  ;;  %v2712_v58 = vmul.f32 %v6253_v48, %v6250_v37 }
 0x30a   : > { %2642 = vrot.lane.b32.xlu1 %v2637_v49, %s4297_s19  ;;  %v6248_v49 = vld [vmem:[%s4610_s15 + $0x20] sm:$0xff]  ;;  %v6335_v39 = vmul.f32 %v4009_v51, %v4977_v33 }
 0x30b   : > { %v6239_v9 = vpop.permute.xlu0 %2211  ;;  %v2711_v1 = vmul.f32 %v6248_v49, %v6250_v37 }
 0x30c   : > { %8145 = vst [vmem:[#allocation192_spill] sm:$0xff] %v6239_v9  ;;  %v6241_v63 = vpop.permute.xlu1 %2213  ;;  %8161 = vst [vmem:[#allocation208_spill] sm:$0xff] %v6335_v39 }
 0x30d   : > { %8146 = vst [vmem:[#allocation193_spill] sm:$0xff] %v6241_v63  ;;  %2652 = vrot.lane.b32.xlu0 %v2648_v56, %s4297_s19  ;;  %v6266_v56 = vstv %s2690_s20  ;;  %s6612_s20 = sld [smem:[#allocation10 + %s2919_s27]]  ;;  %s3130_s27 = sadd.s32 17, %s6143_s8 }
 0x30e   : > { %2654 = vrot.lane.b32.xlu1 %v2649_v26, %s4297_s19  ;;  %8150 = vst [vmem:[#allocation197_spill] sm:$0xff] %v6266_v56 }
 0x30f   : > { %v6255_v13 = vpop.permute.xlu0 %2223 }
 0x310   : > { %8148 = vst [vmem:[#allocation195_spill] sm:$0xff] %v6255_v13  ;;  %v6257_v9 = vpop.permute.xlu1 %2225 }
 0x311   : > { %8149 = vst [vmem:[#allocation196_spill] sm:$0xff] %v6257_v9  ;;  %2664 = vrot.lane.b32.xlu0 %v2660_v55, %s4297_s19  ;;  %v2723_v55 = vmul.f32 %v6248_v49, %v6266_v56 }
 0x312   : > { %2666 = vrot.lane.b32.xlu1 %v2661_v7, %s4297_s19  ;;  %v2724_v7 = vmul.f32 %v6253_v48, %v6266_v56  ;;  %v6322_v56 = vstv %s1181_s9  ;;  %s6748_s9 = sld [smem:[#allocation10 + %s2970_s29]] }
 0x313   : > { %v6268_v26 = vpop.permute.xlu0 %2235 }
 0x314   : > { %8151 = vst [vmem:[#allocation198_spill] sm:$0xff] %v6268_v26  ;;  %v6270_v63 = vpop.permute.xlu1 %2237 }
 0x315   : > { %8152 = vst [vmem:[#allocation199_spill] sm:$0xff] %v6270_v63  ;;  %2715 = vrot.lane.b32.xlu0 %v2711_v1, %s4296_s17  ;;  %v2735_v1 = vmul.f32 %v6248_v49, %v6177_v53 }
 0x316   : > { %2717 = vrot.lane.b32.xlu1 %v2712_v58, %s4296_s17  ;;  %v2736_v58 = vmul.f32 %v6253_v48, %v6177_v53 }
 0x317   : > { %v6280_v9 = vpop.permute.xlu0 %2284 }
 0x318   : > { %8153 = vst [vmem:[#allocation200_spill] sm:$0xff] %v6280_v9  ;;  %v6282_v26 = vpop.permute.xlu1 %2286  ;;  %v6301_v9 = vld [vmem:[%s4612_s1 + $0x20] sm:$0xff] }
 0x319   : > { %8154 = vst [vmem:[#allocation201_spill] sm:$0xff] %v6282_v26  ;;  %2727 = vrot.lane.b32.xlu0 %v2723_v55, %s4296_s17  ;;  %v2747_v55 = vmul.f32 %v6248_v49, %v6188_v3  ;;  %v971_v26 = vstv %s970_s26  ;;  %s6641_s26 = sld [smem:[#allocation10 + %s2900_s4]] }
 0x31a   : > { %2729 = vrot.lane.b32.xlu1 %v2724_v7, %s4296_s17  ;;  %v2748_v7 = vmul.f32 %v6253_v48, %v6188_v3  ;;  %v4007_v3 = vld [vmem:[%s4610_s15 + $0x1] sm:$0xff]  ;;  %v6331_v36 = vmul.f32 %v4008_v6, %v971_v26  ;;  %v6351_v45 = vmul.f32 %v4009_v51, %v971_v26  ;;  %s7076_s4 = sld [smem:[#allocation10 + %s3130_s27]] }
 0x31b   : > { %v6290_v63 = vpop.permute.xlu0 %2296  ;;  %v6320_v44 = vmul.f32 %v4007_v3, %v971_v26  ;;  %v4010_v6 = vld [vmem:[%s4596_s30 + $0x2] sm:$0xff] }
 0x31c   : > { %8155 = vst [vmem:[#allocation202_spill] sm:$0xff] %v6290_v63  ;;  %v6292_v13 = vpop.permute.xlu1 %2298  ;;  %v6306_v63 = vld [vmem:[%s4612_s1 + $0x28] sm:$0x3f]  ;;  %8165 = vst [vmem:[#allocation212_spill] sm:$0xff] %v6351_v45 }
 0x31d   : > { %8156 = vst [vmem:[#allocation203_spill] sm:$0xff] %v6292_v13  ;;  %2739 = vrot.lane.b32.xlu0 %v2735_v1, %s4296_s17  ;;  %v4012_v45 = vld [vmem:[%s4596_s30 + $0xa] sm:$0x3f] }
 0x31e   : > { %2741 = vrot.lane.b32.xlu1 %v2736_v58, %s4296_s17  ;;  %v4006_v58 = vld [vmem:[%s4612_s1 + $0x1] sm:$0xff] }
 0x31f   : > { %v6308_v13 = vpop.permute.xlu0 %2308  ;;  %v6314_v16 = vmul.f32 %v4006_v58, %v4977_v33 }
 0x320   : > { %8158 = vst [vmem:[#allocation205_spill] sm:$0xff] %v6308_v13  ;;  %v6310_v1 = vpop.permute.xlu1 %2310  ;;  %v2762_v13 = vmul.f32 %v6301_v9, %v6303_v24 }
 0x321   : > { %8159 = vst [vmem:[#allocation206_spill] sm:$0xff] %v6310_v1  ;;  %8160 = vst [vmem:[#allocation207_spill] sm:$0xff] %v6314_v16  ;;  %2751 = vrot.lane.b32.xlu0 %v2747_v55, %s4296_s17  ;;  %v2763_v1 = vmul.f32 %v6306_v63, %v6303_v24  ;;  %v6338_v55 = vmul.f32 %v4007_v3, %v5064_v35  ;;  %v6347_v16 = vmul.f32 %v4009_v51, %v4852_v22 }
 0x322   : > { %2753 = vrot.lane.b32.xlu1 %v2748_v7, %s4296_s17  ;;  %v6341_v7 = vmul.f32 %v4006_v58, %v4852_v22  ;;  %v6349_v24 = vmul.f32 %v4006_v58, %v971_v26  ;;  %v6359_v3 = vmul.f32 %v4006_v58, %v5064_v35  ;;  %v6366_v22 = vmul.f32 %v4010_v6, %v6322_v56  ;;  %v4013_v58 = vld [vmem:[%s4604_s18 + $0xa] sm:$0x3f] }
 0x323   : > { %8163 = vst [vmem:[#allocation210_spill] sm:$0xff] %v6347_v16  ;;  %v6353_v57 = vpop.permute.xlu0 %2320  ;;  %v4011_v16 = vld [vmem:[%s4604_s18 + $0x2] sm:$0xff] }
 0x324   : > { %8162 = vst [vmem:[#allocation209_spill] sm:$0xff] %v6341_v7  ;;  %8164 = vst [vmem:[#allocation211_spill] sm:$0xff] %v6349_v24  ;;  %v6355_v39 = vpop.permute.xlu1 %2322  ;;  %v6362_v7 = vmul.f32 %v4009_v51, %v5064_v35  ;;  %v6370_v24 = vmul.f32 %v4011_v16, %v5168_v10  ;;  %v2774_v35 = vmul.f32 %v6301_v9, %v6250_v37 }
 0x325   : > { %8166 = vst [vmem:[#allocation213_spill] sm:$0xff] %v6353_v57  ;;  %8167 = vst [vmem:[#allocation214_spill] sm:$0xff] %v6355_v39  ;;  %v6374_v57 = vmul.f32 %v4012_v45, %v6322_v56  ;;  %2766 = vrot.lane.b32.xlu0 %v2762_v13, %s4296_s17  ;;  %v2775_v51 = vmul.f32 %v6306_v63, %v6250_v37  ;;  %v6384_v39 = vmul.f32 %v4013_v58, %v5168_v10 }
 0x326   : > { %8168 = vst [vmem:[#allocation215_spill] sm:$0xff] %v6362_v7  ;;  %8169 = vst [vmem:[#allocation216_spill] sm:$0xff] %v6366_v22  ;;  %2768 = vrot.lane.b32.xlu1 %v2763_v1, %s4296_s17  ;;  %v6389_v22 = vmul.f32 %v4011_v16, %v4977_v33  ;;  %v6396_v13 = vmul.f32 %v4013_v58, %v4977_v33  ;;  %v6399_v1 = vmul.f32 %v4011_v16, %v6322_v56 }
 0x327   : > { %8170 = vst [vmem:[#allocation217_spill] sm:$0xff] %v6370_v24  ;;  %8171 = vst [vmem:[#allocation218_spill] sm:$0xff] %v6374_v57  ;;  %v6386_v24 = vmul.f32 %v4010_v6, %v971_v26  ;;  %v6391_v57 = vmul.f32 %v4012_v45, %v971_v26  ;;  %v6402_v37 = vmul.f32 %v4013_v58, %v6322_v56  ;;  %v6406_v6 = vpop.permute.xlu0 %2335 }
 0x328   : > { %8172 = vst [vmem:[#allocation219_spill] sm:$0xff] %v6384_v39  ;;  %8173 = vst [vmem:[#allocation220_spill] sm:$0xff] %v6389_v22  ;;  %v6404_v7 = vmul.f32 %v4011_v16, %v971_v26  ;;  %v6408_v39 = vpop.permute.xlu1 %2337  ;;  %v803_v45 = vadd.f32 %v5185_v43, %v5093_v41  ;;  %v804_v33 = vadd.f32 %v5187_v25, %v5095_v42  ;;  %v6417_v22 = vstv %s6317_s0  ;;  %s2034_s0 = sadd.s32 15, %s5351_s21 }
 0x329   : > { %8174 = vst [vmem:[#allocation221_spill] sm:$0xff] %v6396_v13  ;;  %8175 = vst [vmem:[#allocation222_spill] sm:$0xff] %v6402_v37  ;;  %v6414_v13 = vmul.f32 %v4013_v58, %v971_v26  ;;  %v815_v37 = vadd.f32 %v5195_v17, %v5170_v32  ;;  %2778 = vrot.lane.b32.xlu0 %v2774_v35, %s4296_s17  ;;  %v2786_v16 = vmul.f32 %v6301_v9, %v6200_v38  ;;  %s6797_s10 = sld [smem:[#allocation10 + %s2034_s0]] }
 0x32a   : > { %8176 = vst [vmem:[#allocation223_spill] sm:$0xff] %v6406_v6  ;;  %8177 = vst [vmem:[#allocation224_spill] sm:$0xff] %v6408_v39  ;;  %2780 = vrot.lane.b32.xlu1 %v2775_v51, %s4296_s17  ;;  %v2787_v41 = vmul.f32 %v6306_v63, %v6200_v38  ;;  %v816_v42 = vadd.f32 %v5197_v54, %v5172_v23  ;;  %v827_v43 = vadd.f32 %v5213_v19, %v5131_v46  ;;  %v4014_v51 = vld [vmem:[%s4596_s30 + $0x10] sm:$0xff] }
 0x32b   : > { %v828_v32 = vadd.f32 %v5215_v28, %v5134_v60  ;;  %v854_v25 = vadd.f32 %v5234_v59, %v803_v45  ;;  %v839_v17 = vadd.f32 %v5223_v29, %v5181_v50  ;;  %v840_v26 = vadd.f32 %v5225_v47, %v5183_v52  ;;  %v6443_v23 = vpop.permute.xlu0 %2347  ;;  %v4015_v50 = vld [vmem:[%s4596_s30 + $0x18] sm:$0x3f]  ;;  %v4016_v52 = vld [vmem:[%s4604_s18 + $0x10] sm:$0xff] }
 0x32c   : > { %v855_v35 = vadd.f32 %v5236_v4, %v804_v33  ;;  %v6441_v58 = vmul.f32 %v4014_v51, %v6417_v22  ;;  %8178 = vst [vmem:[#allocation225_spill] sm:$0xff] %v6443_v23  ;;  %v6445_v46 = vpop.permute.xlu1 %2349  ;;  %v878_v60 = vadd.f32 %v5256_v5, %v827_v43  ;;  %v6451_v19 = vmul.f32 %v4015_v50, %v6417_v22  ;;  %v4018_v43 = vld [vmem:[%s4610_s15 + $0x2] sm:$0xff] }
 0x32d   : > { %8179 = vst [vmem:[#allocation226_spill] sm:$0xff] %v6445_v46  ;;  %v905_v54 = vadd.f32 %v5276_v21, %v854_v25  ;;  %v6455_v28 = vmul.f32 %v4016_v52, %v5396_v62  ;;  %v879_v29 = vadd.f32 %v5258_v12, %v828_v32  ;;  %2790 = vrot.lane.b32.xlu0 %v2786_v16, %s4296_s17  ;;  %v4017_v21 = vld [vmem:[%s4604_s18 + $0x18] sm:$0x3f]  ;;  %v6471_v12 = vstv %s6393_s13  ;;  %v8265_v39 = vld [vmem:[#allocation68_spill] sm:$0xff]  ;;  %s3021_s13 = sadd.s32 14, %s6143_s8 }
 0x32e   : > { %2792 = vrot.lane.b32.xlu1 %v2787_v41, %s4296_s17  ;;  %v2798_v47 = vmul.f32 %v6301_v9, %v6177_v53  ;;  %v2799_v59 = vmul.f32 %v6306_v63, %v6177_v53  ;;  %v866_v4 = vadd.f32 %v5244_v11, %v815_v37  ;;  %v906_v5 = vadd.f32 %v5278_v30, %v855_v35  ;;  %s6875_s16 = sld [smem:[#allocation10 + %s3021_s13]] }
 0x32f   : > { %v6468_v45 = vmul.f32 %v4017_v21, %v5396_v62  ;;  %v867_v33 = vadd.f32 %v5246_v61, %v816_v42  ;;  %v929_v16 = vadd.f32 %v5296_v31, %v878_v60  ;;  %v930_v41 = vadd.f32 %v5298_v2, %v879_v29  ;;  %v6480_v32 = vpop.permute.xlu0 %2359  ;;  %v4019_v61 = vld [vmem:[%s4612_s1 + $0x2] sm:$0xff]  ;;  %v4020_v60 = vld [vmem:[%s4610_s15 + $0xa] sm:$0x3f] }
 0x330   : > { %v6478_v53 = vmul.f32 %v4018_v43, %v6322_v56  ;;  %8180 = vst [vmem:[#allocation227_spill] sm:$0xff] %v6480_v32  ;;  %v6482_v11 = vpop.permute.xlu1 %2361  ;;  %v890_v30 = vadd.f32 %v5266_v14, %v839_v17  ;;  %v891_v37 = vadd.f32 %v5268_v20, %v840_v26  ;;  %v974_v25 = vadd.f32 %v6320_v44, %v905_v54  ;;  %v8189_v43 = vld [vmem:[#allocation209_spill] sm:$0xff] }
 0x331   : > { %8181 = vst [vmem:[#allocation228_spill] sm:$0xff] %v6482_v11  ;;  %v6489_v31 = vmul.f32 %v4019_v61, %v5168_v10  ;;  %v917_v2 = vadd.f32 %v5286_v15, %v866_v4  ;;  %2802 = vrot.lane.b32.xlu0 %v2798_v47, %s4296_s17  ;;  %v2813_v42 = vmul.f32 %v6248_v49, %v6471_v12  ;;  %v6595_v23 = vstv %s6524_s7  ;;  %s2245_s7 = sadd.s32 20, %s5351_s21 }
 0x332   : > { %2804 = vrot.lane.b32.xlu1 %v2799_v59, %s4296_s17  ;;  %v2814_v14 = vmul.f32 %v6253_v48, %v6471_v12  ;;  %v975_v20 = vadd.f32 %v6331_v36, %v906_v5  ;;  %v918_v44 = vadd.f32 %v5288_v34, %v867_v33  ;;  %v941_v17 = vadd.f32 %v5306_v8, %v890_v30  ;;  %v8184_v8 = vld [vmem:[#allocation22_spill] sm:$0xff]  ;;  %v4021_v59 = vld [vmem:[%s4612_s1 + $0xa] sm:$0x3f]  ;;  %s6917_s21 = sld [smem:[#allocation10 + %s2245_s7]] }
 0x333   : > { %v942_v26 = vadd.f32 %v5308_v0, %v891_v37  ;;  %v978_v15 = vadd.f32 %v6338_v55, %v929_v16  ;;  %v979_v35 = vadd.f32 %v6344_v27, %v930_v41  ;;  %v953_v51 = vadd.f32 %v5318_v40, %v917_v2  ;;  %v6510_v50 = vpop.permute.xlu0 %2371  ;;  %v8185_v0 = vld [vmem:[#allocation23_spill] sm:$0xff]  ;;  %v8186_v27 = vld [vmem:[#allocation204_spill] sm:$0xff]  ;;  %v8190_v37 = vld [vmem:[#allocation210_spill] sm:$0xff] }
 0x334   : > { %v6508_v54 = vmul.f32 %v4020_v60, %v6322_v56  ;;  %8182 = vst [vmem:[#allocation229_spill] sm:$0xff] %v6510_v50  ;;  %v6512_v36 = vpop.permute.xlu1 %2373  ;;  %v954_v34 = vadd.f32 %v5320_v18, %v918_v44  ;;  %v965_v29 = vadd.f32 %v8184_v8, %v941_v17  ;;  %v6519_v55 = vmul.f32 %v4021_v59, %v5168_v10  ;;  %v8187_v5 = vld [vmem:[#allocation207_spill] sm:$0xff]  ;;  %v8188_v10 = vld [vmem:[#allocation208_spill] sm:$0xff] }
 0x335   : > { %8183 = vst [vmem:[#allocation230_spill] sm:$0xff] %v6512_v36  ;;  %v966_v47 = vadd.f32 %v8185_v0, %v942_v26  ;;  %v6522_v40 = vmul.f32 %v4016_v52, %v6417_v22  ;;  %2817 = vrot.lane.b32.xlu0 %v2813_v42, %s4297_s19  ;;  %v2825_v18 = vmul.f32 %v6248_v49, %v8186_v27  ;;  %v8191_v42 = vld [vmem:[#allocation211_spill] sm:$0xff]  ;;  %v8209_v50 = vld [vmem:[#allocation40_spill] sm:$0xff] }
 0x336   : > { %2819 = vrot.lane.b32.xlu1 %v2814_v14, %s4297_s19  ;;  %v2826_v4 = vmul.f32 %v6253_v48, %v8186_v27  ;;  %v987_v33 = vadd.f32 %v8187_v5, %v974_v25  ;;  %v988_v16 = vadd.f32 %v8188_v10, %v975_v20  ;;  %v6535_v52 = vmul.f32 %v4017_v21, %v6417_v22  ;;  %v8194_v20 = vld [vmem:[#allocation212_spill] sm:$0xff]  ;;  %v8197_v8 = vld [vmem:[#allocation187_spill] sm:$0xff]  ;;  %v8200_v5 = vld [vmem:[#allocation29_spill] sm:$0xff] }
 0x337   : > { %v6538_v41 = vmul.f32 %v4019_v61, %v6322_v56  ;;  %v995_v30 = vadd.f32 %v8189_v43, %v978_v15  ;;  %v996_v2 = vadd.f32 %v8190_v37, %v979_v35  ;;  %v991_v14 = vadd.f32 %v8191_v42, %v953_v51  ;;  %v6546_v17 = vpop.permute.xlu0 %2386  ;;  %v8195_v61 = vld [vmem:[#allocation215_spill] sm:$0xff]  ;;  %v4022_v15 = vld [vmem:[%s4610_s15 + $0x10] sm:$0xff] }
 0x338   : > { %v6544_v44 = vmul.f32 %v4021_v59, %v6322_v56  ;;  %8192 = vst [vmem:[#allocation22_spill] sm:$0xff] %v6546_v17  ;;  %v6548_v25 = vpop.permute.xlu1 %2388  ;;  %v992_v21 = vadd.f32 %v8194_v20, %v954_v34  ;;  %v999_v26 = vadd.f32 %v6359_v3, %v965_v29  ;;  %v1000_v60 = vadd.f32 %v8195_v61, %v966_v47  ;;  %v8196_v51 = vld [vmem:[#allocation24_spill] sm:$0xff]  ;;  %v8198_v29 = vld [vmem:[#allocation25_spill] sm:$0xff] }
 0x339   : > { %8193 = vst [vmem:[#allocation23_spill] sm:$0xff] %v6548_v25  ;;  %v6555_v35 = vmul.f32 %v4022_v15, %v6417_v22  ;;  %v1014_v56 = vadd.f32 %v8196_v51, %v987_v33  ;;  %2829 = vrot.lane.b32.xlu0 %v2825_v18, %s4297_s19  ;;  %v2837_v34 = vmul.f32 %v6248_v49, %v8197_v8  ;;  %v8199_v47 = vld [vmem:[#allocation28_spill] sm:$0xff]  ;;  %v4023_v43 = vld [vmem:[%s4610_s15 + $0x18] sm:$0x3f]  ;;  %v8201_v18 = vld [vmem:[#allocation26_spill] sm:$0xff] }
 0x33a   : > { %2831 = vrot.lane.b32.xlu1 %v2826_v4, %s4297_s19  ;;  %v2838_v3 = vmul.f32 %v6253_v48, %v8197_v8  ;;  %v1015_v0 = vadd.f32 %v8198_v29, %v988_v16  ;;  %v1038_v59 = vadd.f32 %v8199_v47, %v995_v30  ;;  %v1039_v10 = vadd.f32 %v8200_v5, %v996_v2  ;;  %v8202_v37 = vld [vmem:[#allocation32_spill] sm:$0xff]  ;;  %v6578_v51 = vld [vmem:[%s4612_s1 + $0x18] sm:$0x3f] }
 0x33b   : > { %v6569_v33 = vmul.f32 %v4023_v43, %v6417_v22  ;;  %v1026_v4 = vadd.f32 %v8201_v18, %v991_v14  ;;  %v1065_v42 = vadd.f32 %v8202_v37, %v1014_v56  ;;  %v4024_v20 = vld [vmem:[%s4612_s1 + $0x10] sm:$0xff]  ;;  %v6582_v16 = vmul.f32 %v6578_v51, %v5396_v62  ;;  %v6584_v30 = vpop.permute.xlu0 %2398  ;;  %v8205_v29 = vld [vmem:[#allocation27_spill] sm:$0xff]  ;;  %v8206_v14 = vld [vmem:[#allocation33_spill] sm:$0xff] }
 0x33c   : > { %v6575_v61 = vmul.f32 %v4024_v20, %v5396_v62  ;;  %8203 = vst [vmem:[#allocation204_spill] sm:$0xff] %v6584_v30  ;;  %v6586_v2 = vpop.permute.xlu1 %2400  ;;  %v1027_v47 = vadd.f32 %v8205_v29, %v992_v21  ;;  %v1066_v5 = vadd.f32 %v8206_v14, %v1015_v0  ;;  %v8207_v56 = vld [vmem:[#allocation36_spill] sm:$0xff]  ;;  %v8208_v37 = vld [vmem:[#allocation37_spill] sm:$0xff]  ;;  %v2849_v62 = vmul.f32 %v6248_v49, %v6200_v38  ;;  %v8210_v0 = vld [vmem:[#allocation30_spill] sm:$0xff] }
 0x33d   : > { %8204 = vst [vmem:[#allocation207_spill] sm:$0xff] %v6586_v2  ;;  %v1089_v18 = vadd.f32 %v8207_v56, %v1038_v59  ;;  %v1090_v36 = vadd.f32 %v8208_v37, %v1039_v10  ;;  %v1116_v46 = vadd.f32 %v8209_v50, %v1065_v42  ;;  %2841 = vrot.lane.b32.xlu0 %v2837_v34, %s4297_s19  ;;  %v8211_v59 = vld [vmem:[#allocation31_spill] sm:$0xff]  ;;  %v8212_v34 = vld [vmem:[#allocation34_spill] sm:$0xff]  ;;  %v8213_v49 = vld [vmem:[#allocation41_spill] sm:$0xff] }
 0x33e   : > { %2843 = vrot.lane.b32.xlu1 %v2838_v3, %s4297_s19  ;;  %v2850_v21 = vmul.f32 %v6253_v48, %v6200_v38  ;;  %v1050_v29 = vadd.f32 %v8210_v0, %v999_v26  ;;  %v1051_v10 = vadd.f32 %v8211_v59, %v1000_v60  ;;  %v6606_v50 = vmul.f32 %v4024_v20, %v6417_v22  ;;  %v8214_v56 = vld [vmem:[#allocation44_spill] sm:$0xff]  ;;  %v8215_v48 = vld [vmem:[#allocation45_spill] sm:$0xff]  ;;  %v8218_v0 = vld [vmem:[#allocation35_spill] sm:$0xff] }
 0x33f   : > { %v6610_v42 = vmul.f32 %v6578_v51, %v6417_v22  ;;  %v1077_v3 = vadd.f32 %v8212_v34, %v1026_v4  ;;  %v1117_v14 = vadd.f32 %v8213_v49, %v1066_v5  ;;  %v1140_v38 = vadd.f32 %v8214_v56, %v1089_v18  ;;  %v6618_v37 = vpop.permute.xlu0 %2410  ;;  %v8219_v2 = vld [vmem:[#allocation38_spill] sm:$0xff]  ;;  %v8220_v30 = vld [vmem:[#allocation39_spill] sm:$0xff]  ;;  %v8221_v4 = vld [vmem:[#allocation216_spill] sm:$0xff] }
 0x340   : > { %v1141_v26 = vadd.f32 %v8215_v48, %v1090_v36  ;;  %8216 = vst [vmem:[#allocation208_spill] sm:$0xff] %v6618_v37  ;;  %v6620_v60 = vpop.permute.xlu1 %2412  ;;  %v1078_v59 = vadd.f32 %v8218_v0, %v1027_v47  ;;  %v1101_v22 = vadd.f32 %v8219_v2, %v1050_v29  ;;  %v1102_v11 = vadd.f32 %v8220_v30, %v1051_v10  ;;  %v8222_v18 = vld [vmem:[#allocation42_spill] sm:$0xff]  ;;  %v8223_v29 = vld [vmem:[#allocation43_spill] sm:$0xff] }
 0x341   : > { %8217 = vst [vmem:[#allocation209_spill] sm:$0xff] %v6620_v60  ;;  %v6627_v32 = vmul.f32 %v4022_v15, %v6595_v23  ;;  %v1185_v5 = vadd.f32 %v8221_v4, %v1116_v46  ;;  %2853 = vrot.lane.b32.xlu0 %v2849_v62, %s4297_s19  ;;  %v2861_v36 = vmul.f32 %v6301_v9, %v6471_v12  ;;  %v8224_v10 = vld [vmem:[#allocation46_spill] sm:$0xff]  ;;  %v8225_v34 = vld [vmem:[#allocation47_spill] sm:$0xff] }
 0x342   : > { %2855 = vrot.lane.b32.xlu1 %v2850_v21, %s4297_s19  ;;  %v2862_v47 = vmul.f32 %v6306_v63, %v6471_v12  ;;  %v1128_v2 = vadd.f32 %v8222_v18, %v1077_v3  ;;  %v1129_v30 = vadd.f32 %v8223_v29, %v1078_v59  ;;  %v1152_v15 = vadd.f32 %v8224_v10, %v1101_v22  ;;  %v8226_v46 = vld [vmem:[#allocation218_spill] sm:$0xff]  ;;  %v8230_v22 = vld [vmem:[#allocation49_spill] sm:$0xff]  ;;  %v8231_v4 = vld [vmem:[#allocation51_spill] sm:$0xff] }
 0x343   : > { %v1153_v49 = vadd.f32 %v8225_v34, %v1102_v11  ;;  %v1186_v62 = vadd.f32 %v8226_v46, %v1117_v14  ;;  %v1189_v21 = vadd.f32 %v6386_v24, %v1140_v38  ;;  %v1190_v56 = vadd.f32 %v6391_v57, %v1141_v26  ;;  %v6651_v3 = vpop.permute.xlu0 %2422  ;;  %v8229_v11 = vld [vmem:[#allocation48_spill] sm:$0xff]  ;;  %v8233_v26 = vld [vmem:[#allocation50_spill] sm:$0xff]  ;;  %v8264_v25 = vld [vmem:[#allocation67_spill] sm:$0xff] }
 0x344   : > { %v6647_v48 = vmul.f32 %v4023_v43, %v6595_v23  ;;  %8227 = vst [vmem:[#allocation210_spill] sm:$0xff] %v6651_v3  ;;  %v6653_v0 = vpop.permute.xlu1 %2424  ;;  %v1164_v59 = vadd.f32 %v8229_v11, %v1128_v2  ;;  %v1165_v14 = vadd.f32 %v8230_v22, %v1129_v30  ;;  %v1176_v24 = vadd.f32 %v8231_v4, %v1152_v15  ;;  %v8232_v38 = vld [vmem:[#allocation52_spill] sm:$0xff]  ;;  %v8234_v2 = vld [vmem:[#allocation217_spill] sm:$0xff] }
 0x345   : > { %8228 = vst [vmem:[#allocation211_spill] sm:$0xff] %v6653_v0  ;;  %v1177_v57 = vadd.f32 %v8232_v38, %v1153_v49  ;;  %v6660_v43 = vmul.f32 %v4024_v20, %v8233_v26  ;;  %2865 = vrot.lane.b32.xlu0 %v2861_v36, %s4297_s19  ;;  %v2873_v18 = vmul.f32 %v6301_v9, %v8197_v8  ;;  %v6677_v34 = vld [vmem:[%s4596_s30 + $0x21] sm:$0xff]  ;;  %v6680_v36 = vstv %s6612_s20  ;;  %s7063_s20 = sld [smem:[#allocation10 + %s6143_s8]] }
 0x346   : > { %2867 = vrot.lane.b32.xlu1 %v2862_v47, %s4297_s19  ;;  %v2874_v29 = vmul.f32 %v6306_v63, %v8197_v8  ;;  %v1198_v10 = vadd.f32 %v8234_v2, %v1185_v5  ;;  %v6670_v30 = vmul.f32 %v4024_v20, %v6595_v23  ;;  %v6674_v15 = vmul.f32 %v6578_v51, %v8233_v26  ;;  %v6683_v47 = vld [vmem:[%s4596_s30 + $0x29] sm:$0x3f]  ;;  %v8236_v46 = vld [vmem:[#allocation220_spill] sm:$0xff]  ;;  %v8240_v38 = vld [vmem:[#allocation222_spill] sm:$0xff] }
 0x347   : > { %v8235_v49 = vld [vmem:[#allocation219_spill] sm:$0xff]  ;;  %v1206_v11 = vadd.f32 %v8236_v46, %v1189_v21  ;;  %v8237_v63 = vld [vmem:[#allocation221_spill] sm:$0xff]  ;;  %v6690_v20 = vmul.f32 %v6578_v51, %v6595_v23  ;;  %v6692_v5 = vpop.permute.xlu0 %2434  ;;  %v1202_v4 = vadd.f32 %v6399_v1, %v1164_v59  ;;  %v1203_v2 = vadd.f32 %v8240_v38, %v1165_v14  ;;  %v8243_v14 = vld [vmem:[#allocation54_spill] sm:$0xff] }
 0x348   : > { %v1199_v9 = vadd.f32 %v8235_v49, %v1186_v62  ;;  %v1207_v8 = vadd.f32 %v8237_v63, %v1190_v56  ;;  %8238 = vst [vmem:[#allocation212_spill] sm:$0xff] %v6692_v5  ;;  %v6694_v22 = vpop.permute.xlu1 %2436  ;;  %v1210_v62 = vadd.f32 %v6404_v7, %v1176_v24  ;;  %v1211_v21 = vadd.f32 %v6414_v13, %v1177_v57  ;;  %v8241_v49 = vld [vmem:[#allocation57_spill] sm:$0xff]  ;;  %v8244_v7 = vld [vmem:[#allocation55_spill] sm:$0xff]  ;;  %v8246_v57 = vld [vmem:[#allocation56_spill] sm:$0xff] }
 0x349   : > { %8239 = vst [vmem:[#allocation215_spill] sm:$0xff] %v6694_v22  ;;  %v1249_v56 = vadd.f32 %v8241_v49, %v1206_v11  ;;  %2877 = vrot.lane.b32.xlu0 %v2873_v18, %s4297_s19  ;;  %v2922_v51 = vmul.f32 %v6677_v34, %v6680_v36  ;;  %v2923_v1 = vmul.f32 %v6683_v47, %v6680_v36  ;;  %v8242_v59 = vld [vmem:[#allocation53_spill] sm:$0xff]  ;;  %v6711_v13 = vstv %s6641_s26  ;;  %v8247_v38 = vld [vmem:[#allocation58_spill] sm:$0xff]  ;;  %s7108_s26 = sld [smem:[#allocation10 + %s3111_s11]] }
 0x34a   : > { %2879 = vrot.lane.b32.xlu1 %v2874_v29, %s4297_s19  ;;  %v1225_v46 = vadd.f32 %v8242_v59, %v1198_v10  ;;  %v1226_v63 = vadd.f32 %v8243_v14, %v1199_v9  ;;  %v1237_v24 = vadd.f32 %v8244_v7, %v1202_v4  ;;  %8245 = vst [vmem:[#allocation24_spill] sm:$0xff] %v6711_v13  ;;  %v8248_v49 = vld [vmem:[#allocation65_spill] sm:$0xff]  ;;  %v6717_v0 = vstv %s6649_s12  ;;  %v8251_v10 = vld [vmem:[#allocation59_spill] sm:$0xff]  ;;  %v8252_v4 = vld [vmem:[#allocation60_spill] sm:$0xff]  ;;  %s3181_s12 = sadd.s32 18, %s6143_s8 }
 0x34b   : > { %v1238_v11 = vadd.f32 %v8246_v57, %v1203_v2  ;;  %v1250_v18 = vadd.f32 %v8247_v38, %v1207_v8  ;;  %v1300_v29 = vadd.f32 %v8248_v49, %v1249_v56  ;;  %v6719_v3 = vpop.permute.xlu0 %2446  ;;  %v1261_v9 = vadd.f32 %v8251_v10, %v1210_v62  ;;  %v8253_v14 = vld [vmem:[#allocation61_spill] sm:$0xff]  ;;  %v8254_v7 = vld [vmem:[#allocation62_spill] sm:$0xff]  ;;  %s7216_s29 = sld [smem:[#allocation10 + %s3181_s12]] }
 0x34c   : > { %8249 = vst [vmem:[#allocation187_spill] sm:$0xff] %v6719_v3  ;;  %v6721_v22 = vpop.permute.xlu1 %2448  ;;  %v1262_v59 = vadd.f32 %v8252_v4, %v1211_v21  ;;  %v1276_v2 = vadd.f32 %v8253_v14, %v1225_v46  ;;  %v1277_v8 = vadd.f32 %v8254_v7, %v1226_v63  ;;  %v8255_v57 = vld [vmem:[#allocation73_spill] sm:$0xff]  ;;  %v2934_v56 = vmul.f32 %v6677_v34, %v6711_v13  ;;  %v8256_v62 = vld [vmem:[#allocation66_spill] sm:$0xff]  ;;  %v8257_v4 = vld [vmem:[#allocation79_spill] sm:$0xff]  ;;  %s3624_s12 = sld [smem:[#allocation11 + %s4270_s24]] }
 0x34d   : > { %8250 = vst [vmem:[#allocation25_spill] sm:$0xff] %v6721_v22  ;;  %v1351_v38 = vadd.f32 %v8255_v57, %v1300_v29  ;;  %2926 = vrot.lane.b32.xlu0 %v2922_v51, %s4296_s17  ;;  %v2935_v49 = vmul.f32 %v6683_v47, %v6711_v13  ;;  %v1301_v10 = vadd.f32 %v8256_v62, %v1250_v18  ;;  %v4026_v21 = vld [vmem:[%s4596_s30 + $0x11] sm:$0xff]  ;;  %v4027_v63 = vld [vmem:[%s4596_s30 + $0x19] sm:$0x3f] }
 0x34e   : > { %2928 = vrot.lane.b32.xlu1 %v2923_v1, %s4296_s17  ;;  %v6738_v46 = vmul.f32 %v4026_v21, %v6717_v0  ;;  %v6742_v29 = vmul.f32 %v4027_v63, %v6717_v0  ;;  %v4028_v51 = vld [vmem:[%s4604_s18 + $0x11] sm:$0xff]  ;;  %v4029_v3 = vld [vmem:[%s4604_s18 + $0x19] sm:$0x3f]  ;;  %v1312_v17 = vadd.f32 %v8264_v25, %v1261_v9  ;;  %v1313_v6 = vadd.f32 %v8265_v39, %v1262_v59 }
 0x34f   : > { %v6746_v1 = vmul.f32 %v4028_v51, %v8257_v4  ;;  %v8259_v14 = vld [vmem:[#allocation63_spill] sm:$0xff]  ;;  %v8260_v57 = vld [vmem:[#allocation64_spill] sm:$0xff]  ;;  %v8261_v18 = vld [vmem:[#allocation69_spill] sm:$0xff]  ;;  %v6755_v5 = vmul.f32 %v4029_v3, %v8257_v4  ;;  %v6757_v60 = vpop.permute.xlu0 %2474 }
 0x350   : > { %v1288_v7 = vadd.f32 %v8259_v14, %v1237_v24  ;;  %v1289_v22 = vadd.f32 %v8260_v57, %v1238_v11  ;;  %v1327_v62 = vadd.f32 %v8261_v18, %v1276_v2  ;;  %8262 = vst [vmem:[#allocation29_spill] sm:$0xff] %v6757_v60  ;;  %v6759_v37 = vpop.permute.xlu1 %2476  ;;  %v8266_v13 = vld [vmem:[#allocation74_spill] sm:$0xff]  ;;  %v6765_v24 = vmul.f32 %v4026_v21, %v6595_v23  ;;  %v8269_v59 = vld [vmem:[#allocation75_spill] sm:$0xff] }
 0x351   : > { %8258 = vst [vmem:[#allocation28_spill] sm:$0xff] %v6746_v1  ;;  %8263 = vst [vmem:[#allocation26_spill] sm:$0xff] %v6759_v37  ;;  %v1352_v1 = vadd.f32 %v8266_v13, %v1301_v10  ;;  %v1393_v11 = vadd.f32 %v6478_v53, %v1351_v38  ;;  %2938 = vrot.lane.b32.xlu0 %v2934_v56, %s4296_s17  ;;  %v8267_v2 = vld [vmem:[#allocation194_spill] sm:$0xff]  ;;  %v1363_v13 = vadd.f32 %v8269_v59, %v1312_v17  ;;  %v8270_v10 = vld [vmem:[#allocation76_spill] sm:$0xff] }
 0x352   : > { %2940 = vrot.lane.b32.xlu1 %v2935_v49, %s4296_s17  ;;  %v2946_v14 = vmul.f32 %v6677_v34, %v8267_v2  ;;  %v2947_v25 = vmul.f32 %v6683_v47, %v8267_v2  ;;  %v8268_v9 = vld [vmem:[#allocation70_spill] sm:$0xff]  ;;  %v1364_v21 = vadd.f32 %v8270_v10, %v1313_v6  ;;  %v6779_v57 = vmul.f32 %v4027_v63, %v6595_v23  ;;  %v8271_v38 = vld [vmem:[#allocation71_spill] sm:$0xff]  ;;  %v8274_v6 = vld [vmem:[#allocation72_spill] sm:$0xff] }
 0x353   : > { %v1328_v39 = vadd.f32 %v8268_v9, %v1277_v8  ;;  %v1499_v53 = vadd.f32 %v6441_v58, %v1327_v62  ;;  %v1339_v56 = vadd.f32 %v8271_v38, %v1288_v7  ;;  %v6784_v49 = vmul.f32 %v4028_v51, %v8233_v26  ;;  %v6789_v37 = vpop.permute.xlu0 %2486  ;;  %v8275_v58 = vld [vmem:[#allocation80_spill] sm:$0xff]  ;;  %v8276_v7 = vld [vmem:[#allocation81_spill] sm:$0xff] }
 0x354   : > { %v6787_v18 = vmul.f32 %v4029_v3, %v8233_v26  ;;  %8272 = vst [vmem:[#allocation32_spill] sm:$0xff] %v6789_v37  ;;  %v6791_v17 = vpop.permute.xlu1 %2488  ;;  %v1340_v8 = vadd.f32 %v8274_v6, %v1289_v22  ;;  %v1394_v63 = vadd.f32 %v6508_v54, %v1352_v1  ;;  %v1387_v62 = vadd.f32 %v8275_v58, %v1363_v13  ;;  %v8277_v59 = vld [vmem:[#allocation197_spill] sm:$0xff]  ;;  %v8283_v6 = vld [vmem:[#allocation82_spill] sm:$0xff] }
 0x355   : > { %8273 = vst [vmem:[#allocation27_spill] sm:$0xff] %v6791_v17  ;;  %v1388_v9 = vadd.f32 %v8276_v7, %v1364_v21  ;;  %v1399_v26 = vadd.f32 %v6489_v31, %v1393_v11  ;;  %2950 = vrot.lane.b32.xlu0 %v2946_v14, %s4296_s17  ;;  %v2958_v10 = vmul.f32 %v6677_v34, %v8277_v59  ;;  %v8278_v1 = vld [vmem:[#allocation77_spill] sm:$0xff]  ;;  %v6815_v31 = vstv %s6748_s9  ;;  %v8282_v14 = vld [vmem:[#allocation78_spill] sm:$0xff]  ;;  %s2675_s9 = sadd.s32 5, %s6143_s8 }
 0x356   : > { %2952 = vrot.lane.b32.xlu1 %v2947_v25, %s4296_s17  ;;  %v2959_v22 = vmul.f32 %v6683_v47, %v8277_v59  ;;  %v1500_v54 = vadd.f32 %v6451_v19, %v1328_v39  ;;  %v1375_v13 = vadd.f32 %v8278_v1, %v1339_v56  ;;  %v6809_v21 = vmul.f32 %v4028_v51, %v6717_v0  ;;  %v6812_v38 = vld [vmem:[%s4604_s18 + $0x21] sm:$0xff]  ;;  %v6818_v11 = vld [vmem:[%s4604_s18 + $0x29] sm:$0x3f]  ;;  %v4037_v60 = vld [vmem:[%s4604_s18 + $0x1a] sm:$0x3f]  ;;  %s7269_s0 = sld [smem:[#allocation10 + %s2675_s9]] }
 0x357   : > { %8279 = vst [vmem:[#allocation33_spill] sm:$0xff] %v6812_v38  ;;  %8280 = vst [vmem:[#allocation36_spill] sm:$0xff] %v6815_v31  ;;  %v1376_v25 = vadd.f32 %v8282_v14, %v1340_v8  ;;  %v1415_v58 = vadd.f32 %v8283_v6, %v1399_v26  ;;  %v6823_v7 = vmul.f32 %v4029_v3, %v6717_v0  ;;  %v6828_v39 = vpop.permute.xlu0 %2498  ;;  %v8286_v14 = vld [vmem:[#allocation86_spill] sm:$0xff]  ;;  %v8344_v59 = vld [vmem:[#allocation124_spill] sm:$0xff] }
 0x358   : > { %8281 = vst [vmem:[#allocation37_spill] sm:$0xff] %v6818_v11  ;;  %v6826_v19 = vmul.f32 %v4028_v51, %v6595_v23  ;;  %8284 = vst [vmem:[#allocation40_spill] sm:$0xff] %v6828_v39  ;;  %v6830_v56 = vpop.permute.xlu1 %2500  ;;  %v1400_v1 = vadd.f32 %v6519_v55, %v1394_v63  ;;  %v1403_v17 = vadd.f32 %v6538_v41, %v1387_v62  ;;  %v8287_v63 = vld [vmem:[#allocation83_spill] sm:$0xff] }
 0x359   : > { %8285 = vst [vmem:[#allocation30_spill] sm:$0xff] %v6830_v56  ;;  %v1404_v37 = vadd.f32 %v6544_v44, %v1388_v9  ;;  %v1509_v8 = vadd.f32 %v6455_v28, %v1499_v53  ;;  %v1439_v26 = vadd.f32 %v8286_v14, %v1415_v58  ;;  %2962 = vrot.lane.b32.xlu0 %v2958_v10, %s4296_s17  ;;  %v8288_v9 = vld [vmem:[#allocation84_spill] sm:$0xff]  ;;  %v8290_v58 = vld [vmem:[#allocation90_spill] sm:$0xff] }
 0x35a   : > { %2964 = vrot.lane.b32.xlu1 %v2959_v22, %s4296_s17  ;;  %v2973_v51 = vmul.f32 %v6812_v38, %v6815_v31  ;;  %v2974_v55 = vmul.f32 %v6818_v11, %v6815_v31  ;;  %v1513_v41 = vadd.f32 %v6522_v40, %v1375_v13  ;;  %v1416_v44 = vadd.f32 %v8287_v63, %v1400_v1  ;;  %v8289_v22 = vld [vmem:[#allocation85_spill] sm:$0xff]  ;;  %v8293_v40 = vld [vmem:[#allocation87_spill] sm:$0xff]  ;;  %v8294_v1 = vld [vmem:[#allocation96_spill] sm:$0xff] }
 0x35b   : > { %v1510_v28 = vadd.f32 %v6468_v45, %v1500_v54  ;;  %v6847_v53 = vmul.f32 %v4029_v3, %v6595_v23  ;;  %v1514_v62 = vadd.f32 %v6535_v52, %v1376_v25  ;;  %v1427_v10 = vadd.f32 %v8288_v9, %v1403_v17  ;;  %v6853_v56 = vpop.permute.xlu0 %2510  ;;  %v8295_v54 = vld [vmem:[#allocation97_spill] sm:$0xff]  ;;  %v8296_v52 = vld [vmem:[#allocation88_spill] sm:$0xff] }
 0x35c   : > { %v1428_v6 = vadd.f32 %v8289_v22, %v1404_v37  ;;  %v1463_v14 = vadd.f32 %v8290_v58, %v1439_v26  ;;  %8291 = vst [vmem:[#allocation31_spill] sm:$0xff] %v6853_v56  ;;  %v6855_v39 = vpop.permute.xlu1 %2512  ;;  %v1440_v13 = vadd.f32 %v8293_v40, %v1416_v44  ;;  %v1528_v45 = vadd.f32 %v8294_v1, %v1509_v8  ;;  %v8297_v26 = vld [vmem:[#allocation89_spill] sm:$0xff]  ;;  %v8298_v8 = vld [vmem:[#allocation91_spill] sm:$0xff]  ;;  %v8302_v40 = vld [vmem:[#allocation98_spill] sm:$0xff] }
 0x35d   : > { %8292 = vst [vmem:[#allocation34_spill] sm:$0xff] %v6855_v39  ;;  %v1529_v23 = vadd.f32 %v8295_v54, %v1510_v28  ;;  %v6862_v3 = vstv %s6797_s10  ;;  %v1451_v17 = vadd.f32 %v8296_v52, %v1427_v10  ;;  %2977 = vrot.lane.b32.xlu0 %v2973_v51, %s4296_s17  ;;  %v2985_v37 = vmul.f32 %v6812_v38, %v6680_v36  ;;  %v8299_v28 = vld [vmem:[#allocation100_spill] sm:$0xff]  ;;  %v8300_v22 = vld [vmem:[#allocation101_spill] sm:$0xff]  ;;  %v8314_v39 = vld [vmem:[#allocation106_spill] sm:$0xff]  ;;  %s3232_s10 = sadd.s32 19, %s6143_s8 }
 0x35e   : > { %2979 = vrot.lane.b32.xlu1 %v2974_v55, %s4296_s17  ;;  %v2986_v25 = vmul.f32 %v6818_v11, %v6680_v36  ;;  %v1452_v63 = vadd.f32 %v8297_v26, %v1428_v6  ;;  %v1464_v44 = vadd.f32 %v8298_v8, %v1440_v13  ;;  %v1555_v9 = vadd.f32 %v8299_v28, %v1528_v45  ;;  %v8301_v55 = vld [vmem:[#allocation92_spill] sm:$0xff]  ;;  %v8305_v45 = vld [vmem:[#allocation93_spill] sm:$0xff]  ;;  %v8306_v26 = vld [vmem:[#allocation99_spill] sm:$0xff]  ;;  %s7353_s13 = sld [smem:[#allocation10 + %s3232_s10]] }
 0x35f   : > { %v1556_v58 = vadd.f32 %v8300_v22, %v1529_v23  ;;  %v1620_v51 = vadd.f32 %v6555_v35, %v1463_v14  ;;  %v1475_v10 = vadd.f32 %v8301_v55, %v1451_v17  ;;  %v1540_v1 = vadd.f32 %v8302_v40, %v1513_v41  ;;  %v4030_v54 = vld [vmem:[%s4610_s15 + $0x11] sm:$0xff]  ;;  %v6884_v6 = vpop.permute.xlu0 %2522 }
 0x360   : > { %v6882_v52 = vmul.f32 %v4030_v54, %v6862_v3  ;;  %8303 = vst [vmem:[#allocation41_spill] sm:$0xff] %v6884_v6  ;;  %v6886_v13 = vpop.permute.xlu1 %2524  ;;  %v1476_v23 = vadd.f32 %v8305_v45, %v1452_v63  ;;  %v1541_v8 = vadd.f32 %v8306_v26, %v1514_v62  ;;  %v8307_v28 = vld [vmem:[#allocation104_spill] sm:$0xff]  ;;  %v8308_v14 = vld [vmem:[#allocation105_spill] sm:$0xff]  ;;  %v8309_v41 = vld [vmem:[#allocation102_spill] sm:$0xff]  ;;  %v2997_v55 = vmul.f32 %v6812_v38, %v8186_v27 }
 0x361   : > { %8304 = vst [vmem:[#allocation44_spill] sm:$0xff] %v6886_v13  ;;  %v1582_v35 = vadd.f32 %v8307_v28, %v1555_v9  ;;  %v1583_v17 = vadd.f32 %v8308_v14, %v1556_v58  ;;  %v1567_v22 = vadd.f32 %v8309_v41, %v1540_v1  ;;  %2989 = vrot.lane.b32.xlu0 %v2985_v37, %s4296_s17  ;;  %v8310_v40 = vld [vmem:[#allocation103_spill] sm:$0xff]  ;;  %v8311_v1 = vld [vmem:[#allocation108_spill] sm:$0xff]  ;;  %v8312_v37 = vld [vmem:[#allocation94_spill] sm:$0xff] }
 0x362   : > { %2991 = vrot.lane.b32.xlu1 %v2986_v25, %s4296_s17  ;;  %v2998_v63 = vmul.f32 %v6818_v11, %v8186_v27  ;;  %v1621_v62 = vadd.f32 %v6569_v33, %v1464_v44  ;;  %v1568_v9 = vadd.f32 %v8310_v40, %v1541_v8  ;;  %v4031_v45 = vld [vmem:[%s4610_s15 + $0x19] sm:$0x3f]  ;;  %v4032_v26 = vld [vmem:[%s4612_s1 + $0x11] sm:$0xff]  ;;  %v1487_v25 = vadd.f32 %v8312_v37, %v1475_v10 }
 0x363   : > { %v6904_v58 = vmul.f32 %v4031_v45, %v6862_v3  ;;  %v6908_v28 = vmul.f32 %v4032_v26, %v8311_v1  ;;  %v8313_v14 = vld [vmem:[#allocation95_spill] sm:$0xff]  ;;  %v1594_v56 = vadd.f32 %v8314_v39, %v1567_v22  ;;  %v6919_v33 = vpop.permute.xlu0 %2534  ;;  %v1616_v8 = vadd.f32 %v6627_v32, %v1582_v35  ;;  %v8318_v39 = vld [vmem:[#allocation109_spill] sm:$0xff] }
 0x364   : > { %v1488_v41 = vadd.f32 %v8313_v14, %v1476_v23  ;;  %v4033_v13 = vld [vmem:[%s4612_s1 + $0x19] sm:$0x3f]  ;;  %8315 = vst [vmem:[#allocation45_spill] sm:$0xff] %v6919_v33  ;;  %v6921_v44 = vpop.permute.xlu1 %2536  ;;  %v1617_v40 = vadd.f32 %v6647_v48, %v1583_v17  ;;  %v1638_v23 = vadd.f32 %v6575_v61, %v1620_v51  ;;  %v3009_v14 = vmul.f32 %v6812_v38, %v8267_v2  ;;  %v8319_v33 = vld [vmem:[#allocation110_spill] sm:$0xff] }
 0x365   : > { %v6915_v6 = vmul.f32 %v4033_v13, %v8311_v1  ;;  %8316 = vst [vmem:[#allocation35_spill] sm:$0xff] %v6921_v44  ;;  %v8317_v10 = vld [vmem:[#allocation107_spill] sm:$0xff]  ;;  %v1606_v22 = vadd.f32 %v8318_v39, %v1594_v56  ;;  %3001 = vrot.lane.b32.xlu0 %v2997_v55, %s4296_s17  ;;  %v3010_v44 = vmul.f32 %v6818_v11, %v8267_v2  ;;  %v6940_v61 = vstv %s6875_s16  ;;  %v8328_v39 = vld [vmem:[#allocation114_spill] sm:$0xff]  ;;  %s2887_s16 = sadd.s32 10, %s6143_s8 }
 0x366   : > { %v1595_v37 = vadd.f32 %v8317_v10, %v1568_v9  ;;  %3003 = vrot.lane.b32.xlu1 %v2998_v63, %s4296_s17  ;;  %v1639_v48 = vadd.f32 %v6582_v16, %v1621_v62  ;;  %v6937_v35 = vmul.f32 %v4030_v54, %v6717_v0  ;;  %8320 = vst [vmem:[#allocation38_spill] sm:$0xff] %v6940_v61  ;;  %v6983_v10 = vstv %s6917_s21  ;;  %s7379_s7 = sld [smem:[#allocation10 + %s2887_s16]]  ;;  %s3341_s21 = sadd.s32 22, %s6143_s8 }
 0x367   : > { %v1642_v56 = vadd.f32 %v6606_v50, %v1487_v25  ;;  %v1643_v51 = vadd.f32 %v6610_v42, %v1488_v41  ;;  %v6945_v17 = vmul.f32 %v4031_v45, %v6717_v0  ;;  %v6948_v55 = vmul.f32 %v4032_v26, %v8257_v4  ;;  %v6950_v2 = vpop.permute.xlu0 %2546  ;;  %v8323_v45 = vld [vmem:[#allocation111_spill] sm:$0xff]  ;;  %s3342_s27 = sld [smem:[#allocation10 + %s3341_s21]] }
 0x368   : > { %v1607_v32 = vadd.f32 %v8319_v33, %v1595_v37  ;;  %8321 = vst [vmem:[#allocation39_spill] sm:$0xff] %v6950_v2  ;;  %v6952_v63 = vpop.permute.xlu1 %2548  ;;  %v1630_v16 = vadd.f32 %v6660_v43, %v1616_v8  ;;  %v1631_v54 = vadd.f32 %v6674_v15, %v1617_v40  ;;  %v6957_v62 = vmul.f32 %v4032_v26, %v6862_v3  ;;  %v8325_v8 = vld [vmem:[#allocation113_spill] sm:$0xff] }
 0x369   : > { %8322 = vst [vmem:[#allocation216_spill] sm:$0xff] %v6952_v63  ;;  %v6960_v50 = vmul.f32 %v4033_v13, %v8257_v4  ;;  %v1634_v42 = vadd.f32 %v6670_v30, %v1606_v22  ;;  %3013 = vrot.lane.b32.xlu0 %v3009_v14, %s4296_s17  ;;  %v3024_v9 = vmul.f32 %v6677_v34, %v6940_v61  ;;  %v8324_v30 = vld [vmem:[#allocation112_spill] sm:$0xff]  ;;  %v8329_v22 = vld [vmem:[#allocation115_spill] sm:$0xff]  ;;  %v8337_v63 = vld [vmem:[#allocation137_spill] sm:$0xff] }
 0x36a   : > { %3015 = vrot.lane.b32.xlu1 %v3010_v44, %s4296_s17  ;;  %v3025_v43 = vmul.f32 %v6683_v47, %v6940_v61  ;;  %v1635_v15 = vadd.f32 %v6690_v20, %v1607_v32  ;;  %v1657_v25 = vadd.f32 %v8323_v45, %v1630_v16  ;;  %v6972_v41 = vmul.f32 %v4032_v26, %v6717_v0  ;;  %v8330_v32 = vld [vmem:[#allocation116_spill] sm:$0xff] }
 0x36b   : > { %v6975_v4 = vmul.f32 %v4033_v13, %v6862_v3  ;;  %v1658_v33 = vadd.f32 %v8324_v30, %v1631_v54  ;;  %v1669_v44 = vadd.f32 %v8325_v8, %v1634_v42  ;;  %v6980_v40 = vmul.f32 %v4033_v13, %v6717_v0  ;;  %v6985_v37 = vpop.permute.xlu0 %2586  ;;  %v8331_v54 = vld [vmem:[#allocation119_spill] sm:$0xff]  ;;  %v8332_v45 = vld [vmem:[#allocation120_spill] sm:$0xff]  ;;  %v8333_v30 = vld [vmem:[#allocation117_spill] sm:$0xff] }
 0x36c   : > { %8326 = vst [vmem:[#allocation42_spill] sm:$0xff] %v6985_v37  ;;  %v6987_v20 = vpop.permute.xlu1 %2588  ;;  %v1670_v26 = vadd.f32 %v8328_v39, %v1635_v15  ;;  %v1681_v14 = vadd.f32 %v8329_v22, %v1638_v23  ;;  %v1682_v16 = vadd.f32 %v8330_v32, %v1639_v48  ;;  %v1708_v42 = vadd.f32 %v8331_v54, %v1657_v25  ;;  %v8334_v8 = vld [vmem:[#allocation118_spill] sm:$0xff]  ;;  %v8335_v48 = vld [vmem:[#allocation127_spill] sm:$0xff] }
 0x36d   : > { %8327 = vst [vmem:[#allocation43_spill] sm:$0xff] %v6987_v20  ;;  %v1709_v0 = vadd.f32 %v8332_v45, %v1658_v33  ;;  %3028 = vrot.lane.b32.xlu0 %v3024_v9, %s4297_s19  ;;  %v3036_v13 = vmul.f32 %v6677_v34, %v6815_v31  ;;  %v3037_v15 = vmul.f32 %v6683_v47, %v6815_v31  ;;  %v4034_v25 = vld [vmem:[%s4596_s30 + $0x12] sm:$0xff]  ;;  %v4035_v54 = vld [vmem:[%s4596_s30 + $0x1a] sm:$0x3f] }
 0x36e   : > { %3030 = vrot.lane.b32.xlu1 %v3025_v43, %s4297_s19  ;;  %v1693_v23 = vadd.f32 %v8333_v30, %v1642_v56  ;;  %v1694_v39 = vadd.f32 %v8334_v8, %v1643_v51  ;;  %v1759_v22 = vadd.f32 %v8335_v48, %v1708_v42  ;;  %v7005_v32 = vmul.f32 %v4034_v25, %v6983_v10  ;;  %v8336_v33 = vld [vmem:[#allocation128_spill] sm:$0xff]  ;;  %v8340_v30 = vld [vmem:[#allocation121_spill] sm:$0xff]  ;;  %v8341_v48 = vld [vmem:[#allocation122_spill] sm:$0xff] }
 0x36f   : > { %v1760_v9 = vadd.f32 %v8336_v33, %v1709_v0  ;;  %v7010_v43 = vmul.f32 %v4035_v54, %v6983_v10  ;;  %v4036_v45 = vld [vmem:[%s4604_s18 + $0x12] sm:$0xff]  ;;  %v7018_v56 = vmul.f32 %v4037_v60, %v8337_v63  ;;  %v7020_v51 = vpop.permute.xlu0 %2598  ;;  %v1720_v8 = vadd.f32 %v8340_v30, %v1669_v44 }
 0x370   : > { %v7014_v2 = vmul.f32 %v4036_v45, %v8337_v63  ;;  %8338 = vst [vmem:[#allocation46_spill] sm:$0xff] %v7020_v51  ;;  %v7022_v42 = vpop.permute.xlu1 %2600  ;;  %v1721_v0 = vadd.f32 %v8341_v48, %v1670_v26  ;;  %v8342_v33 = vld [vmem:[#allocation123_spill] sm:$0xff]  ;;  %v7028_v37 = vmul.f32 %v4034_v25, %v6862_v3  ;;  %v1733_v31 = vadd.f32 %v8344_v59, %v1682_v16  ;;  %v8348_v16 = vld [vmem:[#allocation125_spill] sm:$0xff]  ;;  %v8349_v48 = vld [vmem:[#allocation132_spill] sm:$0xff] }
 0x371   : > { %8339 = vst [vmem:[#allocation47_spill] sm:$0xff] %v7022_v42  ;;  %v1732_v20 = vadd.f32 %v8342_v33, %v1681_v14  ;;  %3040 = vrot.lane.b32.xlu0 %v3036_v13, %s4297_s19  ;;  %v3048_v51 = vmul.f32 %v6677_v34, %v6471_v12  ;;  %v3049_v44 = vmul.f32 %v6683_v47, %v6471_v12  ;;  %v8345_v14 = vld [vmem:[#allocation131_spill] sm:$0xff] }
 0x372   : > { %8343 = vst [vmem:[#allocation218_spill] sm:$0xff] %v7028_v37  ;;  %3042 = vrot.lane.b32.xlu1 %v3037_v15, %s4297_s19  ;;  %v1828_v26 = vadd.f32 %v6738_v46, %v1759_v22  ;;  %v7040_v25 = vmul.f32 %v4035_v54, %v6862_v3  ;;  %v7043_v59 = vmul.f32 %v4036_v45, %v8311_v1  ;;  %v8353_v54 = vld [vmem:[#allocation129_spill] sm:$0xff] }
 0x373   : > { %v1783_v30 = vadd.f32 %v8345_v14, %v1732_v20  ;;  %v1744_v13 = vadd.f32 %v8348_v16, %v1693_v23  ;;  %v1829_v15 = vadd.f32 %v6742_v29, %v1760_v9  ;;  %v1784_v33 = vadd.f32 %v8349_v48, %v1733_v31  ;;  %v7051_v37 = vpop.permute.xlu0 %2613  ;;  %v8352_v20 = vld [vmem:[#allocation126_spill] sm:$0xff]  ;;  %v8355_v29 = vld [vmem:[#allocation133_spill] sm:$0xff]  ;;  %v8358_v48 = vld [vmem:[#allocation28_spill] sm:$0xff] }
 0x374   : > { %8346 = vst [vmem:[#allocation48_spill] sm:$0xff] %v7040_v25  ;;  %8347 = vst [vmem:[#allocation49_spill] sm:$0xff] %v7043_v59  ;;  %v7049_v42 = vmul.f32 %v4037_v60, %v8311_v1  ;;  %v7053_v46 = vpop.permute.xlu1 %2615  ;;  %v1745_v22 = vadd.f32 %v8352_v20, %v1694_v39  ;;  %v1771_v14 = vadd.f32 %v8353_v54, %v1720_v8  ;;  %v8354_v25 = vld [vmem:[#allocation130_spill] sm:$0xff] }
 0x375   : > { %8350 = vst [vmem:[#allocation51_spill] sm:$0xff] %v7051_v37  ;;  %8351 = vst [vmem:[#allocation52_spill] sm:$0xff] %v7053_v46  ;;  %v1772_v59 = vadd.f32 %v8354_v25, %v1721_v0  ;;  %v7060_v23 = vmul.f32 %v4036_v45, %v6983_v10  ;;  %v1795_v31 = vadd.f32 %v8355_v29, %v1744_v13  ;;  %3052 = vrot.lane.b32.xlu0 %v3048_v51, %s4297_s19  ;;  %v8356_v8 = vld [vmem:[#allocation134_spill] sm:$0xff]  ;;  %v8357_v25 = vld [vmem:[#allocation135_spill] sm:$0xff] }
 0x376   : > { %3054 = vrot.lane.b32.xlu1 %v3049_v44, %s4297_s19  ;;  %v3060_v1 = vmul.f32 %v6677_v34, %v8186_v27  ;;  %v3061_v39 = vmul.f32 %v6683_v47, %v8186_v27  ;;  %v1832_v9 = vadd.f32 %v6765_v24, %v1783_v30  ;;  %v1796_v0 = vadd.f32 %v8356_v8, %v1745_v22  ;;  %v8359_v13 = vld [vmem:[#allocation136_spill] sm:$0xff]  ;;  %v8360_v54 = vld [vmem:[#allocation138_spill] sm:$0xff]  ;;  %v8363_v24 = vld [vmem:[#allocation139_spill] sm:$0xff] }
 0x377   : > { %v1807_v16 = vadd.f32 %v8357_v25, %v1771_v14  ;;  %v1841_v20 = vadd.f32 %v8358_v48, %v1828_v26  ;;  %v1833_v51 = vadd.f32 %v6779_v57, %v1784_v33  ;;  %v1808_v44 = vadd.f32 %v8359_v13, %v1772_v59  ;;  %v7082_v37 = vpop.permute.xlu0 %2625  ;;  %v8364_v22 = vld [vmem:[#allocation140_spill] sm:$0xff]  ;;  %v8365_v59 = vld [vmem:[#allocation141_spill] sm:$0xff] }
 0x378   : > { %v1819_v29 = vadd.f32 %v8360_v54, %v1795_v31  ;;  %v1842_v46 = vadd.f32 %v6755_v5, %v1829_v15  ;;  %8361 = vst [vmem:[#allocation50_spill] sm:$0xff] %v7082_v37  ;;  %v7084_v27 = vpop.permute.xlu1 %2627  ;;  %v1820_v30 = vadd.f32 %v8363_v24, %v1796_v0  ;;  %v7090_v26 = vmul.f32 %v4037_v60, %v6983_v10  ;;  %v8366_v0 = vld [vmem:[#allocation148_spill] sm:$0xff]  ;;  %v8367_v48 = vld [vmem:[#allocation149_spill] sm:$0xff] }
 0x379   : > { %8362 = vst [vmem:[#allocation217_spill] sm:$0xff] %v7084_v27  ;;  %v1868_v14 = vadd.f32 %v8364_v22, %v1841_v20  ;;  %v7093_v57 = vmul.f32 %v4036_v45, %v6862_v3  ;;  %3064 = vrot.lane.b32.xlu0 %v3060_v1, %s4297_s19  ;;  %v3072_v5 = vmul.f32 %v6812_v38, %v6940_v61  ;;  %v7122_v13 = vstv %s7063_s20  ;;  %s3098_s20 = sadd.s32 15, %s6143_s8 }
 0x37a   : > { %v1869_v33 = vadd.f32 %v8365_v59, %v1842_v46  ;;  %3066 = vrot.lane.b32.xlu1 %v3061_v39, %s4297_s19  ;;  %v3073_v15 = vmul.f32 %v6818_v11, %v6940_v61  ;;  %v1845_v31 = vadd.f32 %v6809_v21, %v1807_v16  ;;  %v1849_v8 = vadd.f32 %v6784_v49, %v1832_v9  ;;  %v8369_v16 = vld [vmem:[#allocation156_spill] sm:$0xff]  ;;  %s3099_s11 = sld [smem:[#allocation10 + %s3098_s20]] }
 0x37b   : > { %v1919_v45 = vadd.f32 %v8366_v0, %v1868_v14  ;;  %v7106_v25 = vmul.f32 %v4037_v60, %v6862_v3  ;;  %v1846_v46 = vadd.f32 %v6823_v7, %v1808_v44  ;;  %v1853_v1 = vadd.f32 %v6826_v19, %v1819_v29  ;;  %v7114_v21 = vpop.permute.xlu0 %2640  ;;  %v8368_v3 = vld [vmem:[#allocation142_spill] sm:$0xff]  ;;  %v8370_v19 = vld [vmem:[#allocation157_spill] sm:$0xff]  ;;  %v8371_v44 = vld [vmem:[#allocation143_spill] sm:$0xff] }
 0x37c   : > { %v1850_v39 = vadd.f32 %v6787_v18, %v1833_v51  ;;  %v1920_v20 = vadd.f32 %v8367_v48, %v1869_v33  ;;  %v7116_v49 = vpop.permute.xlu1 %2642  ;;  %v1854_v60 = vadd.f32 %v6847_v53, %v1820_v30  ;;  %v1880_v9 = vadd.f32 %v8368_v3, %v1845_v31  ;;  %v8372_v29 = vld [vmem:[#allocation144_spill] sm:$0xff]  ;;  %v8373_v30 = vld [vmem:[#allocation145_spill] sm:$0xff]  ;;  %v8377_v31 = vld [vmem:[#allocation147_spill] sm:$0xff] }
 0x37d   : > { %v1970_v7 = vadd.f32 %v8369_v16, %v1919_v45  ;;  %3076 = vrot.lane.b32.xlu0 %v3072_v5, %s4297_s19  ;;  %v3084_v51 = vmul.f32 %v6812_v38, %v6471_v12  ;;  %v3085_v53 = vmul.f32 %v6818_v11, %v6471_v12  ;;  %v1881_v54 = vadd.f32 %v8371_v44, %v1846_v46  ;;  %v7135_v14 = vld [vmem:[%s4610_s15 + $0x21] sm:$0xff]  ;;  %v7141_v33 = vld [vmem:[%s4610_s15 + $0x29] sm:$0x3f] }
 0x37e   : > { %v1971_v18 = vadd.f32 %v8370_v19, %v1920_v20  ;;  %3078 = vrot.lane.b32.xlu1 %v3073_v15, %s4297_s19  ;;  %v1892_v24 = vadd.f32 %v8372_v29, %v1849_v8  ;;  %v1893_v22 = vadd.f32 %v8373_v30, %v1850_v39  ;;  %8374 = vst [vmem:[#allocation219_spill] sm:$0xff] %v7135_v14  ;;  %v7138_v59 = vstv %s7076_s4  ;;  %v8376_v5 = vld [vmem:[#allocation146_spill] sm:$0xff]  ;;  %v4039_v46 = vld [vmem:[%s4596_s30 + $0x28] sm:$0x3f]  ;;  %v8380_v20 = vld [vmem:[#allocation152_spill] sm:$0xff] }
 0x37f   : > { %8375 = vst [vmem:[#allocation220_spill] sm:$0xff] %v7138_v59  ;;  %v1904_v15 = vadd.f32 %v8376_v5, %v1853_v1  ;;  %v1905_v0 = vadd.f32 %v8377_v31, %v1854_v60  ;;  %v4038_v45 = vld [vmem:[%s4596_s30 + $0x20] sm:$0xff]  ;;  %v7151_v8 = vmul.f32 %v4039_v46, %v7122_v13  ;;  %v7153_v39 = vpop.permute.xlu0 %2652  ;;  %v8381_v16 = vld [vmem:[#allocation153_spill] sm:$0xff]  ;;  %v2039_v60 = vadd.f32 %v6882_v52, %v1970_v7  ;;  %v8384_v7 = vld [vmem:[#allocation151_spill] sm:$0xff] }
 0x380   : > { %v7147_v12 = vmul.f32 %v4038_v45, %v7122_v13  ;;  %8378 = vst [vmem:[#allocation221_spill] sm:$0xff] %v7153_v39  ;;  %v7155_v48 = vpop.permute.xlu1 %2654  ;;  %v1943_v3 = vadd.f32 %v8380_v20, %v1892_v24  ;;  %v1944_v1 = vadd.f32 %v8381_v16, %v1893_v22  ;;  %v4040_v19 = vld [vmem:[%s4604_s18 + $0x20] sm:$0xff]  ;;  %v2040_v30 = vadd.f32 %v6904_v58, %v1971_v18  ;;  %v4041_v45 = vld [vmem:[%s4604_s18 + $0x28] sm:$0x3f]  ;;  %v4042_v16 = vld [vmem:[%s4610_s15 + $0x12] sm:$0xff] }
 0x381   : > { %8379 = vst [vmem:[#allocation222_spill] sm:$0xff] %v7155_v48  ;;  %v8382_v44 = vld [vmem:[#allocation180_spill] sm:$0xff]  ;;  %3088 = vrot.lane.b32.xlu0 %v3084_v51, %s4297_s19  ;;  %v3133_v24 = vmul.f32 %v7135_v14, %v7138_v59  ;;  %v3134_v22 = vmul.f32 %v7141_v33, %v7138_v59  ;;  %v8383_v5 = vld [vmem:[#allocation150_spill] sm:$0xff]  ;;  %v1932_v31 = vadd.f32 %v8384_v7, %v1881_v54  ;;  %v7178_v18 = vstv %s7108_s26  ;;  %v8387_v46 = vld [vmem:[#allocation161_spill] sm:$0xff] }
 0x382   : > { %v7162_v29 = vmul.f32 %v4040_v19, %v8382_v44  ;;  %3090 = vrot.lane.b32.xlu1 %v3085_v53, %s4297_s19  ;;  %v1931_v52 = vadd.f32 %v8383_v5, %v1880_v9  ;;  %v7175_v58 = vmul.f32 %v4041_v45, %v8382_v44  ;;  %8385 = vst [vmem:[#allocation57_spill] sm:$0xff] %v7178_v18  ;;  %v8386_v51 = vld [vmem:[#allocation160_spill] sm:$0xff]  ;;  %v4043_v39 = vld [vmem:[%s4610_s15 + $0x1a] sm:$0x3f]  ;;  %v8390_v7 = vld [vmem:[#allocation154_spill] sm:$0xff] }
 0x383   : > { %v1994_v53 = vadd.f32 %v8386_v51, %v1943_v3  ;;  %v1995_v20 = vadd.f32 %v8387_v46, %v1944_v1  ;;  %v7184_v48 = vmul.f32 %v4042_v16, %v6983_v10  ;;  %v7188_v9 = vmul.f32 %v4043_v39, %v6983_v10  ;;  %v7190_v54 = vpop.permute.xlu0 %2664  ;;  %v4044_v3 = vld [vmem:[%s4612_s1 + $0x12] sm:$0xff]  ;;  %v4045_v51 = vld [vmem:[%s4612_s1 + $0x1a] sm:$0x3f] }
 0x384   : > { %8388 = vst [vmem:[#allocation53_spill] sm:$0xff] %v7190_v54  ;;  %v7192_v5 = vpop.permute.xlu1 %2666  ;;  %v1955_v27 = vadd.f32 %v8390_v7, %v1904_v15  ;;  %v2052_v37 = vadd.f32 %v6908_v28, %v2039_v60  ;;  %v7199_v1 = vmul.f32 %v4044_v3, %v8337_v63  ;;  %v7203_v46 = vmul.f32 %v4045_v51, %v8337_v63  ;;  %v8393_v15 = vld [vmem:[#allocation155_spill] sm:$0xff]  ;;  %v8394_v7 = vld [vmem:[#allocation158_spill] sm:$0xff]  ;;  %v8396_v63 = vld [vmem:[#allocation168_spill] sm:$0xff] }
 0x385   : > { %8389 = vst [vmem:[#allocation54_spill] sm:$0xff] %v7192_v5  ;;  %v2053_v39 = vadd.f32 %v6915_v6, %v2040_v30  ;;  %3137 = vrot.lane.b32.xlu0 %v3133_v24, %s4296_s17  ;;  %v3145_v16 = vmul.f32 %v7135_v14, %v7178_v18  ;;  %v3146_v28 = vmul.f32 %v7141_v33, %v7178_v18  ;;  %v8395_v54 = vld [vmem:[#allocation159_spill] sm:$0xff]  ;;  %v8397_v24 = vld [vmem:[#allocation162_spill] sm:$0xff]  ;;  %v8398_v11 = vld [vmem:[#allocation169_spill] sm:$0xff] }
 0x386   : > { %8391 = vst [vmem:[#allocation55_spill] sm:$0xff] %v7199_v1  ;;  %8392 = vst [vmem:[#allocation56_spill] sm:$0xff] %v7203_v46  ;;  %3139 = vrot.lane.b32.xlu1 %v3134_v22, %s4296_s17  ;;  %v1956_v60 = vadd.f32 %v8393_v15, %v1905_v0  ;;  %v1982_v5 = vadd.f32 %v8394_v7, %v1931_v52  ;;  %v1983_v1 = vadd.f32 %v8395_v54, %v1932_v31  ;;  %v8399_v52 = vld [vmem:[#allocation163_spill] sm:$0xff]  ;;  %v8400_v31 = vld [vmem:[#allocation164_spill] sm:$0xff] }
 0x387   : > { %v2079_v46 = vadd.f32 %v8396_v63, %v2052_v37  ;;  %v2043_v6 = vadd.f32 %v6937_v35, %v1994_v53  ;;  %v2044_v30 = vadd.f32 %v6945_v17, %v1995_v20  ;;  %v2006_v22 = vadd.f32 %v8397_v24, %v1955_v27  ;;  %v7222_v18 = vpop.permute.xlu0 %2715  ;;  %v8401_v37 = vld [vmem:[#allocation165_spill] sm:$0xff]  ;;  %v8402_v63 = vld [vmem:[#allocation176_spill] sm:$0xff]  ;;  %v8404_v27 = vld [vmem:[#allocation166_spill] sm:$0xff] }
 0x388   : > { %v2080_v38 = vadd.f32 %v8398_v11, %v2053_v39  ;;  %v7224_v0 = vpop.permute.xlu1 %2717  ;;  %v2007_v15 = vadd.f32 %v8399_v52, %v1956_v60  ;;  %v2018_v54 = vadd.f32 %v8400_v31, %v1982_v5  ;;  %v2019_v7 = vadd.f32 %v8401_v37, %v1983_v1  ;;  %v8403_v35 = vld [vmem:[#allocation177_spill] sm:$0xff]  ;;  %v8405_v5 = vld [vmem:[#allocation167_spill] sm:$0xff] }
 0x389   : > { %v2130_v61 = vadd.f32 %v8402_v63, %v2079_v46  ;;  %3149 = vrot.lane.b32.xlu0 %v3145_v16, %s4296_s17  ;;  %v3157_v11 = vmul.f32 %v7135_v14, %v6680_v36  ;;  %v3158_v17 = vmul.f32 %v7141_v33, %v6680_v36  ;;  %v2030_v20 = vadd.f32 %v8404_v27, %v2006_v22  ;;  %v8406_v46 = vld [vmem:[#allocation185_spill] sm:$0xff] }
 0x38a   : > { %v2131_v53 = vadd.f32 %v8403_v35, %v2080_v38  ;;  %3151 = vrot.lane.b32.xlu1 %v3146_v28, %s4296_s17  ;;  %v2031_v39 = vadd.f32 %v8405_v5, %v2007_v15  ;;  %v7240_v1 = vmul.f32 %v4040_v19, %v7122_v13  ;;  %v7243_v38 = vmul.f32 %v4041_v45, %v7122_v13  ;;  %v8407_v28 = vld [vmem:[#allocation186_spill] sm:$0xff]  ;;  %v8413_v63 = vld [vmem:[#allocation173_spill] sm:$0xff] }
 0x38b   : > { %v2181_v16 = vadd.f32 %v8406_v46, %v2130_v61  ;;  %v7249_v24 = vmul.f32 %v4044_v3, %v6983_v10  ;;  %v7252_v52 = vmul.f32 %v4045_v51, %v6983_v10  ;;  %v7254_v22 = vpop.permute.xlu0 %2727  ;;  %v2056_v19 = vadd.f32 %v6957_v62, %v2018_v54  ;;  %v7263_v3 = vld [vmem:[%s4610_s15 + $0x20] sm:$0xff] }
 0x38c   : > { %v2182_v60 = vadd.f32 %v8407_v28, %v2131_v53  ;;  %8408 = vst [vmem:[#allocation58_spill] sm:$0xff] %v7254_v22  ;;  %v7256_v15 = vpop.permute.xlu1 %2729  ;;  %v2057_v45 = vadd.f32 %v6975_v4, %v2019_v7  ;;  %v2060_v61 = vadd.f32 %v6948_v55, %v2043_v6  ;;  %v2061_v31 = vadd.f32 %v6960_v50, %v2044_v30  ;;  %v8410_v62 = vld [vmem:[#allocation24_spill] sm:$0xff]  ;;  %v7287_v7 = vld [vmem:[%s4612_s1 + $0x29] sm:$0x3f] }
 0x38d   : > { %8409 = vst [vmem:[#allocation65_spill] sm:$0xff] %v7256_v15  ;;  %v7267_v10 = vmul.f32 %v7263_v3, %v7122_v13  ;;  %3161 = vrot.lane.b32.xlu0 %v3157_v11, %s4296_s17  ;;  %v3169_v4 = vmul.f32 %v7135_v14, %v8410_v62  ;;  %v3170_v55 = vmul.f32 %v7141_v33, %v8410_v62  ;;  %v8411_v6 = vld [vmem:[#allocation172_spill] sm:$0xff]  ;;  %v7284_v37 = vstv %s7216_s29  ;;  %s3894_s29 = smul.u32 12, %s8536_s25 }
 0x38e   : > { %3163 = vrot.lane.b32.xlu1 %v3158_v17, %s4296_s17  ;;  %v2064_v50 = vadd.f32 %v6972_v41, %v2030_v20  ;;  %v2065_v51 = vadd.f32 %v6980_v40, %v2031_v39  ;;  %v2103_v30 = vadd.f32 %v8411_v6, %v2060_v61  ;;  %v7281_v54 = vld [vmem:[%s4612_s1 + $0x21] sm:$0xff]  ;;  %8412 = vst [vmem:[#allocation59_spill] sm:$0xff] %v7284_v37 }
 0x38f   : > { %v2104_v35 = vadd.f32 %v8413_v63, %v2061_v31  ;;  %v2250_v53 = vadd.f32 %v7005_v32, %v2181_v16  ;;  %v2251_v11 = vadd.f32 %v7010_v43, %v2182_v60  ;;  %v4047_v17 = vld [vmem:[%s4610_s15 + $0x28] sm:$0x3f]  ;;  %v7296_v40 = vpop.permute.xlu0 %2739  ;;  %v8416_v20 = vld [vmem:[#allocation170_spill] sm:$0xff]  ;;  %v3185_v31 = vmul.f32 %v7287_v7, %v7284_v37 }
 0x390   : > { %v7294_v41 = vmul.f32 %v4047_v17, %v7122_v13  ;;  %8414 = vst [vmem:[#allocation60_spill] sm:$0xff] %v7296_v40  ;;  %v7298_v27 = vpop.permute.xlu1 %2741  ;;  %v2091_v5 = vadd.f32 %v8416_v20, %v2056_v19  ;;  %v8417_v39 = vld [vmem:[#allocation181_spill] sm:$0xff]  ;;  %v7303_v28 = vld [vmem:[%s4612_s1 + $0x20] sm:$0xff]  ;;  %v3184_v19 = vmul.f32 %v7281_v54, %v7284_v37  ;;  %v8421_v6 = vld [vmem:[#allocation171_spill] sm:$0xff] }
 0x391   : > { %8415 = vst [vmem:[#allocation61_spill] sm:$0xff] %v7298_v27  ;;  %v2154_v46 = vadd.f32 %v8417_v39, %v2103_v30  ;;  %v7307_v32 = vmul.f32 %v7303_v28, %v8382_v44  ;;  %v7310_v43 = vld [vmem:[%s4612_s1 + $0x28] sm:$0x3f]  ;;  %v8420_v60 = vld [vmem:[#allocation182_spill] sm:$0xff]  ;;  %3173 = vrot.lane.b32.xlu0 %v3169_v4, %s4296_s17  ;;  %v2092_v30 = vadd.f32 %v8421_v6, %v2057_v45 }
 0x392   : > { %v7314_v16 = vmul.f32 %v7310_v43, %v8382_v44  ;;  %v2155_v61 = vadd.f32 %v8420_v60, %v2104_v35  ;;  %3175 = vrot.lane.b32.xlu1 %v3170_v55, %s4296_s17  ;;  %v8422_v63 = vld [vmem:[#allocation174_spill] sm:$0xff]  ;;  %v7328_v35 = vmul.f32 %v7303_v28, %v7122_v13  ;;  %v8425_v4 = vld [vmem:[#allocation175_spill] sm:$0xff]  ;;  %v2263_v40 = vadd.f32 %v7014_v2, %v2250_v53 }
 0x393   : > { %8418 = vst [vmem:[#allocation62_spill] sm:$0xff] %v7307_v32  ;;  %v2115_v20 = vadd.f32 %v8422_v63, %v2064_v50  ;;  %v8423_v39 = vld [vmem:[#allocation190_spill] sm:$0xff]  ;;  %v2116_v55 = vadd.f32 %v8425_v4, %v2065_v51  ;;  %v8426_v60 = vld [vmem:[#allocation191_spill] sm:$0xff]  ;;  %v7335_v32 = vpop.permute.xlu0 %2751  ;;  %v3196_v51 = vmul.f32 %v7281_v54, %v7138_v59  ;;  %v8432_v4 = vld [vmem:[#allocation200_spill] sm:$0xff]  ;;  %v7347_v53 = vstv %s7269_s0 }
 0x394   : > { %8419 = vst [vmem:[#allocation73_spill] sm:$0xff] %v7314_v16  ;;  %v2205_v44 = vadd.f32 %v8423_v39, %v2154_v46  ;;  %8424 = vst [vmem:[#allocation66_spill] sm:$0xff] %v7328_v35  ;;  %v2206_v27 = vadd.f32 %v8426_v60, %v2155_v61  ;;  %v2264_v16 = vadd.f32 %v7018_v56, %v2251_v11  ;;  %v7337_v45 = vpop.permute.xlu1 %2753  ;;  %v8429_v50 = vld [vmem:[#allocation178_spill] sm:$0xff]  ;;  %v8430_v6 = vld [vmem:[#allocation179_spill] sm:$0xff] }
 0x395   : > { %8427 = vst [vmem:[#allocation79_spill] sm:$0xff] %v7335_v32  ;;  %8428 = vst [vmem:[#allocation63_spill] sm:$0xff] %v7337_v45  ;;  %v2142_v46 = vadd.f32 %v8429_v50, %v2091_v5  ;;  %v2143_v63 = vadd.f32 %v8430_v6, %v2092_v30  ;;  %v8431_v39 = vld [vmem:[#allocation183_spill] sm:$0xff]  ;;  %v2290_v61 = vadd.f32 %v8432_v4, %v2263_v40  ;;  %v8433_v60 = vld [vmem:[#allocation201_spill] sm:$0xff]  ;;  %3188 = vrot.lane.b32.xlu0 %v3184_v19, %s4296_s17 }
 0x396   : > { %v2166_v35 = vadd.f32 %v8431_v39, %v2115_v20  ;;  %v2291_v2 = vadd.f32 %v8433_v60, %v2264_v16  ;;  %3190 = vrot.lane.b32.xlu1 %v3185_v31, %s4296_s17  ;;  %v3197_v56 = vmul.f32 %v7287_v7, %v7138_v59  ;;  %v8434_v11 = vld [vmem:[#allocation184_spill] sm:$0xff]  ;;  %v8436_v50 = vld [vmem:[#allocation189_spill] sm:$0xff]  ;;  %v8437_v40 = vld [vmem:[#allocation218_spill] sm:$0xff] }
 0x397   : > { %v2167_v5 = vadd.f32 %v8434_v11, %v2116_v55  ;;  %v8435_v30 = vld [vmem:[#allocation188_spill] sm:$0xff]  ;;  %v2194_v6 = vadd.f32 %v8436_v50, %v2143_v63  ;;  %v2254_v39 = vadd.f32 %v8437_v40, %v2205_v44  ;;  %v8440_v45 = vld [vmem:[#allocation223_spill] sm:$0xff]  ;;  %v7364_v59 = vpop.permute.xlu0 %2766  ;;  %v8442_v55 = vld [vmem:[#allocation193_spill] sm:$0xff] }
 0x398   : > { %v2193_v20 = vadd.f32 %v8435_v30, %v2142_v46  ;;  %v8438_v16 = vld [vmem:[#allocation48_spill] sm:$0xff]  ;;  %v2341_v31 = vadd.f32 %v8440_v45, %v2290_v61  ;;  %v7366_v22 = vpop.permute.xlu1 %2768  ;;  %v8443_v46 = vld [vmem:[#allocation195_spill] sm:$0xff]  ;;  %v7383_v45 = vmul.f32 %v7263_v3, %v7347_v53  ;;  %v7386_v61 = vmul.f32 %v4047_v17, %v7347_v53 }
 0x399   : > { %v2255_v4 = vadd.f32 %v8438_v16, %v2206_v27  ;;  %v8439_v60 = vld [vmem:[#allocation192_spill] sm:$0xff]  ;;  %v2218_v11 = vadd.f32 %v8442_v55, %v2167_v5  ;;  %v8446_v27 = vld [vmem:[#allocation22_spill] sm:$0xff]  ;;  %3200 = vrot.lane.b32.xlu0 %v3196_v51, %s4296_s17 }
 0x39a   : > { %v2217_v19 = vadd.f32 %v8439_v60, %v2166_v35  ;;  %v8441_v32 = vld [vmem:[#allocation224_spill] sm:$0xff]  ;;  %v2229_v30 = vadd.f32 %v8443_v46, %v2193_v20  ;;  %v2392_v16 = vadd.f32 %v8446_v27, %v2341_v31  ;;  %v8447_v35 = vld [vmem:[#allocation23_spill] sm:$0xff]  ;;  %3202 = vrot.lane.b32.xlu1 %v3197_v56, %s4296_s17  ;;  %v8449_v51 = vld [vmem:[#allocation198_spill] sm:$0xff] }
 0x39b   : > { %v2342_v15 = vadd.f32 %v8441_v32, %v2291_v2  ;;  %v8444_v63 = vld [vmem:[#allocation196_spill] sm:$0xff]  ;;  %v8448_v2 = vld [vmem:[#allocation197_spill] sm:$0xff]  ;;  %v8450_v20 = vld [vmem:[#allocation199_spill] sm:$0xff]  ;;  %v7403_v17 = vpop.permute.xlu0 %2778  ;;  %v2272_v27 = vadd.f32 %v7049_v42, %v2255_v4  ;;  %v7425_v4 = vmul.f32 %v7303_v28, %v7347_v53 }
 0x39c   : > { %v2230_v50 = vadd.f32 %v8444_v63, %v2194_v6  ;;  %v8445_v44 = vld [vmem:[#allocation36_spill] sm:$0xff]  ;;  %v7390_v5 = vmul.f32 %v7303_v28, %v8448_v2  ;;  %v2241_v56 = vadd.f32 %v8449_v51, %v2217_v19  ;;  %v2242_v6 = vadd.f32 %v8450_v20, %v2218_v11  ;;  %v8451_v31 = vld [vmem:[#allocation49_spill] sm:$0xff]  ;;  %v7405_v46 = vpop.permute.xlu1 %2780 }
 0x39d   : > { %v3208_v40 = vmul.f32 %v7281_v54, %v8445_v44  ;;  %v2393_v60 = vadd.f32 %v8447_v35, %v2342_v15  ;;  %v3209_v32 = vmul.f32 %v7287_v7, %v8445_v44  ;;  %v7394_v15 = vmul.f32 %v7310_v43, %v7122_v13 }
 0x39e   : > { %v2271_v55 = vadd.f32 %v8451_v31, %v2254_v39  ;;  %v7401_v3 = vmul.f32 %v7310_v43, %v8448_v2  ;;  %v2267_v63 = vadd.f32 %v7060_v23, %v2229_v30  ;;  %v2268_v13 = vadd.f32 %v7090_v26, %v2230_v50  ;;  %v8452_v23 = vld [vmem:[#allocation205_spill] sm:$0xff]  ;;  %v8453_v30 = vld [vmem:[#allocation206_spill] sm:$0xff]  ;;  %v8456_v31 = vld [vmem:[#allocation227_spill] sm:$0xff] }
 0x39f   : > { %v3220_v19 = vmul.f32 %v7281_v54, %v6680_v36  ;;  %v2563_v11 = vadd.f32 %v7147_v12, %v2392_v16  ;;  %v2564_v39 = vadd.f32 %v7151_v8, %v2393_v60  ;;  %3212 = vrot.lane.b32.xlu0 %v3208_v40, %s4296_s17  ;;  %3214 = vrot.lane.b32.xlu1 %v3209_v32, %s4296_s17  ;;  %v7419_v51 = vstv %s7353_s13  ;;  %v8454_v8 = vld [vmem:[#allocation202_spill] sm:$0xff]  ;;  %v8455_v40 = vld [vmem:[#allocation203_spill] sm:$0xff]  ;;  %v7435_v32 = vpop.permute.xlu0 %2790 }
 0x3a0   : > { %v3221_v35 = vmul.f32 %v7287_v7, %v6680_v36  ;;  %v2314_v26 = vadd.f32 %v8452_v23, %v2271_v55  ;;  %v2315_v42 = vadd.f32 %v8453_v30, %v2272_v27  ;;  %v7429_v12 = vmul.f32 %v7310_v43, %v7347_v53  ;;  %v7437_v20 = vpop.permute.xlu1 %2792  ;;  %v8457_v55 = vld [vmem:[#allocation228_spill] sm:$0xff]  ;;  %v8458_v23 = vld [vmem:[#allocation213_spill] sm:$0xff]  ;;  %v8460_v30 = vld [vmem:[#allocation226_spill] sm:$0xff] }
 0x3a1   : > { %v2302_v50 = vadd.f32 %v8454_v8, %v2267_v63  ;;  %v2303_v16 = vadd.f32 %v8455_v40, %v2268_v13  ;;  %v2275_v36 = vadd.f32 %v7093_v57, %v2241_v56  ;;  %v2276_v60 = vadd.f32 %v7106_v25, %v2242_v6  ;;  %v8459_v6 = vld [vmem:[#allocation225_spill] sm:$0xff]  ;;  %v8461_v8 = vld [vmem:[#allocation208_spill] sm:$0xff]  ;;  %v8463_v2 = vld [vmem:[#allocation214_spill] sm:$0xff] }
 0x3a2   : > { %v2365_v28 = vadd.f32 %v8456_v31, %v2314_v26  ;;  %v2366_v27 = vadd.f32 %v8457_v55, %v2315_v42  ;;  %v3235_v43 = vmul.f32 %v7135_v14, %v7419_v51  ;;  %v3236_v63 = vmul.f32 %v7141_v33, %v7419_v51  ;;  %v8462_v31 = vld [vmem:[#allocation209_spill] sm:$0xff] }
 0x3a3   : > { %v2326_v13 = vadd.f32 %v8458_v23, %v2275_v36  ;;  %v2573_v57 = vadd.f32 %v7162_v29, %v2563_v11  ;;  %v2574_v25 = vadd.f32 %v7175_v58, %v2564_v39  ;;  %3224 = vrot.lane.b32.xlu0 %v3220_v19, %s4296_s17  ;;  %3226 = vrot.lane.b32.xlu1 %v3221_v35, %s4296_s17  ;;  %v7451_v56 = vstv %s7379_s7  ;;  %v8464_v23 = vld [vmem:[#allocation42_spill] sm:$0xff]  ;;  %v8465_v11 = vld [vmem:[#allocation43_spill] sm:$0xff]  ;;  %v7460_v39 = vpop.permute.xlu0 %2802 }
 0x3a4   : > { %v2353_v26 = vadd.f32 %v8459_v6, %v2302_v50  ;;  %v2354_v42 = vadd.f32 %v8460_v30, %v2303_v16  ;;  %v2416_v40 = vadd.f32 %v8461_v8, %v2365_v28  ;;  %v2417_v55 = vadd.f32 %v8462_v31, %v2366_v27  ;;  %v7462_v19 = vpop.permute.xlu1 %2804  ;;  %v8467_v50 = vld [vmem:[#allocation204_spill] sm:$0xff]  ;;  %v8468_v16 = vld [vmem:[#allocation207_spill] sm:$0xff] }
 0x3a5   : > { %v2327_v36 = vadd.f32 %v8463_v2, %v2276_v60  ;;  %v2592_v29 = vadd.f32 %v8464_v23, %v2573_v57  ;;  %v2593_v58 = vadd.f32 %v8465_v11, %v2574_v25  ;;  %8466 = vst [vmem:[#allocation64_spill] sm:$0xff] %v7462_v19  ;;  %v3247_v35 = vmul.f32 %v7135_v14, %v7284_v37  ;;  %v8469_v60 = vld [vmem:[#allocation51_spill] sm:$0xff]  ;;  %v8470_v57 = vld [vmem:[#allocation52_spill] sm:$0xff] }
 0x3a6   : > { %v2404_v6 = vadd.f32 %v8467_v50, %v2353_v26  ;;  %v2405_v30 = vadd.f32 %v8468_v16, %v2354_v42  ;;  %v7470_v28 = vmul.f32 %v6677_v34, %v7451_v56  ;;  %v3248_v2 = vmul.f32 %v7141_v33, %v7284_v37  ;;  %v8471_v8 = vld [vmem:[#allocation212_spill] sm:$0xff]  ;;  %v8472_v23 = vld [vmem:[#allocation215_spill] sm:$0xff]  ;;  %v8473_v50 = vld [vmem:[#allocation229_spill] sm:$0xff] }
 0x3a7   : > { %v2619_v27 = vadd.f32 %v8469_v60, %v2592_v29  ;;  %v2620_v25 = vadd.f32 %v8470_v57, %v2593_v58  ;;  %3239 = vrot.lane.b32.xlu0 %v3235_v43, %s4297_s19  ;;  %3241 = vrot.lane.b32.xlu1 %v3236_v63, %s4297_s19  ;;  %v7480_v26 = vmul.f32 %v6683_v47, %v7451_v56  ;;  %v8474_v16 = vld [vmem:[#allocation230_spill] sm:$0xff]  ;;  %v7490_v60 = vpop.permute.xlu0 %2817  ;;  %v8482_v37 = vld [vmem:[#allocation187_spill] sm:$0xff] }
 0x3a8   : > { %v2458_v42 = vadd.f32 %v7184_v48, %v2416_v40  ;;  %v2459_v34 = vadd.f32 %v7188_v9, %v2417_v55  ;;  %v2440_v31 = vadd.f32 %v8471_v8, %v2404_v6  ;;  %v2441_v11 = vadd.f32 %v8472_v23, %v2405_v30  ;;  %v7492_v47 = vpop.permute.xlu1 %2819  ;;  %v8475_v57 = vld [vmem:[#allocation38_spill] sm:$0xff]  ;;  %v8476_v40 = vld [vmem:[#allocation33_spill] sm:$0xff]  ;;  %v8479_v6 = vld [vmem:[#allocation211_spill] sm:$0xff] }
 0x3a9   : > { %v2377_v29 = vadd.f32 %v8473_v50, %v2326_v13  ;;  %v2378_v58 = vadd.f32 %v8474_v16, %v2327_v36  ;;  %v2646_v43 = vadd.f32 %v7114_v21, %v2619_v27  ;;  %v2647_v63 = vadd.f32 %v7116_v49, %v2620_v25  ;;  %v8477_v13 = vld [vmem:[#allocation37_spill] sm:$0xff]  ;;  %v8478_v21 = vld [vmem:[#allocation210_spill] sm:$0xff]  ;;  %v8480_v25 = vld [vmem:[#allocation55_spill] sm:$0xff] }
 0x3aa   : > { %v3259_v48 = vmul.f32 %v7135_v14, %v8475_v57  ;;  %v3260_v9 = vmul.f32 %v7141_v33, %v8475_v57  ;;  %v7500_v55 = vmul.f32 %v8476_v40, %v8410_v62  ;;  %v7504_v36 = vmul.f32 %v8477_v13, %v8410_v62  ;;  %v8481_v23 = vld [vmem:[#allocation56_spill] sm:$0xff] }
 0x3ab   : > { %v2428_v49 = vadd.f32 %v8478_v21, %v2377_v29  ;;  %v2429_v30 = vadd.f32 %v8479_v6, %v2378_v58  ;;  %3251 = vrot.lane.b32.xlu0 %v3247_v35, %s4297_s19  ;;  %3253 = vrot.lane.b32.xlu1 %v3248_v2, %s4297_s19  ;;  %v3271_v27 = vmul.f32 %v7135_v14, %v8445_v44  ;;  %v8483_v29 = vld [vmem:[#allocation25_spill] sm:$0xff]  ;;  %v7520_v2 = vpop.permute.xlu0 %2829 }
 0x3ac   : > { %v2464_v8 = vadd.f32 %v8480_v25, %v2458_v42  ;;  %v2465_v50 = vadd.f32 %v8481_v23, %v2459_v34  ;;  %v2577_v16 = vadd.f32 %v7240_v1, %v2440_v31  ;;  %v2578_v62 = vadd.f32 %v7243_v38, %v2441_v11  ;;  %v7522_v6 = vpop.permute.xlu1 %2831  ;;  %v8484_v14 = vld [vmem:[#allocation29_spill] sm:$0xff]  ;;  %v8485_v25 = vld [vmem:[#allocation26_spill] sm:$0xff]  ;;  %v8487_v31 = vld [vmem:[#allocation47_spill] sm:$0xff] }
 0x3ad   : > { %v2452_v19 = vadd.f32 %v8482_v37, %v2428_v49  ;;  %v2453_v21 = vadd.f32 %v8483_v29, %v2429_v30  ;;  %v2680_v58 = vadd.f32 %v7383_v45, %v2646_v43  ;;  %v2681_v35 = vadd.f32 %v7386_v61, %v2647_v63  ;;  %v8486_v23 = vld [vmem:[#allocation46_spill] sm:$0xff] }
 0x3ae   : > { %v2480_v42 = vadd.f32 %v8484_v14, %v2464_v8  ;;  %v2481_v34 = vadd.f32 %v8485_v25, %v2465_v50  ;;  %v2604_v1 = vadd.f32 %v8486_v23, %v2577_v16  ;;  %v2605_v38 = vadd.f32 %v8487_v31, %v2578_v62  ;;  %v8488_v14 = vld [vmem:[#allocation40_spill] sm:$0xff]  ;;  %v8489_v43 = vld [vmem:[#allocation30_spill] sm:$0xff]  ;;  %v8491_v62 = vld [vmem:[#allocation217_spill] sm:$0xff] }
 0x3af   : > { %3263 = vrot.lane.b32.xlu0 %v3259_v48, %s4297_s19  ;;  %3265 = vrot.lane.b32.xlu1 %v3260_v9, %s4297_s19  ;;  %v3272_v37 = vmul.f32 %v7141_v33, %v8445_v44  ;;  %v3283_v45 = vmul.f32 %v7281_v54, %v7419_v51  ;;  %v3284_v61 = vmul.f32 %v7287_v7, %v7419_v51  ;;  %v8490_v49 = vld [vmem:[#allocation50_spill] sm:$0xff]  ;;  %v7544_v16 = vpop.permute.xlu0 %2841 }
 0x3b0   : > { %v2504_v11 = vadd.f32 %v8488_v14, %v2480_v42  ;;  %v2505_v63 = vadd.f32 %v8489_v43, %v2481_v34  ;;  %v2631_v30 = vadd.f32 %v8490_v49, %v2604_v1  ;;  %v2632_v8 = vadd.f32 %v8491_v62, %v2605_v38  ;;  %v7546_v29 = vpop.permute.xlu1 %2843  ;;  %v8492_v42 = vld [vmem:[#allocation41_spill] sm:$0xff]  ;;  %v8493_v34 = vld [vmem:[#allocation44_spill] sm:$0xff]  ;;  %v8495_v38 = vld [vmem:[#allocation222_spill] sm:$0xff] }
 0x3b1   : > { %v2468_v48 = vadd.f32 %v7249_v24, %v2452_v19  ;;  %v2469_v9 = vadd.f32 %v7252_v52, %v2453_v21  ;;  %v2694_v44 = vadd.f32 %v7390_v5, %v2680_v58  ;;  %v2695_v50 = vadd.f32 %v7401_v3, %v2681_v35  ;;  %v8494_v1 = vld [vmem:[#allocation221_spill] sm:$0xff]  ;;  %v8496_v24 = vld [vmem:[#allocation32_spill] sm:$0xff]  ;;  %v8497_v3 = vld [vmem:[#allocation27_spill] sm:$0xff] }
 0x3b2   : > { %v2528_v25 = vadd.f32 %v8492_v42, %v2504_v11  ;;  %v2529_v23 = vadd.f32 %v8493_v34, %v2505_v63  ;;  %v2658_v31 = vadd.f32 %v8494_v1, %v2631_v30  ;;  %v2659_v14 = vadd.f32 %v8495_v38, %v2632_v8  ;;  %v8498_v58 = vld [vmem:[#allocation53_spill] sm:$0xff]  ;;  %v8499_v11 = vld [vmem:[#allocation54_spill] sm:$0xff]  ;;  %v8500_v30 = vld [vmem:[#allocation31_spill] sm:$0xff] }
 0x3b3   : > { %v2492_v19 = vadd.f32 %v8496_v24, %v2468_v48  ;;  %v2721_v52 = vadd.f32 %v7222_v18, %v2694_v44  ;;  %v2722_v5 = vadd.f32 %v7224_v0, %v2695_v50  ;;  %3275 = vrot.lane.b32.xlu0 %v3271_v27, %s4297_s19  ;;  %3277 = vrot.lane.b32.xlu1 %v3272_v37, %s4297_s19  ;;  %v4050_v63 = vld [vmem:[%s4596_s30 + $0x21] sm:$0xff]  ;;  %v7567_v62 = vpop.permute.xlu0 %2853 }
 0x3b4   : > { %v2493_v21 = vadd.f32 %v8497_v3, %v2469_v9  ;;  %v2670_v35 = vadd.f32 %v8498_v58, %v2658_v31  ;;  %v2671_v43 = vadd.f32 %v8499_v11, %v2659_v14  ;;  %v7562_v49 = vmul.f32 %v4050_v63, %v7347_v53  ;;  %v7569_v37 = vpop.permute.xlu1 %2855  ;;  %v8501_v48 = vld [vmem:[#allocation34_spill] sm:$0xff]  ;;  %v8502_v34 = vld [vmem:[#allocation45_spill] sm:$0xff]  ;;  %v8503_v14 = vld [vmem:[#allocation35_spill] sm:$0xff] }
 0x3b5   : > { %v2516_v18 = vadd.f32 %v8500_v30, %v2492_v19  ;;  %v2772_v0 = vadd.f32 %v7364_v59, %v2721_v52  ;;  %v2773_v27 = vadd.f32 %v7366_v22, %v2722_v5  ;;  %v3295_v8 = vmul.f32 %v7281_v54, %v8475_v57  ;;  %v7579_v59 = vld [vmem:[%s4596_s30 + $0x22] sm:$0xff]  ;;  %v7582_v22 = vld [vmem:[%s4596_s30 + $0x2a] sm:$0x3f] }
 0x3b6   : > { %v2517_v9 = vadd.f32 %v8501_v48, %v2493_v21  ;;  %v2684_v44 = vadd.f32 %v7267_v10, %v2528_v25  ;;  %v2685_v50 = vadd.f32 %v7294_v41, %v2529_v23  ;;  %v3296_v42 = vmul.f32 %v7287_v7, %v8475_v57  ;;  %v4051_v25 = vld [vmem:[%s4596_s30 + $0x29] sm:$0x3f]  ;;  %v8508_v58 = vld [vmem:[#allocation62_spill] sm:$0xff]  ;;  %s3322_s30 = sadd.s32 21, %s6143_s8 }
 0x3b7   : > { %v2540_v1 = vadd.f32 %v8502_v34, %v2516_v18  ;;  %v2823_v31 = vadd.f32 %v7490_v60, %v2772_v0  ;;  %v2824_v38 = vadd.f32 %v7492_v47, %v2773_v27  ;;  %3287 = vrot.lane.b32.xlu0 %v3283_v45, %s4297_s19  ;;  %3289 = vrot.lane.b32.xlu1 %v3284_v61, %s4297_s19  ;;  %v8504_v19 = vld [vmem:[#allocation39_spill] sm:$0xff]  ;;  %v2866_v52 = vpop.permute.xlu0 %2865  ;;  %v8505_v5 = vld [vmem:[#allocation57_spill] sm:$0xff]  ;;  %v8506_v61 = vld [vmem:[#allocation58_spill] sm:$0xff] }
 0x3b8   : > { %v2698_v10 = vadd.f32 %v7425_v4, %v2670_v35  ;;  %v2699_v41 = vadd.f32 %v7429_v12, %v2671_v43  ;;  %v2895_v57 = vmul.f32 %v4051_v25, %v7347_v53  ;;  %v2907_v23 = vmul.f32 %v8476_v40, %v7451_v56  ;;  %v2868_v47 = vpop.permute.xlu1 %2867  ;;  %v8507_v3 = vld [vmem:[#allocation65_spill] sm:$0xff]  ;;  %v8510_v43 = vld [vmem:[#allocation216_spill] sm:$0xff] }
 0x3b9   : > { %v2541_v24 = vadd.f32 %v8503_v14, %v2517_v9  ;;  %v2552_v60 = vadd.f32 %v8504_v19, %v2540_v1  ;;  %v3380_v45 = vmul.f32 %v7579_v59, %v8505_v5  ;;  %v3381_v4 = vmul.f32 %v7582_v22, %v8505_v5  ;;  %v8509_v11 = vld [vmem:[#allocation73_spill] sm:$0xff]  ;;  %v8511_v0 = vld [vmem:[#allocation60_spill] sm:$0xff]  ;;  %v8513_v1 = vld [vmem:[#allocation66_spill] sm:$0xff] }
 0x3ba   : > { %v2733_v12 = vadd.f32 %v8506_v61, %v2698_v10  ;;  %v2734_v21 = vadd.f32 %v8507_v3, %v2699_v41  ;;  %v2702_v35 = vadd.f32 %v8508_v58, %v2684_v44  ;;  %v2703_v40 = vadd.f32 %v8509_v11, %v2685_v50  ;;  %v8512_v48 = vld [vmem:[#allocation61_spill] sm:$0xff] }
 0x3bb   : > { %v2553_v63 = vadd.f32 %v8510_v43, %v2541_v24  ;;  %v2892_v30 = vadd.f32 %v7470_v28, %v2823_v31  ;;  %v2893_v18 = vadd.f32 %v7480_v26, %v2824_v38  ;;  %3299 = vrot.lane.b32.xlu0 %v3295_v8, %s4297_s19  ;;  %3301 = vrot.lane.b32.xlu1 %v3296_v42, %s4297_s19  ;;  %v2878_v10 = vpop.permute.xlu0 %2877  ;;  %v8514_v28 = vld [vmem:[#allocation220_spill] sm:$0xff]  ;;  %v7636_v19 = vld [vmem:[%s4604_s18 + $0x2a] sm:$0x3f] }
 0x3bc   : > { %v2745_v27 = vadd.f32 %v8511_v0, %v2702_v35  ;;  %v2746_v9 = vadd.f32 %v8512_v48, %v2703_v40  ;;  %v2784_v34 = vadd.f32 %v7403_v17, %v2733_v12  ;;  %v2785_v44 = vadd.f32 %v7405_v46, %v2734_v21  ;;  %v2880_v41 = vpop.permute.xlu1 %2879  ;;  %v8517_v3 = vld [vmem:[#allocation197_spill] sm:$0xff] }
 0x3bd   : > { %v2706_v50 = vadd.f32 %v8513_v1, %v2552_v60  ;;  %v3368_v26 = vmul.f32 %v7579_v59, %v8514_v28  ;;  %v3369_v8 = vmul.f32 %v7582_v22, %v8514_v28  ;;  %v2908_v42 = vmul.f32 %v8477_v13, %v7451_v56  ;;  %v7631_v13 = vld [vmem:[%s4604_s18 + $0x22] sm:$0xff] }
 0x3be   : > { %v2796_v31 = vadd.f32 %v7435_v32, %v2745_v27  ;;  %v2797_v17 = vadd.f32 %v7437_v20, %v2746_v9  ;;  %v2835_v46 = vadd.f32 %v7520_v2, %v2784_v34  ;;  %v2836_v38 = vadd.f32 %v7522_v6, %v2785_v44  ;;  %v4053_v35 = vld [vmem:[%s4604_s18 + $0x29] sm:$0x3f] }
 0x3bf   : > { %v2707_v25 = vadd.f32 %v7394_v15, %v2553_v63  ;;  %3384 = vrot.lane.b32.xlu0 %v3380_v45, %s4296_s17  ;;  %3386 = vrot.lane.b32.xlu1 %v3381_v4, %s4296_s17  ;;  %v2905_v14 = vadd.f32 %v7500_v55, %v2892_v30  ;;  %v2906_v24 = vadd.f32 %v7504_v36, %v2893_v18  ;;  %v8515_v15 = vld [vmem:[#allocation79_spill] sm:$0xff]  ;;  %v2927_v4 = vpop.permute.xlu0 %2926 }
 0x3c0   : > { %v2847_v32 = vadd.f32 %v7544_v16, %v2796_v31  ;;  %v2848_v20 = vadd.f32 %v7546_v29, %v2797_v17  ;;  %v2871_v2 = vadd.f32 %v2866_v52, %v2835_v46  ;;  %v2872_v6 = vadd.f32 %v2868_v47, %v2836_v38  ;;  %v8516_v45 = vld [vmem:[#allocation63_spill] sm:$0xff]  ;;  %v2929_v12 = vpop.permute.xlu1 %2928  ;;  %v8518_v47 = vld [vmem:[#allocation64_spill] sm:$0xff] }
 0x3c1   : > { %v2757_v60 = vadd.f32 %v8515_v15, %v2706_v50  ;;  %v2758_v61 = vadd.f32 %v8516_v45, %v2707_v25  ;;  %v4052_v55 = vld [vmem:[%s4604_s18 + $0x21] sm:$0xff]  ;;  %v2932_v21 = vadd.f32 %v2927_v4, %v2905_v14  ;;  %v2933_v58 = vadd.f32 %v2929_v12, %v2906_v24  ;;  %s3323_s18 = sld [smem:[#allocation10 + %s3322_s30]] }
 0x3c2   : > { %v2911_v36 = vmul.f32 %v4052_v55, %v8517_v3  ;;  %v3431_v16 = vmul.f32 %v7631_v13, %v8514_v28  ;;  %v2912_v29 = vmul.f32 %v4053_v35, %v8517_v3  ;;  %v3432_v40 = vmul.f32 %v7636_v19, %v8514_v28  ;;  %v8519_v1 = vld [vmem:[#allocation59_spill] sm:$0xff] }
 0x3c3   : > { %v2808_v52 = vadd.f32 %v7460_v39, %v2757_v60  ;;  %v2809_v11 = vadd.f32 %v8518_v47, %v2758_v61  ;;  %3372 = vrot.lane.b32.xlu0 %v3368_v26, %s4296_s17  ;;  %3374 = vrot.lane.b32.xlu1 %v3369_v8, %s4296_s17  ;;  %v2896_v43 = vadd.f32 %v7562_v49, %v2847_v32  ;;  %v2939_v0 = vpop.permute.xlu0 %2938 }
 0x3c4   : > { %v2897_v63 = vadd.f32 %v2895_v57, %v2848_v20  ;;  %v2909_v30 = vadd.f32 %v2907_v23, %v2871_v2  ;;  %v2910_v18 = vadd.f32 %v2908_v42, %v2872_v6  ;;  %v2941_v27 = vpop.permute.xlu1 %2940  ;;  %v2915_v48 = vmul.f32 %v4052_v55, %v7347_v53 }
 0x3c5   : > { %v2859_v39 = vadd.f32 %v7567_v62, %v2808_v52  ;;  %v2860_v9 = vadd.f32 %v7569_v37, %v2809_v11  ;;  %v3419_v49 = vmul.f32 %v7631_v13, %v8519_v1  ;;  %v3420_v57 = vmul.f32 %v7636_v19, %v8519_v1 }
 0x3c6   : > { %v2944_v34 = vadd.f32 %v2939_v0, %v2909_v30  ;;  %v2945_v44 = vadd.f32 %v2941_v27, %v2910_v18  ;;  %v2916_v23 = vmul.f32 %v4053_v35, %v7347_v53  ;;  %v2913_v26 = vadd.f32 %v2911_v36, %v2896_v43 }
 0x3c7   : > { %3435 = vrot.lane.b32.xlu0 %v3431_v16, %s4296_s17  ;;  %3437 = vrot.lane.b32.xlu1 %v3432_v40, %s4296_s17  ;;  %v2883_v50 = vadd.f32 %v2878_v10, %v2859_v39  ;;  %v2884_v28 = vadd.f32 %v2880_v41, %v2860_v9  ;;  %v2914_v62 = vadd.f32 %v2912_v29, %v2897_v63  ;;  %v2951_v8 = vpop.permute.xlu0 %2950  ;;  %v7683_v61 = vstv %s3323_s18 }
 0x3c8   : > { %v2953_v37 = vpop.permute.xlu1 %2952  ;;  %v2956_v42 = vadd.f32 %v2951_v8, %v2913_v26  ;;  %v3482_v17 = vmul.f32 %v7579_v59, %v8519_v1  ;;  %v3483_v53 = vmul.f32 %v7582_v22, %v8519_v1  ;;  %v3470_v24 = vmul.f32 %v7579_v59, %v7419_v51  ;;  %v7721_v8 = vld [vmem:[%s4612_s1 + $0x2a] sm:$0x3f] }
 0x3c9   : > { %v2957_v31 = vadd.f32 %v2953_v37, %v2914_v62  ;;  %v2917_v10 = vadd.f32 %v2915_v48, %v2883_v50  ;;  %v2918_v41 = vadd.f32 %v2916_v23, %v2884_v28  ;;  %v3471_v32 = vmul.f32 %v7582_v22, %v7419_v51  ;;  %v7718_v62 = vld [vmem:[%s4612_s1 + $0x22] sm:$0xff]  ;;  %s3443_s1 = sadd.s32 24, %s6143_s8 }
 0x3ca   : > { %v3506_v60 = vmul.f32 %v7631_v13, %v7419_v51  ;;  %v3507_v45 = vmul.f32 %v7636_v19, %v7419_v51  ;;  %v3356_v36 = vmul.f32 %v7579_v59, %v7683_v61  ;;  %v7695_v51 = vld [vmem:[%s4610_s15 + $0x2a] sm:$0x3f]  ;;  %v3343_v40 = vstv %s3342_s27  ;;  %s3444_s26 = sld [smem:[#allocation10 + %s3443_s1]] }
 0x3cb   : > { %3423 = vrot.lane.b32.xlu0 %v3419_v49, %s4296_s17  ;;  %3425 = vrot.lane.b32.xlu1 %v3420_v57, %s4296_s17  ;;  %v2963_v46 = vpop.permute.xlu0 %2962  ;;  %v3547_v11 = vmul.f32 %v7695_v51, %v7683_v61  ;;  %v3344_v0 = vmul.f32 %v7579_v59, %v3343_v40  ;;  %v3345_v27 = vmul.f32 %v7582_v22, %v3343_v40 }
 0x3cc   : > { %v2965_v38 = vpop.permute.xlu1 %2964  ;;  %v2968_v25 = vadd.f32 %v2963_v46, %v2917_v10  ;;  %v3408_v1 = vmul.f32 %v7636_v19, %v3343_v40  ;;  %v3535_v26 = vmul.f32 %v7695_v51, %v3343_v40  ;;  %v3571_v10 = vmul.f32 %v7721_v8, %v3343_v40 }
 0x3cd   : > { %v2969_v14 = vadd.f32 %v2965_v38, %v2918_v41  ;;  %v7727_v46 = vstv %s3099_s11 }
 0x3cf   : > { %3486 = vrot.lane.b32.xlu0 %v3482_v17, %s4297_s19  ;;  %3488 = vrot.lane.b32.xlu1 %v3483_v53, %s4297_s19  ;;  %v2978_v20 = vpop.permute.xlu0 %2977  ;;  %v3570_v53 = vmul.f32 %v7718_v62, %v3343_v40 }
 0x3d0   : > { %v2980_v2 = vpop.permute.xlu1 %2979  ;;  %v2983_v6 = vadd.f32 %v2978_v20, %v2932_v21  ;;  %v3357_v21 = vmul.f32 %v7582_v22, %v7683_v61 }
 0x3d1   : > { %v2984_v15 = vadd.f32 %v2980_v2, %v2933_v58  ;;  %v7692_v58 = vld [vmem:[%s4610_s15 + $0x22] sm:$0xff]  ;;  %s3392_s15 = sadd.s32 23, %s6143_s8 }
 0x3d2   : > { %v3546_v47 = vmul.f32 %v7692_v58, %v7683_v61  ;;  %s3393_s4 = sld [smem:[#allocation10 + %s3392_s15]]  ;;  %v3534_v28 = vmul.f32 %v7692_v58, %v3343_v40  ;;  %v8520_v2 = vld [vmem:[#allocation219_spill] sm:$0xff] }
 0x3d3   : > { %3474 = vrot.lane.b32.xlu0 %v3470_v24, %s4297_s19  ;;  %3476 = vrot.lane.b32.xlu1 %v3471_v32, %s4297_s19  ;;  %v2990_v4 = vpop.permute.xlu0 %2989 }
 0x3d4   : > { %v2992_v12 = vpop.permute.xlu1 %2991  ;;  %v2995_v55 = vadd.f32 %v2990_v4, %v2944_v34 }
 0x3d5   : > { %v2996_v3 = vadd.f32 %v2992_v12, %v2945_v44  ;;  %v3407_v44 = vmul.f32 %v7631_v13, %v3343_v40 }
 0x3d7   : > { %3510 = vrot.lane.b32.xlu0 %v3506_v60, %s4297_s19  ;;  %3512 = vrot.lane.b32.xlu1 %v3507_v45, %s4297_s19  ;;  %v3002_v16 = vpop.permute.xlu0 %3001 }
 0x3d8   : > { %v3004_v35 = vpop.permute.xlu1 %3003  ;;  %v3007_v29 = vadd.f32 %v3002_v16, %v2956_v42  ;;  %v3394_v41 = vstv %s3393_s4  ;;  %v3114_v16 = vmul.f32 %v7281_v54, %v8505_v5 }
 0x3d9   : > { %v3008_v52 = vadd.f32 %v3004_v35, %v2957_v31  ;;  %v3395_v32 = vmul.f32 %v7631_v13, %v3394_v41  ;;  %v3396_v20 = vmul.f32 %v7636_v19, %v3394_v41  ;;  %v3115_v35 = vmul.f32 %v7287_v7, %v8505_v5 }
 0x3db   : > { %3360 = vrot.lane.b32.xlu0 %v3356_v36, %s4296_s17  ;;  %3362 = vrot.lane.b32.xlu1 %v3357_v21, %s4296_s17  ;;  %v3014_v43 = vpop.permute.xlu0 %3013 }
 0x3dc   : > { %v3016_v63 = vpop.permute.xlu1 %3015  ;;  %v3019_v30 = vadd.f32 %v3014_v43, %v2968_v25  ;;  %v3106_v43 = vmul.f32 %v7141_v33, %v7451_v56 }
 0x3dd   : > { %v3020_v18 = vadd.f32 %v3016_v63, %v2969_v14  ;;  %v3558_v63 = vmul.f32 %v7718_v62, %v3394_v41 }
 0x3df   : > { %3550 = vrot.lane.b32.xlu0 %v3546_v47, %s4296_s17  ;;  %3552 = vrot.lane.b32.xlu1 %v3547_v11, %s4296_s17  ;;  %v3029_v48 = vpop.permute.xlu0 %3028  ;;  %v3105_v47 = vmul.f32 %v8520_v2, %v7451_v56 }
 0x3e0   : > { %v3031_v39 = vpop.permute.xlu1 %3030  ;;  %v3034_v9 = vadd.f32 %v3029_v48, %v2983_v6  ;;  %v3101_v6 = vmul.f32 %v8520_v2, %v7727_v46  ;;  %v3119_v48 = vmul.f32 %v7287_v7, %v7727_v46 }
 0x3e1   : > { %v3035_v34 = vadd.f32 %v3031_v39, %v2984_v15  ;;  %v3102_v15 = vmul.f32 %v7141_v33, %v7727_v46 }
 0x3e2   : > { %v3103_v36 = vadd.f32 %v3101_v6, %v3034_v9 }
 0x3e3   : > { %3348 = vrot.lane.b32.xlu0 %v3344_v0, %s4296_s17  ;;  %3350 = vrot.lane.b32.xlu1 %v3345_v27, %s4296_s17  ;;  %v3041_v49 = vpop.permute.xlu0 %3040  ;;  %v3104_v21 = vadd.f32 %v3102_v15, %v3035_v34  ;;  %v3118_v27 = vmul.f32 %v7281_v54, %v7727_v46 }
 0x3e4   : > { %v3043_v57 = vpop.permute.xlu1 %3042  ;;  %v3046_v23 = vadd.f32 %v3041_v49, %v2995_v55  ;;  %v3458_v55 = vmul.f32 %v7579_v59, %v3394_v41  ;;  %v3594_v49 = vmul.f32 %v7692_v58, %v3394_v41 }
 0x3e5   : > { %v3047_v50 = vadd.f32 %v3043_v57, %v2996_v3  ;;  %v3459_v3 = vmul.f32 %v7582_v22, %v3394_v41  ;;  %v3117_v0 = vadd.f32 %v3115_v35, %v3104_v21  ;;  %v3595_v57 = vmul.f32 %v7695_v51, %v3394_v41 }
 0x3e7   : > { %3411 = vrot.lane.b32.xlu0 %v3407_v44, %s4296_s17  ;;  %3413 = vrot.lane.b32.xlu1 %v3408_v1, %s4296_s17  ;;  %v3053_v37 = vpop.permute.xlu0 %3052  ;;  %v8521_v44 = vld [vmem:[#allocation24_spill] sm:$0xff] }
 0x3e8   : > { %v3055_v42 = vpop.permute.xlu1 %3054  ;;  %v3058_v31 = vadd.f32 %v3053_v37, %v3007_v29  ;;  %v3122_v1 = vmul.f32 %v7281_v54, %v8521_v44 }
 0x3e9   : > { %v3059_v17 = vadd.f32 %v3055_v42, %v3008_v52 }
 0x3eb   : > { %3538 = vrot.lane.b32.xlu0 %v3534_v28, %s4296_s17  ;;  %3540 = vrot.lane.b32.xlu1 %v3535_v26, %s4296_s17  ;;  %v3065_v38 = vpop.permute.xlu0 %3064  ;;  %v3107_v28 = vadd.f32 %v3105_v47, %v3058_v31  ;;  %v3108_v26 = vadd.f32 %v3106_v43, %v3059_v17  ;;  %v3126_v31 = vmul.f32 %v7281_v54, %v7451_v56 }
 0x3ec   : > { %v3067_v25 = vpop.permute.xlu1 %3066  ;;  %v3070_v14 = vadd.f32 %v3065_v38, %v3019_v30  ;;  %v3559_v30 = vmul.f32 %v7721_v8, %v3394_v41  ;;  %v3127_v17 = vmul.f32 %v7287_v7, %v7451_v56 }
 0x3ed   : > { %v3071_v24 = vadd.f32 %v3067_v25, %v3020_v18  ;;  %v3116_v18 = vadd.f32 %v3114_v16, %v3103_v36 }
 0x3ef   : > { %3574 = vrot.lane.b32.xlu0 %v3570_v53, %s4296_s17  ;;  %3576 = vrot.lane.b32.xlu1 %v3571_v10, %s4296_s17  ;;  %v3077_v60 = vpop.permute.xlu0 %3076 }
 0x3f0   : > { %v3079_v45 = vpop.permute.xlu1 %3078  ;;  %v3082_v4 = vadd.f32 %v3077_v60, %v3046_v23  ;;  %v3123_v23 = vmul.f32 %v7287_v7, %v8521_v44 }
 0x3f1   : > { %v3083_v12 = vadd.f32 %v3079_v45, %v3047_v50  ;;  %v3445_v50 = vstv %s3444_s26 }
 0x3f2   : > { %v3120_v37 = vadd.f32 %v3118_v27, %v3082_v4  ;;  %v3447_v41 = vmul.f32 %v7582_v22, %v3445_v50  ;;  %v3494_v60 = vmul.f32 %v7631_v13, %v3445_v50  ;;  %v3495_v45 = vmul.f32 %v7636_v19, %v3445_v50 }
 0x3f3   : > { %3399 = vrot.lane.b32.xlu0 %v3395_v32, %s4296_s17  ;;  %3401 = vrot.lane.b32.xlu1 %v3396_v20, %s4296_s17  ;;  %v3089_v29 = vpop.permute.xlu0 %3088  ;;  %v3121_v42 = vadd.f32 %v3119_v48, %v3083_v12  ;;  %v3125_v32 = vadd.f32 %v3123_v23, %v3108_v26  ;;  %v3582_v7 = vmul.f32 %v7692_v58, %v3445_v50 }
 0x3f4   : > { %v3091_v52 = vpop.permute.xlu1 %3090  ;;  %v3094_v11 = vadd.f32 %v3089_v29, %v3070_v14  ;;  %v3446_v14 = vmul.f32 %v7579_v59, %v3445_v50  ;;  %v3583_v56 = vmul.f32 %v7695_v51, %v3445_v50  ;;  %v3607_v47 = vmul.f32 %v7721_v8, %v3445_v50 }
 0x3f5   : > { %v3095_v40 = vadd.f32 %v3091_v52, %v3071_v24  ;;  %v3124_v24 = vadd.f32 %v3122_v1, %v3107_v28  ;;  %v3606_v52 = vmul.f32 %v7718_v62, %v3445_v50 }
 0x3f6   : > { %v3128_v4 = vadd.f32 %v3126_v31, %v3094_v11 }
 0x3f7   : > { %3462 = vrot.lane.b32.xlu0 %v3458_v55, %s4297_s19  ;;  %3464 = vrot.lane.b32.xlu1 %v3459_v3, %s4297_s19  ;;  %v3138_v39 = vpop.permute.xlu0 %3137  ;;  %v3129_v12 = vadd.f32 %v3127_v17, %v3095_v40  ;;  %v3337_v17 = vmul.f32 %v7631_v13, %v7727_v46 }
 0x3f8   : > { %v3140_v9 = vpop.permute.xlu1 %3139  ;;  %v3143_v34 = vadd.f32 %v3138_v39, %v3116_v18 }
 0x3f9   : > { %v3144_v33 = vadd.f32 %v3140_v9, %v3117_v0 }
 0x3fb   : > { %3562 = vrot.lane.b32.xlu0 %v3558_v63, %s4296_s17  ;;  %3564 = vrot.lane.b32.xlu1 %v3559_v30, %s4296_s17  ;;  %v3150_v53 = vpop.permute.xlu0 %3149  ;;  %s3309_s17 = sadd.s32 20, %s6143_s8 }
 0x3fc   : > { %v3152_v10 = vpop.permute.xlu1 %3151  ;;  %v3155_v38 = vadd.f32 %v3150_v53, %v3120_v37  ;;  %s432_s8 = scalar_select %p431_p10, %s4270_s24, 5 }
 0x3fd   : > { %v3156_v25 = vadd.f32 %v3152_v10, %v3121_v42 }
 0x3fe   : > { %s3833_s9 = sshll.u32 %s432_s8, 1 }
 0x3ff   : > { %3598 = vrot.lane.b32.xlu0 %v3594_v49, %s4297_s19  ;;  %3600 = vrot.lane.b32.xlu1 %v3595_v57, %s4297_s19  ;;  %v3162_v20 = vpop.permute.xlu0 %3161  ;;  %s435_s24 = sadd.s32 %s3894_s29, %s3833_s9 }
 0x400   : > { %v3164_v2 = vpop.permute.xlu1 %3163  ;;  %v3167_v6 = vadd.f32 %v3162_v20, %v3124_v24  ;;  %v3338_v20 = vmul.f32 %v7636_v19, %v7727_v46  ;;  %s3834_s0 = sshll.u32 %s435_s24, 3 }
 0x401   : > { %v3168_v15 = vadd.f32 %v3164_v2, %v3125_v32  ;;  %s437_s13 = scalar_lea.vmem %s7895_s6, %s3834_s0 }
 0x403   : > { %3450 = vrot.lane.b32.xlu0 %v3446_v14, %s4297_s19  ;;  %3452 = vrot.lane.b32.xlu1 %v3447_v41, %s4297_s19  ;;  %v3174_v55 = vpop.permute.xlu0 %3173 }
 0x404   : > { %v3176_v3 = vpop.permute.xlu1 %3175  ;;  %v3179_v54 = vadd.f32 %v3174_v55, %v3128_v4 }
 0x405   : > { %v3180_v36 = vadd.f32 %v3176_v3, %v3129_v12 }
 0x407   : > { %3498 = vrot.lane.b32.xlu0 %v3494_v60, %s4297_s19  ;;  %3500 = vrot.lane.b32.xlu1 %v3495_v45, %s4297_s19  ;;  %v3189_v21 = vpop.permute.xlu0 %3188 }
 0x408   : > { %v3191_v16 = vpop.permute.xlu1 %3190  ;;  %v3194_v35 = vadd.f32 %v3189_v21, %v3143_v34 }
 0x409   : > { %v3195_v29 = vadd.f32 %v3191_v16, %v3144_v33 }
 0x40b   : > { %3586 = vrot.lane.b32.xlu0 %v3582_v7, %s4297_s19  ;;  %3588 = vrot.lane.b32.xlu1 %v3583_v56, %s4297_s19  ;;  %v3201_v11 = vpop.permute.xlu0 %3200 }
 0x40c   : > { %v3203_v40 = vpop.permute.xlu1 %3202  ;;  %v3206_v43 = vadd.f32 %v3201_v11, %v3155_v38 }
 0x40d   : > { %v3207_v63 = vadd.f32 %v3203_v40, %v3156_v25 }
 0x40f   : > { %3610 = vrot.lane.b32.xlu0 %v3606_v52, %s4297_s19  ;;  %3612 = vrot.lane.b32.xlu1 %v3607_v47, %s4297_s19  ;;  %s3310_s19 = sld [smem:[#allocation10 + %s3309_s17]] }
 0x411   : > { %v3213_v30 = vpop.permute.xlu0 %3212  ;;  %v3215_v18 = vpop.permute.xlu1 %3214 }
 0x412   : > { %v3218_v0 = vadd.f32 %v3213_v30, %v3167_v6  ;;  %v3219_v27 = vadd.f32 %v3215_v18, %v3168_v15 }
 0x415   : > { %v3225_v48 = vpop.permute.xlu0 %3224  ;;  %v3227_v39 = vpop.permute.xlu1 %3226 }
 0x416   : > { %v3230_v9 = vadd.f32 %v3225_v48, %v3179_v54  ;;  %v3231_v34 = vadd.f32 %v3227_v39, %v3180_v36 }
 0x419   : > { %v3240_v33 = vpop.permute.xlu0 %3239  ;;  %v3242_v44 = vpop.permute.xlu1 %3241 }
 0x41a   : > { %v7788_v1 = vadd.f32 %v3240_v33, %v3194_v35  ;;  %v7790_v49 = vadd.f32 %v3242_v44, %v3195_v29 }
 0x41d   : > { %v3252_v57 = vpop.permute.xlu0 %3251  ;;  %v3254_v23 = vpop.permute.xlu1 %3253 }
 0x41e   : > { %v3257_v50 = vadd.f32 %v3252_v57, %v3206_v43  ;;  %v3258_v28 = vadd.f32 %v3254_v23, %v3207_v63  ;;  %v3316_v23 = vmul.f32 %v7579_v59, %v7727_v46 }
 0x421   : > { %v3264_v26 = vpop.permute.xlu0 %3263  ;;  %v3266_v37 = vpop.permute.xlu1 %3265 }
 0x422   : > { %v3269_v42 = vadd.f32 %v3264_v26, %v3218_v0  ;;  %v3270_v53 = vadd.f32 %v3266_v37, %v3219_v27  ;;  %v3311_v37 = vstv %s3310_s19 }
 0x425   : > { %v3276_v10 = vpop.permute.xlu0 %3275  ;;  %v3278_v38 = vpop.permute.xlu1 %3277 }
 0x426   : > { %v3281_v25 = vadd.f32 %v3276_v10, %v3230_v9  ;;  %v3282_v14 = vadd.f32 %v3278_v38, %v3231_v34  ;;  %v3318_v10 = vadd.f32 %v3316_v23, %v3269_v42  ;;  %v3329_v42 = vmul.f32 %v7631_v13, %v3311_v37 }
 0x429   : > { %v3288_v41 = vpop.permute.xlu0 %3287  ;;  %v3290_v24 = vpop.permute.xlu1 %3289 }
 0x42a   : > { %v7792_v32 = vadd.f32 %v3288_v41, %v3257_v50  ;;  %v7794_v31 = vadd.f32 %v3290_v24, %v3258_v28  ;;  %v3317_v50 = vmul.f32 %v7582_v22, %v7727_v46 }
 0x42c   : > { %v3319_v38 = vadd.f32 %v3317_v50, %v3270_v53  ;;  %v3330_v53 = vmul.f32 %v7636_v19, %v3311_v37 }
 0x42d   : > { %v3300_v2 = vpop.permute.xlu0 %3299  ;;  %v3302_v6 = vpop.permute.xlu1 %3301 }
 0x42e   : > { %v3305_v15 = vadd.f32 %v3300_v2, %v3281_v25  ;;  %v3306_v60 = vadd.f32 %v3302_v6, %v3282_v14  ;;  %v3333_v25 = vmul.f32 %v7631_v13, %v8505_v5  ;;  %v3334_v14 = vmul.f32 %v7636_v19, %v8505_v5 }
 0x430   : > { %v3339_v45 = vadd.f32 %v3337_v17, %v3305_v15  ;;  %v3340_v4 = vadd.f32 %v3338_v20, %v3306_v60  ;;  %v3312_v17 = vmul.f32 %v7579_v59, %v3311_v37  ;;  %v3313_v20 = vmul.f32 %v7582_v22, %v3311_v37 }
 0x431   : > { %v3385_v12 = vpop.permute.xlu0 %3384  ;;  %v3387_v55 = vpop.permute.xlu1 %3386  ;;  %v3335_v2 = vadd.f32 %v3333_v25, %v3318_v10  ;;  %v3336_v6 = vadd.f32 %v3334_v14, %v3319_v38  ;;  %v3325_v59 = vmul.f32 %v7631_v13, %v7683_v61  ;;  %v3326_v22 = vmul.f32 %v7636_v19, %v7683_v61 }
 0x432   : > { %v3390_v3 = vadd.f32 %v3385_v12, %v3339_v45  ;;  %v3391_v54 = vadd.f32 %v3387_v55, %v3340_v4  ;;  %v3314_v5 = vadd.f32 %v3312_v17, %v7788_v1  ;;  %v3315_v4 = vadd.f32 %v3313_v20, %v7790_v49 }
 0x433   : > { %v3520_v25 = vmul.f32 %v7692_v58, %v3311_v37  ;;  %v3331_v1 = vadd.f32 %v3329_v42, %v7792_v32  ;;  %v3332_v49 = vadd.f32 %v3330_v53, %v7794_v31  ;;  %v3531_v58 = vmul.f32 %v7721_v8, %v3311_v37 }
 0x435   : > { %v3373_v36 = vpop.permute.xlu0 %3372  ;;  %v3375_v7 = vpop.permute.xlu1 %3374 }
 0x436   : > { %v3378_v60 = vadd.f32 %v3373_v36, %v3335_v2  ;;  %v3379_v45 = vadd.f32 %v3375_v7, %v3336_v6  ;;  %v3521_v36 = vmul.f32 %v7695_v51, %v3311_v37 }
 0x439   : > { %v3436_v56 = vpop.permute.xlu0 %3435  ;;  %v3438_v21 = vpop.permute.xlu1 %3437 }
 0x43a   : > { %v3441_v12 = vadd.f32 %v3436_v56, %v3390_v3  ;;  %v3442_v55 = vadd.f32 %v3438_v21, %v3391_v54  ;;  %v3327_v3 = vadd.f32 %v3325_v59, %v3314_v5  ;;  %v3328_v54 = vadd.f32 %v3326_v22, %v3315_v4 }
 0x43d   : > { %v3424_v16 = vpop.permute.xlu0 %3423  ;;  %v3426_v35 = vpop.permute.xlu1 %3425 }
 0x43e   : > { %v3429_v23 = vadd.f32 %v3424_v16, %v3378_v60  ;;  %v3430_v50 = vadd.f32 %v3426_v35, %v3379_v45  ;;  %v3530_v16 = vmul.f32 %v7718_v62, %v3311_v37 }
 0x441   : > { %v3487_v29 = vpop.permute.xlu0 %3486  ;;  %v3489_v52 = vpop.permute.xlu1 %3488 }
 0x442   : > { %v3492_v7 = vadd.f32 %v3487_v29, %v3441_v12  ;;  %v3493_v14 = vadd.f32 %v3489_v52, %v3442_v55 }
 0x445   : > { %v3475_v47 = vpop.permute.xlu0 %3474  ;;  %v3477_v11 = vpop.permute.xlu1 %3476 }
 0x446   : > { %v3480_v13 = vadd.f32 %v3475_v47, %v3429_v23  ;;  %v3481_v17 = vadd.f32 %v3477_v11, %v3430_v50 }
 0x448   : > { %v3522_v47 = vadd.f32 %v3520_v25, %v3480_v13  ;;  %v3523_v11 = vadd.f32 %v3521_v36, %v3481_v17 }
 0x449   : > { %v3511_v40 = vpop.permute.xlu0 %3510  ;;  %v3513_v43 = vpop.permute.xlu1 %3512 }
 0x44a   : > { %v3516_v56 = vadd.f32 %v3511_v40, %v3492_v7  ;;  %v3517_v21 = vadd.f32 %v3513_v43, %v3493_v14  ;;  %v3527_v40 = vmul.f32 %v7721_v8, %v7683_v61 }
 0x44c   : > { %v3529_v8 = vadd.f32 %v3527_v40, %v3523_v11 }
 0x44d   : > { %v3361_v63 = vpop.permute.xlu0 %3360  ;;  %v3363_v30 = vpop.permute.xlu1 %3362 }
 0x44e   : > { %v3366_v20 = vadd.f32 %v3361_v63, %v3331_v1  ;;  %v3367_v19 = vadd.f32 %v3363_v30, %v3332_v49  ;;  %v3526_v63 = vmul.f32 %v7718_v62, %v7683_v61 }
 0x450   : > { %v3528_v61 = vadd.f32 %v3526_v63, %v3522_v47 }
 0x451   : > { %v7800_v18 = vpop.permute.xlu0 %3550  ;;  %v7802_v0 = vpop.permute.xlu1 %3552 }
 0x455   : > { %v3349_v27 = vpop.permute.xlu0 %3348  ;;  %v3351_v48 = vpop.permute.xlu1 %3350 }
 0x456   : > { %v3354_v35 = vadd.f32 %v3349_v27, %v3327_v3  ;;  %v3355_v31 = vadd.f32 %v3351_v48, %v3328_v54  ;;  %v3532_v27 = vadd.f32 %v3530_v16, %v3516_v56  ;;  %v3533_v48 = vadd.f32 %v3531_v58, %v3517_v21 }
 0x459   : > { %v3412_v39 = vpop.permute.xlu0 %3411  ;;  %v3414_v9 = vpop.permute.xlu1 %3413 }
 0x45a   : > { %v3417_v29 = vadd.f32 %v3412_v39, %v3366_v20  ;;  %v3418_v52 = vadd.f32 %v3414_v9, %v3367_v19 }
 0x45d   : > { %v7805_v34 = vpop.permute.xlu0 %3538  ;;  %v7807_v33 = vpop.permute.xlu1 %3540 }
 0x45e   : > { %v3544_v5 = vadd.f32 %v7805_v34, %v3528_v61  ;;  %v3545_v4 = vadd.f32 %v7807_v33, %v3529_v8 }
 0x461   : > { %v7809_v44 = vpop.permute.xlu0 %3574  ;;  %v7811_v57 = vpop.permute.xlu1 %3576 }
 0x465   : > { %v3400_v28 = vpop.permute.xlu0 %3399  ;;  %v3402_v26 = vpop.permute.xlu1 %3401 }
 0x466   : > { %v3405_v43 = vadd.f32 %v3400_v28, %v3354_v35  ;;  %v3406_v30 = vadd.f32 %v3402_v26, %v3355_v31  ;;  %v3556_v28 = vadd.f32 %v7800_v18, %v3532_v27  ;;  %v3557_v26 = vadd.f32 %v7802_v0, %v3533_v48 }
 0x468   : > { %v3580_v59 = vadd.f32 %v7809_v44, %v3556_v28  ;;  %v3581_v22 = vadd.f32 %v7811_v57, %v3557_v26  ;;  %v3625_v44 = vstv %s3624_s12 }
 0x469   : > { %v3463_v41 = vpop.permute.xlu0 %3462  ;;  %v3465_v24 = vpop.permute.xlu1 %3464 }
 0x46a   : > { %v3468_v37 = vadd.f32 %v3463_v41, %v3417_v29  ;;  %v3469_v2 = vadd.f32 %v3465_v24, %v3418_v52 }
 0x46d   : > { %v7823_v46 = vpop.permute.xlu0 %3562  ;;  %v7825_v15 = vpop.permute.xlu1 %3564 }
 0x46e   : > { %v3568_v18 = vadd.f32 %v7823_v46, %v3544_v5  ;;  %v3569_v0 = vadd.f32 %v7825_v15, %v3545_v4 }
 0x471   : > { %v3599_v10 = vpop.permute.xlu0 %3598  ;;  %v3601_v38 = vpop.permute.xlu1 %3600 }
 0x472   : > { %v3604_v12 = vadd.f32 %v3599_v10, %v3580_v59  ;;  %v3605_v55 = vadd.f32 %v3601_v38, %v3581_v22 }
 0x475   : > { %v3451_v51 = vpop.permute.xlu0 %3450  ;;  %v3453_v32 = vpop.permute.xlu1 %3452 }
 0x476   : > { %v3456_v6 = vadd.f32 %v3451_v51, %v3405_v43  ;;  %v3457_v62 = vadd.f32 %v3453_v32, %v3406_v30 }
 0x479   : > { %v3499_v39 = vpop.permute.xlu0 %3498  ;;  %v3501_v9 = vpop.permute.xlu1 %3500 }
 0x47a   : > { %v3504_v42 = vadd.f32 %v3499_v39, %v3468_v37  ;;  %v3505_v53 = vadd.f32 %v3501_v9, %v3469_v2 }
 0x47c   : > { %v3618_v41 = vmax.f32 %v3456_v6, %v3504_v42  ;;  %v3619_v24 = vmax.f32 %v3457_v62, %v3505_v53 }
 0x47d   : > { %v3587_v60 = vpop.permute.xlu0 %3586  ;;  %v3589_v45 = vpop.permute.xlu1 %3588 }
 0x47e   : > { %v3592_v25 = vadd.f32 %v3587_v60, %v3568_v18  ;;  %v3593_v36 = vadd.f32 %v3589_v45, %v3569_v0 }
 0x481   : > { %v3611_v23 = vpop.permute.xlu0 %3610  ;;  %v3613_v50 = vpop.permute.xlu1 %3612 }
 0x482   : > { %v3616_v1 = vadd.f32 %v3611_v23, %v3604_v12  ;;  %v3617_v34 = vadd.f32 %v3613_v50, %v3605_v55 }
 0x484   : > { %v3620_v33 = vmax.f32 %v3592_v25, %v3616_v1  ;;  %v3621_v49 = vmax.f32 %v3593_v36, %v3617_v34 }
 0x486   : > { %v3622_v57 = vmax.f32 %v3618_v41, %v3620_v33  ;;  %v3623_v7 = vmax.f32 %v3619_v24, %v3621_v49 }
 0x488   : > { %v3626_v14 = vadd.f32 %v3625_v44, %v3622_v57  ;;  %v3627_v46 = vadd.f32 %v3625_v44, %v3623_v7 }
 0x48a   : > { %v3628_v15 = vmax.f32 %v3626_v14, 0.0  ;;  %v3629_v10 = vmax.f32 %v3627_v46, 0.0 }
 0x48c   : > { %3631 = vst.msk [vmem:[%s437_s13] sm:$0xff] %vm3630_vm0, %v3628_v15 }
 0x48d   : > { %3633 = vst.msk [vmem:[%s437_s13 + $0x8] sm:$0x3f] %vm3632_vm1, %v3629_v10 }
 0x48e PF: > { %s27_s28 = sadd.s32 1, %s4286_s28   ;;  %s8522_s24 = sld [smem:[#allocation18_spill]] }
 0x48f   : > { %p24_p9 = scmp.ge.s32.totalorder %s27_s28, 14   ;;  %s8523_s25 = sld [smem:[#allocation19_spill]] }
 0x490   : > { %s8524_s26 = sld [smem:[#allocation20_spill]]  ;;  %s8525_s27 = sld [smem:[#allocation21_spill]] }
 0x491   : > { %s8526_s21 = smov %s4262_s22  ;;  %s8527_s22 = smov %s4266_s23 }
 0x492   : > { %s8528_s23 = smov %s4402_s14  ;;  %26 = sbr.rel (!%p24_p9) target bundleno = 15 (0xf), region = 138 }
 0x499   :  { %3663 = vsyncpa [#allocation3], 1 }
 0x49a   :  { %3665 = vsyncpa [#allocation3 + $0x1], 1 }
 0x49b   :  { %3666 = vsyncpa [#allocation6], 1 }
 0x49c   :  { %3668 = vsyncpa [#allocation6 + $0x1], 1 }
 0x49d   :  { %3669 = vsyncpa [#allocation9], 1 }
 0x49e   :  { %3671 = vsyncpa [#allocation9 + $0x1], 1 }
 0x49f   :  { %3672 = vsyncpa [#allocation4], 1 }
 0x4a0   :  { %3674 = vsyncpa [#allocation4 + $0x1], 1 }
 0x4a1   :  { %3675 = vsyncpa [#allocation12], 1 }

</bundles_post_ra>
